<compile_context>
chip_gen: v7x
topology: tpu7x:2x2x1
jax: 0.10.0
libtpu: 0.0.40
codegen_flags: <defaults>
</compile_context>

<pallas_src>
import functools

import jax
import jax.numpy as jnp
from jax.experimental import pallas as pl
from jax.experimental.pallas import tpu as pltpu


def _res_block_kernel(x_ref, w1_ref, b1_ref, w2_ref, b2_ref, o_ref,
                      pad_ref, cols_ref, *, H, W, C, Nb, dilation):
    """Fused conv3x3+bias+ReLU -> conv3x3+bias+ReLU -> +residual for Nb batch elems.

    Layouts (channels-first, lane-dense):
      x_ref, o_ref : (Nb, C, H*W)          f32, H*W on the lane axis
      w*_ref       : (C_out, 9*C_in)       bf16 (im2col weight matrix)
      b*_ref       : (C_out, 1)            f32
      pad_ref      : (Nb*C, H+2d, W+2d)    f32 scratch (zero halo + interior)
      cols_ref     : (9*C, Nb*H*W)         bf16 scratch (im2col columns)
    """
    d = dilation
    HW = H * W
    Hp, Wp = H + 2 * d, W + 2 * d
    f32, bf16 = jnp.float32, jnp.bfloat16

    # Zero only the halo ring; the interior is fully overwritten below every step,
    # so correctness does not depend on scratch state under the "parallel" axis.
    pad_ref[:, :d, :] = jnp.zeros((Nb * C, d, Wp), f32)
    pad_ref[:, d + H:, :] = jnp.zeros((Nb * C, d, Wp), f32)
    pad_ref[:, :, :d] = jnp.zeros((Nb * C, Hp, d), f32)
    pad_ref[:, :, d + W:] = jnp.zeros((Nb * C, Hp, d), f32)

    def conv3x3_bias_relu(w_ref, b_ref):
        # im2col: per tap a contiguous (C, H*W) row-block store at 128-aligned lanes.
        for n in range(Nb):
            for kh in range(3):
                for kw in range(3):
                    t = kh * 3 + kw
                    patch = pad_ref[n * C:(n + 1) * C,
                                    kh * d:kh * d + H,
                                    kw * d:kw * d + W]            # (C, H, W) f32
                    cols_ref[t * C:(t + 1) * C, n * HW:(n + 1) * HW] = (
                        patch.reshape(C, HW).astype(bf16))
        # Single MXU matmul per conv: bf16 operands, f32 accumulation,
        # lane-dense (C, Nb*HW) output.
        acc = jnp.dot(w_ref[...], cols_ref[...],
                      preferred_element_type=jnp.float32)         # (C, Nb*HW)
        return jnp.maximum(acc + b_ref[...], 0.0)                 # bias + ReLU (f32)

    # conv1: padded interior = x, halo = 0.
    for n in range(Nb):
        pad_ref[n * C:(n + 1) * C, d:d + H, d:d + W] = (
            x_ref[n].astype(f32).reshape(C, H, W))
    h = conv3x3_bias_relu(w1_ref, b1_ref)                         # (C, Nb*HW) f32

    # conv2: padded interior fully overwritten with h, halo still 0.
    for n in range(Nb):
        pad_ref[n * C:(n + 1) * C, d:d + H, d:d + W] = (
            h[:, n * HW:(n + 1) * HW].reshape(C, H, W))
    y = conv3x3_bias_relu(w2_ref, b2_ref)                         # (C, Nb*HW) f32

    # Residual add (f32) + lane-dense output store.
    for n in range(Nb):
        o_ref[n] = (y[:, n * HW:(n + 1) * HW]
                    + x_ref[n].astype(f32)).astype(o_ref.dtype)


def res_block_pallas(x_nchw, w1, b1, w2, b2, *, dilation=1, batch_block=None):
    """x_nchw: (N, C, H, W); w*: (3, 3, C, C) HWIO; b*: (C,). Returns (N, C, H, W)."""
    N, C, H, W = x_nchw.shape
    d = dilation
    HW = H * W
    Hp, Wp = H + 2 * d, W + 2 * d

    if batch_block is None:
        batch_block = next(nb for nb in (4, 3, 2, 1) if N % nb == 0)
    Nb = batch_block
    assert N % Nb == 0, "batch_block must divide N"

    # Lane-dense (N, C, H*W) view of the NCHW tensor (free, row-major reshape).
    x_flat = x_nchw.reshape(N, C, HW)

    # Hoisted (trace-time) weight prep:
    #   im2col weight matrices (C_out, 9*C_in) in bf16 for the MXU, bias (C, 1) in f32.
    #   Row ordering of the 9*C axis is tap-major / c_in-minor, matching cols_ref.
    w1m = jnp.asarray(w1, jnp.float32).reshape(9 * C, C).T.astype(jnp.bfloat16)
    w2m = jnp.asarray(w2, jnp.float32).reshape(9 * C, C).T.astype(jnp.bfloat16)
    b1c = jnp.asarray(b1, jnp.float32).reshape(C, 1)
    b2c = jnp.asarray(b2, jnp.float32).reshape(C, 1)

    # Rough VMEM footprint (double-buffered I/O blocks + scratch).
    vmem_est = (4 * Nb * C * HW * 4          # x block + o block, 2 buffers each
                + Nb * C * Hp * Wp * 4       # padded-activation scratch (f32)
                + 9 * C * Nb * HW * 2)       # im2col columns scratch (bf16)
    # TODO(synk): row-tile (grid over H with a 2*d halo) + explicit vmem_limit_bytes
    #             once production H,W push this toward the 64 MiB v7x VMEM budget.
    assert vmem_est < 40 * 1024 * 1024, "add row tiling for this problem size"

    kernel = functools.partial(_res_block_kernel, H=H, W=W, C=C, Nb=Nb, dilation=d)

    out_flat = pl.pallas_call(
        kernel,
        out_shape=jax.ShapeDtypeStruct((N, C, HW), x_nchw.dtype),
        grid_spec=pltpu.PrefetchScalarGridSpec(
            num_scalar_prefetch=0,
            grid=(N // Nb,),
            in_specs=[
                pl.BlockSpec((Nb, C, HW), lambda g: (g, 0, 0)),   # x (also residual)
                pl.BlockSpec((C, 9 * C), lambda g: (0, 0)),       # w1 (im2col, bf16)
                pl.BlockSpec((C, 1), lambda g: (0, 0)),           # b1
                pl.BlockSpec((C, 9 * C), lambda g: (0, 0)),       # w2 (im2col, bf16)
                pl.BlockSpec((C, 1), lambda g: (0, 0)),           # b2
            ],
            out_specs=pl.BlockSpec((Nb, C, HW), lambda g: (g, 0, 0)),
            scratch_shapes=[
                pltpu.VMEM((Nb * C, Hp, Wp), jnp.float32),        # zero-padded activation
                pltpu.VMEM((9 * C, Nb * HW), jnp.bfloat16),       # im2col columns
            ],
        ),
        compiler_params=pltpu.CompilerParams(dimension_semantics=("parallel",)),
    )(x_flat, w1m, b1c, w2m, b2c)

    return out_flat.reshape(N, C, H, W)


def res_block_forward(x_nchw, params, dilation=1):
    """Pallas ResBlock.forward; NCHW in/out to match PyTorch (no transposes needed)."""
    return res_block_pallas(x_nchw, params["w1"], params["b1"],
                            params["w2"], params["b2"], dilation=dilation)


# ----------------------------- pure-JAX reference -----------------------------

def _ref_conv_relu(x_nchw, w_hwio, b, dilation):
    y = jax.lax.conv_general_dilated(
        x_nchw, w_hwio, window_strides=(1, 1),
        padding=((dilation, dilation), (dilation, dilation)),
        rhs_dilation=(dilation, dilation),
        dimension_numbers=("NCHW", "HWIO", "NCHW"))
    return jnp.maximum(y + b.reshape(1, -1, 1, 1), 0.0)


def _ref_res_block(x_nchw, params, dilation=1):
    h = _ref_conv_relu(x_nchw, params["w1"], params["b1"], dilation)
    return _ref_conv_relu(h, params["w2"], params["b2"], dilation) + x_nchw


if __name__ == "__main__":
    key = jax.random.PRNGKey(0)
    N, C0, H, W = 2, 4, 16, 16
    dilation = 1

    k_x, k_w1, k_b1, k_w2, k_b2 = jax.random.split(key, 5)
    x = jax.random.normal(k_x, (N, C0, H, W), dtype=jnp.float32)     # NCHW, as PyTorch
    params = {
        "w1": jax.random.normal(k_w1, (3, 3, C0, C0), dtype=jnp.float32) * 0.1,
        "b1": jax.random.normal(k_b1, (C0,), dtype=jnp.float32) * 0.1,
        "w2": jax.random.normal(k_w2, (3, 3, C0, C0), dtype=jnp.float32) * 0.1,
        "b2": jax.random.normal(k_b2, (C0,), dtype=jnp.float32) * 0.1,
    }

    out = jax.block_until_ready(res_block_forward(x, params, dilation=dilation))
    ref = _ref_res_block(x, params, dilation=dilation)

    assert out.shape == (N, C0, H, W)
    # bf16 MXU operands (f32 accumulation) -> slightly looser tolerance than pure f32.
    assert jnp.allclose(out, ref, atol=2e-2, rtol=2e-2), "mismatch vs JAX reference"
    print("KERNEL_OK")
</pallas_src>

<mosaic_0001>
module attributes {stable_mosaic.version = 11 : i64} {
  func.func @_res_block_kernel(%arg0: i32, %arg1: memref<2x4x256xf32, #tpu.memory_space<vmem>>, %arg2: memref<4x36xbf16, #tpu.memory_space<vmem>>, %arg3: memref<4x1xf32, #tpu.memory_space<vmem>>, %arg4: memref<4x36xbf16, #tpu.memory_space<vmem>>, %arg5: memref<4x1xf32, #tpu.memory_space<vmem>>, %arg6: memref<2x4x256xf32, #tpu.memory_space<vmem>>, %arg7: memref<8x18x18xf32, #tpu.memory_space<vmem>>, %arg8: memref<36x512xbf16, #tpu.memory_space<vmem>>) attributes {dimension_semantics = [#tpu.dimension_semantics<parallel>], iteration_bounds = array<i64: 1>, scalar_prefetch = 0 : i64, scratch_operands = 2 : i64, tpu.core_type = #tpu.core_type<tc>, window_params = [{transform_indices = @transform_0, window_bounds = array<i64: 2, 4, 256>}, {pipeline_mode = #tpu.pipeline_mode<synchronous>, transform_indices = @transform_1, window_bounds = array<i64: 4, 36>}, {pipeline_mode = #tpu.pipeline_mode<synchronous>, transform_indices = @transform_2, window_bounds = array<i64: 4, 1>}, {pipeline_mode = #tpu.pipeline_mode<synchronous>, transform_indices = @transform_3, window_bounds = array<i64: 4, 36>}, {pipeline_mode = #tpu.pipeline_mode<synchronous>, transform_indices = @transform_4, window_bounds = array<i64: 4, 1>}, {transform_indices = @transform_5, window_bounds = array<i64: 2, 4, 256>}]} {
    %cst = arith.constant 0.000000e+00 : f32
    %0 = vector.broadcast %cst : f32 to vector<8x1x18xf32>
    %c0 = arith.constant 0 : index
    %c0_0 = arith.constant 0 : index
    %c0_1 = arith.constant 0 : index
    %1 = vector.load %arg7[%c0, %c0_0, %c0_1] : memref<8x18x18xf32, #tpu.memory_space<vmem>>, vector<8x1x18xf32>
    tpu.vector_store %arg7[%c0, %c0_0, %c0_1], %0 {strides = array<i32>} : memref<8x18x18xf32, #tpu.memory_space<vmem>>, vector<8x1x18xf32>,
    %cst_2 = arith.constant 0.000000e+00 : f32
    %2 = vector.broadcast %cst_2 : f32 to vector<8x1x18xf32>
    %c0_3 = arith.constant 0 : index
    %c17 = arith.constant 17 : index
    %c0_4 = arith.constant 0 : index
    %3 = vector.load %arg7[%c0_3, %c17, %c0_4] : memref<8x18x18xf32, #tpu.memory_space<vmem>>, vector<8x1x18xf32>
    tpu.vector_store %arg7[%c0_3, %c17, %c0_4], %2 {strides = array<i32>} : memref<8x18x18xf32, #tpu.memory_space<vmem>>, vector<8x1x18xf32>,
    %cst_5 = arith.constant 0.000000e+00 : f32
    %4 = vector.broadcast %cst_5 : f32 to vector<8x18x1xf32>
    %c0_6 = arith.constant 0 : index
    %c0_7 = arith.constant 0 : index
    %c0_8 = arith.constant 0 : index
    %5 = vector.load %arg7[%c0_6, %c0_7, %c0_8] : memref<8x18x18xf32, #tpu.memory_space<vmem>>, vector<8x18x1xf32>
    tpu.vector_store %arg7[%c0_6, %c0_7, %c0_8], %4 {strides = array<i32>} : memref<8x18x18xf32, #tpu.memory_space<vmem>>, vector<8x18x1xf32>,
    %cst_9 = arith.constant 0.000000e+00 : f32
    %6 = vector.broadcast %cst_9 : f32 to vector<8x18x1xf32>
    %c0_10 = arith.constant 0 : index
    %c0_11 = arith.constant 0 : index
    %c17_12 = arith.constant 17 : index
    %7 = vector.load %arg7[%c0_10, %c0_11, %c17_12] : memref<8x18x18xf32, #tpu.memory_space<vmem>>, vector<8x18x1xf32>
    tpu.vector_store %arg7[%c0_10, %c0_11, %c17_12], %6 {strides = array<i32>} : memref<8x18x18xf32, #tpu.memory_space<vmem>>, vector<8x18x1xf32>,
    %c0_13 = arith.constant 0 : index
    %c0_14 = arith.constant 0 : index
    %c0_15 = arith.constant 0 : index
    %8 = vector.load %arg1[%c0_13, %c0_14, %c0_15] : memref<2x4x256xf32, #tpu.memory_space<vmem>>, vector<1x4x256xf32>
    %9 = vector.shape_cast %8 : vector<1x4x256xf32> to vector<4x256xf32>
    %10 = vector.shape_cast %9 : vector<4x256xf32> to vector<4x16x16xf32>
    %c0_16 = arith.constant 0 : index
    %c1 = arith.constant 1 : index
    %c1_17 = arith.constant 1 : index
    %11 = vector.load %arg7[%c0_16, %c1, %c1_17] : memref<8x18x18xf32, #tpu.memory_space<vmem>>, vector<4x16x16xf32>
    tpu.vector_store %arg7[%c0_16, %c1, %c1_17], %10 {strides = array<i32>} : memref<8x18x18xf32, #tpu.memory_space<vmem>>, vector<4x16x16xf32>,
    %c1_18 = arith.constant 1 : index
    %c0_19 = arith.constant 0 : index
    %c0_20 = arith.constant 0 : index
    %12 = vector.load %arg1[%c1_18, %c0_19, %c0_20] : memref<2x4x256xf32, #tpu.memory_space<vmem>>, vector<1x4x256xf32>
    %13 = vector.shape_cast %12 : vector<1x4x256xf32> to vector<4x256xf32>
    %14 = vector.shape_cast %13 : vector<4x256xf32> to vector<4x16x16xf32>
    %c4 = arith.constant 4 : index
    %c1_21 = arith.constant 1 : index
    %c1_22 = arith.constant 1 : index
    %15 = vector.load %arg7[%c4, %c1_21, %c1_22] : memref<8x18x18xf32, #tpu.memory_space<vmem>>, vector<4x16x16xf32>
    tpu.vector_store %arg7[%c4, %c1_21, %c1_22], %14 {strides = array<i32>} : memref<8x18x18xf32, #tpu.memory_space<vmem>>, vector<4x16x16xf32>,
    %c0_23 = arith.constant 0 : index
    %c0_24 = arith.constant 0 : index
    %c0_25 = arith.constant 0 : index
    %16 = vector.load %arg7[%c0_23, %c0_24, %c0_25] : memref<8x18x18xf32, #tpu.memory_space<vmem>>, vector<4x16x16xf32>
    %17 = vector.shape_cast %16 : vector<4x16x16xf32> to vector<4x256xf32>
    %18 = arith.truncf %17 : vector<4x256xf32> to vector<4x256xbf16>
    %c0_26 = arith.constant 0 : index
    %c0_27 = arith.constant 0 : index
    %19 = vector.load %arg8[%c0_26, %c0_27] : memref<36x512xbf16, #tpu.memory_space<vmem>>, vector<4x256xbf16>
    tpu.vector_store %arg8[%c0_26, %c0_27], %18 {strides = array<i32>} : memref<36x512xbf16, #tpu.memory_space<vmem>>, vector<4x256xbf16>,
    %c0_28 = arith.constant 0 : index
    %c0_29 = arith.constant 0 : index
    %c1_30 = arith.constant 1 : index
    %20 = vector.load %arg7[%c0_28, %c0_29, %c1_30] : memref<8x18x18xf32, #tpu.memory_space<vmem>>, vector<4x16x16xf32>
    %21 = vector.shape_cast %20 : vector<4x16x16xf32> to vector<4x256xf32>
    %22 = arith.truncf %21 : vector<4x256xf32> to vector<4x256xbf16>
    %c4_31 = arith.constant 4 : index
    %c0_32 = arith.constant 0 : index
    %23 = vector.load %arg8[%c4_31, %c0_32] : memref<36x512xbf16, #tpu.memory_space<vmem>>, vector<4x256xbf16>
    tpu.vector_store %arg8[%c4_31, %c0_32], %22 {strides = array<i32>} : memref<36x512xbf16, #tpu.memory_space<vmem>>, vector<4x256xbf16>,
    %c0_33 = arith.constant 0 : index
    %c0_34 = arith.constant 0 : index
    %c2 = arith.constant 2 : index
    %24 = vector.load %arg7[%c0_33, %c0_34, %c2] : memref<8x18x18xf32, #tpu.memory_space<vmem>>, vector<4x16x16xf32>
    %25 = vector.shape_cast %24 : vector<4x16x16xf32> to vector<4x256xf32>
    %26 = arith.truncf %25 : vector<4x256xf32> to vector<4x256xbf16>
    %c8 = arith.constant 8 : index
    %c0_35 = arith.constant 0 : index
    %27 = vector.load %arg8[%c8, %c0_35] : memref<36x512xbf16, #tpu.memory_space<vmem>>, vector<4x256xbf16>
    tpu.vector_store %arg8[%c8, %c0_35], %26 {strides = array<i32>} : memref<36x512xbf16, #tpu.memory_space<vmem>>, vector<4x256xbf16>,
    %c0_36 = arith.constant 0 : index
    %c1_37 = arith.constant 1 : index
    %c0_38 = arith.constant 0 : index
    %28 = vector.load %arg7[%c0_36, %c1_37, %c0_38] : memref<8x18x18xf32, #tpu.memory_space<vmem>>, vector<4x16x16xf32>
    %29 = vector.shape_cast %28 : vector<4x16x16xf32> to vector<4x256xf32>
    %30 = arith.truncf %29 : vector<4x256xf32> to vector<4x256xbf16>
    %c12 = arith.constant 12 : index
    %c0_39 = arith.constant 0 : index
    %31 = vector.load %arg8[%c12, %c0_39] : memref<36x512xbf16, #tpu.memory_space<vmem>>, vector<4x256xbf16>
    tpu.vector_store %arg8[%c12, %c0_39], %30 {strides = array<i32>} : memref<36x512xbf16, #tpu.memory_space<vmem>>, vector<4x256xbf16>,
    %c0_40 = arith.constant 0 : index
    %c1_41 = arith.constant 1 : index
    %c1_42 = arith.constant 1 : index
    %32 = vector.load %arg7[%c0_40, %c1_41, %c1_42] : memref<8x18x18xf32, #tpu.memory_space<vmem>>, vector<4x16x16xf32>
    %33 = vector.shape_cast %32 : vector<4x16x16xf32> to vector<4x256xf32>
    %34 = arith.truncf %33 : vector<4x256xf32> to vector<4x256xbf16>
    %c16 = arith.constant 16 : index
    %c0_43 = arith.constant 0 : index
    %35 = vector.load %arg8[%c16, %c0_43] : memref<36x512xbf16, #tpu.memory_space<vmem>>, vector<4x256xbf16>
    tpu.vector_store %arg8[%c16, %c0_43], %34 {strides = array<i32>} : memref<36x512xbf16, #tpu.memory_space<vmem>>, vector<4x256xbf16>,
    %c0_44 = arith.constant 0 : index
    %c1_45 = arith.constant 1 : index
    %c2_46 = arith.constant 2 : index
    %36 = vector.load %arg7[%c0_44, %c1_45, %c2_46] : memref<8x18x18xf32, #tpu.memory_space<vmem>>, vector<4x16x16xf32>
    %37 = vector.shape_cast %36 : vector<4x16x16xf32> to vector<4x256xf32>
    %38 = arith.truncf %37 : vector<4x256xf32> to vector<4x256xbf16>
    %c20 = arith.constant 20 : index
    %c0_47 = arith.constant 0 : index
    %39 = vector.load %arg8[%c20, %c0_47] : memref<36x512xbf16, #tpu.memory_space<vmem>>, vector<4x256xbf16>
    tpu.vector_store %arg8[%c20, %c0_47], %38 {strides = array<i32>} : memref<36x512xbf16, #tpu.memory_space<vmem>>, vector<4x256xbf16>,
    %c0_48 = arith.constant 0 : index
    %c2_49 = arith.constant 2 : index
    %c0_50 = arith.constant 0 : index
    %40 = vector.load %arg7[%c0_48, %c2_49, %c0_50] : memref<8x18x18xf32, #tpu.memory_space<vmem>>, vector<4x16x16xf32>
    %41 = vector.shape_cast %40 : vector<4x16x16xf32> to vector<4x256xf32>
    %42 = arith.truncf %41 : vector<4x256xf32> to vector<4x256xbf16>
    %c24 = arith.constant 24 : index
    %c0_51 = arith.constant 0 : index
    %43 = vector.load %arg8[%c24, %c0_51] : memref<36x512xbf16, #tpu.memory_space<vmem>>, vector<4x256xbf16>
    tpu.vector_store %arg8[%c24, %c0_51], %42 {strides = array<i32>} : memref<36x512xbf16, #tpu.memory_space<vmem>>, vector<4x256xbf16>,
    %c0_52 = arith.constant 0 : index
    %c2_53 = arith.constant 2 : index
    %c1_54 = arith.constant 1 : index
    %44 = vector.load %arg7[%c0_52, %c2_53, %c1_54] : memref<8x18x18xf32, #tpu.memory_space<vmem>>, vector<4x16x16xf32>
    %45 = vector.shape_cast %44 : vector<4x16x16xf32> to vector<4x256xf32>
    %46 = arith.truncf %45 : vector<4x256xf32> to vector<4x256xbf16>
    %c28 = arith.constant 28 : index
    %c0_55 = arith.constant 0 : index
    %47 = vector.load %arg8[%c28, %c0_55] : memref<36x512xbf16, #tpu.memory_space<vmem>>, vector<4x256xbf16>
    tpu.vector_store %arg8[%c28, %c0_55], %46 {strides = array<i32>} : memref<36x512xbf16, #tpu.memory_space<vmem>>, vector<4x256xbf16>,
    %c0_56 = arith.constant 0 : index
    %c2_57 = arith.constant 2 : index
    %c2_58 = arith.constant 2 : index
    %48 = vector.load %arg7[%c0_56, %c2_57, %c2_58] : memref<8x18x18xf32, #tpu.memory_space<vmem>>, vector<4x16x16xf32>
    %49 = vector.shape_cast %48 : vector<4x16x16xf32> to vector<4x256xf32>
    %50 = arith.truncf %49 : vector<4x256xf32> to vector<4x256xbf16>
    %c32 = arith.constant 32 : index
    %c0_59 = arith.constant 0 : index
    %51 = vector.load %arg8[%c32, %c0_59] : memref<36x512xbf16, #tpu.memory_space<vmem>>, vector<4x256xbf16>
    tpu.vector_store %arg8[%c32, %c0_59], %50 {strides = array<i32>} : memref<36x512xbf16, #tpu.memory_space<vmem>>, vector<4x256xbf16>,
    %c4_60 = arith.constant 4 : index
    %c0_61 = arith.constant 0 : index
    %c0_62 = arith.constant 0 : index
    %52 = vector.load %arg7[%c4_60, %c0_61, %c0_62] : memref<8x18x18xf32, #tpu.memory_space<vmem>>, vector<4x16x16xf32>
    %53 = vector.shape_cast %52 : vector<4x16x16xf32> to vector<4x256xf32>
    %54 = arith.truncf %53 : vector<4x256xf32> to vector<4x256xbf16>
    %c0_63 = arith.constant 0 : index
    %c256 = arith.constant 256 : index
    %55 = vector.load %arg8[%c0_63, %c256] : memref<36x512xbf16, #tpu.memory_space<vmem>>, vector<4x256xbf16>
    tpu.vector_store %arg8[%c0_63, %c256], %54 {strides = array<i32>} : memref<36x512xbf16, #tpu.memory_space<vmem>>, vector<4x256xbf16>,
    %c4_64 = arith.constant 4 : index
    %c0_65 = arith.constant 0 : index
    %c1_66 = arith.constant 1 : index
    %56 = vector.load %arg7[%c4_64, %c0_65, %c1_66] : memref<8x18x18xf32, #tpu.memory_space<vmem>>, vector<4x16x16xf32>
    %57 = vector.shape_cast %56 : vector<4x16x16xf32> to vector<4x256xf32>
    %58 = arith.truncf %57 : vector<4x256xf32> to vector<4x256xbf16>
    %c4_67 = arith.constant 4 : index
    %c256_68 = arith.constant 256 : index
    %59 = vector.load %arg8[%c4_67, %c256_68] : memref<36x512xbf16, #tpu.memory_space<vmem>>, vector<4x256xbf16>
    tpu.vector_store %arg8[%c4_67, %c256_68], %58 {strides = array<i32>} : memref<36x512xbf16, #tpu.memory_space<vmem>>, vector<4x256xbf16>,
    %c4_69 = arith.constant 4 : index
    %c0_70 = arith.constant 0 : index
    %c2_71 = arith.constant 2 : index
    %60 = vector.load %arg7[%c4_69, %c0_70, %c2_71] : memref<8x18x18xf32, #tpu.memory_space<vmem>>, vector<4x16x16xf32>
    %61 = vector.shape_cast %60 : vector<4x16x16xf32> to vector<4x256xf32>
    %62 = arith.truncf %61 : vector<4x256xf32> to vector<4x256xbf16>
    %c8_72 = arith.constant 8 : index
    %c256_73 = arith.constant 256 : index
    %63 = vector.load %arg8[%c8_72, %c256_73] : memref<36x512xbf16, #tpu.memory_space<vmem>>, vector<4x256xbf16>
    tpu.vector_store %arg8[%c8_72, %c256_73], %62 {strides = array<i32>} : memref<36x512xbf16, #tpu.memory_space<vmem>>, vector<4x256xbf16>,
    %c4_74 = arith.constant 4 : index
    %c1_75 = arith.constant 1 : index
    %c0_76 = arith.constant 0 : index
    %64 = vector.load %arg7[%c4_74, %c1_75, %c0_76] : memref<8x18x18xf32, #tpu.memory_space<vmem>>, vector<4x16x16xf32>
    %65 = vector.shape_cast %64 : vector<4x16x16xf32> to vector<4x256xf32>
    %66 = arith.truncf %65 : vector<4x256xf32> to vector<4x256xbf16>
    %c12_77 = arith.constant 12 : index
    %c256_78 = arith.constant 256 : index
    %67 = vector.load %arg8[%c12_77, %c256_78] : memref<36x512xbf16, #tpu.memory_space<vmem>>, vector<4x256xbf16>
    tpu.vector_store %arg8[%c12_77, %c256_78], %66 {strides = array<i32>} : memref<36x512xbf16, #tpu.memory_space<vmem>>, vector<4x256xbf16>,
    %c4_79 = arith.constant 4 : index
    %c1_80 = arith.constant 1 : index
    %c1_81 = arith.constant 1 : index
    %68 = vector.load %arg7[%c4_79, %c1_80, %c1_81] : memref<8x18x18xf32, #tpu.memory_space<vmem>>, vector<4x16x16xf32>
    %69 = vector.shape_cast %68 : vector<4x16x16xf32> to vector<4x256xf32>
    %70 = arith.truncf %69 : vector<4x256xf32> to vector<4x256xbf16>
    %c16_82 = arith.constant 16 : index
    %c256_83 = arith.constant 256 : index
    %71 = vector.load %arg8[%c16_82, %c256_83] : memref<36x512xbf16, #tpu.memory_space<vmem>>, vector<4x256xbf16>
    tpu.vector_store %arg8[%c16_82, %c256_83], %70 {strides = array<i32>} : memref<36x512xbf16, #tpu.memory_space<vmem>>, vector<4x256xbf16>,
    %c4_84 = arith.constant 4 : index
    %c1_85 = arith.constant 1 : index
    %c2_86 = arith.constant 2 : index
    %72 = vector.load %arg7[%c4_84, %c1_85, %c2_86] : memref<8x18x18xf32, #tpu.memory_space<vmem>>, vector<4x16x16xf32>
    %73 = vector.shape_cast %72 : vector<4x16x16xf32> to vector<4x256xf32>
    %74 = arith.truncf %73 : vector<4x256xf32> to vector<4x256xbf16>
    %c20_87 = arith.constant 20 : index
    %c256_88 = arith.constant 256 : index
    %75 = vector.load %arg8[%c20_87, %c256_88] : memref<36x512xbf16, #tpu.memory_space<vmem>>, vector<4x256xbf16>
    tpu.vector_store %arg8[%c20_87, %c256_88], %74 {strides = array<i32>} : memref<36x512xbf16, #tpu.memory_space<vmem>>, vector<4x256xbf16>,
    %c4_89 = arith.constant 4 : index
    %c2_90 = arith.constant 2 : index
    %c0_91 = arith.constant 0 : index
    %76 = vector.load %arg7[%c4_89, %c2_90, %c0_91] : memref<8x18x18xf32, #tpu.memory_space<vmem>>, vector<4x16x16xf32>
    %77 = vector.shape_cast %76 : vector<4x16x16xf32> to vector<4x256xf32>
    %78 = arith.truncf %77 : vector<4x256xf32> to vector<4x256xbf16>
    %c24_92 = arith.constant 24 : index
    %c256_93 = arith.constant 256 : index
    %79 = vector.load %arg8[%c24_92, %c256_93] : memref<36x512xbf16, #tpu.memory_space<vmem>>, vector<4x256xbf16>
    tpu.vector_store %arg8[%c24_92, %c256_93], %78 {strides = array<i32>} : memref<36x512xbf16, #tpu.memory_space<vmem>>, vector<4x256xbf16>,
    %c4_94 = arith.constant 4 : index
    %c2_95 = arith.constant 2 : index
    %c1_96 = arith.constant 1 : index
    %80 = vector.load %arg7[%c4_94, %c2_95, %c1_96] : memref<8x18x18xf32, #tpu.memory_space<vmem>>, vector<4x16x16xf32>
    %81 = vector.shape_cast %80 : vector<4x16x16xf32> to vector<4x256xf32>
    %82 = arith.truncf %81 : vector<4x256xf32> to vector<4x256xbf16>
    %c28_97 = arith.constant 28 : index
    %c256_98 = arith.constant 256 : index
    %83 = vector.load %arg8[%c28_97, %c256_98] : memref<36x512xbf16, #tpu.memory_space<vmem>>, vector<4x256xbf16>
    tpu.vector_store %arg8[%c28_97, %c256_98], %82 {strides = array<i32>} : memref<36x512xbf16, #tpu.memory_space<vmem>>, vector<4x256xbf16>,
    %c4_99 = arith.constant 4 : index
    %c2_100 = arith.constant 2 : index
    %c2_101 = arith.constant 2 : index
    %84 = vector.load %arg7[%c4_99, %c2_100, %c2_101] : memref<8x18x18xf32, #tpu.memory_space<vmem>>, vector<4x16x16xf32>
    %85 = vector.shape_cast %84 : vector<4x16x16xf32> to vector<4x256xf32>
    %86 = arith.truncf %85 : vector<4x256xf32> to vector<4x256xbf16>
    %c32_102 = arith.constant 32 : index
    %c256_103 = arith.constant 256 : index
    %87 = vector.load %arg8[%c32_102, %c256_103] : memref<36x512xbf16, #tpu.memory_space<vmem>>, vector<4x256xbf16>
    tpu.vector_store %arg8[%c32_102, %c256_103], %86 {strides = array<i32>} : memref<36x512xbf16, #tpu.memory_space<vmem>>, vector<4x256xbf16>,
    %c0_104 = arith.constant 0 : index
    %c0_105 = arith.constant 0 : index
    %88 = vector.load %arg2[%c0_104, %c0_105] : memref<4x36xbf16, #tpu.memory_space<vmem>>, vector<4x36xbf16>
    %c0_106 = arith.constant 0 : index
    %c0_107 = arith.constant 0 : index
    %89 = vector.load %arg8[%c0_106, %c0_107] : memref<36x512xbf16, #tpu.memory_space<vmem>>, vector<36x512xbf16>
    %cst_108 = arith.constant dense<0.000000e+00> : vector<4x512xf32>
    %90 = tpu.matmul %88, %89, %cst_108 {dimension_numbers = #tpu.dot_dimension_numbers<[1], [0], [0], [1], [0, 0, 1, 1], [], []>} : vector<4x36xbf16>, vector<36x512xbf16>, vector<4x512xf32> -> vector<4x512xf32>
    %c0_109 = arith.constant 0 : index
    %c0_110 = arith.constant 0 : index
    %91 = vector.load %arg3[%c0_109, %c0_110] : memref<4x1xf32, #tpu.memory_space<vmem>>, vector<4x1xf32>
    %92 = vector.broadcast %91 : vector<4x1xf32> to vector<4x512xf32>
    %93 = arith.addf %90, %92 : vector<4x512xf32>
    %cst_111 = arith.constant 0.000000e+00 : f32
    %94 = vector.broadcast %cst_111 : f32 to vector<4x512xf32>
    %95 = arith.maximumf %93, %94 : vector<4x512xf32>
    %96 = vector.extract_strided_slice %95 {offsets = [0, 0], sizes = [4, 256], strides = [1, 1]} : vector<4x512xf32> to vector<4x256xf32>
    %97 = vector.shape_cast %96 : vector<4x256xf32> to vector<4x16x16xf32>
    %c0_112 = arith.constant 0 : index
    %c1_113 = arith.constant 1 : index
    %c1_114 = arith.constant 1 : index
    %98 = vector.load %arg7[%c0_112, %c1_113, %c1_114] : memref<8x18x18xf32, #tpu.memory_space<vmem>>, vector<4x16x16xf32>
    tpu.vector_store %arg7[%c0_112, %c1_113, %c1_114], %97 {strides = array<i32>} : memref<8x18x18xf32, #tpu.memory_space<vmem>>, vector<4x16x16xf32>,
    %99 = vector.extract_strided_slice %95 {offsets = [0, 256], sizes = [4, 256], strides = [1, 1]} : vector<4x512xf32> to vector<4x256xf32>
    %100 = vector.shape_cast %99 : vector<4x256xf32> to vector<4x16x16xf32>
    %c4_115 = arith.constant 4 : index
    %c1_116 = arith.constant 1 : index
    %c1_117 = arith.constant 1 : index
    %101 = vector.load %arg7[%c4_115, %c1_116, %c1_117] : memref<8x18x18xf32, #tpu.memory_space<vmem>>, vector<4x16x16xf32>
    tpu.vector_store %arg7[%c4_115, %c1_116, %c1_117], %100 {strides = array<i32>} : memref<8x18x18xf32, #tpu.memory_space<vmem>>, vector<4x16x16xf32>,
    %c0_118 = arith.constant 0 : index
    %c0_119 = arith.constant 0 : index
    %c0_120 = arith.constant 0 : index
    %102 = vector.load %arg7[%c0_118, %c0_119, %c0_120] : memref<8x18x18xf32, #tpu.memory_space<vmem>>, vector<4x16x16xf32>
    %103 = vector.shape_cast %102 : vector<4x16x16xf32> to vector<4x256xf32>
    %104 = arith.truncf %103 : vector<4x256xf32> to vector<4x256xbf16>
    %c0_121 = arith.constant 0 : index
    %c0_122 = arith.constant 0 : index
    %105 = vector.load %arg8[%c0_121, %c0_122] : memref<36x512xbf16, #tpu.memory_space<vmem>>, vector<4x256xbf16>
    tpu.vector_store %arg8[%c0_121, %c0_122], %104 {strides = array<i32>} : memref<36x512xbf16, #tpu.memory_space<vmem>>, vector<4x256xbf16>,
    %c0_123 = arith.constant 0 : index
    %c0_124 = arith.constant 0 : index
    %c1_125 = arith.constant 1 : index
    %106 = vector.load %arg7[%c0_123, %c0_124, %c1_125] : memref<8x18x18xf32, #tpu.memory_space<vmem>>, vector<4x16x16xf32>
    %107 = vector.shape_cast %106 : vector<4x16x16xf32> to vector<4x256xf32>
    %108 = arith.truncf %107 : vector<4x256xf32> to vector<4x256xbf16>
    %c4_126 = arith.constant 4 : index
    %c0_127 = arith.constant 0 : index
    %109 = vector.load %arg8[%c4_126, %c0_127] : memref<36x512xbf16, #tpu.memory_space<vmem>>, vector<4x256xbf16>
    tpu.vector_store %arg8[%c4_126, %c0_127], %108 {strides = array<i32>} : memref<36x512xbf16, #tpu.memory_space<vmem>>, vector<4x256xbf16>,
    %c0_128 = arith.constant 0 : index
    %c0_129 = arith.constant 0 : index
    %c2_130 = arith.constant 2 : index
    %110 = vector.load %arg7[%c0_128, %c0_129, %c2_130] : memref<8x18x18xf32, #tpu.memory_space<vmem>>, vector<4x16x16xf32>
    %111 = vector.shape_cast %110 : vector<4x16x16xf32> to vector<4x256xf32>
    %112 = arith.truncf %111 : vector<4x256xf32> to vector<4x256xbf16>
    %c8_131 = arith.constant 8 : index
    %c0_132 = arith.constant 0 : index
    %113 = vector.load %arg8[%c8_131, %c0_132] : memref<36x512xbf16, #tpu.memory_space<vmem>>, vector<4x256xbf16>
    tpu.vector_store %arg8[%c8_131, %c0_132], %112 {strides = array<i32>} : memref<36x512xbf16, #tpu.memory_space<vmem>>, vector<4x256xbf16>,
    %c0_133 = arith.constant 0 : index
    %c1_134 = arith.constant 1 : index
    %c0_135 = arith.constant 0 : index
    %114 = vector.load %arg7[%c0_133, %c1_134, %c0_135] : memref<8x18x18xf32, #tpu.memory_space<vmem>>, vector<4x16x16xf32>
    %115 = vector.shape_cast %114 : vector<4x16x16xf32> to vector<4x256xf32>
    %116 = arith.truncf %115 : vector<4x256xf32> to vector<4x256xbf16>
    %c12_136 = arith.constant 12 : index
    %c0_137 = arith.constant 0 : index
    %117 = vector.load %arg8[%c12_136, %c0_137] : memref<36x512xbf16, #tpu.memory_space<vmem>>, vector<4x256xbf16>
    tpu.vector_store %arg8[%c12_136, %c0_137], %116 {strides = array<i32>} : memref<36x512xbf16, #tpu.memory_space<vmem>>, vector<4x256xbf16>,
    %c0_138 = arith.constant 0 : index
    %c1_139 = arith.constant 1 : index
    %c1_140 = arith.constant 1 : index
    %118 = vector.load %arg7[%c0_138, %c1_139, %c1_140] : memref<8x18x18xf32, #tpu.memory_space<vmem>>, vector<4x16x16xf32>
    %119 = vector.shape_cast %118 : vector<4x16x16xf32> to vector<4x256xf32>
    %120 = arith.truncf %119 : vector<4x256xf32> to vector<4x256xbf16>
    %c16_141 = arith.constant 16 : index
    %c0_142 = arith.constant 0 : index
    %121 = vector.load %arg8[%c16_141, %c0_142] : memref<36x512xbf16, #tpu.memory_space<vmem>>, vector<4x256xbf16>
    tpu.vector_store %arg8[%c16_141, %c0_142], %120 {strides = array<i32>} : memref<36x512xbf16, #tpu.memory_space<vmem>>, vector<4x256xbf16>,
    %c0_143 = arith.constant 0 : index
    %c1_144 = arith.constant 1 : index
    %c2_145 = arith.constant 2 : index
    %122 = vector.load %arg7[%c0_143, %c1_144, %c2_145] : memref<8x18x18xf32, #tpu.memory_space<vmem>>, vector<4x16x16xf32>
    %123 = vector.shape_cast %122 : vector<4x16x16xf32> to vector<4x256xf32>
    %124 = arith.truncf %123 : vector<4x256xf32> to vector<4x256xbf16>
    %c20_146 = arith.constant 20 : index
    %c0_147 = arith.constant 0 : index
    %125 = vector.load %arg8[%c20_146, %c0_147] : memref<36x512xbf16, #tpu.memory_space<vmem>>, vector<4x256xbf16>
    tpu.vector_store %arg8[%c20_146, %c0_147], %124 {strides = array<i32>} : memref<36x512xbf16, #tpu.memory_space<vmem>>, vector<4x256xbf16>,
    %c0_148 = arith.constant 0 : index
    %c2_149 = arith.constant 2 : index
    %c0_150 = arith.constant 0 : index
    %126 = vector.load %arg7[%c0_148, %c2_149, %c0_150] : memref<8x18x18xf32, #tpu.memory_space<vmem>>, vector<4x16x16xf32>
    %127 = vector.shape_cast %126 : vector<4x16x16xf32> to vector<4x256xf32>
    %128 = arith.truncf %127 : vector<4x256xf32> to vector<4x256xbf16>
    %c24_151 = arith.constant 24 : index
    %c0_152 = arith.constant 0 : index
    %129 = vector.load %arg8[%c24_151, %c0_152] : memref<36x512xbf16, #tpu.memory_space<vmem>>, vector<4x256xbf16>
    tpu.vector_store %arg8[%c24_151, %c0_152], %128 {strides = array<i32>} : memref<36x512xbf16, #tpu.memory_space<vmem>>, vector<4x256xbf16>,
    %c0_153 = arith.constant 0 : index
    %c2_154 = arith.constant 2 : index
    %c1_155 = arith.constant 1 : index
    %130 = vector.load %arg7[%c0_153, %c2_154, %c1_155] : memref<8x18x18xf32, #tpu.memory_space<vmem>>, vector<4x16x16xf32>
    %131 = vector.shape_cast %130 : vector<4x16x16xf32> to vector<4x256xf32>
    %132 = arith.truncf %131 : vector<4x256xf32> to vector<4x256xbf16>
    %c28_156 = arith.constant 28 : index
    %c0_157 = arith.constant 0 : index
    %133 = vector.load %arg8[%c28_156, %c0_157] : memref<36x512xbf16, #tpu.memory_space<vmem>>, vector<4x256xbf16>
    tpu.vector_store %arg8[%c28_156, %c0_157], %132 {strides = array<i32>} : memref<36x512xbf16, #tpu.memory_space<vmem>>, vector<4x256xbf16>,
    %c0_158 = arith.constant 0 : index
    %c2_159 = arith.constant 2 : index
    %c2_160 = arith.constant 2 : index
    %134 = vector.load %arg7[%c0_158, %c2_159, %c2_160] : memref<8x18x18xf32, #tpu.memory_space<vmem>>, vector<4x16x16xf32>
    %135 = vector.shape_cast %134 : vector<4x16x16xf32> to vector<4x256xf32>
    %136 = arith.truncf %135 : vector<4x256xf32> to vector<4x256xbf16>
    %c32_161 = arith.constant 32 : index
    %c0_162 = arith.constant 0 : index
    %137 = vector.load %arg8[%c32_161, %c0_162] : memref<36x512xbf16, #tpu.memory_space<vmem>>, vector<4x256xbf16>
    tpu.vector_store %arg8[%c32_161, %c0_162], %136 {strides = array<i32>} : memref<36x512xbf16, #tpu.memory_space<vmem>>, vector<4x256xbf16>,
    %c4_163 = arith.constant 4 : index
    %c0_164 = arith.constant 0 : index
    %c0_165 = arith.constant 0 : index
    %138 = vector.load %arg7[%c4_163, %c0_164, %c0_165] : memref<8x18x18xf32, #tpu.memory_space<vmem>>, vector<4x16x16xf32>
    %139 = vector.shape_cast %138 : vector<4x16x16xf32> to vector<4x256xf32>
    %140 = arith.truncf %139 : vector<4x256xf32> to vector<4x256xbf16>
    %c0_166 = arith.constant 0 : index
    %c256_167 = arith.constant 256 : index
    %141 = vector.load %arg8[%c0_166, %c256_167] : memref<36x512xbf16, #tpu.memory_space<vmem>>, vector<4x256xbf16>
    tpu.vector_store %arg8[%c0_166, %c256_167], %140 {strides = array<i32>} : memref<36x512xbf16, #tpu.memory_space<vmem>>, vector<4x256xbf16>,
    %c4_168 = arith.constant 4 : index
    %c0_169 = arith.constant 0 : index
    %c1_170 = arith.constant 1 : index
    %142 = vector.load %arg7[%c4_168, %c0_169, %c1_170] : memref<8x18x18xf32, #tpu.memory_space<vmem>>, vector<4x16x16xf32>
    %143 = vector.shape_cast %142 : vector<4x16x16xf32> to vector<4x256xf32>
    %144 = arith.truncf %143 : vector<4x256xf32> to vector<4x256xbf16>
    %c4_171 = arith.constant 4 : index
    %c256_172 = arith.constant 256 : index
    %145 = vector.load %arg8[%c4_171, %c256_172] : memref<36x512xbf16, #tpu.memory_space<vmem>>, vector<4x256xbf16>
    tpu.vector_store %arg8[%c4_171, %c256_172], %144 {strides = array<i32>} : memref<36x512xbf16, #tpu.memory_space<vmem>>, vector<4x256xbf16>,
    %c4_173 = arith.constant 4 : index
    %c0_174 = arith.constant 0 : index
    %c2_175 = arith.constant 2 : index
    %146 = vector.load %arg7[%c4_173, %c0_174, %c2_175] : memref<8x18x18xf32, #tpu.memory_space<vmem>>, vector<4x16x16xf32>
    %147 = vector.shape_cast %146 : vector<4x16x16xf32> to vector<4x256xf32>
    %148 = arith.truncf %147 : vector<4x256xf32> to vector<4x256xbf16>
    %c8_176 = arith.constant 8 : index
    %c256_177 = arith.constant 256 : index
    %149 = vector.load %arg8[%c8_176, %c256_177] : memref<36x512xbf16, #tpu.memory_space<vmem>>, vector<4x256xbf16>
    tpu.vector_store %arg8[%c8_176, %c256_177], %148 {strides = array<i32>} : memref<36x512xbf16, #tpu.memory_space<vmem>>, vector<4x256xbf16>,
    %c4_178 = arith.constant 4 : index
    %c1_179 = arith.constant 1 : index
    %c0_180 = arith.constant 0 : index
    %150 = vector.load %arg7[%c4_178, %c1_179, %c0_180] : memref<8x18x18xf32, #tpu.memory_space<vmem>>, vector<4x16x16xf32>
    %151 = vector.shape_cast %150 : vector<4x16x16xf32> to vector<4x256xf32>
    %152 = arith.truncf %151 : vector<4x256xf32> to vector<4x256xbf16>
    %c12_181 = arith.constant 12 : index
    %c256_182 = arith.constant 256 : index
    %153 = vector.load %arg8[%c12_181, %c256_182] : memref<36x512xbf16, #tpu.memory_space<vmem>>, vector<4x256xbf16>
    tpu.vector_store %arg8[%c12_181, %c256_182], %152 {strides = array<i32>} : memref<36x512xbf16, #tpu.memory_space<vmem>>, vector<4x256xbf16>,
    %c4_183 = arith.constant 4 : index
    %c1_184 = arith.constant 1 : index
    %c1_185 = arith.constant 1 : index
    %154 = vector.load %arg7[%c4_183, %c1_184, %c1_185] : memref<8x18x18xf32, #tpu.memory_space<vmem>>, vector<4x16x16xf32>
    %155 = vector.shape_cast %154 : vector<4x16x16xf32> to vector<4x256xf32>
    %156 = arith.truncf %155 : vector<4x256xf32> to vector<4x256xbf16>
    %c16_186 = arith.constant 16 : index
    %c256_187 = arith.constant 256 : index
    %157 = vector.load %arg8[%c16_186, %c256_187] : memref<36x512xbf16, #tpu.memory_space<vmem>>, vector<4x256xbf16>
    tpu.vector_store %arg8[%c16_186, %c256_187], %156 {strides = array<i32>} : memref<36x512xbf16, #tpu.memory_space<vmem>>, vector<4x256xbf16>,
    %c4_188 = arith.constant 4 : index
    %c1_189 = arith.constant 1 : index
    %c2_190 = arith.constant 2 : index
    %158 = vector.load %arg7[%c4_188, %c1_189, %c2_190] : memref<8x18x18xf32, #tpu.memory_space<vmem>>, vector<4x16x16xf32>
    %159 = vector.shape_cast %158 : vector<4x16x16xf32> to vector<4x256xf32>
    %160 = arith.truncf %159 : vector<4x256xf32> to vector<4x256xbf16>
    %c20_191 = arith.constant 20 : index
    %c256_192 = arith.constant 256 : index
    %161 = vector.load %arg8[%c20_191, %c256_192] : memref<36x512xbf16, #tpu.memory_space<vmem>>, vector<4x256xbf16>
    tpu.vector_store %arg8[%c20_191, %c256_192], %160 {strides = array<i32>} : memref<36x512xbf16, #tpu.memory_space<vmem>>, vector<4x256xbf16>,
    %c4_193 = arith.constant 4 : index
    %c2_194 = arith.constant 2 : index
    %c0_195 = arith.constant 0 : index
    %162 = vector.load %arg7[%c4_193, %c2_194, %c0_195] : memref<8x18x18xf32, #tpu.memory_space<vmem>>, vector<4x16x16xf32>
    %163 = vector.shape_cast %162 : vector<4x16x16xf32> to vector<4x256xf32>
    %164 = arith.truncf %163 : vector<4x256xf32> to vector<4x256xbf16>
    %c24_196 = arith.constant 24 : index
    %c256_197 = arith.constant 256 : index
    %165 = vector.load %arg8[%c24_196, %c256_197] : memref<36x512xbf16, #tpu.memory_space<vmem>>, vector<4x256xbf16>
    tpu.vector_store %arg8[%c24_196, %c256_197], %164 {strides = array<i32>} : memref<36x512xbf16, #tpu.memory_space<vmem>>, vector<4x256xbf16>,
    %c4_198 = arith.constant 4 : index
    %c2_199 = arith.constant 2 : index
    %c1_200 = arith.constant 1 : index
    %166 = vector.load %arg7[%c4_198, %c2_199, %c1_200] : memref<8x18x18xf32, #tpu.memory_space<vmem>>, vector<4x16x16xf32>
    %167 = vector.shape_cast %166 : vector<4x16x16xf32> to vector<4x256xf32>
    %168 = arith.truncf %167 : vector<4x256xf32> to vector<4x256xbf16>
    %c28_201 = arith.constant 28 : index
    %c256_202 = arith.constant 256 : index
    %169 = vector.load %arg8[%c28_201, %c256_202] : memref<36x512xbf16, #tpu.memory_space<vmem>>, vector<4x256xbf16>
    tpu.vector_store %arg8[%c28_201, %c256_202], %168 {strides = array<i32>} : memref<36x512xbf16, #tpu.memory_space<vmem>>, vector<4x256xbf16>,
    %c4_203 = arith.constant 4 : index
    %c2_204 = arith.constant 2 : index
    %c2_205 = arith.constant 2 : index
    %170 = vector.load %arg7[%c4_203, %c2_204, %c2_205] : memref<8x18x18xf32, #tpu.memory_space<vmem>>, vector<4x16x16xf32>
    %171 = vector.shape_cast %170 : vector<4x16x16xf32> to vector<4x256xf32>
    %172 = arith.truncf %171 : vector<4x256xf32> to vector<4x256xbf16>
    %c32_206 = arith.constant 32 : index
    %c256_207 = arith.constant 256 : index
    %173 = vector.load %arg8[%c32_206, %c256_207] : memref<36x512xbf16, #tpu.memory_space<vmem>>, vector<4x256xbf16>
    tpu.vector_store %arg8[%c32_206, %c256_207], %172 {strides = array<i32>} : memref<36x512xbf16, #tpu.memory_space<vmem>>, vector<4x256xbf16>,
    %c0_208 = arith.constant 0 : index
    %c0_209 = arith.constant 0 : index
    %174 = vector.load %arg4[%c0_208, %c0_209] : memref<4x36xbf16, #tpu.memory_space<vmem>>, vector<4x36xbf16>
    %c0_210 = arith.constant 0 : index
    %c0_211 = arith.constant 0 : index
    %175 = vector.load %arg8[%c0_210, %c0_211] : memref<36x512xbf16, #tpu.memory_space<vmem>>, vector<36x512xbf16>
    %cst_212 = arith.constant dense<0.000000e+00> : vector<4x512xf32>
    %176 = tpu.matmul %174, %175, %cst_212 {dimension_numbers = #tpu.dot_dimension_numbers<[1], [0], [0], [1], [0, 0, 1, 1], [], []>} : vector<4x36xbf16>, vector<36x512xbf16>, vector<4x512xf32> -> vector<4x512xf32>
    %c0_213 = arith.constant 0 : index
    %c0_214 = arith.constant 0 : index
    %177 = vector.load %arg5[%c0_213, %c0_214] : memref<4x1xf32, #tpu.memory_space<vmem>>, vector<4x1xf32>
    %178 = vector.broadcast %177 : vector<4x1xf32> to vector<4x512xf32>
    %179 = arith.addf %176, %178 : vector<4x512xf32>
    %cst_215 = arith.constant 0.000000e+00 : f32
    %180 = vector.broadcast %cst_215 : f32 to vector<4x512xf32>
    %181 = arith.maximumf %179, %180 : vector<4x512xf32>
    %182 = vector.extract_strided_slice %181 {offsets = [0, 0], sizes = [4, 256], strides = [1, 1]} : vector<4x512xf32> to vector<4x256xf32>
    %c0_216 = arith.constant 0 : index
    %c0_217 = arith.constant 0 : index
    %c0_218 = arith.constant 0 : index
    %183 = vector.load %arg1[%c0_216, %c0_217, %c0_218] : memref<2x4x256xf32, #tpu.memory_space<vmem>>, vector<1x4x256xf32>
    %184 = vector.shape_cast %183 : vector<1x4x256xf32> to vector<4x256xf32>
    %185 = arith.addf %182, %184 : vector<4x256xf32>
    %c0_219 = arith.constant 0 : index
    %c0_220 = arith.constant 0 : index
    %c0_221 = arith.constant 0 : index
    %186 = vector.load %arg6[%c0_219, %c0_220, %c0_221] : memref<2x4x256xf32, #tpu.memory_space<vmem>>, vector<1x4x256xf32>
    %187 = vector.shape_cast %186 : vector<1x4x256xf32> to vector<4x256xf32>
    %188 = vector.shape_cast %185 : vector<4x256xf32> to vector<1x4x256xf32>
    tpu.vector_store %arg6[%c0_219, %c0_220, %c0_221], %188 {strides = array<i32>} : memref<2x4x256xf32, #tpu.memory_space<vmem>>, vector<1x4x256xf32>,
    %189 = vector.extract_strided_slice %181 {offsets = [0, 256], sizes = [4, 256], strides = [1, 1]} : vector<4x512xf32> to vector<4x256xf32>
    %c1_222 = arith.constant 1 : index
    %c0_223 = arith.constant 0 : index
    %c0_224 = arith.constant 0 : index
    %190 = vector.load %arg1[%c1_222, %c0_223, %c0_224] : memref<2x4x256xf32, #tpu.memory_space<vmem>>, vector<1x4x256xf32>
    %191 = vector.shape_cast %190 : vector<1x4x256xf32> to vector<4x256xf32>
    %192 = arith.addf %189, %191 : vector<4x256xf32>
    %c1_225 = arith.constant 1 : index
    %c0_226 = arith.constant 0 : index
    %c0_227 = arith.constant 0 : index
    %193 = vector.load %arg6[%c1_225, %c0_226, %c0_227] : memref<2x4x256xf32, #tpu.memory_space<vmem>>, vector<1x4x256xf32>
    %194 = vector.shape_cast %193 : vector<1x4x256xf32> to vector<4x256xf32>
    %195 = vector.shape_cast %192 : vector<4x256xf32> to vector<1x4x256xf32>
    tpu.vector_store %arg6[%c1_225, %c0_226, %c0_227], %195 {strides = array<i32>} : memref<2x4x256xf32, #tpu.memory_space<vmem>>, vector<1x4x256xf32>,
    return
  }
  func.func @transform_0(%arg0: i32) -> (i32, i32, i32) {
    %c0_i32 = arith.constant 0 : i32
    %c0_i32_0 = arith.constant 0 : i32
    %c0_i32_1 = arith.constant 0 : i32
    return %arg0, %c0_i32, %c0_i32_0 : i32, i32, i32
  }
  func.func @transform_1(%arg0: i32) -> (i32, i32) {
    %c0_i32 = arith.constant 0 : i32
    %c0_i32_0 = arith.constant 0 : i32
    %c0_i32_1 = arith.constant 0 : i32
    return %c0_i32, %c0_i32_0 : i32, i32
  }
  func.func @transform_2(%arg0: i32) -> (i32, i32) {
    %c0_i32 = arith.constant 0 : i32
    %c0_i32_0 = arith.constant 0 : i32
    %c0_i32_1 = arith.constant 0 : i32
    return %c0_i32, %c0_i32_0 : i32, i32
  }
  func.func @transform_3(%arg0: i32) -> (i32, i32) {
    %c0_i32 = arith.constant 0 : i32
    %c0_i32_0 = arith.constant 0 : i32
    %c0_i32_1 = arith.constant 0 : i32
    return %c0_i32, %c0_i32_0 : i32, i32
  }
  func.func @transform_4(%arg0: i32) -> (i32, i32) {
    %c0_i32 = arith.constant 0 : i32
    %c0_i32_0 = arith.constant 0 : i32
    %c0_i32_1 = arith.constant 0 : i32
    return %c0_i32, %c0_i32_0 : i32, i32
  }
  func.func @transform_5(%arg0: i32) -> (i32, i32, i32) {
    %c0_i32 = arith.constant 0 : i32
    %c0_i32_0 = arith.constant 0 : i32
    %c0_i32_1 = arith.constant 0 : i32
    return %arg0, %c0_i32, %c0_i32_0 : i32, i32, i32
  }
}

</mosaic_0001>

<bundles_post_ra>
// kernel: tpu_custom_call.1
= control target key start
LH: loop header
LB: loop body
LE: loop exit
PB: predicated region body
PF: predicated region fallthrough
CT: control target
= control target key end

     0   :  { %10 = vsyncpa [#allocation5], 0  ;;  %s17792_s0 = inlined_call_operand.hbm [shape: f32[2,4,256], index: 0, kind: input, shape index: {}]   ;;  %s17793_s1 = inlined_call_operand.vmem [shape: bf16[4,36], index: 1, kind: input, shape index: {}]   ;;  %s17794_s2 = inlined_call_operand.vmem [shape: f32[4,1], index: 2, kind: input, shape index: {}]   ;;  %s17795_s3 = inlined_call_operand.vmem [shape: bf16[4,36], index: 3, kind: input, shape index: {}]   ;;  %s17796_s4 = inlined_call_operand.vmem [shape: f32[4,1], index: 4, kind: input, shape index: {}]   ;;  %s17797_s5 = inlined_call_operand.hbm [shape: f32[2,4,256], index: 5, kind: output, shape index: {}]  }
   0x1   :  { %11 = vsyncpa [#allocation6], 0  ;;  %s11752_s18 = smov [#allocation4]   ;;  %s11704_s22 = scalar_lea.hbm %s17792_s0, 256 }
   0x2   :  { %s17_s19 = sshll.u32 %s11752_s18, 4  ;;  %p11705_p0 = scmp.ne.s32.totalorder %s17792_s0, %s11704_s22  ;;  %s18_s19 = int_to_ptr.vmem [resolvable:$true] %s17_s19 }
   0x3   :  { %p11708_p1 = scmp.lt.u32.totalorder %s11704_s22, %s17792_s0 }
   0x5   :  { %p11710_p2 = pnand %p11708_p1, %p11705_p0 }
   0x7   :  { %11713 = shalt.err (!%p11710_p2)
}
   0x8   :  { %s11714_s27 = scalar_lea.vmem %s18_s19, 256  ;;  %p11719_p4 = scmp.lt.s32.totalorder %s18_s19, %s18_s19 }
   0x9   :  { %p11715_p3 = scmp.ne.s32.totalorder %s18_s19, %s11714_s27  ;;  %p11720_p5 = scmp.lt.s32.totalorder %s11714_s27, %s11714_s27 }
   0xb   :  { %p11721_p6 = por %p11720_p5, %p11719_p4 }
   0xd   :  { %p11722_p7 = pnand %p11721_p6, %p11715_p3 }
   0xf   :  { %11725 = shalt.err (!%p11722_p7)
}
  0x10   :  { %s11753_s28 = smov 128   ;;  %s11754_s29 = smov 8  }
  0x11   :  { %23 = dma.hbm_to_vmem [thread:$0]  %s17792_s0, 256, %s18_s19, [#allocation5], %s11753_s28, %s11753_s28, %s11754_s29  }
  0x12   :  { %11748 = dma.done.wait [#allocation5], 256  }
  0x13   :  { %11749 = vsyncadd [#allocation5], 4294967040  ;;  %v11815_v0 = vld [vmem:[#allocation4] sm:$0xff]  ;;  %s11755_s7 = smov 80   ;;  %s11756_s8 = smov 112   ;;  %v11829_v1 = vld [vmem:[#allocation4 + $0x8] sm:$0xff]  ;;  %v148_v7 = vlaneseq }
  0x14   :  { %117 = vrot.lane.b32.xlu1 %v11815_v0, %s11755_s7  ;;  %109 = vrot.lane.b32.xlu0 %v11815_v0, %s11756_s8  ;;  %s11757_s9 = smov 64   ;;  %s11758_s10 = smov 96   ;;  %vm36_vm0 = vcmask 139264   ;;  %vm53_vm1 = vcmask 7168   ;;  %vm79_vm2 = vcmask 146568   ;;  %v17798_v2 = vmov 0.0  }
  0x15   :  { %s11759_s0 = smov 32   ;;  %s11760_s11 = smov 48   ;;  %37 = vst.msk [vmem:[#allocation2] sm:$0x1] %vm36_vm0, %v17798_v2  ;;  %38 = vst.msk [vmem:[#allocation2 + $0x18] sm:$0x1] %vm36_vm0, %v17798_v2 }
  0x16   :  { %s11761_s12 = smov 16   ;;  %55 = vst.msk [vmem:[#allocation2 + $0x8] sm:$0xff] %vm53_vm1, %v17798_v2  ;;  %59 = vst.msk [vmem:[#allocation2 + $0x20] sm:$0xff] %vm53_vm1, %v17798_v2  ;;  %v11763_v5 = vmov 1983009808   ;;  %v149_v11 = vshrl.u32 %v148_v7, 7 }
  0x17   :  { %39 = vst.msk [vmem:[#allocation2 + $0x30] sm:$0x1] %vm36_vm0, %v17798_v2  ;;  %40 = vst.msk [vmem:[#allocation2 + $0x48] sm:$0x1] %vm36_vm0, %v17798_v2  ;;  %v146_v6 = vunpack.c.l.s4 %v11763_v5  ;;  %v11764_v12 = vmov 1934713408  }
  0x18   :  { %121 = vrot.lane.b32.xlu1 %v11815_v0, %s11757_s9  ;;  %113 = vrot.lane.b32.xlu0 %v11815_v0, %s11758_s10  ;;  %41 = vst.msk [vmem:[#allocation2 + $0x60] sm:$0x1] %vm36_vm0, %v17798_v2  ;;  %42 = vst.msk [vmem:[#allocation2 + $0x78] sm:$0x1] %vm36_vm0, %v17798_v2  ;;  %v163_v13 = vunpack.c.l.s4 %v11764_v12  ;;  %v340_v32 = vrot.slane %v11829_v1, 4  ;;  %s11765_s13 = smov 1  }
  0x19   :  { %43 = vst.msk [vmem:[#allocation2 + $0x90] sm:$0x1] %vm36_vm0, %v17798_v2  ;;  %44 = vst.msk [vmem:[#allocation2 + $0xa8] sm:$0x1] %vm36_vm0, %v17798_v2  ;;  %v147_v10 = vunpack.c.0.s8 %v146_v6  ;;  %vm56_vm3 = vcmask 1024   ;;  %vm82_vm4 = vcmask 140424  }
  0x1a   :  { %45 = vst.msk [vmem:[#allocation2 + $0x11] sm:$0x1] %vm36_vm0, %v17798_v2  ;;  %46 = vst.msk [vmem:[#allocation2 + $0x29] sm:$0x1] %vm36_vm0, %v17798_v2  ;;  %v164_v19 = vunpack.c.0.s8 %v163_v13  ;;  %vm328_vm5 = vcmask 138248   ;;  %s11766_s14 = smov 126  }
  0x1b   :  { %47 = vst.msk [vmem:[#allocation2 + $0x41] sm:$0x1] %vm36_vm0, %v17798_v2  ;;  %48 = vst.msk [vmem:[#allocation2 + $0x59] sm:$0x1] %vm36_vm0, %v17798_v2  ;;  %v11957_v17 = vsub.s32 %v147_v10, %v149_v11  ;;  %s11767_s15 = smov 127   ;;  %vm770_vm6 = vcmask 130048  }
  0x1c   :  { %129 = vrot.lane.b32.xlu1 %v11815_v0, %s11759_s0  ;;  %125 = vrot.lane.b32.xlu0 %v11815_v0, %s11760_s11  ;;  %49 = vst.msk [vmem:[#allocation2 + $0x71] sm:$0x1] %vm36_vm0, %v17798_v2  ;;  %50 = vst.msk [vmem:[#allocation2 + $0x89] sm:$0x1] %vm36_vm0, %v17798_v2  ;;  %v11969_v26 = vsub.s32 %v164_v19, %v149_v11  ;;  %vm772_vm7 = vcmask 261120   ;;  %vm774_vm8 = vcmask 392192  }
  0x1d   :  { %51 = vst.msk [vmem:[#allocation2 + $0xa1] sm:$0x1] %vm36_vm0, %v17798_v2  ;;  %52 = vst.msk [vmem:[#allocation2 + $0xb9] sm:$0x1] %vm36_vm0, %v17798_v2  ;;  %vm776_vm9 = vcmask 523264   ;;  %vm778_vm10 = vcmask 654336  }
  0x1e   :  { %62 = vst.msk [vmem:[#allocation2 + $0x38] sm:$0xff] %vm53_vm1, %v17798_v2  ;;  %65 = vst.msk [vmem:[#allocation2 + $0x50] sm:$0xff] %vm53_vm1, %v17798_v2  ;;  %vm780_vm11 = vcmask 785408   ;;  %vm782_vm12 = vcmask 916480   ;;  %vm5054_vm13 = vcmask 1041408   ;;  %vm5050_vm14 = vcmask 293888  }
  0x1f   :  { %68 = vst.msk [vmem:[#allocation2 + $0x68] sm:$0xff] %vm53_vm1, %v17798_v2  ;;  %71 = vst.msk [vmem:[#allocation2 + $0x80] sm:$0xff] %vm53_vm1, %v17798_v2 }
  0x20   :  { %342 = vrot.lane.b32.xlu1 %v11829_v1, %s11756_s8  ;;  %133 = vrot.lane.b32.xlu0 %v11815_v0, %s11761_s12  ;;  %74 = vst.msk [vmem:[#allocation2 + $0x98] sm:$0xff] %vm53_vm1, %v17798_v2  ;;  %77 = vst.msk [vmem:[#allocation2 + $0xb0] sm:$0xff] %vm53_vm1, %v17798_v2 }
  0x21   :  { %54 = vst.msk [vmem:[#allocation2] sm:$0xff] %vm53_vm1, %v17798_v2  ;;  %58 = vst.msk [vmem:[#allocation2 + $0x18] sm:$0xff] %vm53_vm1, %v17798_v2 }
  0x22   :  { %81 = vst.msk [vmem:[#allocation2 + $0x8] sm:$0xff] %vm79_vm2, %v17798_v2  ;;  %85 = vst.msk [vmem:[#allocation2 + $0x20] sm:$0xff] %vm79_vm2, %v17798_v2 }
  0x23   :  { %61 = vst.msk [vmem:[#allocation2 + $0x30] sm:$0xff] %vm53_vm1, %v17798_v2  ;;  %64 = vst.msk [vmem:[#allocation2 + $0x48] sm:$0xff] %vm53_vm1, %v17798_v2 }
  0x24   :  { %350 = vrot.lane.b32.xlu1 %v11829_v1, %s11755_s7  ;;  %346 = vrot.lane.b32.xlu0 %v11829_v1, %s11758_s10  ;;  %67 = vst.msk [vmem:[#allocation2 + $0x60] sm:$0xff] %vm53_vm1, %v17798_v2  ;;  %70 = vst.msk [vmem:[#allocation2 + $0x78] sm:$0xff] %vm53_vm1, %v17798_v2 }
  0x25   :  { %73 = vst.msk [vmem:[#allocation2 + $0x90] sm:$0xff] %vm53_vm1, %v17798_v2  ;;  %76 = vst.msk [vmem:[#allocation2 + $0xa8] sm:$0xff] %vm53_vm1, %v17798_v2 }
  0x26   :  { %88 = vst.msk [vmem:[#allocation2 + $0x38] sm:$0xff] %vm79_vm2, %v17798_v2  ;;  %91 = vst.msk [vmem:[#allocation2 + $0x50] sm:$0xff] %vm79_vm2, %v17798_v2 }
  0x27   :  { %94 = vst.msk [vmem:[#allocation2 + $0x68] sm:$0xff] %vm79_vm2, %v17798_v2  ;;  %97 = vst.msk [vmem:[#allocation2 + $0x80] sm:$0xff] %vm79_vm2, %v17798_v2 }
  0x28   :  { %358 = vrot.lane.b32.xlu1 %v11829_v1, %s11760_s11  ;;  %354 = vrot.lane.b32.xlu0 %v11829_v1, %s11757_s9  ;;  %100 = vst.msk [vmem:[#allocation2 + $0x98] sm:$0xff] %vm79_vm2, %v17798_v2  ;;  %103 = vst.msk [vmem:[#allocation2 + $0xb0] sm:$0xff] %vm79_vm2, %v17798_v2 }
  0x29   :  { %80 = vst.msk [vmem:[#allocation2] sm:$0xff] %vm79_vm2, %v17798_v2  ;;  %84 = vst.msk [vmem:[#allocation2 + $0x18] sm:$0xff] %vm79_vm2, %v17798_v2 }
  0x2a   :  { %87 = vst.msk [vmem:[#allocation2 + $0x30] sm:$0xff] %vm79_vm2, %v17798_v2  ;;  %90 = vst.msk [vmem:[#allocation2 + $0x48] sm:$0xff] %vm79_vm2, %v17798_v2 }
  0x2b   :  { %93 = vst.msk [vmem:[#allocation2 + $0x60] sm:$0xff] %vm79_vm2, %v17798_v2  ;;  %96 = vst.msk [vmem:[#allocation2 + $0x78] sm:$0xff] %vm79_vm2, %v17798_v2 }
  0x2c   :  { %366 = vrot.lane.b32.xlu1 %v11829_v1, %s11761_s12  ;;  %362 = vrot.lane.b32.xlu0 %v11829_v1, %s11759_s0  ;;  %99 = vst.msk [vmem:[#allocation2 + $0x90] sm:$0xff] %vm79_vm2, %v17798_v2  ;;  %102 = vst.msk [vmem:[#allocation2 + $0xa8] sm:$0xff] %vm79_vm2, %v17798_v2 }
  0x2d   :  { %18125 = vst [vmem:[#allocation10_spill] sm:$0xff] %v11957_v17  ;;  %69 = vst.msk [vmem:[#allocation2 + $0x70] sm:$0x3] %vm56_vm3, %v17798_v2 }
  0x2e   :  { %57 = vst.msk [vmem:[#allocation2 + $0x10] sm:$0x3] %vm56_vm3, %v17798_v2  ;;  %60 = vst.msk [vmem:[#allocation2 + $0x28] sm:$0x3] %vm56_vm3, %v17798_v2 }
  0x2f   :  { %63 = vst.msk [vmem:[#allocation2 + $0x40] sm:$0x3] %vm56_vm3, %v17798_v2  ;;  %66 = vst.msk [vmem:[#allocation2 + $0x58] sm:$0x3] %vm56_vm3, %v17798_v2 }
  0x30   :  { %72 = vst.msk [vmem:[#allocation2 + $0x88] sm:$0x3] %vm56_vm3, %v17798_v2  ;;  %75 = vst.msk [vmem:[#allocation2 + $0xa0] sm:$0x3] %vm56_vm3, %v17798_v2 }
  0x31   :  { %78 = vst.msk [vmem:[#allocation2 + $0xb8] sm:$0x3] %vm56_vm3, %v17798_v2 }
  0x32   :  { %95 = vst.msk [vmem:[#allocation2 + $0x70] sm:$0x3] %vm82_vm4, %v17798_v2  ;;  %83 = vst.msk [vmem:[#allocation2 + $0x10] sm:$0x3] %vm82_vm4, %v17798_v2 }
  0x33   :  { %86 = vst.msk [vmem:[#allocation2 + $0x28] sm:$0x3] %vm82_vm4, %v17798_v2  ;;  %89 = vst.msk [vmem:[#allocation2 + $0x40] sm:$0x3] %vm82_vm4, %v17798_v2 }
  0x34   :  { %92 = vst.msk [vmem:[#allocation2 + $0x58] sm:$0x3] %vm82_vm4, %v17798_v2  ;;  %98 = vst.msk [vmem:[#allocation2 + $0x88] sm:$0x3] %vm82_vm4, %v17798_v2 }
  0x35   :  { %101 = vst.msk [vmem:[#allocation2 + $0xa0] sm:$0x3] %vm82_vm4, %v17798_v2  ;;  %104 = vst.msk [vmem:[#allocation2 + $0xb8] sm:$0x3] %vm82_vm4, %v17798_v2 }
  0x86   :  { %v11943_v3 = vpop.permute.xlu1 %117  ;;  %v11945_v4 = vpop.permute.xlu0 %109 }
  0x87   :  { %v152_v18 = vcombine.low %v11945_v4, %v11943_v3 }
  0x89   :  { %v159_v24 = vrot.slane %v152_v18, %v11957_v17 }
  0x8a   :  { %v11947_v8 = vpop.permute.xlu1 %121  ;;  %v11949_v9 = vpop.permute.xlu0 %113 }
  0x8b   :  { %v144_v14 = vcombine.low %v11815_v0, %v11949_v9  ;;  %v123_v63 = vrot.slane %v11947_v8, 4 }
  0x8d   :  { %v151_v20 = vrot.slane %v144_v14, %v11957_v17 }
  0x8e   :  { %v11953_v15 = vpop.permute.xlu1 %129  ;;  %v11955_v16 = vpop.permute.xlu0 %125 }
  0x8f   :  { %v178_v21 = vcombine.low %v11947_v8, %v11953_v15  ;;  %v160_v27 = vcombine.low %v151_v20, %v159_v24  ;;  %v161_v49 = vcombine.high %v151_v20, %v159_v24  ;;  %v115_v20 = vrot.slane %v11949_v9, 4 }
  0x91   :  { %v185_v28 = vrot.slane %v178_v21, %v11957_v17  ;;  %v168_v40 = vrot.slane %v160_v27, %v11969_v26  ;;  %v175_v5 = vrot.slane %v161_v49, %v11969_v26  ;;  %v131_v21 = vrot.slane %v11953_v15, 4 }
  0x92   :  { %v343_v22 = vpop.permute.xlu1 %342  ;;  %v11964_v23 = vpop.permute.xlu0 %133  ;;  %v111_v27 = vrot.slane %v11945_v4, 4 }
  0x93   :  { %v186_v25 = vcombine.low %v11955_v16, %v11964_v23  ;;  %v344_v29 = vrot.slane %v343_v22, 4  ;;  %v135_v13 = vrot.slane %v11964_v23, 4 }
  0x95   :  { %v193_v30 = vrot.slane %v186_v25, %v11957_v17  ;;  %v119_v25 = vrot.slane %v11943_v3, 4 }
  0x96   :  { %v351_v31 = vpop.permute.xlu1 %350  ;;  %v347_v33 = vpop.permute.xlu0 %346 }
  0x97   :  { %v194_v34 = vcombine.low %v185_v28, %v193_v30  ;;  %v352_v35 = vrot.slane %v351_v31, 4  ;;  %v385_v36 = vcombine.low %v343_v22, %v351_v31  ;;  %v348_v37 = vrot.slane %v347_v33, 4 }
  0x98   :  { %v377_v38 = vcombine.low %v11829_v1, %v347_v33  ;;  %v195_v42 = vcombine.high %v185_v28, %v193_v30  ;;  %v107_v1 = vrot.slane %v11815_v0, 4  ;;  %v127_v22 = vrot.slane %v11955_v16, 4 }
  0x99   :  { %v453_v39 = vcombine.low %v344_v29, %v352_v35  ;;  %v202_v41 = vrot.slane %v194_v34, %v11969_v26  ;;  %v11978_v43 = vrot.slane %v385_v36, %v11957_v17  ;;  %v445_v45 = vcombine.low %v340_v32, %v348_v37 }
  0x9a   :  { %v11981_v44 = vrot.slane %v377_v38, %v11957_v17  ;;  %v359_v46 = vpop.permute.xlu1 %358  ;;  %v355_v47 = vpop.permute.xlu0 %354  ;;  %v209_v58 = vrot.slane %v195_v42, %v11969_v26  ;;  %v254_v28 = vcombine.low %v127_v22, %v135_v13  ;;  %v212_v32 = vcombine.low %v107_v1, %v115_v20 }
  0x9b   :  { %v296_v48 = vcombine.low %v168_v40, %v202_v41  ;;  %v11984_v50 = vrot.slane %v453_v39, %v11957_v17  ;;  %v11987_v51 = vrot.slane %v445_v45, %v11957_v17  ;;  %v360_v52 = vrot.slane %v359_v46, 4 }
  0x9c   :  { %v356_v53 = vrot.slane %v355_v47, 4  ;;  %v393_v54 = vcombine.low %v11981_v44, %v11978_v43  ;;  %v10207_v57 = vcombine.high %v168_v40, %v202_v41  ;;  %v300_v14 = vcombine.low %v175_v5, %v209_v58 }
  0x9d   :  { %304 = vrot.lane.b32.xlu1 %v296_v48, %s11765_s13  ;;  %v461_v6 = vcombine.low %v11987_v51, %v11984_v50  ;;  %v394_v23 = vcombine.high %v11981_v44, %v11978_v43  ;;  %v10209_v29 = vcombine.high %v175_v5, %v209_v58  ;;  %v246_v33 = vcombine.low %v123_v63, %v131_v21 }
  0x9e   :  { %v367_v55 = vpop.permute.xlu1 %366  ;;  %v363_v56 = vpop.permute.xlu0 %362  ;;  %v401_v19 = vrot.slane %v393_v54, %v11969_v26  ;;  %v220_v3 = vcombine.low %v111_v27, %v119_v25  ;;  %v261_v4 = vrot.slane %v254_v28, %v11957_v17  ;;  %v462_v38 = vcombine.high %v11987_v51, %v11984_v50 }
  0x9f   :  { %v368_v59 = vrot.slane %v367_v55, 4  ;;  %v419_v60 = vcombine.low %v359_v46, %v367_v55  ;;  %v364_v61 = vrot.slane %v363_v56, 4  ;;  %v411_v62 = vcombine.low %v355_v47, %v363_v56 }
  0xa0   :  { %v469_v16 = vrot.slane %v461_v6, %v11969_v26  ;;  %v408_v34 = vrot.slane %v394_v23, %v11969_v26  ;;  %v219_v40 = vrot.slane %v212_v32, %v11957_v17  ;;  %v253_v41 = vrot.slane %v246_v33, %v11957_v17 }
  0xa1   :  { %v426_v7 = vrot.slane %v419_v60, %v11957_v17  ;;  %v487_v10 = vcombine.low %v360_v52, %v368_v59  ;;  %v418_v11 = vrot.slane %v411_v62, %v11957_v17  ;;  %v479_v12 = vcombine.low %v356_v53, %v364_v61  ;;  %308 = vrot.lane.b32.xlu1 %v10207_v57, %s11765_s13 }
  0xa2   :  { %v227_v44 = vrot.slane %v220_v3, %v11957_v17  ;;  %v476_v45 = vrot.slane %v462_v38, %v11969_v26  ;;  %v262_v47 = vcombine.low %v253_v41, %v261_v4  ;;  %v263_v55 = vcombine.high %v253_v41, %v261_v4 }
  0xa3   :  { %v494_v0 = vrot.slane %v487_v10, %v11957_v17  ;;  %v427_v8 = vcombine.low %v418_v11, %v426_v7  ;;  %v486_v18 = vrot.slane %v479_v12, %v11957_v17  ;;  %v428_v9 = vcombine.high %v418_v11, %v426_v7 }
  0xa4   :  { %v228_v48 = vcombine.low %v219_v40, %v227_v44  ;;  %v270_v51 = vrot.slane %v262_v47, %v11969_v26  ;;  %v229_v56 = vcombine.high %v219_v40, %v227_v44  ;;  %v277_v58 = vrot.slane %v263_v55, %v11969_v26 }
  0xa5   :  { %312 = vrot.lane.b32.xlu1 %v300_v14, %s11765_s13  ;;  %v435_v15 = vrot.slane %v427_v8, %v11969_v26  ;;  %v495_v24 = vcombine.low %v486_v18, %v494_v0  ;;  %v442_v37 = vrot.slane %v428_v9, %v11969_v26  ;;  %v496_v39 = vcombine.high %v486_v18, %v494_v0 }
  0xa6   :  { %v236_v52 = vrot.slane %v228_v48, %v11969_v26  ;;  %v243_v59 = vrot.slane %v229_v56, %v11969_v26 }
  0xa7   :  { %v529_v30 = vcombine.low %v401_v19, %v435_v15  ;;  %v503_v31 = vrot.slane %v495_v24, %v11969_v26  ;;  %v10211_v35 = vcombine.high %v401_v19, %v435_v15  ;;  %v533_v42 = vcombine.low %v408_v34, %v442_v37 }
  0xa8   :  { %v510_v46 = vrot.slane %v496_v39, %v11969_v26  ;;  %v10213_v49 = vcombine.high %v408_v34, %v442_v37  ;;  %v297_v54 = vcombine.low %v236_v52, %v270_v51  ;;  %v10208_v57 = vcombine.high %v236_v52, %v270_v51 }
  0xa9   :  { %316 = vrot.lane.b32.xlu1 %v10209_v29, %s11765_s13  ;;  %537 = vrot.lane.b32.xlu0 %v529_v30, %s11765_s13  ;;  %v530_v36 = vcombine.low %v469_v16, %v503_v31  ;;  %v10212_v43 = vcombine.high %v469_v16, %v503_v31  ;;  %v301_v60 = vcombine.low %v243_v59, %v277_v58 }
  0xaa   :  { %v534_v50 = vcombine.low %v476_v45, %v510_v46  ;;  %v10214_v53 = vcombine.high %v476_v45, %v510_v46  ;;  %v10210_v61 = vcombine.high %v243_v59, %v277_v58 }
  0xad   :  { %541 = vrot.lane.b32.xlu0 %v10211_v35, %s11765_s13  ;;  %539 = vrot.lane.b32.xlu1 %v530_v36, %s11765_s13 }
  0xb1   :  { %545 = vrot.lane.b32.xlu0 %v533_v42, %s11765_s13  ;;  %543 = vrot.lane.b32.xlu1 %v10212_v43, %s11765_s13 }
  0xb5   :  { %549 = vrot.lane.b32.xlu0 %v10213_v49, %s11765_s13  ;;  %547 = vrot.lane.b32.xlu1 %v534_v50, %s11765_s13 }
  0xb9   :  { %551 = vrot.lane.b32.xlu1 %v10214_v53, %s11765_s13  ;;  %306 = vrot.lane.b32.xlu0 %v297_v54, %s11765_s13 }
  0xbd   :  { %310 = vrot.lane.b32.xlu0 %v10208_v57, %s11765_s13 }
  0xc1   :  { %314 = vrot.lane.b32.xlu0 %v301_v60, %s11765_s13 }
  0xc5   :  { %318 = vrot.lane.b32.xlu0 %v10210_v61, %s11765_s13 }
 0x10f   :  { %v305_v62 = vpop.permute.xlu1 %304 }
 0x110   :  { %329 = vst.msk [vmem:[#allocation2 + $0x1] sm:$0xff] %vm328_vm5, %v305_v62 }
 0x113   :  { %v309_v63 = vpop.permute.xlu1 %308 }
 0x114   :  { %331 = vst.msk [vmem:[#allocation2 + $0x19] sm:$0xff] %vm328_vm5, %v309_v63 }
 0x117   :  { %v313_v1 = vpop.permute.xlu1 %312  ;;  %v12069_v5 = vld [vmem:[#allocation2] sm:$0xff] }
 0x118   :  { %333 = vst.msk [vmem:[#allocation2 + $0x31] sm:$0xff] %vm328_vm5, %v313_v1  ;;  %1072 = vrot.lane.b32.xlu0 %v12069_v5, %s11766_s14  ;;  %816 = vrot.lane.b32.xlu1 %v12069_v5, %s11767_s15  ;;  %v12100_v20 = vld [vmem:[#allocation2 + $0x1] sm:$0xff] }
 0x11b   :  { %v317_v6 = vpop.permute.xlu1 %316  ;;  %v538_v7 = vpop.permute.xlu0 %537  ;;  %v12076_v10 = vld [vmem:[#allocation2 + $0x18] sm:$0xff] }
 0x11c   :  { %335 = vst.msk [vmem:[#allocation2 + $0x49] sm:$0xff] %vm328_vm5, %v317_v6  ;;  %562 = vst.msk [vmem:[#allocation2 + $0x61] sm:$0xff] %vm328_vm5, %v538_v7  ;;  %1076 = vrot.lane.b32.xlu0 %v12076_v10, %s11766_s14  ;;  %820 = vrot.lane.b32.xlu1 %v12076_v10, %s11767_s15  ;;  %v12108_v23 = vld [vmem:[#allocation2 + $0x19] sm:$0xff] }
 0x11f   :  { %v542_v11 = vpop.permute.xlu0 %541  ;;  %v540_v12 = vpop.permute.xlu1 %539  ;;  %v12084_v13 = vld [vmem:[#allocation2 + $0x30] sm:$0xff] }
 0x120   :  { %564 = vst.msk [vmem:[#allocation2 + $0x79] sm:$0xff] %vm328_vm5, %v542_v11  ;;  %563 = vst.msk [vmem:[#allocation2 + $0x69] sm:$0xff] %vm328_vm5, %v540_v12  ;;  %1080 = vrot.lane.b32.xlu0 %v12084_v13, %s11766_s14  ;;  %824 = vrot.lane.b32.xlu1 %v12084_v13, %s11767_s15  ;;  %v12116_v15 = vld [vmem:[#allocation2 + $0x31] sm:$0xff]  ;;  %v578_v62 = vcombine.low %v12069_v5, %v12084_v13  ;;  %v579_v6 = vcombine.high %v12069_v5, %v12084_v13 }
 0x121   :  { %v1319_v59 = vcombine.low %v12100_v20, %v12116_v15  ;;  %v1320_v60 = vcombine.high %v12100_v20, %v12116_v15 }
 0x122   :  { %v12328_v13 = vrot.slane %v578_v62, %v11957_v17 }
 0x123   :  { %v546_v14 = vpop.permute.xlu0 %545  ;;  %v544_v0 = vpop.permute.xlu1 %543  ;;  %v12092_v8 = vld [vmem:[#allocation2 + $0x48] sm:$0xff]  ;;  %v12130_v27 = vld [vmem:[#allocation2 + $0x60] sm:$0xff] }
 0x124   :  { %566 = vst.msk [vmem:[#allocation2 + $0x91] sm:$0xff] %vm328_vm5, %v546_v14  ;;  %565 = vst.msk [vmem:[#allocation2 + $0x81] sm:$0xff] %vm328_vm5, %v544_v0  ;;  %1084 = vrot.lane.b32.xlu0 %v12092_v8, %s11766_s14  ;;  %828 = vrot.lane.b32.xlu1 %v12092_v8, %s11767_s15  ;;  %v12123_v24 = vld [vmem:[#allocation2 + $0x49] sm:$0xff]  ;;  %v12157_v32 = vld [vmem:[#allocation2 + $0x61] sm:$0xff]  ;;  %v594_v57 = vcombine.low %v12076_v10, %v12092_v8  ;;  %v595_v61 = vcombine.high %v12076_v10, %v12092_v8 }
 0x125   :  { %v1335_v53 = vcombine.low %v12108_v23, %v12123_v24  ;;  %v1336_v54 = vcombine.high %v12108_v23, %v12123_v24  ;;  %v12317_v0 = vrot.slane %v1319_v59, %v11957_v17  ;;  %v1334_v8 = vrot.slane %v1320_v60, %v11957_v17 }
 0x126   :  { %v12312_v12 = vrot.slane %v594_v57, %v11957_v17 }
 0x127   :  { %v550_v18 = vpop.permute.xlu0 %549  ;;  %v548_v19 = vpop.permute.xlu1 %547  ;;  %v12137_v28 = vld [vmem:[#allocation2 + $0x78] sm:$0xff]  ;;  %v12259_v49 = vld [vmem:[#allocation2 + $0x68] sm:$0xff]  ;;  %v12300_v63 = vrot.slane %v1335_v53, %v11957_v17  ;;  %v1350_v1 = vrot.slane %v1336_v54, %v11957_v17 }
 0x128   :  { %568 = vst.msk [vmem:[#allocation2 + $0xa9] sm:$0xff] %vm328_vm5, %v550_v18  ;;  %567 = vst.msk [vmem:[#allocation2 + $0x99] sm:$0xff] %vm328_vm5, %v548_v19  ;;  %1551 = vrot.lane.b32.xlu0 %v12100_v20, %s11767_s15  ;;  %1806 = vrot.lane.b32.xlu1 %v12100_v20, %s11766_s14  ;;  %v12165_v34 = vld [vmem:[#allocation2 + $0x79] sm:$0xff]  ;;  %v609_v18 = vrot.slane %v595_v61, %v11957_v17  ;;  %v12348_v53 = vld [vmem:[#allocation2 + $0x69] sm:$0xff] }
 0x129   :  { %v1352_v19 = vcombine.high %v12317_v0, %v12300_v63  ;;  %v1367_v20 = vcombine.low %v1334_v8, %v1350_v1  ;;  %v1368_v57 = vcombine.high %v1334_v8, %v1350_v1 }
 0x12b   :  { %v552_v21 = vpop.permute.xlu1 %551  ;;  %v307_v22 = vpop.permute.xlu0 %306  ;;  %v12143_v29 = vld [vmem:[#allocation2 + $0x90] sm:$0xff]  ;;  %v12269_v52 = vld [vmem:[#allocation2 + $0x80] sm:$0xff]  ;;  %v12365_v62 = vrot.slane %v1352_v19, %v11969_v26  ;;  %v12368_v1 = vrot.slane %v1367_v20, %v11969_v26 }
 0x12c   :  { %569 = vst.msk [vmem:[#allocation2 + $0xb1] sm:$0xff] %vm328_vm5, %v552_v21  ;;  %330 = vst.msk [vmem:[#allocation2 + $0x9] sm:$0xff] %vm328_vm5, %v307_v22  ;;  %1555 = vrot.lane.b32.xlu0 %v12108_v23, %s11767_s15  ;;  %1810 = vrot.lane.b32.xlu1 %v12108_v23, %s11766_s14  ;;  %v12173_v36 = vld [vmem:[#allocation2 + $0x91] sm:$0xff]  ;;  %v593_v21 = vrot.slane %v579_v6, %v11957_v17  ;;  %v12386_v19 = vld [vmem:[#allocation2 + $0x81] sm:$0xff] }
 0x12e   :  { %v626_v59 = vcombine.low %v593_v21, %v609_v18  ;;  %v627_v60 = vcombine.high %v593_v21, %v609_v18  ;;  %v2788_v18 = vcombine.low %v12130_v27, %v12143_v29 }
 0x12f   :  { %v311_v9 = vpop.permute.xlu0 %310  ;;  %v12149_v30 = vld [vmem:[#allocation2 + $0xa8] sm:$0xff]  ;;  %v12285_v58 = vld [vmem:[#allocation2 + $0x98] sm:$0xff] }
 0x130   :  { %332 = vst.msk [vmem:[#allocation2 + $0x21] sm:$0xff] %vm328_vm5, %v311_v9  ;;  %1559 = vrot.lane.b32.xlu0 %v12116_v15, %s11767_s15  ;;  %1814 = vrot.lane.b32.xlu1 %v12116_v15, %s11766_s14  ;;  %v12181_v3 = vld [vmem:[#allocation2 + $0xa9] sm:$0xff] }
 0x133   :  { %v315_v16 = vpop.permute.xlu0 %314  ;;  %v12155_v31 = vld [vmem:[#allocation2 + $0x8] sm:$0xff]  ;;  %v12314_v14 = vld [vmem:[#allocation2 + $0xb0] sm:$0xff] }
 0x134   :  { %334 = vst.msk [vmem:[#allocation2 + $0x39] sm:$0xff] %vm328_vm5, %v315_v16  ;;  %1563 = vrot.lane.b32.xlu0 %v12123_v24, %s11767_s15  ;;  %1818 = vrot.lane.b32.xlu1 %v12123_v24, %s11766_s14  ;;  %v12187_v4 = vld [vmem:[#allocation2 + $0x9] sm:$0xff]  ;;  %v611_v24 = vcombine.high %v12328_v13, %v12312_v12 }
 0x135   :  { %v12211_v41 = vld [vmem:[#allocation2 + $0xa] sm:$0xff]  ;;  %v12235_v45 = vld [vmem:[#allocation2 + $0x2] sm:$0xff] }
 0x136   :  { %v12389_v20 = vrot.slane %v611_v24, %v11969_v26  ;;  %v12405_v24 = vrot.slane %v626_v59, %v11969_v26  ;;  %v12421_v59 = vrot.slane %v627_v60, %v11969_v26 }
 0x137   :  { %v319_v25 = vpop.permute.xlu0 %318  ;;  %v12163_v33 = vld [vmem:[#allocation2 + $0x20] sm:$0xff] }
 0x138   :  { %336 = vst.msk [vmem:[#allocation2 + $0x51] sm:$0xff] %vm328_vm5, %v319_v25  ;;  %3019 = vrot.lane.b32.xlu0 %v12130_v27, %s11767_s15  ;;  %3275 = vrot.lane.b32.xlu1 %v12130_v27, %s11766_s14  ;;  %v12193_v38 = vld [vmem:[#allocation2 + $0x21] sm:$0xff] }
 0x139   :  { %v12217_v42 = vld [vmem:[#allocation2 + $0x22] sm:$0xff]  ;;  %v12241_v46 = vld [vmem:[#allocation2 + $0x1a] sm:$0xff] }
 0x13b   :  { %v12171_v35 = vld [vmem:[#allocation2 + $0x38] sm:$0xff] }
 0x13c   :  { %3023 = vrot.lane.b32.xlu0 %v12137_v28, %s11767_s15  ;;  %3279 = vrot.lane.b32.xlu1 %v12137_v28, %s11766_s14  ;;  %v12199_v39 = vld [vmem:[#allocation2 + $0x39] sm:$0xff]  ;;  %v646_v6 = vcombine.low %v12155_v31, %v12171_v35 }
 0x13d   :  { %v12223_v43 = vld [vmem:[#allocation2 + $0x3a] sm:$0xff]  ;;  %v12247_v47 = vld [vmem:[#allocation2 + $0x32] sm:$0xff]  ;;  %v1387_v5 = vcombine.low %v12187_v4, %v12199_v39 }
 0x13f   :  { %v12179_v37 = vld [vmem:[#allocation2 + $0x50] sm:$0xff] }
 0x140   :  { %3027 = vrot.lane.b32.xlu0 %v12143_v29, %s11767_s15  ;;  %3283 = vrot.lane.b32.xlu1 %v12143_v29, %s11766_s14  ;;  %v12205_v40 = vld [vmem:[#allocation2 + $0x51] sm:$0xff]  ;;  %v662_v54 = vcombine.low %v12163_v33, %v12179_v37 }
 0x141   :  { %v12229_v44 = vld [vmem:[#allocation2 + $0x52] sm:$0xff]  ;;  %v12253_v48 = vld [vmem:[#allocation2 + $0x4a] sm:$0xff]  ;;  %v1403_v11 = vcombine.low %v12193_v38, %v12205_v40  ;;  %v1404_v16 = vcombine.high %v12193_v38, %v12205_v40 }
 0x142   :  { %v12392_v21 = vrot.slane %v662_v54, %v11957_v17  ;;  %v2789_v54 = vcombine.high %v12130_v27, %v12143_v29 }
 0x143   :  { %v12340_v15 = vrot.slane %v1403_v11, %v11957_v17 }
 0x144   :  { %3031 = vrot.lane.b32.xlu0 %v12149_v30, %s11767_s15  ;;  %3287 = vrot.lane.b32.xlu1 %v12149_v30, %s11766_s14 }
 0x148   :  { %818 = vrot.lane.b32.xlu0 %v12155_v31, %s11767_s15  ;;  %3754 = vrot.lane.b32.xlu1 %v12157_v32, %s11767_s15 }
 0x14c   :  { %822 = vrot.lane.b32.xlu0 %v12163_v33, %s11767_s15  ;;  %3758 = vrot.lane.b32.xlu1 %v12165_v34, %s11767_s15 }
 0x150   :  { %826 = vrot.lane.b32.xlu0 %v12171_v35, %s11767_s15  ;;  %3762 = vrot.lane.b32.xlu1 %v12173_v36, %s11767_s15 }
 0x154   :  { %830 = vrot.lane.b32.xlu0 %v12179_v37, %s11767_s15  ;;  %3766 = vrot.lane.b32.xlu1 %v12181_v3, %s11767_s15 }
 0x158   :  { %1808 = vrot.lane.b32.xlu0 %v12187_v4, %s11766_s14  ;;  %1074 = vrot.lane.b32.xlu1 %v12155_v31, %s11766_s14 }
 0x15c   :  { %1812 = vrot.lane.b32.xlu0 %v12193_v38, %s11766_s14  ;;  %1078 = vrot.lane.b32.xlu1 %v12163_v33, %s11766_s14 }
 0x160   :  { %1816 = vrot.lane.b32.xlu0 %v12199_v39, %s11766_s14  ;;  %1082 = vrot.lane.b32.xlu1 %v12171_v35, %s11766_s14 }
 0x164   :  { %1820 = vrot.lane.b32.xlu0 %v12205_v40, %s11766_s14  ;;  %1086 = vrot.lane.b32.xlu1 %v12179_v37, %s11766_s14 }
 0x168   :  { %2287 = vrot.lane.b32.xlu0 %v12211_v41, %s11767_s15  ;;  %1553 = vrot.lane.b32.xlu1 %v12187_v4, %s11767_s15 }
 0x16c   :  { %2291 = vrot.lane.b32.xlu0 %v12217_v42, %s11767_s15  ;;  %1557 = vrot.lane.b32.xlu1 %v12193_v38, %s11767_s15  ;;  %v12357_v38 = vrot.slane %v1387_v5, %v11957_v17 }
 0x170   :  { %2295 = vrot.lane.b32.xlu0 %v12223_v43, %s11767_s15  ;;  %1561 = vrot.lane.b32.xlu1 %v12199_v39, %s11767_s15 }
 0x174   :  { %2299 = vrot.lane.b32.xlu0 %v12229_v44, %s11767_s15  ;;  %1565 = vrot.lane.b32.xlu1 %v12205_v40, %s11767_s15  ;;  %v1388_v40 = vcombine.high %v12187_v4, %v12199_v39  ;;  %v1420_v4 = vcombine.high %v12357_v38, %v12340_v15  ;;  %v12382_v39 = vrot.slane %v1404_v16, %v11957_v17 }
 0x176   :  { %v1402_v2 = vrot.slane %v1388_v40, %v11957_v17  ;;  %v2872_v40 = vcombine.low %v12269_v52, %v12314_v14  ;;  %v12428_v29 = vrot.slane %v1420_v4, %v11969_v26  ;;  %v2805_v4 = vcombine.high %v12137_v28, %v12149_v30 }
 0x178   :  { %2541 = vrot.lane.b32.xlu0 %v12235_v45, %s11766_s14  ;;  %2285 = vrot.lane.b32.xlu1 %v12235_v45, %s11767_s15  ;;  %18137 = vst [vmem:[#allocation22_spill] sm:$0xff] %v12428_v29 }
 0x17c   :  { %2545 = vrot.lane.b32.xlu0 %v12241_v46, %s11766_s14  ;;  %2289 = vrot.lane.b32.xlu1 %v12241_v46, %s11767_s15 }
 0x180   :  { %2549 = vrot.lane.b32.xlu0 %v12247_v47, %s11766_s14  ;;  %2293 = vrot.lane.b32.xlu1 %v12247_v47, %s11767_s15 }
 0x184   :  { %2553 = vrot.lane.b32.xlu0 %v12253_v48, %s11766_s14  ;;  %2297 = vrot.lane.b32.xlu1 %v12253_v48, %s11767_s15 }
 0x188   :  { %3277 = vrot.lane.b32.xlu0 %v12259_v49, %s11766_s14  ;;  %2543 = vrot.lane.b32.xlu1 %v12211_v41, %s11766_s14 }
 0x18a   :  { %v12265_v50 = vpop.permute.xlu0 %1072  ;;  %v12267_v51 = vpop.permute.xlu1 %816 }
 0x18b   :  { %18126 = vst [vmem:[#allocation11_spill] sm:$0xff] %v12265_v50  ;;  %v2857_v50 = vcombine.high %v12259_v49, %v12285_v58 }
 0x18c   :  { %3281 = vrot.lane.b32.xlu0 %v12269_v52, %s11766_s14  ;;  %2547 = vrot.lane.b32.xlu1 %v12217_v42, %s11766_s14 }
 0x18e   :  { %v12279_v55 = vpop.permute.xlu0 %1076  ;;  %v12281_v56 = vpop.permute.xlu1 %820 }
 0x18f   :  { %18127 = vst [vmem:[#allocation12_spill] sm:$0xff] %v12279_v55 }
 0x190   :  { %3285 = vrot.lane.b32.xlu0 %v12285_v58, %s11766_s14  ;;  %2551 = vrot.lane.b32.xlu1 %v12223_v43, %s11766_s14 }
 0x192   :  { %v12305_v7 = vpop.permute.xlu0 %1080  ;;  %v12307_v10 = vpop.permute.xlu1 %824 }
 0x193   :  { %18128 = vst [vmem:[#allocation13_spill] sm:$0xff] %v12305_v7  ;;  %v840_v22 = vcombine.low %v12267_v51, %v12307_v10  ;;  %v2873_v7 = vcombine.high %v12269_v52, %v12314_v14 }
 0x194   :  { %3289 = vrot.lane.b32.xlu0 %v12314_v14, %s11766_s14  ;;  %2555 = vrot.lane.b32.xlu1 %v12229_v44, %s11766_s14 }
 0x195   :  { %v12373_v11 = vrot.slane %v840_v22, %v11957_v17  ;;  %v12395_v22 = vrot.slane %v1368_v57, %v11969_v26  ;;  %v12411_v57 = vld [vmem:[#allocation2 + $0x99] sm:$0xff] }
 0x196   :  { %v12335_v23 = vpop.permute.xlu0 %1084  ;;  %v12337_v9 = vpop.permute.xlu1 %828 }
 0x197   :  { %18129 = vst [vmem:[#allocation14_spill] sm:$0xff] %v12335_v23  ;;  %v856_v25 = vcombine.low %v12281_v56, %v12337_v9  ;;  %18131 = vst [vmem:[#allocation16_spill] sm:$0xff] %v12373_v11 }
 0x198   :  { %3756 = vrot.lane.b32.xlu0 %v12348_v53, %s11767_s15  ;;  %3021 = vrot.lane.b32.xlu1 %v12259_v49, %s11767_s15  ;;  %18134 = vst [vmem:[#allocation19_spill] sm:$0xff] %v12395_v22 }
 0x199   :  { %v12362_v61 = vrot.slane %v856_v25, %v11957_v17  ;;  %v663_v25 = vcombine.high %v12163_v33, %v12179_v37  ;;  %v12414_v33 = vrot.slane %v646_v6, %v11957_v17  ;;  %v647_v37 = vcombine.high %v12155_v31, %v12171_v35 }
 0x19a   :  { %v12375_v8 = vpop.permute.xlu0 %1551  ;;  %v12377_v5 = vpop.permute.xlu1 %1806  ;;  %v12432_v6 = vrot.slane %v2788_v18, %v11957_v17  ;;  %v2804_v31 = vcombine.low %v12137_v28, %v12149_v30  ;;  %v12446_v18 = vrot.slane %v2789_v54, %v11957_v17  ;;  %v12458_v30 = vrot.slane %v2872_v40, %v11957_v17 }
 0x19b   :  { %18130 = vst [vmem:[#allocation15_spill] sm:$0xff] %v12362_v61  ;;  %18132 = vst [vmem:[#allocation17_spill] sm:$0xff] %v12375_v8  ;;  %v1435_v8 = vcombine.low %v1402_v2, %v12382_v39  ;;  %v679_v35 = vcombine.high %v12414_v33, %v12392_v21  ;;  %v677_v60 = vrot.slane %v663_v25, %v11957_v17 }
 0x19c   :  { %18133 = vst [vmem:[#allocation18_spill] sm:$0xff] %v12377_v5  ;;  %3760 = vrot.lane.b32.xlu0 %v12386_v19, %s11767_s15  ;;  %3025 = vrot.lane.b32.xlu1 %v12269_v52, %s11767_s15  ;;  %v661_v28 = vrot.slane %v647_v37, %v11957_v17  ;;  %v2070_v54 = vcombine.low %v12241_v46, %v12253_v48 }
 0x19d   :  { %v10352_v25 = vpack.i.bf16 %v12428_v29, %v12365_v62  ;;  %v1436_v37 = vcombine.high %v1402_v2, %v12382_v39  ;;  %v12475_v40 = vrot.slane %v2804_v31, %v11957_v17  ;;  %v12478_v23 = vrot.slane %v679_v35, %v11969_v26 }
 0x19e   :  { %v12423_v16 = vpop.permute.xlu0 %1555  ;;  %v12425_v27 = vpop.permute.xlu1 %1810  ;;  %v694_v11 = vcombine.low %v661_v28, %v677_v60  ;;  %v12491_v2 = vrot.slane %v2873_v7, %v11957_v17  ;;  %v2054_v39 = vcombine.low %v12235_v45, %v12247_v47  ;;  %v2122_v31 = vcombine.low %v12211_v41, %v12223_v43 }
 0x19f   :  { %18135 = vst [vmem:[#allocation20_spill] sm:$0xff] %v12423_v16  ;;  %18136 = vst [vmem:[#allocation21_spill] sm:$0xff] %v12425_v27  ;;  %v2856_v16 = vcombine.low %v12259_v49, %v12285_v58  ;;  %v2138_v49 = vcombine.low %v12217_v42, %v12229_v44  ;;  %v12502_v35 = vrot.slane %v2070_v54, %v11957_v17 }
 0x1a0   :  { %3764 = vrot.lane.b32.xlu0 %v12411_v57, %s11767_s15  ;;  %3029 = vrot.lane.b32.xlu1 %v12285_v58, %s11767_s15  ;;  %v12471_v58 = vrot.slane %v1435_v8, %v11969_v26  ;;  %v12488_v8 = vrot.slane %v2857_v50, %v11957_v17  ;;  %v2071_v7 = vcombine.high %v12241_v46, %v12253_v48 }
 0x1a1   :  { %v12481_v61 = vrot.slane %v2856_v16, %v11957_v17  ;;  %v12505_v50 = vrot.slane %v2138_v49, %v11957_v17  ;;  %v695_v54 = vcombine.high %v661_v28, %v677_v60  ;;  %v10337_v46 = vpack.i.bf16 %v12478_v23, %v12389_v20 }
 0x1a2   :  { %v12464_v55 = vpop.permute.xlu0 %1559  ;;  %v12466_v52 = vpop.permute.xlu1 %1814  ;;  %v12525_v48 = vrot.slane %v694_v11, %v11969_v26  ;;  %v2904_v60 = vcombine.low %v12488_v8, %v12491_v2  ;;  %v12535_v28 = vrot.slane %v2054_v39, %v11957_v17 }
 0x1a3   :  { %18138 = vst [vmem:[#allocation23_spill] sm:$0xff] %v12464_v55  ;;  %18139 = vst [vmem:[#allocation24_spill] sm:$0xff] %v12466_v52  ;;  %v12484_v55 = vrot.slane %v2805_v4, %v11957_v17  ;;  %v2889_v16 = vcombine.high %v12481_v61, %v12458_v30  ;;  %v1830_v4 = vcombine.low %v12377_v5, %v12466_v52  ;;  %v12551_v52 = vld [vmem:[#allocation2 + $0xb1] sm:$0xff] }
 0x1a4   :  { %18140 = vst [vmem:[#allocation25_spill] sm:$0xff] %v12481_v61  ;;  %10353 = vrot.lane.b32.xlu0 %v10352_v25, %s11759_s0  ;;  %3033 = vrot.lane.b32.xlu1 %v12314_v14, %s11767_s15  ;;  %v10357_v14 = vpack.i.bf16 %v12471_v58, %v12368_v1  ;;  %v12518_v61 = vrot.slane %v1436_v37, %v11969_v26 }
 0x1a5   :  { %v2821_v5 = vcombine.high %v12432_v6, %v12475_v40  ;;  %v12538_v37 = vrot.slane %v2122_v31, %v11957_v17  ;;  %v12554_v39 = vrot.slane %v1830_v4, %v11957_v17 }
 0x1a6   :  { %v12511_v25 = vpop.permute.xlu0 %1563  ;;  %v12513_v29 = vpop.permute.xlu1 %1818 }
 0x1a7   :  { %18141 = vst [vmem:[#allocation26_spill] sm:$0xff] %v12511_v25  ;;  %18142 = vst [vmem:[#allocation27_spill] sm:$0xff] %v12513_v29  ;;  %v1846_v49 = vcombine.low %v12425_v27, %v12513_v29  ;;  %v2139_v25 = vcombine.high %v12217_v42, %v12229_v44  ;;  %v12545_v42 = vrot.slane %v2889_v16, %v11969_v26 }
 0x1a8   :  { %10358 = vrot.lane.b32.xlu0 %v10357_v14, %s11757_s9  ;;  %10338 = vrot.lane.b32.xlu1 %v10337_v46, %s11759_s0  ;;  %v2055_v44 = vcombine.high %v12235_v45, %v12247_v47  ;;  %v2123_v14 = vcombine.high %v12211_v41, %v12223_v43  ;;  %18144 = vst [vmem:[#allocation29_spill] sm:$0xff] %v12554_v39 }
 0x1a9   :  { %v12541_v11 = vrot.slane %v1846_v49, %v11957_v17  ;;  %v10362_v46 = vpack.i.bf16 %v12518_v61, %v12395_v22  ;;  %v2087_v16 = vcombine.high %v12535_v28, %v12502_v35  ;;  %v2155_v45 = vcombine.high %v12538_v37, %v12505_v50 }
 0x1aa   :  { %v12556_v31 = vpop.permute.xlu0 %3019  ;;  %v12558_v49 = vpop.permute.xlu1 %3275  ;;  %v10342_v41 = vpack.i.bf16 %v12525_v48, %v12405_v24  ;;  %v12569_v43 = vrot.slane %v695_v54, %v11969_v26  ;;  %v2085_v47 = vrot.slane %v2071_v7, %v11957_v17  ;;  %v2153_v4 = vrot.slane %v2139_v25, %v11957_v17 }
 0x1ab   :  { %18143 = vst [vmem:[#allocation28_spill] sm:$0xff] %v12541_v11  ;;  %18145 = vst [vmem:[#allocation30_spill] sm:$0xff] %v12556_v31  ;;  %v12577_v27 = vrot.slane %v2821_v5, %v11969_v26  ;;  %v2836_v29 = vcombine.low %v12446_v18, %v12484_v55  ;;  %v3606_v22 = vcombine.low %v12386_v19, %v12551_v52 }
 0x1ac   :  { %18146 = vst [vmem:[#allocation31_spill] sm:$0xff] %v12558_v49  ;;  %10363 = vrot.lane.b32.xlu0 %v10362_v46, %s11758_s10  ;;  %10343 = vrot.lane.b32.xlu1 %v10342_v41, %s11757_s9  ;;  %v12585_v7 = vrot.slane %v2904_v60, %v11969_v26  ;;  %v2905_v25 = vcombine.high %v12488_v8, %v12491_v2 }
 0x1ad   :  { %18147 = vst [vmem:[#allocation32_spill] sm:$0xff] %v12577_v27  ;;  %v2069_v54 = vrot.slane %v2055_v44, %v11957_v17  ;;  %v2137_v46 = vrot.slane %v2123_v14, %v11957_v17  ;;  %v10382_v39 = vpack.i.bf16 %v12545_v42, %v12577_v27  ;;  %v12598_v11 = vrot.slane %v2087_v16, %v11969_v26 }
 0x1ae   :  { %18148 = vst [vmem:[#allocation33_spill] sm:$0xff] %v12585_v7  ;;  %v12591_v5 = vpop.permute.xlu0 %3023  ;;  %v12593_v31 = vpop.permute.xlu1 %3279  ;;  %v12601_v60 = vrot.slane %v2155_v45, %v11969_v26  ;;  %v678_v8 = vcombine.low %v12414_v33, %v12392_v21  ;;  %v10347_v2 = vpack.i.bf16 %v12569_v43, %v12421_v59  ;;  %v12609_v41 = vrot.slane %v2836_v29, %v11969_v26 }
 0x1af   :  { %18149 = vst [vmem:[#allocation34_spill] sm:$0xff] %v12591_v5  ;;  %v2102_v44 = vcombine.low %v2069_v54, %v2085_v47  ;;  %v2170_v14 = vcombine.low %v2137_v46, %v2153_v4  ;;  %v2837_v16 = vcombine.high %v12446_v18, %v12484_v55  ;;  %v610_v45 = vcombine.low %v12328_v13, %v12312_v12 }
 0x1b0   :  { %10383 = vrot.lane.b32.xlu0 %v10382_v39, %s11759_s0  ;;  %18150 = vst [vmem:[#allocation35_spill] sm:$0xff] %v12609_v41  ;;  %v3522_v5 = vcombine.low %v12157_v32, %v12173_v36  ;;  %10348 = vrot.lane.b32.xlu1 %v10347_v2, %s11758_s10  ;;  %v3538_v21 = vcombine.low %v12165_v34, %v12181_v3 }
 0x1b1   :  { %v18151_v33 = vcombine.low %v12348_v53, %v12411_v57  ;;  %v12627_v39 = vrot.slane %v3606_v22, %v11957_v17  ;;  %v3607_v55 = vcombine.high %v12386_v19, %v12551_v52  ;;  %v10387_v18 = vpack.i.bf16 %v12585_v7, %v12609_v41 }
 0x1b2   :  { %v12631_v12 = vpop.permute.xlu0 %3027  ;;  %v12633_v13 = vpop.permute.xlu1 %3283  ;;  %v10367_v2 = vpack.i.bf16 %v12601_v60, %v12598_v11  ;;  %v12640_v27 = vrot.slane %v2905_v25, %v11969_v26  ;;  %v12646_v22 = vrot.slane %v2102_v44, %v11969_v26  ;;  %v12649_v19 = vrot.slane %v2170_v14, %v11969_v26 }
 0x1b3   :  { %v12624_v29 = vrot.slane %v18151_v33, %v11957_v17  ;;  %18152 = vst [vmem:[#allocation36_spill] sm:$0xff] %v12631_v12  ;;  %v12643_v33 = vrot.slane %v678_v8, %v11969_v26  ;;  %v2103_v52 = vcombine.high %v2069_v54, %v2085_v47  ;;  %v2171_v12 = vcombine.high %v2137_v46, %v2153_v4 }
 0x1b4   :  { %10388 = vrot.lane.b32.xlu0 %v10387_v18, %s11757_s9  ;;  %v12653_v7 = vrot.slane %v2837_v16, %v11969_v26  ;;  %v12656_v41 = vrot.slane %v610_v45, %v11969_v26  ;;  %v12659_v25 = vrot.slane %v3522_v5, %v11957_v17  ;;  %v3523_v8 = vcombine.high %v12157_v32, %v12173_v36 }
 0x1b5   :  { %18153 = vst [vmem:[#allocation37_spill] sm:$0xff] %v12643_v33  ;;  %10368 = vrot.lane.b32.xlu1 %v10367_v2, %s11759_s0  ;;  %v12665_v44 = vrot.slane %v3538_v21, %v11957_v17  ;;  %v3623_v47 = vcombine.high %v12624_v29, %v12627_v39  ;;  %v3539_v4 = vcombine.high %v12165_v34, %v12181_v3  ;;  %v18156_v14 = vmov 0.0  }
 0x1b6   :  { %18154 = vst [vmem:[#allocation38_spill] sm:$0xff] %v12656_v41  ;;  %v3591_v54 = vcombine.high %v12348_v53, %v12411_v57  ;;  %v3299_v46 = vcombine.low %v12558_v49, %v12633_v13  ;;  %v12675_v5 = vpop.permute.xlu0 %3031  ;;  %v12677_v32 = vpop.permute.xlu1 %3287  ;;  %v10392_v36 = vpack.i.bf16 %v12640_v27, %v12653_v7  ;;  %v710_v16 = vcombine.high %v12643_v33, %v18156_v14 }
 0x1b7   :  { %18155 = vst [vmem:[#allocation39_spill] sm:$0xff] %v12675_v5  ;;  %v3621_v45 = vrot.slane %v3607_v55, %v11957_v17  ;;  %v3315_v34 = vcombine.low %v12593_v31, %v12677_v32  ;;  %v10372_v3 = vpack.i.bf16 %v12649_v19, %v12646_v22  ;;  %v12689_v53 = vrot.slane %v2103_v52, %v11969_v26 }
 0x1b8   :  { %v12692_v57 = vrot.slane %v2171_v12, %v11969_v26  ;;  %10393 = vrot.lane.b32.xlu0 %v10392_v36, %s11758_s10  ;;  %v642_v21 = vcombine.high %v12656_v41, %v18156_v14  ;;  %v3555_v55 = vcombine.high %v12659_v25, %v12665_v44  ;;  %v3553_v2 = vrot.slane %v3539_v4, %v11957_v17 }
 0x1b9   :  { %v12698_v18 = vrot.slane %v3315_v34, %v11957_v17  ;;  %10373 = vrot.lane.b32.xlu1 %v10372_v3, %s11757_s9  ;;  %v3605_v52 = vrot.slane %v3591_v54, %v11957_v17  ;;  %v12706_v12 = vrot.slane %v3299_v46, %v11957_v17  ;;  %v643_v34 = vcombine.high %v12389_v20, %v18156_v14 }
 0x1ba   :  { %v12708_v33 = vpop.permute.xlu0 %818  ;;  %v12710_v36 = vpop.permute.xlu1 %3754  ;;  %v10412_v41 = vpack.i.bf16 %v710_v16, %v642_v21  ;;  %v711_v3 = vcombine.high %v12478_v23, %v18156_v14  ;;  %v10377_v5 = vpack.i.bf16 %v12692_v57, %v12689_v53  ;;  %v12719_v4 = vrot.slane %v3623_v47, %v11969_v26 }
 0x1bb   :  { %18157 = vst [vmem:[#allocation40_spill] sm:$0xff] %v12710_v36  ;;  %v3537_v54 = vrot.slane %v3523_v8, %v11957_v17  ;;  %v3638_v46 = vcombine.low %v3605_v52, %v3621_v45  ;;  %v1419_v20 = vcombine.low %v12357_v38, %v12340_v15  ;;  %v2086_v23 = vcombine.low %v12535_v28, %v12502_v35 }
 0x1bc   :  { %10413 = vrot.lane.b32.xlu0 %v10412_v41, %s11761_s12  ;;  %v2154_v16 = vcombine.low %v12538_v37, %v12505_v50  ;;  %v12733_v47 = vrot.slane %v3555_v55, %v11969_v26  ;;  %v1351_v21 = vcombine.low %v12317_v0, %v12300_v63  ;;  %v857_v41 = vcombine.high %v12281_v56, %v12337_v9 }
 0x1bd   :  { %10378 = vrot.lane.b32.xlu1 %v10377_v5, %s11758_s10  ;;  %v3570_v8 = vcombine.low %v3537_v54, %v3553_v2  ;;  %v10417_v38 = vpack.i.bf16 %v711_v3, %v643_v34  ;;  %v712_v35 = vcombine.high %v12525_v48, %v18156_v14  ;;  %v3639_v50 = vcombine.high %v3605_v52, %v3621_v45 }
 0x1be   :  { %v823_v49 = vpop.permute.xlu0 %822  ;;  %v12739_v15 = vpop.permute.xlu1 %3758  ;;  %v10397_v28 = vpack.i.bf16 %v12719_v4, %v12733_v47  ;;  %v12746_v37 = vrot.slane %v3638_v46, %v11969_v26  ;;  %v644_v63 = vcombine.high %v12405_v24, %v18156_v14  ;;  %v3571_v0 = vcombine.high %v3537_v54, %v3553_v2  ;;  %v18164_v46 = vld [vmem:[#allocation22_spill] sm:$0xff] }
 0x1bf   :  { %18158 = vst [vmem:[#allocation41_spill] sm:$0xff] %v12739_v15  ;;  %v841_v56 = vcombine.high %v12267_v51, %v12307_v10  ;;  %v12754_v9 = vrot.slane %v1419_v20, %v11969_v26  ;;  %v12757_v48 = vrot.slane %v2086_v23, %v11969_v26  ;;  %v12760_v5 = vrot.slane %v2154_v16, %v11969_v26 }
 0x1c0   :  { %10418 = vrot.lane.b32.xlu0 %v10417_v38, %s11760_s11  ;;  %v12764_v45 = vrot.slane %v3570_v8, %v11969_v26  ;;  %v645_v24 = vcombine.high %v12421_v59, %v18156_v14  ;;  %v713_v51 = vcombine.high %v12569_v43, %v18156_v14  ;;  %v12771_v10 = vrot.slane %v1351_v21, %v11969_v26 }
 0x1c1   :  { %18159 = vst [vmem:[#allocation42_spill] sm:$0xff] %v12754_v9  ;;  %18160 = vst [vmem:[#allocation43_spill] sm:$0xff] %v12757_v48  ;;  %10398 = vrot.lane.b32.xlu1 %v10397_v28, %s11759_s0  ;;  %v871_v55 = vrot.slane %v857_v41, %v11957_v17  ;;  %v10422_v34 = vpack.i.bf16 %v712_v35, %v644_v63  ;;  %v12777_v3 = vrot.slane %v3639_v50, %v11969_v26  ;;  %v18165_v50 = vld [vmem:[#allocation15_spill] sm:$0xff]  ;;  %v18166_v28 = vld [vmem:[#allocation16_spill] sm:$0xff] }
 0x1c2   :  { %18161 = vst [vmem:[#allocation44_spill] sm:$0xff] %v12760_v5  ;;  %18162 = vst [vmem:[#allocation45_spill] sm:$0xff] %v12771_v10  ;;  %v827_v2 = vpop.permute.xlu0 %826  ;;  %v12774_v52 = vpop.permute.xlu1 %3762  ;;  %v12781_v54 = vcombine.high %v12365_v62, %v18156_v14  ;;  %v10402_v59 = vpack.i.bf16 %v12746_v37, %v12764_v45  ;;  %v12786_v43 = vrot.slane %v3571_v0, %v11969_v26 }
 0x1c3   :  { %18163 = vst [vmem:[#allocation46_spill] sm:$0xff] %v12774_v52  ;;  %v12790_v20 = vcombine.high %v18164_v46, %v18156_v14  ;;  %v12794_v23 = vcombine.high %v12368_v1, %v18156_v14  ;;  %v855_v16 = vrot.slane %v841_v56, %v11957_v17  ;;  %v1451_v62 = vcombine.high %v12754_v9, %v18156_v14  ;;  %v18192_v9 = vld [vmem:[#allocation12_spill] sm:$0xff] }
 0x1c4   :  { %10423 = vrot.lane.b32.xlu0 %v10422_v34, %s11755_s7  ;;  %v2118_v8 = vcombine.high %v12757_v48, %v18156_v14  ;;  %v2186_v21 = vcombine.high %v12760_v5, %v18156_v14  ;;  %v908_v41 = vcombine.low %v12708_v33, %v827_v2  ;;  %v909_v38 = vcombine.high %v12708_v33, %v827_v2 }
 0x1c5   :  { %10403 = vrot.lane.b32.xlu1 %v10402_v59, %s11757_s9  ;;  %v10427_v1 = vpack.i.bf16 %v713_v51, %v645_v24  ;;  %v1383_v35 = vcombine.high %v12771_v10, %v18156_v14  ;;  %v873_v63 = vcombine.high %v18166_v28, %v18165_v50  ;;  %v888_v0 = vcombine.low %v855_v16, %v871_v55 }
 0x1c6   :  { %v831_v56 = vpop.permute.xlu0 %830  ;;  %v12811_v34 = vpop.permute.xlu1 %3766  ;;  %v10407_v46 = vpack.i.bf16 %v12777_v3, %v12786_v43  ;;  %v2119_v15 = vcombine.high %v12598_v11, %v18156_v14  ;;  %v10437_v24 = vpack.i.bf16 %v12790_v20, %v12781_v54  ;;  %v2187_v51 = vcombine.high %v12601_v60, %v18156_v14  ;;  %v18168_v20 = vld [vmem:[#allocation25_spill] sm:$0xff] }
 0x1c7   :  { %18167 = vst [vmem:[#allocation22_spill] sm:$0xff] %v12811_v34  ;;  %v924_v33 = vcombine.low %v823_v49, %v831_v56  ;;  %v925_v2 = vcombine.high %v823_v49, %v831_v56  ;;  %v889_v59 = vcombine.high %v855_v16, %v871_v55  ;;  %v10432_v36 = vpack.i.bf16 %v1451_v62, %v1383_v35 }
 0x1c8   :  { %10428 = vrot.lane.b32.xlu0 %v10427_v1, %s11756_s8  ;;  %v10452_v52 = vpack.i.bf16 %v2186_v21, %v2118_v8  ;;  %v12824_v34 = vcombine.high %v12471_v58, %v18156_v14  ;;  %v12827_v10 = vrot.slane %v908_v41, %v11957_v17  ;;  %v923_v11 = vrot.slane %v909_v38, %v11957_v17 }
 0x1c9   :  { %v12831_v49 = vrot.slane %v924_v33, %v11957_v17  ;;  %v939_v54 = vrot.slane %v925_v2, %v11957_v17  ;;  %10408 = vrot.lane.b32.xlu1 %v10407_v46, %s11758_s10  ;;  %v2820_v58 = vcombine.low %v12432_v6, %v12475_v40  ;;  %v2888_v16 = vcombine.low %v18168_v20, %v12458_v30 }
 0x1ca   :  { %v12835_v60 = vpop.permute.xlu0 %1808  ;;  %v12837_v55 = vpop.permute.xlu1 %1074  ;;  %v12844_v62 = vrot.slane %v873_v63, %v11969_v26  ;;  %v12847_v8 = vrot.slane %v888_v0, %v11969_v26  ;;  %v10457_v6 = vpack.i.bf16 %v2187_v51, %v2119_v15  ;;  %v2120_v30 = vcombine.high %v12646_v22, %v18156_v14 }
 0x1cb   :  { %v941_v41 = vcombine.high %v12827_v10, %v12831_v49  ;;  %v956_v38 = vcombine.low %v923_v11, %v939_v54  ;;  %v957_v1 = vcombine.high %v923_v11, %v939_v54  ;;  %v2188_v40 = vcombine.high %v12649_v19, %v18156_v14 }
 0x1cc   :  { %10453 = vrot.lane.b32.xlu0 %v10452_v52, %s11761_s12  ;;  %v12859_v35 = vrot.slane %v889_v59, %v11969_v26  ;;  %v3554_v63 = vcombine.low %v12659_v25, %v12665_v44  ;;  %v1454_v19 = vcombine.high %v12518_v61, %v18156_v14  ;;  %v2189_v25 = vcombine.high %v12692_v57, %v18156_v14  ;;  %v18177_v59 = vld [vmem:[#allocation19_spill] sm:$0xff] }
 0x1cd   :  { %10433 = vrot.lane.b32.xlu1 %v10432_v36, %s11761_s12  ;;  %v12865_v0 = vrot.slane %v941_v41, %v11969_v26  ;;  %v12868_v52 = vrot.slane %v956_v38, %v11969_v26  ;;  %v12871_v15 = vrot.slane %v957_v1, %v11969_v26  ;;  %v2121_v36 = vcombine.high %v12689_v53, %v18156_v14 }
 0x1ce   :  { %v1813_v22 = vpop.permute.xlu0 %1812  ;;  %v12873_v56 = vpop.permute.xlu1 %1078  ;;  %v3622_v44 = vcombine.low %v12624_v29, %v12627_v39  ;;  %v12884_v46 = vrot.slane %v2820_v58, %v11969_v26  ;;  %v12887_v33 = vrot.slane %v2888_v16, %v11969_v26  ;;  %v12891_v2 = vcombine.high %v12844_v62, %v18156_v14 }
 0x1cf   :  { %v12895_v61 = vcombine.high %v12847_v8, %v18156_v14  ;;  %v12900_v53 = vcombine.high %v12865_v0, %v18156_v14  ;;  %v12904_v29 = vcombine.high %v12868_v52, %v18156_v14  ;;  %v12908_v39 = vcombine.high %v12859_v35, %v18156_v14 }
 0x1d0   :  { %18169 = vst [vmem:[#allocation15_spill] sm:$0xff] %v12884_v46  ;;  %18170 = vst [vmem:[#allocation16_spill] sm:$0xff] %v12887_v33  ;;  %10458 = vrot.lane.b32.xlu0 %v10457_v6, %s11760_s11  ;;  %v12912_v57 = vcombine.high %v12871_v15, %v18156_v14  ;;  %v10462_v51 = vpack.i.bf16 %v2188_v40, %v2120_v30  ;;  %v1386_v11 = vcombine.high %v18177_v59, %v18156_v14  ;;  %v18180_v40 = vld [vmem:[#allocation32_spill] sm:$0xff]  ;;  %v18182_v59 = vld [vmem:[#allocation21_spill] sm:$0xff] }
 0x1d1   :  { %18171 = vst [vmem:[#allocation25_spill] sm:$0xff] %v12891_v2  ;;  %18172 = vst [vmem:[#allocation47_spill] sm:$0xff] %v12895_v61  ;;  %10438 = vrot.lane.b32.xlu1 %v10437_v24, %s11760_s11  ;;  %v12918_v54 = vrot.slane %v3554_v63, %v11969_v26  ;;  %v12922_v58 = vcombine.high %v12545_v42, %v18156_v14  ;;  %v12927_v41 = vrot.slane %v3622_v44, %v11969_v26  ;;  %v18181_v44 = vld [vmem:[#allocation27_spill] sm:$0xff]  ;;  %v18193_v61 = vld [vmem:[#allocation13_spill] sm:$0xff] }
 0x1d2   :  { %18173 = vst [vmem:[#allocation48_spill] sm:$0xff] %v12900_v53  ;;  %18174 = vst [vmem:[#allocation49_spill] sm:$0xff] %v12904_v29  ;;  %v1817_v20 = vpop.permute.xlu0 %1816  ;;  %v12924_v16 = vpop.permute.xlu1 %1082  ;;  %v10442_v6 = vpack.i.bf16 %v12824_v34, %v12794_v23  ;;  %v10447_v42 = vpack.i.bf16 %v1454_v19, %v1386_v11  ;;  %v10467_v30 = vpack.i.bf16 %v2189_v25, %v2121_v36  ;;  %v18184_v11 = vld [vmem:[#allocation18_spill] sm:$0xff]  ;;  %v18194_v29 = vld [vmem:[#allocation11_spill] sm:$0xff] }
 0x1d3   :  { %18175 = vst [vmem:[#allocation50_spill] sm:$0xff] %v12908_v39  ;;  %18176 = vst [vmem:[#allocation51_spill] sm:$0xff] %v12912_v57  ;;  %v12939_v63 = vcombine.high %v18180_v40, %v18156_v14  ;;  %v1847_v21 = vcombine.high %v18182_v59, %v18181_v44  ;;  %v2852_v38 = vcombine.high %v12884_v46, %v18156_v14  ;;  %v18187_v46 = vld [vmem:[#allocation28_spill] sm:$0xff] }
 0x1d4   :  { %18178 = vst [vmem:[#allocation19_spill] sm:$0xff] %v12918_v54  ;;  %18179 = vst [vmem:[#allocation52_spill] sm:$0xff] %v12927_v41  ;;  %10463 = vrot.lane.b32.xlu0 %v10462_v51, %s11755_s7  ;;  %v2920_v1 = vcombine.high %v12887_v33, %v18156_v14  ;;  %v3587_v23 = vcombine.high %v12733_v47, %v18156_v14  ;;  %v1898_v34 = vcombine.low %v12835_v60, %v1817_v20  ;;  %v18183_v51 = vld [vmem:[#allocation24_spill] sm:$0xff]  ;;  %v18188_v33 = vld [vmem:[#allocation29_spill] sm:$0xff] }
 0x1d5   :  { %v1899_v19 = vcombine.high %v12835_v60, %v1817_v20  ;;  %10443 = vrot.lane.b32.xlu1 %v10442_v6, %s11755_s7  ;;  %v10477_v36 = vpack.i.bf16 %v12922_v58, %v12939_v63  ;;  %v3655_v25 = vcombine.high %v12719_v4, %v18156_v14  ;;  %v1831_v40 = vcombine.high %v18184_v11, %v18183_v51  ;;  %v18185_v60 = vld [vmem:[#allocation35_spill] sm:$0xff]  ;;  %v18186_v63 = vld [vmem:[#allocation33_spill] sm:$0xff] }
 0x1d6   :  { %v1821_v44 = vpop.permute.xlu0 %1820  ;;  %v1087_v59 = vpop.permute.xlu1 %1086  ;;  %v3586_v47 = vcombine.high %v12918_v54, %v18156_v14  ;;  %v3654_v24 = vcombine.high %v12927_v41, %v18156_v14  ;;  %v12965_v20 = vcombine.high %v18185_v60, %v18156_v14  ;;  %v12969_v4 = vcombine.high %v18186_v63, %v18156_v14 }
 0x1d7   :  { %v1914_v6 = vcombine.low %v1813_v22, %v1821_v44  ;;  %v1915_v58 = vcombine.high %v1813_v22, %v1821_v44  ;;  %v3588_v51 = vcombine.high %v12764_v45, %v18156_v14  ;;  %v1861_v11 = vrot.slane %v1847_v21, %v11957_v17  ;;  %v18191_v21 = vld [vmem:[#allocation14_spill] sm:$0xff] }
 0x1d8   :  { %v1863_v54 = vcombine.high %v18188_v33, %v18187_v46  ;;  %10468 = vrot.lane.b32.xlu0 %v10467_v30, %s11756_s8  ;;  %v10472_v41 = vpack.i.bf16 %v2920_v1, %v2852_v38  ;;  %v3656_v60 = vcombine.high %v12746_v37, %v18156_v14  ;;  %v12980_v22 = vrot.slane %v1898_v34, %v11957_v17 }
 0x1d9   :  { %v1913_v44 = vrot.slane %v1899_v19, %v11957_v17  ;;  %v12984_v63 = vrot.slane %v1914_v6, %v11957_v17  ;;  %v1929_v45 = vrot.slane %v1915_v58, %v11957_v17  ;;  %10448 = vrot.lane.b32.xlu1 %v10447_v42, %s11756_s8  ;;  %v1112_v48 = vcombine.low %v18192_v9, %v18191_v21 }
 0x1da   :  { %18189 = vst [vmem:[#allocation32_spill] sm:$0xff] %v12980_v22  ;;  %v1845_v38 = vrot.slane %v1831_v40, %v11957_v17  ;;  %v1180_v1 = vcombine.low %v12873_v56, %v1087_v59  ;;  %v12992_v37 = vpop.permute.xlu0 %2287  ;;  %v12994_v30 = vpop.permute.xlu1 %1553  ;;  %v10492_v34 = vpack.i.bf16 %v3654_v24, %v3586_v47  ;;  %v10497_v40 = vpack.i.bf16 %v3655_v25, %v3587_v23 }
 0x1db   :  { %18190 = vst [vmem:[#allocation27_spill] sm:$0xff] %v12984_v63  ;;  %v1931_v6 = vcombine.high %v12980_v22, %v12984_v63  ;;  %v1946_v58 = vcombine.low %v1913_v44, %v1929_v45  ;;  %v1947_v42 = vcombine.high %v1913_v44, %v1929_v45  ;;  %v10482_v57 = vpack.i.bf16 %v12969_v4, %v12965_v20 }
 0x1dc   :  { %v1878_v5 = vcombine.low %v1845_v38, %v1861_v11  ;;  %v1879_v39 = vcombine.high %v1845_v38, %v1861_v11  ;;  %10493 = vrot.lane.b32.xlu0 %v10492_v34, %s11761_s12  ;;  %v1096_v2 = vcombine.low %v18194_v29, %v18193_v61  ;;  %v1164_v24 = vcombine.low %v12837_v55, %v12924_v16 }
 0x1dd   :  { %10473 = vrot.lane.b32.xlu1 %v10472_v41, %s11761_s12  ;;  %v10502_v47 = vpack.i.bf16 %v3656_v60, %v3588_v51  ;;  %v13009_v19 = vrot.slane %v1863_v54, %v11969_v26  ;;  %v1181_v11 = vcombine.high %v12873_v56, %v1087_v59  ;;  %v13017_v25 = vrot.slane %v1931_v6, %v11969_v26  ;;  %v18202_v6 = vld [vmem:[#allocation20_spill] sm:$0xff] }
 0x1de   :  { %v13012_v44 = vpop.permute.xlu0 %2291  ;;  %v13014_v23 = vpop.permute.xlu1 %1557  ;;  %v13020_v20 = vrot.slane %v1946_v58, %v11969_v26  ;;  %v13023_v4 = vrot.slane %v1947_v42, %v11969_v26  ;;  %v1113_v41 = vcombine.high %v18192_v9, %v18191_v21  ;;  %v13028_v54 = vrot.slane %v1112_v48, %v11957_v17 }
 0x1df   :  { %v13031_v56 = vrot.slane %v1180_v1, %v11957_v17  ;;  %v2923_v59 = vcombine.high %v12640_v27, %v18156_v14  ;;  %v1165_v51 = vcombine.high %v12837_v55, %v12924_v16  ;;  %v3657_v60 = vcombine.high %v12777_v3, %v18156_v14 }
 0x1e0   :  { %10498 = vrot.lane.b32.xlu0 %v10497_v40, %s11760_s11  ;;  %v13041_v45 = vrot.slane %v1878_v5, %v11969_v26  ;;  %v13044_v9 = vrot.slane %v1879_v39, %v11969_v26  ;;  %v1097_v48 = vcombine.high %v18194_v29, %v18193_v61  ;;  %v13049_v21 = vrot.slane %v1096_v2, %v11957_v17 }
 0x1e1   :  { %v13052_v27 = vrot.slane %v1164_v24, %v11957_v17  ;;  %10478 = vrot.lane.b32.xlu1 %v10477_v36, %s11760_s11  ;;  %v13057_v3 = vcombine.high %v13009_v19, %v18156_v14  ;;  %v13060_v5 = vrot.slane %v1181_v11, %v11957_v17  ;;  %v13068_v2 = vcombine.high %v13017_v25, %v18156_v14 }
 0x1e2   :  { %v13062_v55 = vpop.permute.xlu0 %2295  ;;  %v13064_v39 = vpop.permute.xlu1 %1561  ;;  %v13072_v61 = vcombine.high %v13020_v20, %v18156_v14  ;;  %v13076_v29 = vcombine.high %v13023_v4, %v18156_v14  ;;  %v13079_v16 = vrot.slane %v1113_v41, %v11957_v17  ;;  %v1129_v36 = vcombine.high %v13049_v21, %v13028_v54 }
 0x1e3   :  { %18195 = vst [vmem:[#allocation21_spill] sm:$0xff] %v13057_v3  ;;  %18196 = vst [vmem:[#allocation24_spill] sm:$0xff] %v13068_v2  ;;  %v1197_v38 = vcombine.high %v13052_v27, %v13031_v56  ;;  %v3589_v1 = vcombine.high %v12786_v43, %v18156_v14  ;;  %v1179_v34 = vrot.slane %v1165_v51, %v11957_v17 }
 0x1e4   :  { %18197 = vst [vmem:[#allocation18_spill] sm:$0xff] %v13072_v61  ;;  %18198 = vst [vmem:[#allocation35_spill] sm:$0xff] %v13076_v29  ;;  %10503 = vrot.lane.b32.xlu0 %v10502_v47, %s11755_s7  ;;  %v13093_v58 = vcombine.high %v13041_v45, %v18156_v14  ;;  %v13097_v42 = vcombine.high %v13044_v9, %v18156_v14  ;;  %v2377_v40 = vcombine.low %v12992_v37, %v13062_v55 }
 0x1e5   :  { %10483 = vrot.lane.b32.xlu1 %v10482_v57, %s11755_s7  ;;  %v2855_v43 = vcombine.high %v12653_v7, %v18156_v14  ;;  %v10507_v24 = vpack.i.bf16 %v3657_v60, %v3589_v1  ;;  %v1111_v47 = vrot.slane %v1097_v48, %v11957_v17  ;;  %v1212_v11 = vcombine.low %v1179_v34, %v13060_v5  ;;  %v18201_v1 = vld [vmem:[#allocation26_spill] sm:$0xff] }
 0x1e6   :  { %18199 = vst [vmem:[#allocation33_spill] sm:$0xff] %v13093_v58  ;;  %18200 = vst [vmem:[#allocation29_spill] sm:$0xff] %v13097_v42  ;;  %v2300_v41 = vpop.permute.xlu0 %2299  ;;  %v1566_v51 = vpop.permute.xlu1 %1565  ;;  %v13113_v7 = vrot.slane %v1197_v38, %v11969_v26  ;;  %v13118_v48 = vrot.slane %v1129_v36, %v11969_v26  ;;  %v1591_v58 = vcombine.low %v18202_v6, %v18201_v1  ;;  %v18204_v38 = vld [vmem:[#allocation23_spill] sm:$0xff] }
 0x1e7   :  { %v2393_v2 = vcombine.low %v13012_v44, %v2300_v41  ;;  %v1659_v57 = vcombine.low %v13014_v23, %v1566_v51  ;;  %v10487_v53 = vpack.i.bf16 %v2923_v59, %v2855_v43  ;;  %v1144_v60 = vcombine.low %v1111_v47, %v13079_v16  ;;  %v18205_v43 = vld [vmem:[#allocation17_spill] sm:$0xff] }
 0x1e8   :  { %10508 = vrot.lane.b32.xlu0 %v10507_v24, %s11756_s8  ;;  %v13123_v3 = vrot.slane %v2377_v40, %v11957_v17  ;;  %v1643_v42 = vcombine.low %v12994_v30, %v13064_v39  ;;  %v1575_v24 = vcombine.low %v18205_v43, %v18204_v38  ;;  %v1213_v36 = vcombine.high %v1179_v34, %v13060_v5 }
 0x1e9   :  { %v13128_v59 = vrot.slane %v2393_v2, %v11957_v17  ;;  %10488 = vrot.lane.b32.xlu1 %v10487_v53, %s11756_s8  ;;  %v10512_v40 = vpack.i.bf16 %v12865_v0, %v12844_v62  ;;  %v13141_v63 = vrot.slane %v1212_v11, %v11969_v26  ;;  %v1660_v53 = vcombine.high %v13014_v23, %v1566_v51 }
 0x1ea   :  { %v13134_v29 = vpop.permute.xlu0 %2541  ;;  %v13136_v61 = vpop.permute.xlu1 %2285  ;;  %v13147_v22 = vrot.slane %v1659_v57, %v11957_v17  ;;  %v10527_v5 = vpack.i.bf16 %v13113_v7, %v13118_v48  ;;  %v1145_v34 = vcombine.high %v1111_v47, %v13079_v16  ;;  %v1592_v46 = vcombine.high %v18202_v6, %v18201_v1 }
 0x1eb   :  { %18203 = vst [vmem:[#allocation14_spill] sm:$0xff] %v13128_v59  ;;  %v13156_v62 = vrot.slane %v1591_v58, %v11957_v17  ;;  %v1644_v0 = vcombine.high %v12994_v30, %v13064_v39  ;;  %v13161_v23 = vrot.slane %v1643_v42, %v11957_v17  ;;  %v13165_v11 = vrot.slane %v1144_v60, %v11969_v26 }
 0x1ec   :  { %10513 = vrot.lane.b32.xlu0 %v10512_v40, %s11759_s0  ;;  %v1576_v16 = vcombine.high %v18205_v43, %v18204_v38  ;;  %v13170_v6 = vrot.slane %v1575_v24, %v11957_v17  ;;  %v10517_v30 = vpack.i.bf16 %v12868_v52, %v12847_v8  ;;  %v1674_v39 = vrot.slane %v1660_v53, %v11957_v17 }
 0x1ed   :  { %10528 = vrot.lane.b32.xlu1 %v10527_v5, %s11759_s0  ;;  %v1676_v42 = vcombine.high %v13161_v23, %v13147_v22  ;;  %v10532_v51 = vpack.i.bf16 %v13141_v63, %v13165_v11  ;;  %v13182_v57 = vrot.slane %v1213_v36, %v11969_v26  ;;  %v1606_v60 = vrot.slane %v1592_v46, %v11957_v17 }
 0x1ee   :  { %v13172_v47 = vpop.permute.xlu0 %2545  ;;  %v2290_v58 = vpop.permute.xlu1 %2289  ;;  %v1608_v1 = vcombine.high %v13170_v6, %v13156_v62  ;;  %v1658_v8 = vrot.slane %v1644_v0, %v11957_v17  ;;  %v2394_v52 = vcombine.high %v13012_v44, %v2300_v41  ;;  %v13192_v38 = vrot.slane %v1145_v34, %v11969_v26 }
 0x1ef   :  { %v1590_v43 = vrot.slane %v1576_v16, %v11957_v17  ;;  %v2378_v24 = vcombine.high %v12992_v37, %v13062_v55  ;;  %v10522_v40 = vpack.i.bf16 %v12871_v15, %v12859_v35  ;;  %v13204_v41 = vrot.slane %v1676_v42, %v11969_v26 }
 0x1f0   :  { %10518 = vrot.lane.b32.xlu0 %v10517_v30, %s11757_s9  ;;  %v1691_v53 = vcombine.low %v1658_v8, %v1674_v39  ;;  %v10537_v44 = vpack.i.bf16 %v13182_v57, %v13192_v38  ;;  %v2408_v34 = vrot.slane %v2394_v52, %v11957_v17  ;;  %v13210_v37 = vrot.slane %v1608_v1, %v11969_v26 }
 0x1f1   :  { %10533 = vrot.lane.b32.xlu1 %v10532_v51, %s11757_s9  ;;  %v1623_v5 = vcombine.low %v1590_v43, %v1606_v60  ;;  %v10557_v35 = vpack.i.bf16 %v13017_v25, %v13009_v19  ;;  %v2392_v15 = vrot.slane %v2378_v24, %v11957_v17  ;;  %v1692_v55 = vcombine.high %v1658_v8, %v1674_v39 }
 0x1f2   :  { %v13197_v46 = vpop.permute.xlu0 %2549  ;;  %v2294_v36 = vpop.permute.xlu1 %2293  ;;  %v13222_v1 = vrot.slane %v1691_v53, %v11969_v26  ;;  %v2410_v25 = vcombine.high %v13123_v3, %v13128_v59  ;;  %v10562_v53 = vpack.i.bf16 %v13020_v20, %v13041_v45  ;;  %v10567_v45 = vpack.i.bf16 %v13023_v4, %v13044_v9 }
 0x1f3   :  { %v2309_v0 = vcombine.low %v13136_v61, %v2294_v36  ;;  %v2310_v16 = vcombine.high %v13136_v61, %v2294_v36  ;;  %v13226_v19 = vrot.slane %v1623_v5, %v11969_v26  ;;  %v2425_v61 = vcombine.low %v2392_v15, %v2408_v34 }
 0x1f4   :  { %10523 = vrot.lane.b32.xlu0 %v10522_v40, %s11758_s10  ;;  %v10542_v40 = vpack.i.bf16 %v13204_v41, %v13210_v37  ;;  %v2426_v8 = vcombine.high %v2392_v15, %v2408_v34  ;;  %v3316_v4 = vcombine.high %v12593_v31, %v12677_v32 }
 0x1f5   :  { %10538 = vrot.lane.b32.xlu1 %v10537_v44, %s11758_s10  ;;  %v1624_v44 = vcombine.high %v1590_v43, %v1606_v60  ;;  %v13236_v24 = vrot.slane %v2309_v0, %v11957_v17  ;;  %v2324_v60 = vrot.slane %v2310_v16, %v11957_v17  ;;  %v10547_v5 = vpack.i.bf16 %v13222_v1, %v13226_v19 }
 0x1f6   :  { %v13217_v30 = vpop.permute.xlu0 %2553  ;;  %v2298_v42 = vpop.permute.xlu1 %2297  ;;  %v13305_v59 = vrot.slane %v3316_v4, %v11957_v17 }
 0x1f7   :  { %v2325_v51 = vcombine.low %v2290_v58, %v2298_v42  ;;  %v2326_v52 = vcombine.high %v2290_v58, %v2298_v42  ;;  %18207 = vst [vmem:[#allocation13_spill] sm:$0xff] %v13236_v24  ;;  %v13255_v20 = vrot.slane %v1624_v44, %v11969_v26  ;;  %v2433_v42 = vrot.slane %v2425_v61, %v11969_v26 }
 0x1f8   :  { %10558 = vrot.lane.b32.xlu0 %v10557_v35, %s11759_s0  ;;  %v13246_v35 = vrot.slane %v1692_v55, %v11969_v26  ;;  %v2424_v55 = vrot.slane %v2410_v25, %v11969_v26 }
 0x1f9   :  { %v13231_v39 = vrot.slane %v2325_v51, %v11957_v17  ;;  %v2340_v58 = vrot.slane %v2326_v52, %v11957_v17  ;;  %10543 = vrot.lane.b32.xlu1 %v10542_v40, %s11759_s0 }
 0x1fa   :  { %v3278_v43 = vpop.permute.xlu0 %3277  ;;  %v13239_v36 = vpop.permute.xlu1 %2543  ;;  %18208 = vst [vmem:[#allocation11_spill] sm:$0xff] %v13246_v35  ;;  %v10552_v44 = vpack.i.bf16 %v13246_v35, %v13255_v20  ;;  %v13275_v25 = vcombine.high %v2424_v55, %v18156_v14 }
 0x1fb   :  { %18206 = vst [vmem:[#allocation12_spill] sm:$0xff] %v13231_v39  ;;  %v2342_v15 = vcombine.high %v13236_v24, %v13231_v39  ;;  %v2357_v0 = vcombine.low %v2324_v60, %v2340_v58  ;;  %v2358_v16 = vcombine.high %v2324_v60, %v2340_v58  ;;  %v18214_v24 = vld [vmem:[#allocation31_spill] sm:$0xff] }
 0x1fc   :  { %10563 = vrot.lane.b32.xlu0 %v10562_v53, %s11757_s9  ;;  %v2440_v53 = vrot.slane %v2426_v8, %v11969_v26  ;;  %v3300_v35 = vcombine.high %v18214_v24, %v12633_v13 }
 0x1fd   :  { %10548 = vrot.lane.b32.xlu1 %v10547_v5, %s11757_s9  ;;  %v2356_v40 = vrot.slane %v2342_v15, %v11969_v26  ;;  %v2365_v58 = vrot.slane %v2357_v0, %v11969_v26  ;;  %v2372_v60 = vrot.slane %v2358_v16, %v11969_v26  ;;  %v2581_v5 = vcombine.low %v13172_v47, %v13217_v30 }
 0x1fe   :  { %v3282_v51 = vpop.permute.xlu0 %3281  ;;  %v2548_v52 = vpop.permute.xlu1 %2547  ;;  %v13286_v0 = vcombine.high %v2433_v42, %v18156_v14  ;;  %v13289_v16 = vcombine.high %v2440_v53, %v18156_v14 }
 0x1ff   :  { %v13272_v9 = vcombine.high %v2356_v40, %v18156_v14  ;;  %v13278_v61 = vcombine.high %v2365_v58, %v18156_v14  ;;  %v13281_v8 = vcombine.high %v2372_v60, %v18156_v14  ;;  %v10572_v15 = vpack.i.bf16 %v2424_v55, %v2356_v40 }
 0x200   :  { %10568 = vrot.lane.b32.xlu0 %v10567_v45, %s11758_s10  ;;  %18212 = vst [vmem:[#allocation17_spill] sm:$0xff] %v13286_v0  ;;  %18213 = vst [vmem:[#allocation53_spill] sm:$0xff] %v13289_v16  ;;  %v2565_v45 = vcombine.low %v13134_v29, %v13197_v46  ;;  %v10577_v39 = vpack.i.bf16 %v2433_v42, %v2365_v58 }
 0x201   :  { %10553 = vrot.lane.b32.xlu1 %v10552_v44, %s11758_s10  ;;  %18209 = vst [vmem:[#allocation26_spill] sm:$0xff] %v13272_v9  ;;  %18210 = vst [vmem:[#allocation20_spill] sm:$0xff] %v13278_v61  ;;  %v2582_v44 = vcombine.high %v13172_v47, %v13217_v30  ;;  %v3332_v47 = vcombine.high %v12706_v12, %v12698_v18  ;;  %v2566_v30 = vcombine.high %v13134_v29, %v13197_v46  ;;  %v18219_v9 = vld [vmem:[#allocation39_spill] sm:$0xff] }
 0x202   :  { %18211 = vst [vmem:[#allocation23_spill] sm:$0xff] %v13281_v8  ;;  %v3286_v31 = vpop.permute.xlu0 %3285  ;;  %v2552_v32 = vpop.permute.xlu1 %2551  ;;  %v13317_v16 = vrot.slane %v2565_v45, %v11957_v17  ;;  %v3314_v45 = vrot.slane %v3300_v35, %v11957_v17 }
 0x203   :  { %v3367_v34 = vcombine.low %v3278_v43, %v3286_v31  ;;  %v3368_v2 = vcombine.high %v3278_v43, %v3286_v31  ;;  %v13312_v43 = vrot.slane %v2581_v5, %v11957_v17  ;;  %v2633_v31 = vcombine.low %v13239_v36, %v2552_v32 }
 0x204   :  { %10573 = vrot.lane.b32.xlu0 %v10572_v15, %s11759_s0  ;;  %v2634_v15 = vcombine.high %v13239_v36, %v2552_v32  ;;  %v13320_v61 = vrot.slane %v2582_v44, %v11957_v17  ;;  %v10582_v32 = vpack.i.bf16 %v2440_v53, %v2372_v60  ;;  %v13356_v60 = vrot.slane %v3332_v47, %v11969_v26 }
 0x205   :  { %v13323_v29 = vrot.slane %v3367_v34, %v11957_v17  ;;  %v3382_v46 = vrot.slane %v3368_v2, %v11957_v17  ;;  %v2598_v58 = vcombine.high %v13317_v16, %v13312_v43  ;;  %v13338_v34 = vrot.slane %v2633_v31, %v11957_v17 }
 0x206   :  { %v3290_v40 = vpop.permute.xlu0 %3289  ;;  %v2556_v55 = vpop.permute.xlu1 %2555  ;;  %v2648_v2 = vrot.slane %v2634_v15, %v11957_v17  ;;  %18216 = vst [vmem:[#allocation54_spill] sm:$0xff] %v13356_v60 }
 0x207   :  { %v3383_v13 = vcombine.low %v3282_v51, %v3290_v40  ;;  %v3384_v24 = vcombine.high %v3282_v51, %v3290_v40  ;;  %v2649_v4 = vcombine.low %v2548_v52, %v2556_v55  ;;  %v2650_v8 = vcombine.high %v2548_v52, %v2556_v55 }
 0x208   :  { %10578 = vrot.lane.b32.xlu0 %v10577_v39, %s11757_s9  ;;  %v2580_v40 = vrot.slane %v2566_v30, %v11957_v17  ;;  %v13365_v30 = vrot.slane %v2598_v58, %v11969_v26 }
 0x209   :  { %v13328_v36 = vrot.slane %v3383_v13, %v11957_v17  ;;  %v3398_v42 = vrot.slane %v3384_v24, %v11957_v17  ;;  %v13332_v51 = vrot.slane %v2649_v4, %v11957_v17  ;;  %v2664_v52 = vrot.slane %v2650_v8, %v11957_v17 }
 0x20a   :  { %v13341_v5 = vpop.permute.xlu0 %3756  ;;  %v13343_v39 = vpop.permute.xlu1 %3021  ;;  %v3347_v13 = vcombine.low %v3314_v45, %v13305_v59  ;;  %v2613_v53 = vcombine.low %v2580_v40, %v13320_v61 }
 0x20b   :  { %18215 = vst [vmem:[#allocation31_spill] sm:$0xff] %v13341_v5  ;;  %v3400_v8 = vcombine.high %v13323_v29, %v13328_v36  ;;  %v3415_v55 = vcombine.low %v3382_v46, %v3398_v42  ;;  %v2666_v31 = vcombine.high %v13338_v34, %v13332_v51  ;;  %v2681_v15 = vcombine.low %v2648_v2, %v2664_v52 }
 0x20c   :  { %10583 = vrot.lane.b32.xlu0 %v10582_v32, %s11758_s10  ;;  %v1196_v32 = vcombine.low %v13052_v27, %v13031_v56  ;;  %v3416_v44 = vcombine.high %v3382_v46, %v3398_v42  ;;  %v2682_v0 = vcombine.high %v2648_v2, %v2664_v52  ;;  %v18220_v56 = vld [vmem:[#allocation34_spill] sm:$0xff]  ;;  %v3348_v46 = vcombine.high %v3314_v45, %v13305_v59 }
 0x20d   :  { %v13359_v35 = vrot.slane %v3400_v8, %v11969_v26  ;;  %v13368_v4 = vrot.slane %v2666_v31, %v11969_v26  ;;  %v13375_v8 = vrot.slane %v3415_v55, %v11969_v26  ;;  %v13380_v58 = vrot.slane %v2681_v15, %v11969_v26 }
 0x20e   :  { %v13362_v24 = vpop.permute.xlu0 %3760  ;;  %v3026_v5 = vpop.permute.xlu1 %3025  ;;  %v1128_v31 = vcombine.low %v13049_v21, %v13028_v54  ;;  %v3059_v27 = vcombine.low %v18220_v56, %v18219_v9  ;;  %v13389_v42 = vrot.slane %v3347_v13, %v11969_v26  ;;  %v2614_v52 = vcombine.high %v2580_v40, %v13320_v61  ;;  %v18223_v54 = vld [vmem:[#allocation36_spill] sm:$0xff]  ;;  %v18224_v21 = vld [vmem:[#allocation30_spill] sm:$0xff] }
 0x20f   :  { %18217 = vst [vmem:[#allocation55_spill] sm:$0xff] %v13362_v24  ;;  %v10617_v47 = vpack.i.bf16 %v13359_v35, %v13356_v60  ;;  %18218 = vst [vmem:[#allocation56_spill] sm:$0xff] %v13375_v8  ;;  %v10587_v24 = vpack.i.bf16 %v13368_v4, %v13365_v30  ;;  %v13396_v55 = vrot.slane %v2613_v53, %v11969_v26 }
 0x210   :  { %18221 = vst [vmem:[#allocation39_spill] sm:$0xff] %v13389_v42  ;;  %v3043_v15 = vcombine.low %v18224_v21, %v18223_v54  ;;  %v13401_v60 = vrot.slane %v1196_v32, %v11969_v26  ;;  %v10622_v45 = vpack.i.bf16 %v13375_v8, %v13389_v42  ;;  %v13406_v13 = vrot.slane %v3416_v44, %v11969_v26 }
 0x211   :  { %10618 = vrot.lane.b32.xlu0 %v10617_v47, %s11759_s0  ;;  %10588 = vrot.lane.b32.xlu1 %v10587_v24, %s11759_s0  ;;  %v10592_v61 = vpack.i.bf16 %v13380_v58, %v13396_v55  ;;  %v13411_v40 = vrot.slane %v2682_v0, %v11969_v26  ;;  %v13414_v53 = vrot.slane %v1128_v31, %v11969_v26 }
 0x212   :  { %v13393_v2 = vpop.permute.xlu0 %3764  ;;  %18225 = vst [vmem:[#allocation36_spill] sm:$0xff] %v13401_v60  ;;  %v3030_v59 = vpop.permute.xlu1 %3029  ;;  %18226 = vst [vmem:[#allocation30_spill] sm:$0xff] %v13406_v13  ;;  %v3060_v24 = vcombine.high %v18220_v56, %v18219_v9  ;;  %v13419_v32 = vrot.slane %v3059_v27, %v11957_v17  ;;  %v13423_v44 = vrot.slane %v3348_v46, %v11969_v26 }
 0x213   :  { %18222 = vst [vmem:[#allocation34_spill] sm:$0xff] %v13393_v2  ;;  %18227 = vst [vmem:[#allocation57_spill] sm:$0xff] %v13414_v53  ;;  %v3111_v47 = vcombine.low %v13343_v39, %v3030_v59  ;;  %v3112_v2 = vcombine.high %v13343_v39, %v3030_v59  ;;  %v13431_v31 = vrot.slane %v2614_v52, %v11969_v26 }
 0x214   :  { %18228 = vst [vmem:[#allocation58_spill] sm:$0xff] %v13423_v44  ;;  %v13434_v9 = vrot.slane %v3043_v15, %v11957_v17  ;;  %v10627_v27 = vpack.i.bf16 %v13406_v13, %v13423_v44  ;;  %v1228_v46 = vcombine.high %v13401_v60, %v18156_v14  ;;  %v3044_v39 = vcombine.high %v18224_v21, %v18223_v54 }
 0x215   :  { %10623 = vrot.lane.b32.xlu0 %v10622_v45, %s11757_s9  ;;  %10593 = vrot.lane.b32.xlu1 %v10592_v61, %s11757_s9  ;;  %v10597_v61 = vpack.i.bf16 %v13411_v40, %v13431_v31  ;;  %v3074_v52 = vrot.slane %v3060_v24, %v11957_v17  ;;  %v1160_v44 = vcombine.high %v13414_v53, %v18156_v14 }
 0x216   :  { %v13428_v0 = vpop.permute.xlu0 %10353  ;;  %v3034_v56 = vpop.permute.xlu1 %3033  ;;  %v3076_v15 = vcombine.high %v13434_v9, %v13419_v32  ;;  %v13451_v60 = vrot.slane %v3111_v47, %v11957_v17  ;;  %v3126_v54 = vrot.slane %v3112_v2, %v11957_v17  ;;  %v1229_v53 = vcombine.high %v13113_v7, %v18156_v14 }
 0x217   :  { %v3127_v59 = vcombine.low %v3026_v5, %v3034_v56  ;;  %v3128_v45 = vcombine.high %v3026_v5, %v3034_v56  ;;  %v3058_v47 = vrot.slane %v3044_v39, %v11957_v17  ;;  %v1675_v7 = vcombine.low %v13161_v23, %v13147_v22 }
 0x218   :  { %v13474_v42 = vrot.slane %v3076_v15, %v11969_v26  ;;  %v1607_v15 = vcombine.low %v13170_v6, %v13156_v62  ;;  %v1162_v22 = vcombine.high %v13165_v11, %v18156_v14  ;;  %v1231_v62 = vcombine.high %v13182_v57, %v18156_v14 }
 0x219   :  { %10628 = vrot.lane.b32.xlu0 %v10627_v27, %s11758_s10  ;;  %v13455_v5 = vrot.slane %v3127_v59, %v11957_v17  ;;  %v3142_v21 = vrot.slane %v3128_v45, %v11957_v17  ;;  %10598 = vrot.lane.b32.xlu1 %v10597_v61, %s11758_s10  ;;  %v10652_v27 = vpack.i.bf16 %v1228_v46, %v1160_v44 }
 0x21a   :  { %v13459_v24 = vpop.permute.xlu0 %10358  ;;  %v13461_v56 = vpop.permute.xlu1 %10338  ;;  %v1161_v59 = vcombine.high %v13118_v48, %v18156_v14  ;;  %v3091_v45 = vcombine.low %v3058_v47, %v3074_v52  ;;  %v3092_v23 = vcombine.high %v3058_v47, %v3074_v52  ;;  %v18229_v11 = vcombine.low %v12827_v10, %v12831_v49 }
 0x21b   :  { %v3144_v2 = vcombine.high %v13451_v60, %v13455_v5  ;;  %v3159_v13 = vcombine.low %v3126_v54, %v3142_v21  ;;  %v3160_v17 = vcombine.high %v3126_v54, %v3142_v21  ;;  %v13500_v54 = vrot.slane %v1675_v7, %v11969_v26 }
 0x21c   :  { %v10657_v39 = vpack.i.bf16 %v1229_v53, %v1161_v59  ;;  %v13510_v6 = vrot.slane %v18229_v11, %v11969_v26  ;;  %v1163_v59 = vcombine.high %v13192_v38, %v18156_v14  ;;  %v18230_v57 = vcombine.low %v18166_v28, %v18165_v50  ;;  %v18231_v28 = vld [vmem:[#allocation28_spill] sm:$0xff] }
 0x21d   :  { %10653 = vrot.lane.b32.xlu0 %v10652_v27, %s11761_s12  ;;  %v13477_v44 = vrot.slane %v3144_v2, %v11969_v26  ;;  %v1230_v27 = vcombine.high %v13141_v63, %v18156_v14  ;;  %v13488_v8 = vrot.slane %v3159_v13, %v11969_v26  ;;  %v3099_v63 = vrot.slane %v3091_v45, %v11969_v26 }
 0x21e   :  { %v13471_v61 = vpop.permute.xlu0 %10363  ;;  %v13481_v46 = vpop.permute.xlu1 %10343  ;;  %v13514_v47 = vrot.slane %v3160_v17, %v11969_v26  ;;  %v13517_v2 = vrot.slane %v1607_v15, %v11969_v26  ;;  %v13526_v10 = vrot.slane %v18230_v57, %v11969_v26  ;;  %v3106_v17 = vrot.slane %v3092_v23, %v11969_v26 }
 0x21f   :  { %v10602_v48 = vpack.i.bf16 %v13477_v44, %v13474_v42  ;;  %v10662_v21 = vpack.i.bf16 %v1230_v27, %v1162_v22  ;;  %v10607_v52 = vpack.i.bf16 %v13488_v8, %v3099_v63  ;;  %v10667_v7 = vpack.i.bf16 %v1231_v62, %v1163_v59 }
 0x220   :  { %v3075_v38 = vcombine.low %v13434_v9, %v13419_v32  ;;  %v10612_v27 = vpack.i.bf16 %v13514_v47, %v3106_v17  ;;  %v972_v50 = vcombine.high %v13510_v6, %v18156_v14  ;;  %v1639_v22 = vcombine.high %v13517_v2, %v18156_v14 }
 0x221   :  { %10658 = vrot.lane.b32.xlu0 %v10657_v39, %s11760_s11  ;;  %10603 = vrot.lane.b32.xlu1 %v10602_v48, %s11759_s0  ;;  %v1707_v39 = vcombine.high %v13500_v54, %v18156_v14  ;;  %v18232_v48 = vcombine.low %v18188_v33, %v18231_v28  ;;  %v904_v32 = vcombine.high %v13526_v10, %v18156_v14 }
 0x222   :  { %v13496_v53 = vpop.permute.xlu0 %10383  ;;  %v13502_v13 = vpop.permute.xlu1 %10348  ;;  %v1640_v33 = vcombine.high %v13210_v37, %v18156_v14  ;;  %v1708_v62 = vcombine.high %v13204_v41, %v18156_v14  ;;  %v1641_v11 = vcombine.high %v13226_v19, %v18156_v14  ;;  %v13568_v57 = vcombine.high %v13255_v20, %v18156_v14 }
 0x223   :  { %v13545_v15 = vrot.slane %v18232_v48, %v11969_v26  ;;  %v10632_v59 = vpack.i.bf16 %v972_v50, %v904_v32  ;;  %v18238_v19 = vcombine.low %v12706_v12, %v12698_v18  ;;  %v1709_v50 = vcombine.high %v13222_v1, %v18156_v14 }
 0x224   :  { %v2665_v28 = vcombine.low %v13338_v34, %v13332_v51  ;;  %v2597_v18 = vcombine.low %v13317_v16, %v13312_v43  ;;  %v13602_v1 = vcombine.high %v13474_v42, %v18156_v14  ;;  %v18239_v51 = vld [vmem:[#allocation37_spill] sm:$0xff]  ;;  %v13617_v43 = vcombine.high %v3106_v17, %v18156_v14  ;;  %v18241_v42 = vld [vmem:[#allocation14_spill] sm:$0xff] }
 0x225   :  { %10663 = vrot.lane.b32.xlu0 %v10662_v21, %s11755_s7  ;;  %10608 = vrot.lane.b32.xlu1 %v10607_v52, %s11757_s9  ;;  %18233 = vst [vmem:[#allocation28_spill] sm:$0xff] %v13545_v15  ;;  %v10672_v21 = vpack.i.bf16 %v1707_v39, %v1639_v22  ;;  %v13564_v52 = vrot.slane %v3075_v38, %v11969_v26  ;;  %v18236_v39 = vld [vmem:[#allocation27_spill] sm:$0xff] }
 0x226   :  { %v13529_v49 = vpop.permute.xlu0 %10388  ;;  %v13579_v41 = vcombine.high %v13545_v15, %v18156_v14  ;;  %v13585_v20 = vrot.slane %v18238_v19, %v11969_v26  ;;  %v18243_v19 = vld [vmem:[#allocation48_spill] sm:$0xff] }
 0x227   :  { %v13532_v45 = vpop.permute.xlu1 %10368  ;;  %18234 = vst [vmem:[#allocation59_spill] sm:$0xff] %v13564_v52  ;;  %v13598_v12 = vcombine.high %v13564_v52, %v18156_v14 }
 0x229   :  { %10668 = vrot.lane.b32.xlu0 %v10667_v7, %s11756_s8  ;;  %10613 = vrot.lane.b32.xlu1 %v10612_v27, %s11758_s10  ;;  %v18235_v7 = vld [vmem:[#allocation32_spill] sm:$0xff] }
 0x22a   :  { %v13551_v23 = vpop.permute.xlu0 %10393  ;;  %v18237_v27 = vcombine.low %v18235_v7, %v18236_v39  ;;  %v18240_v7 = vld [vmem:[#allocation38_spill] sm:$0xff]  ;;  %v10341_v39 = vunpack.i.h.bf16 %v13461_v56 }
 0x22b   :  { %v13555_v9 = vpop.permute.xlu1 %10373 }
 0x22c   :  { %v13574_v37 = vrot.slane %v18237_v27, %v11969_v26  ;;  %v10340_v27 = vunpack.i.l.bf16 %v13461_v56  ;;  %v13639_v56 = vrot.slane %v2597_v18, %v11969_v26 }
 0x22d   :  { %10673 = vrot.lane.b32.xlu0 %v10672_v21, %s11761_s12  ;;  %10633 = vrot.lane.b32.xlu1 %v10632_v59, %s11761_s12  ;;  %v10677_v21 = vpack.i.bf16 %v1708_v62, %v1640_v33  ;;  %v13605_v59 = vcombine.high %v3099_v63, %v18156_v14  ;;  %v18242_v63 = vcombine.low %v13123_v3, %v18241_v42 }
 0x22e   :  { %v10414_v38 = vpop.permute.xlu0 %10413  ;;  %v13614_v16 = vcombine.high %v13574_v37, %v18156_v14 }
 0x22f   :  { %v13592_v48 = vpop.permute.xlu1 %10378  ;;  %v10416_v22 = vunpack.i.h.bf16 %v10414_v38  ;;  %v10415_v32 = vunpack.i.l.bf16 %v10414_v38  ;;  %v13623_v62 = vrot.slane %v18242_v63, %v11969_v26  ;;  %v18244_v38 = vld [vmem:[#allocation25_spill] sm:$0xff]  ;;  %v10682_v63 = vpack.i.bf16 %v1709_v50, %v1641_v11 }
 0x230   :  { %v18250_v11 = vcombine.low %v13323_v29, %v13328_v36  ;;  %v10692_v29 = vpack.i.bf16 %v13614_v16, %v13579_v41  ;;  %v2629_v41 = vcombine.high %v13639_v56, %v18156_v14  ;;  %v2630_v16 = vcombine.high %v13365_v30, %v18156_v14  ;;  %v18254_v30 = vld [vmem:[#allocation51_spill] sm:$0xff] }
 0x231   :  { %v784_v34 = vsel %vm770_vm6, %v18239_v51, %v10416_v22  ;;  %v771_v33 = vsel %vm770_vm6, %v18240_v7, %v10415_v32  ;;  %10678 = vrot.lane.b32.xlu0 %v10677_v21, %s11760_s11  ;;  %v18245_v22 = vpack.i.bf16 %v18243_v19, %v18244_v38  ;;  %v18246_v21 = vld [vmem:[#allocation11_spill] sm:$0xff]  ;;  %v13634_v51 = vrot.slane %v2665_v28, %v11969_v26  ;;  %v18248_v28 = vld [vmem:[#allocation12_spill] sm:$0xff] }
 0x232   :  { %v10419_v32 = vpop.permute.xlu0 %10418  ;;  %v1710_v17 = vcombine.high %v18246_v21, %v18156_v14  ;;  %v773_v52 = vsel %vm772_vm7, %v771_v33, %v10340_v27  ;;  %v785_v19 = vsel %vm772_vm7, %v784_v34, %v10341_v39  ;;  %v13645_v38 = vcombine.high %v13585_v20, %v18156_v14  ;;  %v18251_v27 = vld [vmem:[#allocation49_spill] sm:$0xff] }
 0x233   :  { %10638 = vrot.lane.b32.xlu1 %v18245_v22, %s11760_s11  ;;  %v13636_v3 = vpop.permute.xlu1 %10398  ;;  %v10421_v7 = vunpack.i.h.bf16 %v10419_v32  ;;  %v10420_v42 = vunpack.i.l.bf16 %v10419_v32  ;;  %v18247_v22 = vld [vmem:[#allocation13_spill] sm:$0xff]  ;;  %v13657_v50 = vrot.slane %v18250_v11, %v11969_v26  ;;  %v10346_v33 = vunpack.i.h.bf16 %v13481_v46  ;;  %v18252_v32 = vld [vmem:[#allocation47_spill] sm:$0xff] }
 0x234   :  { %v18249_v21 = vcombine.low %v18247_v22, %v18248_v28  ;;  %v10345_v39 = vunpack.i.l.bf16 %v13481_v46  ;;  %v18253_v22 = vpack.i.bf16 %v18251_v27, %v18252_v32  ;;  %v13672_v36 = vcombine.high %v13623_v62, %v18156_v14 }
 0x235   :  { %v775_v18 = vsel %vm774_vm8, %v773_v52, %v10420_v42  ;;  %v786_v34 = vsel %vm774_vm8, %v785_v19, %v10421_v7  ;;  %10683 = vrot.lane.b32.xlu0 %v10682_v63, %s11755_s7  ;;  %v10687_v63 = vpack.i.bf16 %v1710_v17, %v13568_v57  ;;  %v2697_v46 = vcombine.high %v13634_v51, %v18156_v14 }
 0x236   :  { %v13651_v15 = vrot.slane %v18249_v21, %v11969_v26  ;;  %v10424_v28 = vpop.permute.xlu0 %10423  ;;  %v777_v19 = vsel %vm776_vm9, %v775_v18, %v10345_v39  ;;  %v787_v21 = vsel %vm776_vm9, %v786_v34, %v10346_v33  ;;  %v13694_v17 = vcombine.high %v13657_v50, %v18156_v14  ;;  %v18255_v33 = vld [vmem:[#allocation50_spill] sm:$0xff] }
 0x237   :  { %10643 = vrot.lane.b32.xlu1 %v18253_v22, %s11755_s7  ;;  %v13674_v52 = vpop.permute.xlu1 %10403  ;;  %v10426_v7 = vunpack.i.h.bf16 %v10424_v28  ;;  %v10425_v42 = vunpack.i.l.bf16 %v10424_v28  ;;  %v10351_v18 = vunpack.i.h.bf16 %v13502_v13  ;;  %v10350_v34 = vunpack.i.l.bf16 %v13502_v13 }
 0x238   :  { %v13690_v57 = vcombine.high %v13651_v15, %v18156_v14  ;;  %v18256_v39 = vpack.i.bf16 %v18254_v30, %v18255_v33  ;;  %v2698_v22 = vcombine.high %v13368_v4, %v18156_v14  ;;  %v2699_v28 = vcombine.high %v13380_v58, %v18156_v14 }
 0x239   :  { %v779_v11 = vsel %vm778_vm10, %v777_v19, %v10425_v42  ;;  %v788_v27 = vsel %vm778_vm10, %v787_v21, %v10426_v7  ;;  %10688 = vrot.lane.b32.xlu0 %v10687_v63, %s11756_s8  ;;  %v10732_v19 = vpack.i.bf16 %v2697_v46, %v2629_v41  ;;  %v13710_v13 = vcombine.high %v13411_v40, %v18156_v14 }
 0x23a   :  { %v10429_v32 = vpop.permute.xlu0 %10428  ;;  %v781_v21 = vsel %vm780_vm11, %v779_v11, %v10350_v34  ;;  %v789_v30 = vsel %vm780_vm11, %v788_v27, %v10351_v18  ;;  %v2631_v33 = vcombine.high %v13396_v55, %v18156_v14  ;;  %v13718_v4 = vcombine.high %v13431_v31, %v18156_v14 }
 0x23b   :  { %10648 = vrot.lane.b32.xlu1 %v18256_v39, %s11756_s8  ;;  %v13706_v7 = vpop.permute.xlu1 %10408  ;;  %v10431_v42 = vunpack.i.h.bf16 %v10429_v32  ;;  %v10430_v63 = vunpack.i.l.bf16 %v10429_v32  ;;  %v3143_v58 = vcombine.low %v13451_v60, %v13455_v5  ;;  %v10712_v40 = vpack.i.bf16 %v13672_v36, %v13690_v57 }
 0x23c   :  { %v10737_v27 = vpack.i.bf16 %v2698_v22, %v2630_v16  ;;  %v10742_v18 = vpack.i.bf16 %v2699_v28, %v2631_v33  ;;  %v10356_v60 = vunpack.i.h.bf16 %v13428_v0  ;;  %v10747_v32 = vpack.i.bf16 %v13710_v13, %v13718_v4  ;;  %v18257_v28 = vld [vmem:[#allocation44_spill] sm:$0xff]  ;;  %v18259_v4 = vld [vmem:[#allocation42_spill] sm:$0xff] }
 0x23d   :  { %v783_v46 = vsel %vm782_vm12, %v781_v21, %v10430_v63  ;;  %v790_v41 = vsel %vm782_vm12, %v789_v30, %v10431_v42  ;;  %10733 = vrot.lane.b32.xlu0 %v10732_v19, %s11761_s12  ;;  %v10355_v42 = vunpack.i.l.bf16 %v13428_v0  ;;  %v10361_v63 = vunpack.i.h.bf16 %v13459_v24  ;;  %v18258_v30 = vld [vmem:[#allocation43_spill] sm:$0xff] }
 0x23e   :  { %v10283_v11 = vpack.c.bf16 %v790_v41, %v783_v46  ;;  %v10454_v55 = vpop.permute.xlu0 %10453  ;;  %v13736_v16 = vrot.slane %v3143_v58, %v11969_v26  ;;  %v10360_v22 = vunpack.i.l.bf16 %v13459_v24  ;;  %v10371_v0 = vunpack.i.h.bf16 %v13532_v45  ;;  %v18260_v41 = vld [vmem:[#allocation45_spill] sm:$0xff]  ;;  %v18261_v24 = vld [vmem:[#allocation24_spill] sm:$0xff] }
 0x23f   :  { %10693 = vrot.lane.b32.xlu1 %v10692_v29, %s11761_s12  ;;  %v10434_v5 = vpop.permute.xlu1 %10433  ;;  %v10456_v34 = vunpack.i.h.bf16 %v10454_v55  ;;  %v10455_v39 = vunpack.i.l.bf16 %v10454_v55  ;;  %v10370_v13 = vunpack.i.l.bf16 %v13532_v45  ;;  %v10385_v36 = vunpack.i.l.bf16 %v13496_v53 }
 0x240   :  { %799 = vst [vmem:[#allocation3] sm:$0x33] %v10283_v11  ;;  %v10436_v29 = vunpack.i.h.bf16 %v10434_v5  ;;  %v10435_v19 = vunpack.i.l.bf16 %v10434_v5  ;;  %v18262_v11 = vld [vmem:[#allocation21_spill] sm:$0xff] }
 0x241   :  { %v2253_v21 = vsel %vm770_vm6, %v18257_v28, %v10456_v34  ;;  %v2246_v33 = vsel %vm770_vm6, %v18258_v30, %v10455_v39  ;;  %10738 = vrot.lane.b32.xlu0 %v10737_v27, %s11760_s11  ;;  %v18263_v55 = vpack.i.bf16 %v18261_v24, %v18262_v11  ;;  %v10366_v34 = vunpack.i.h.bf16 %v13471_v61 }
 0x242   :  { %v1518_v46 = vsel %vm770_vm6, %v18259_v4, %v10436_v29  ;;  %v1511_v58 = vsel %vm770_vm6, %v18260_v41, %v10435_v19  ;;  %v10459_v5 = vpop.permute.xlu0 %10458  ;;  %v10365_v27 = vunpack.i.l.bf16 %v13471_v61  ;;  %v2247_v29 = vsel %vm772_vm7, %v2246_v33, %v10370_v13 }
 0x243   :  { %10698 = vrot.lane.b32.xlu1 %v18263_v55, %s11760_s11  ;;  %v10439_v39 = vpop.permute.xlu1 %10438  ;;  %v10461_v28 = vunpack.i.h.bf16 %v10459_v5  ;;  %v10460_v30 = vunpack.i.l.bf16 %v10459_v5  ;;  %v2254_v4 = vsel %vm772_vm7, %v2253_v21, %v10371_v0  ;;  %v1512_v19 = vsel %vm772_vm7, %v1511_v58, %v10355_v42  ;;  %v18264_v21 = vld [vmem:[#allocation18_spill] sm:$0xff]  ;;  %v18265_v0 = vld [vmem:[#allocation33_spill] sm:$0xff] }
 0x244   :  { %v10441_v45 = vunpack.i.h.bf16 %v10439_v39  ;;  %v10440_v31 = vunpack.i.l.bf16 %v10439_v39  ;;  %v1519_v41 = vsel %vm772_vm7, %v1518_v46, %v10356_v60  ;;  %v10376_v61 = vunpack.i.h.bf16 %v13555_v9 }
 0x245   :  { %v2248_v24 = vsel %vm774_vm8, %v2247_v29, %v10460_v30  ;;  %v2255_v11 = vsel %vm774_vm8, %v2254_v4, %v10461_v28  ;;  %10743 = vrot.lane.b32.xlu0 %v10742_v18, %s11755_s7  ;;  %v10375_v55 = vunpack.i.l.bf16 %v13555_v9  ;;  %v18266_v42 = vpack.i.bf16 %v18264_v21, %v18265_v0 }
 0x246   :  { %v1513_v5 = vsel %vm774_vm8, %v1512_v19, %v10440_v31  ;;  %v1520_v33 = vsel %vm774_vm8, %v1519_v41, %v10441_v45  ;;  %v10464_v60 = vpop.permute.xlu0 %10463  ;;  %v3175_v18 = vcombine.high %v13736_v16, %v18156_v14  ;;  %v3176_v39 = vcombine.high %v13477_v44, %v18156_v14 }
 0x247   :  { %10703 = vrot.lane.b32.xlu1 %v18266_v42, %s11755_s7  ;;  %v10444_v13 = vpop.permute.xlu1 %10443  ;;  %v10466_v46 = vunpack.i.h.bf16 %v10464_v60  ;;  %v10465_v58 = vunpack.i.l.bf16 %v10464_v60  ;;  %v2249_v31 = vsel %vm776_vm9, %v2248_v24, %v10375_v55  ;;  %v2256_v30 = vsel %vm776_vm9, %v2255_v11, %v10376_v61  ;;  %v18267_v11 = vld [vmem:[#allocation35_spill] sm:$0xff]  ;;  %v18268_v61 = vld [vmem:[#allocation29_spill] sm:$0xff] }
 0x248   :  { %v10446_v9 = vunpack.i.h.bf16 %v10444_v13  ;;  %v10445_v28 = vunpack.i.l.bf16 %v10444_v13  ;;  %v1514_v45 = vsel %vm776_vm9, %v1513_v5, %v10360_v22  ;;  %v1521_v29 = vsel %vm776_vm9, %v1520_v33, %v10361_v63 }
 0x249   :  { %v2250_v4 = vsel %vm778_vm10, %v2249_v31, %v10465_v58  ;;  %v2257_v19 = vsel %vm778_vm10, %v2256_v30, %v10466_v46  ;;  %10748 = vrot.lane.b32.xlu0 %v10747_v32, %s11756_s8  ;;  %v10381_v41 = vunpack.i.h.bf16 %v13592_v48  ;;  %v10380_v44 = vunpack.i.l.bf16 %v13592_v48 }
 0x24a   :  { %v1515_v21 = vsel %vm778_vm10, %v1514_v45, %v10445_v28  ;;  %v1522_v24 = vsel %vm778_vm10, %v1521_v29, %v10446_v9  ;;  %v18269_v22 = vpack.i.bf16 %v18267_v11, %v18268_v61  ;;  %v10469_v63 = vpop.permute.xlu0 %10468  ;;  %v10752_v0 = vpack.i.bf16 %v3175_v18, %v13598_v12  ;;  %v18272_v61 = vld [vmem:[#allocation16_spill] sm:$0xff] }
 0x24b   :  { %v10449_v55 = vpop.permute.xlu1 %10448  ;;  %v10471_v5 = vunpack.i.h.bf16 %v10469_v63  ;;  %v10470_v33 = vunpack.i.l.bf16 %v10469_v63  ;;  %v3177_v32 = vcombine.high %v13488_v8, %v18156_v14  ;;  %v2251_v60 = vsel %vm780_vm11, %v2250_v4, %v10380_v44 }
 0x24c   :  { %10708 = vrot.lane.b32.xlu1 %v18269_v22, %s11756_s8  ;;  %v10451_v42 = vunpack.i.h.bf16 %v10449_v55  ;;  %v10450_v48 = vunpack.i.l.bf16 %v10449_v55  ;;  %v2258_v13 = vsel %vm780_vm11, %v2257_v19, %v10381_v41  ;;  %v1516_v46 = vsel %vm780_vm11, %v1515_v21, %v10365_v27 }
 0x24d   :  { %v1523_v58 = vsel %vm780_vm11, %v1522_v24, %v10366_v34  ;;  %v2252_v9 = vsel %vm782_vm12, %v2251_v60, %v10470_v33  ;;  %v2259_v28 = vsel %vm782_vm12, %v2258_v13, %v10471_v5  ;;  %10753 = vrot.lane.b32.xlu0 %v10752_v0, %s11761_s12  ;;  %v3178_v34 = vcombine.high %v13514_v47, %v18156_v14  ;;  %v18271_v24 = vld [vmem:[#allocation19_spill] sm:$0xff] }
 0x24e   :  { %v1517_v12 = vsel %vm782_vm12, %v1516_v46, %v10450_v48  ;;  %v1524_v8 = vsel %vm782_vm12, %v1523_v58, %v10451_v42  ;;  %v10289_v18 = vpack.c.bf16 %v2259_v28, %v2252_v9  ;;  %v10494_v31 = vpop.permute.xlu0 %10493  ;;  %v10757_v4 = vpack.i.bf16 %v3176_v39, %v13602_v1 }
 0x24f   :  { %v10286_v27 = vpack.c.bf16 %v1524_v8, %v1517_v12  ;;  %v10474_v30 = vpop.permute.xlu1 %10473  ;;  %v10496_v45 = vunpack.i.h.bf16 %v10494_v31  ;;  %v10495_v29 = vunpack.i.l.bf16 %v10494_v31  ;;  %v10386_v19 = vunpack.i.h.bf16 %v13496_v53  ;;  %v18274_v53 = vld [vmem:[#allocation26_spill] sm:$0xff]  ;;  %v18277_v31 = vld [vmem:[#allocation20_spill] sm:$0xff] }
 0x250   :  { %10713 = vrot.lane.b32.xlu1 %v10712_v40, %s11761_s12  ;;  %2268 = vst [vmem:[#allocation3 + $0x30] sm:$0x33] %v10289_v18  ;;  %v10476_v41 = vunpack.i.h.bf16 %v10474_v30  ;;  %v10475_v44 = vunpack.i.l.bf16 %v10474_v30  ;;  %v13812_v21 = vcombine.high %v13359_v35, %v18156_v14  ;;  %v18270_v40 = vld [vmem:[#allocation52_spill] sm:$0xff]  ;;  %v10401_v1 = vunpack.i.h.bf16 %v13636_v3  ;;  %v18273_v35 = vld [vmem:[#allocation15_spill] sm:$0xff]  ;;  %v18276_v18 = vld [vmem:[#allocation17_spill] sm:$0xff] }
 0x251   :  { %v1532_v57 = vrot.slane %v10286_v27, 6  ;;  %v3721_v47 = vsel %vm770_vm6, %v18270_v40, %v10496_v45  ;;  %v3714_v11 = vsel %vm770_vm6, %v18271_v24, %v10495_v29  ;;  %10758 = vrot.lane.b32.xlu0 %v10757_v4, %s11760_s11  ;;  %v10400_v39 = vunpack.i.l.bf16 %v13636_v3 }
 0x252   :  { %v2987_v22 = vsel %vm770_vm6, %v18272_v61, %v10476_v41  ;;  %v2980_v63 = vsel %vm770_vm6, %v18273_v35, %v10475_v44  ;;  %v18275_v55 = vpack.i.bf16 %v13275_v25, %v18274_v53  ;;  %v10499_v5 = vpop.permute.xlu0 %10498  ;;  %v10762_v48 = vpack.i.bf16 %v3177_v32, %v13605_v59  ;;  %v18279_v61 = vld [vmem:[#allocation53_spill] sm:$0xff] }
 0x253   :  { %1534 = vst [vmem:[#allocation3 + $0x10] sm:$0xcc] %v1532_v57  ;;  %v10479_v33 = vpop.permute.xlu1 %10478  ;;  %v10501_v0 = vunpack.i.h.bf16 %v10499_v5  ;;  %v10500_v42 = vunpack.i.l.bf16 %v10499_v5  ;;  %v10767_v3 = vpack.i.bf16 %v3178_v34, %v13617_v43  ;;  %v3715_v46 = vsel %vm772_vm7, %v3714_v11, %v10400_v39 }
 0x254   :  { %10718 = vrot.lane.b32.xlu1 %v18275_v55, %s11760_s11  ;;  %v10481_v60 = vunpack.i.h.bf16 %v10479_v33  ;;  %v10480_v13 = vunpack.i.l.bf16 %v10479_v33  ;;  %v3722_v58 = vsel %vm772_vm7, %v3721_v47, %v10401_v1  ;;  %v2981_v9 = vsel %vm772_vm7, %v2980_v63, %v10385_v36 }
 0x255   :  { %v2988_v25 = vsel %vm772_vm7, %v2987_v22, %v10386_v19  ;;  %v3716_v28 = vsel %vm774_vm8, %v3715_v46, %v10500_v42  ;;  %v3723_v12 = vsel %vm774_vm8, %v3722_v58, %v10501_v0  ;;  %10763 = vrot.lane.b32.xlu0 %v10762_v48, %s11755_s7  ;;  %v10406_v59 = vunpack.i.h.bf16 %v13674_v52  ;;  %v18280_v22 = vld [vmem:[#allocation23_spill] sm:$0xff] }
 0x256   :  { %v10405_v43 = vunpack.i.l.bf16 %v13674_v52  ;;  %v2982_v32 = vsel %vm774_vm8, %v2981_v9, %v10480_v13  ;;  %v2989_v8 = vsel %vm774_vm8, %v2988_v25, %v10481_v60  ;;  %v18278_v34 = vpack.i.bf16 %v18276_v18, %v18277_v31  ;;  %v10504_v27 = vpop.permute.xlu0 %10503  ;;  %v13868_v60 = vld [vmem:[#allocation2 + $0xb1] sm:$0xff] }
 0x257   :  { %v10391_v30 = vunpack.i.h.bf16 %v13529_v49  ;;  %v10390_v45 = vunpack.i.l.bf16 %v13529_v49  ;;  %v10484_v29 = vpop.permute.xlu1 %10483  ;;  %v10506_v4 = vunpack.i.h.bf16 %v10504_v27  ;;  %v10505_v19 = vunpack.i.l.bf16 %v10504_v27 }
 0x258   :  { %10723 = vrot.lane.b32.xlu1 %v18278_v34, %s11755_s7  ;;  %v10486_v41 = vunpack.i.h.bf16 %v10484_v29  ;;  %v10485_v44 = vunpack.i.l.bf16 %v10484_v29  ;;  %v3717_v52 = vsel %vm776_vm9, %v3716_v28, %v10405_v43  ;;  %v3724_v36 = vsel %vm776_vm9, %v3723_v12, %v10406_v59  ;;  %v18283_v43 = vld [vmem:[#allocation54_spill] sm:$0xff]  ;;  %v18284_v34 = vld [vmem:[#allocation56_spill] sm:$0xff] }
 0x259   :  { %v2983_v57 = vsel %vm776_vm9, %v2982_v32, %v10390_v45  ;;  %v2990_v40 = vsel %vm776_vm9, %v2989_v8, %v10391_v30  ;;  %v3718_v47 = vsel %vm778_vm10, %v3717_v52, %v10505_v19  ;;  %v3725_v24 = vsel %vm778_vm10, %v3724_v36, %v10506_v4  ;;  %10768 = vrot.lane.b32.xlu0 %v10767_v3, %s11756_s8  ;;  %v18286_v4 = vld [vmem:[#allocation30_spill] sm:$0xff] }
 0x25a   :  { %v10411_v49 = vunpack.i.h.bf16 %v13706_v7  ;;  %v10410_v11 = vunpack.i.l.bf16 %v13706_v7  ;;  %v2984_v1 = vsel %vm778_vm10, %v2983_v57, %v10485_v44  ;;  %v2991_v39 = vsel %vm778_vm10, %v2990_v40, %v10486_v41  ;;  %v10509_v63 = vpop.permute.xlu0 %10508  ;;  %v18287_v41 = vld [vmem:[#allocation58_spill] sm:$0xff] }
 0x25b   :  { %v18281_v35 = vpack.i.bf16 %v18279_v61, %v18280_v22  ;;  %v10396_v53 = vunpack.i.h.bf16 %v13551_v23  ;;  %v10395_v55 = vunpack.i.l.bf16 %v13551_v23  ;;  %v10489_v5 = vpop.permute.xlu1 %10488  ;;  %v10511_v33 = vunpack.i.h.bf16 %v10509_v63 }
 0x25c   :  { %v10510_v0 = vunpack.i.l.bf16 %v10509_v63  ;;  %v10491_v42 = vunpack.i.h.bf16 %v10489_v5  ;;  %v10490_v48 = vunpack.i.l.bf16 %v10489_v5  ;;  %v3719_v7 = vsel %vm780_vm11, %v3718_v47, %v10410_v11 }
 0x25d   :  { %10728 = vrot.lane.b32.xlu1 %v18281_v35, %s11756_s8  ;;  %v3726_v3 = vsel %vm780_vm11, %v3725_v24, %v10411_v49  ;;  %v2985_v13 = vsel %vm780_vm11, %v2984_v1, %v10395_v55  ;;  %v2992_v46 = vsel %vm780_vm11, %v2991_v39, %v10396_v53  ;;  %3768 = vrot.lane.b32.xlu0 %v13868_v60, %s11767_s15 }
 0x25e   :  { %v3720_v58 = vsel %vm782_vm12, %v3719_v7, %v10510_v0  ;;  %v3727_v9 = vsel %vm782_vm12, %v3726_v3, %v10511_v33  ;;  %v2986_v23 = vsel %vm782_vm12, %v2985_v13, %v10490_v48  ;;  %v2993_v25 = vsel %vm782_vm12, %v2992_v46, %v10491_v42  ;;  %v13882_v59 = vpop.permute.xlu0 %10513  ;;  %v18288_v7 = vld [vmem:[#allocation36_spill] sm:$0xff]  ;;  %v18289_v13 = vld [vmem:[#allocation57_spill] sm:$0xff] }
 0x25f   :  { %v10295_v28 = vpack.c.bf16 %v3727_v9, %v3720_v58  ;;  %v18282_v12 = vpack.i.bf16 %v13694_v17, %v13645_v38  ;;  %v3364_v32 = vcombine.high %v18283_v43, %v18156_v14  ;;  %v10292_v8 = vpack.c.bf16 %v2993_v25, %v2986_v23  ;;  %v10529_v30 = vpop.permute.xlu1 %10528  ;;  %v18285_v38 = vld [vmem:[#allocation39_spill] sm:$0xff] }
 0x260   :  { %v3433_v27 = vcombine.high %v18284_v34, %v18156_v14  ;;  %v3365_v17 = vcombine.high %v18285_v38, %v18156_v14  ;;  %v3434_v19 = vcombine.high %v18286_v4, %v18156_v14  ;;  %v3366_v44 = vcombine.high %v18287_v41, %v18156_v14 }
 0x261   :  { %10773 = vrot.lane.b32.xlu1 %v18282_v12, %s11761_s12  ;;  %v3735_v18 = vrot.slane %v10295_v28, 6  ;;  %v10777_v31 = vpack.i.bf16 %v13812_v21, %v3364_v32  ;;  %3002 = vst [vmem:[#allocation3 + $0x8] sm:$0x33] %v10292_v8  ;;  %v10531_v58 = vunpack.i.h.bf16 %v10529_v30  ;;  %v10530_v9 = vunpack.i.l.bf16 %v10529_v30 }
 0x262   :  { %v13890_v45 = vpop.permute.xlu0 %10518  ;;  %v10782_v29 = vpack.i.bf16 %v3433_v27, %v3365_v17  ;;  %v10787_v36 = vpack.i.bf16 %v3434_v19, %v3366_v44 }
 0x263   :  { %3737 = vst [vmem:[#allocation3 + $0x18] sm:$0xcc] %v3735_v18  ;;  %v10534_v52 = vpop.permute.xlu1 %10533 }
 0x264   :  { %v10535_v34 = vunpack.i.l.bf16 %v10534_v52 }
 0x265   :  { %10778 = vrot.lane.b32.xlu1 %v10777_v31, %s11760_s11  ;;  %v10536_v31 = vunpack.i.h.bf16 %v10534_v52 }
 0x266   :  { %v13897_v21 = vpop.permute.xlu0 %10523 }
 0x267   :  { %v10539_v40 = vpop.permute.xlu1 %10538 }
 0x268   :  { %v10541_v44 = vunpack.i.h.bf16 %v10539_v40 }
 0x269   :  { %10783 = vrot.lane.b32.xlu1 %v10782_v29, %s11755_s7 }
 0x26a   :  { %v13902_v57 = vpop.permute.xlu0 %10558 }
 0x26b   :  { %v13908_v49 = vpop.permute.xlu1 %10543 }
 0x26d   :  { %10788 = vrot.lane.b32.xlu1 %v10787_v36, %s11756_s8  ;;  %v10540_v36 = vunpack.i.l.bf16 %v10539_v40  ;;  %v18291_v40 = vld [vmem:[#allocation40_spill] sm:$0xff] }
 0x26e   :  { %v13904_v47 = vpop.permute.xlu0 %10563 }
 0x26f   :  { %v13912_v1 = vpop.permute.xlu1 %10548 }
 0x272   :  { %v13906_v24 = vpop.permute.xlu0 %10568 }
 0x273   :  { %v13918_v22 = vpop.permute.xlu1 %10553 }
 0x276   :  { %v13910_v11 = vpop.permute.xlu0 %10573 }
 0x27a   :  { %v13914_v39 = vpop.permute.xlu0 %10578 }
 0x27e   :  { %v13916_v61 = vpop.permute.xlu0 %10583 }
 0x283   :  { %v13920_v35 = vpop.permute.xlu0 %10618  ;;  %v13922_v63 = vpop.permute.xlu1 %10588 }
 0x287   :  { %v13924_v53 = vpop.permute.xlu0 %10623  ;;  %v13926_v55 = vpop.permute.xlu1 %10593 }
 0x28b   :  { %v13928_v5 = vpop.permute.xlu0 %10628  ;;  %v13930_v0 = vpop.permute.xlu1 %10598 }
 0x28f   :  { %v10654_v33 = vpop.permute.xlu0 %10653 }
 0x290   :  { %v10656_v42 = vunpack.i.h.bf16 %v10654_v33  ;;  %v10655_v48 = vunpack.i.l.bf16 %v10654_v33 }
 0x292   :  { %v1295_v3 = vsel %vm770_vm6, %v18288_v7, %v10656_v42  ;;  %v1288_v46 = vsel %vm770_vm6, %v18289_v13, %v10655_v48 }
 0x293   :  { %v10659_v23 = vpop.permute.xlu0 %10658  ;;  %v13936_v25 = vpop.permute.xlu1 %10603  ;;  %v1289_v43 = vsel %vm772_vm7, %v1288_v46, %v10530_v9  ;;  %v1296_v32 = vsel %vm772_vm7, %v1295_v3, %v10531_v58 }
 0x294   :  { %v10661_v28 = vunpack.i.h.bf16 %v10659_v23  ;;  %v10660_v12 = vunpack.i.l.bf16 %v10659_v23 }
 0x296   :  { %v1290_v8 = vsel %vm774_vm8, %v1289_v43, %v10660_v12  ;;  %v1297_v18 = vsel %vm774_vm8, %v1296_v32, %v10661_v28  ;;  %v18290_v43 = vld [vmem:[#allocation46_spill] sm:$0xff] }
 0x297   :  { %v10664_v27 = vpop.permute.xlu0 %10663  ;;  %v13942_v38 = vpop.permute.xlu1 %10608  ;;  %v1291_v29 = vsel %vm776_vm9, %v1290_v8, %v10535_v34  ;;  %v1298_v4 = vsel %vm776_vm9, %v1297_v18, %v10536_v31  ;;  %v3778_v32 = vcombine.low %v18291_v40, %v18290_v43  ;;  %v3779_v31 = vcombine.high %v18291_v40, %v18290_v43  ;;  %v18292_v34 = vld [vmem:[#allocation22_spill] sm:$0xff] }
 0x298   :  { %v10666_v17 = vunpack.i.h.bf16 %v10664_v27  ;;  %v10665_v30 = vunpack.i.l.bf16 %v10664_v27  ;;  %v18293_v27 = vld [vmem:[#allocation41_spill] sm:$0xff]  ;;  %v10591_v40 = vunpack.i.h.bf16 %v13922_v63 }
 0x29a   :  { %v1292_v19 = vsel %vm778_vm10, %v1291_v29, %v10665_v30  ;;  %v1299_v41 = vsel %vm778_vm10, %v1298_v4, %v10666_v17  ;;  %v3794_v17 = vcombine.low %v18293_v27, %v18292_v34  ;;  %v10546_v4 = vunpack.i.h.bf16 %v13908_v49 }
 0x29b   :  { %v10669_v33 = vpop.permute.xlu0 %10668  ;;  %v13948_v42 = vpop.permute.xlu1 %10613  ;;  %v1293_v7 = vsel %vm780_vm11, %v1292_v19, %v10540_v36  ;;  %v1300_v3 = vsel %vm780_vm11, %v1299_v41, %v10541_v44  ;;  %v10545_v19 = vunpack.i.l.bf16 %v13908_v49 }
 0x29c   :  { %v10671_v48 = vunpack.i.h.bf16 %v10669_v33  ;;  %v10670_v52 = vunpack.i.l.bf16 %v10669_v33  ;;  %v10516_v33 = vunpack.i.h.bf16 %v13882_v59 }
 0x29e   :  { %v1294_v13 = vsel %vm782_vm12, %v1293_v7, %v10670_v52  ;;  %v1301_v46 = vsel %vm782_vm12, %v1300_v3, %v10671_v48  ;;  %v10515_v48 = vunpack.i.l.bf16 %v13882_v59  ;;  %v10550_v59 = vunpack.i.l.bf16 %v13912_v1 }
 0x29f   :  { %v10285_v58 = vpack.c.bf16 %v1301_v46, %v1294_v13  ;;  %v10674_v9 = vpop.permute.xlu0 %10673  ;;  %v10634_v23 = vpop.permute.xlu1 %10633 }
 0x2a0   :  { %v10676_v28 = vunpack.i.h.bf16 %v10674_v9  ;;  %v10675_v12 = vunpack.i.l.bf16 %v10674_v9  ;;  %v10636_v8 = vunpack.i.h.bf16 %v10634_v23  ;;  %v10635_v18 = vunpack.i.l.bf16 %v10634_v23 }
 0x2a1   :  { %1310 = vst [vmem:[#allocation3 + $0x10] sm:$0x33] %v10285_v58  ;;  %v10551_v9 = vunpack.i.h.bf16 %v13912_v1 }
 0x2a2   :  { %v1774_v30 = vsel %vm770_vm6, %v13500_v54, %v10676_v28  ;;  %v1767_v29 = vsel %vm770_vm6, %v13517_v2, %v10675_v12  ;;  %v1039_v41 = vsel %vm770_vm6, %v13510_v6, %v10636_v8  ;;  %v1032_v44 = vsel %vm770_vm6, %v13526_v10, %v10635_v18 }
 0x2a3   :  { %v10679_v36 = vpop.permute.xlu0 %10678  ;;  %v1768_v13 = vsel %vm772_vm7, %v1767_v29, %v10545_v19  ;;  %v1775_v49 = vsel %vm772_vm7, %v1774_v30, %v10546_v4  ;;  %v1033_v46 = vsel %vm772_vm7, %v1032_v44, %v10515_v48  ;;  %v1040_v6 = vsel %vm772_vm7, %v1039_v41, %v10516_v33 }
 0x2a4   :  { %v10681_v54 = vunpack.i.h.bf16 %v10679_v36  ;;  %v10680_v7 = vunpack.i.l.bf16 %v10679_v36  ;;  %v10521_v8 = vunpack.i.h.bf16 %v13890_v45  ;;  %v10520_v18 = vunpack.i.l.bf16 %v13890_v45 }
 0x2a5   :  { %v10639_v52 = vpop.permute.xlu1 %10638  ;;  %v10555_v45 = vunpack.i.l.bf16 %v13918_v22 }
 0x2a6   :  { %v10641_v3 = vunpack.i.h.bf16 %v10639_v52  ;;  %v10640_v2 = vunpack.i.l.bf16 %v10639_v52  ;;  %v1769_v10 = vsel %vm774_vm8, %v1768_v13, %v10680_v7  ;;  %v1776_v58 = vsel %vm774_vm8, %v1775_v49, %v10681_v54 }
 0x2a7   :  { %v10684_v12 = vpop.permute.xlu0 %10683  ;;  %v1770_v44 = vsel %vm776_vm9, %v1769_v10, %v10550_v59  ;;  %v1777_v36 = vsel %vm776_vm9, %v1776_v58, %v10551_v9  ;;  %v10556_v54 = vunpack.i.h.bf16 %v13918_v22  ;;  %v10526_v13 = vunpack.i.h.bf16 %v13897_v21 }
 0x2a8   :  { %v1034_v23 = vsel %vm774_vm8, %v1033_v46, %v10640_v2  ;;  %v1041_v28 = vsel %vm774_vm8, %v1040_v6, %v10641_v3  ;;  %v10686_v29 = vunpack.i.h.bf16 %v10684_v12  ;;  %v10685_v4 = vunpack.i.l.bf16 %v10684_v12 }
 0x2a9   :  { %v10644_v30 = vpop.permute.xlu1 %10643  ;;  %v1035_v1 = vsel %vm776_vm9, %v1034_v23, %v10520_v18  ;;  %v1042_v33 = vsel %vm776_vm9, %v1041_v28, %v10521_v8  ;;  %v10525_v49 = vunpack.i.l.bf16 %v13897_v21 }
 0x2aa   :  { %v10646_v19 = vunpack.i.h.bf16 %v10644_v30  ;;  %v10645_v41 = vunpack.i.l.bf16 %v10644_v30  ;;  %v1771_v48 = vsel %vm778_vm10, %v1770_v44, %v10685_v4  ;;  %v1778_v52 = vsel %vm778_vm10, %v1777_v36, %v10686_v29  ;;  %v18294_v4 = vld [vmem:[#allocation10_spill] sm:$0xff] }
 0x2ab   :  { %v10689_v2 = vpop.permute.xlu0 %10688  ;;  %v1772_v59 = vsel %vm780_vm11, %v1771_v48, %v10555_v45  ;;  %v1779_v23 = vsel %vm780_vm11, %v1778_v52, %v10556_v54  ;;  %v3795_v48 = vcombine.high %v18293_v27, %v18292_v34  ;;  %v18297_v34 = vld [vmem:[#allocation31_spill] sm:$0xff] }
 0x2ac   :  { %v1036_v7 = vsel %vm778_vm10, %v1035_v1, %v10645_v41  ;;  %v1043_v3 = vsel %vm778_vm10, %v1042_v33, %v10646_v19  ;;  %v10691_v6 = vunpack.i.h.bf16 %v10689_v2  ;;  %v10690_v10 = vunpack.i.l.bf16 %v10689_v2  ;;  %v18295_v2 = vld [vmem:[#allocation28_spill] sm:$0xff] }
 0x2ad   :  { %v10649_v46 = vpop.permute.xlu1 %10648  ;;  %v1037_v22 = vsel %vm780_vm11, %v1036_v7, %v10525_v49  ;;  %v1044_v28 = vsel %vm780_vm11, %v1043_v3, %v10526_v13  ;;  %v14008_v19 = vrot.slane %v3778_v32, %v18294_v4  ;;  %v14014_v33 = vrot.slane %v3779_v31, %v18294_v4 }
 0x2ae   :  { %v10651_v58 = vunpack.i.h.bf16 %v10649_v46  ;;  %v10650_v9 = vunpack.i.l.bf16 %v10649_v46  ;;  %v1773_v12 = vsel %vm782_vm12, %v1772_v59, %v10690_v10  ;;  %v1780_v8 = vsel %vm782_vm12, %v1779_v23, %v10691_v6 }
 0x2af   :  { %v10287_v30 = vpack.c.bf16 %v1780_v8, %v1773_v12  ;;  %v10734_v29 = vpop.permute.xlu0 %10733  ;;  %v14022_v32 = vrot.slane %v3794_v17, %v18294_v4  ;;  %v10590_v31 = vunpack.i.l.bf16 %v13922_v63  ;;  %v10561_v17 = vunpack.i.h.bf16 %v13902_v57 }
 0x2b0   :  { %v1038_v18 = vsel %vm782_vm12, %v1037_v22, %v10650_v9  ;;  %v1045_v21 = vsel %vm782_vm12, %v1044_v28, %v10651_v58  ;;  %v10736_v36 = vunpack.i.h.bf16 %v10734_v29  ;;  %v10735_v1 = vunpack.i.l.bf16 %v10734_v29 }
 0x2b1   :  { %v10284_v41 = vpack.c.bf16 %v1045_v21, %v1038_v18  ;;  %v10694_v44 = vpop.permute.xlu1 %10693  ;;  %1789 = vst [vmem:[#allocation3 + $0x20] sm:$0x33] %v10287_v30  ;;  %v10560_v46 = vunpack.i.l.bf16 %v13902_v57  ;;  %v10596_v57 = vunpack.i.h.bf16 %v13926_v55  ;;  %v10595_v28 = vunpack.i.l.bf16 %v13926_v55 }
 0x2b2   :  { %v10696_v52 = vunpack.i.h.bf16 %v10694_v44  ;;  %v10695_v54 = vunpack.i.l.bf16 %v10694_v44  ;;  %v2764_v7 = vsel %vm770_vm6, %v13634_v51, %v10736_v36  ;;  %v2757_v43 = vsel %vm770_vm6, %v13639_v56, %v10735_v1 }
 0x2b3   :  { %v1053_v45 = vrot.slane %v10284_v41, 6  ;;  %v10739_v49 = vpop.permute.xlu0 %10738  ;;  %v2758_v9 = vsel %vm772_vm7, %v2757_v43, %v10590_v31  ;;  %v2765_v63 = vsel %vm772_vm7, %v2764_v7, %v10591_v40  ;;  %v10566_v21 = vunpack.i.h.bf16 %v13904_v47 }
 0x2b4   :  { %v2029_v3 = vsel %vm770_vm6, %v13574_v37, %v10696_v52  ;;  %v2022_v13 = vsel %vm770_vm6, %v18295_v2, %v10695_v54  ;;  %v10741_v6 = vunpack.i.h.bf16 %v10739_v49  ;;  %v10740_v10 = vunpack.i.l.bf16 %v10739_v49 }
 0x2b5   :  { %1055 = vst [vmem:[#allocation3] sm:$0xcc] %v1053_v45  ;;  %v10699_v51 = vpop.permute.xlu1 %10698  ;;  %v2023_v37 = vsel %vm772_vm7, %v2022_v13, %v10560_v46  ;;  %v2030_v59 = vsel %vm772_vm7, %v2029_v3, %v10561_v17  ;;  %v10565_v30 = vunpack.i.l.bf16 %v13904_v47  ;;  %v10601_v40 = vunpack.i.h.bf16 %v13930_v0 }
 0x2b6   :  { %v10701_v56 = vunpack.i.h.bf16 %v10699_v51  ;;  %v10700_v58 = vunpack.i.l.bf16 %v10699_v51  ;;  %v2759_v23 = vsel %vm774_vm8, %v2758_v9, %v10740_v10  ;;  %v2766_v22 = vsel %vm774_vm8, %v2765_v63, %v10741_v6 }
 0x2b7   :  { %v10744_v18 = vpop.permute.xlu0 %10743  ;;  %v2760_v52 = vsel %vm776_vm9, %v2759_v23, %v10595_v28  ;;  %v2767_v54 = vsel %vm776_vm9, %v2766_v22, %v10596_v57  ;;  %v10600_v47 = vunpack.i.l.bf16 %v13930_v0  ;;  %v10571_v17 = vunpack.i.h.bf16 %v13906_v24 }
 0x2b8   :  { %v2024_v12 = vsel %vm774_vm8, %v2023_v37, %v10700_v58  ;;  %v2031_v8 = vsel %vm774_vm8, %v2030_v59, %v10701_v56  ;;  %v10746_v41 = vunpack.i.h.bf16 %v10744_v18  ;;  %v10745_v44 = vunpack.i.l.bf16 %v10744_v18 }
 0x2b9   :  { %v10704_v29 = vpop.permute.xlu1 %10703  ;;  %v2025_v55 = vsel %vm776_vm9, %v2024_v12, %v10565_v30  ;;  %v2032_v45 = vsel %vm776_vm9, %v2031_v8, %v10566_v21  ;;  %v10570_v46 = vunpack.i.l.bf16 %v13906_v24  ;;  %v14070_v24 = vrot.slane %v3795_v48, %v18294_v4 }
 0x2ba   :  { %v10706_v36 = vunpack.i.h.bf16 %v10704_v29  ;;  %v10705_v1 = vunpack.i.l.bf16 %v10704_v29  ;;  %v2761_v7 = vsel %vm778_vm10, %v2760_v52, %v10745_v44  ;;  %v2768_v43 = vsel %vm778_vm10, %v2767_v54, %v10746_v41  ;;  %v18296_v44 = vld [vmem:[#allocation34_spill] sm:$0xff] }
 0x2bb   :  { %v10749_v2 = vpop.permute.xlu0 %10748  ;;  %v2762_v9 = vsel %vm780_vm11, %v2761_v7, %v10600_v47  ;;  %v2769_v0 = vsel %vm780_vm11, %v2768_v43, %v10601_v40  ;;  %v3810_v8 = vcombine.low %v14008_v19, %v14022_v32  ;;  %v3811_v41 = vcombine.high %v14008_v19, %v14022_v32 }
 0x2bc   :  { %v2026_v31 = vsel %vm778_vm10, %v2025_v55, %v10705_v1  ;;  %v2033_v3 = vsel %vm778_vm10, %v2032_v45, %v10706_v36  ;;  %v11630_v13 = vld [vmem:[#allocation3 + $0x4] ss:$16 sps:$4 sm:$0xff]   ;;  %v11632_v49 = vld [vmem:[#allocation3] ss:$16 sps:$4 sm:$0xff]   ;;  %v10751_v6 = vunpack.i.h.bf16 %v10749_v2  ;;  %v10750_v10 = vunpack.i.l.bf16 %v10749_v2  ;;  %v18298_v55 = vld [vmem:[#allocation59_spill] sm:$0xff] }
 0x2bd   :  { %5067 = vmatprep.subr.bf16.mxu0 %v11630_v13  ;;  %v2027_v63 = vsel %vm780_vm11, %v2026_v31, %v10570_v46  ;;  %v2034_v37 = vsel %vm780_vm11, %v2033_v3, %v10571_v17  ;;  %v3846_v27 = vcombine.low %v18297_v34, %v18296_v44  ;;  %v3847_v1 = vcombine.high %v18297_v34, %v18296_v44 }
 0x2be   :  { %v10709_v51 = vpop.permute.xlu1 %10708  ;;  %v2763_v59 = vsel %vm782_vm12, %v2762_v9, %v10750_v10  ;;  %v2770_v23 = vsel %vm782_vm12, %v2769_v0, %v10751_v6  ;;  %5068 = vmatpush1.bf16.msra.mxu0 %v11632_v49  ;;  %v10606_v7 = vunpack.i.h.bf16 %v13936_v25  ;;  %v10605_v43 = vunpack.i.l.bf16 %v13936_v25 }
 0x2bf   :  { %v10711_v56 = vunpack.i.h.bf16 %v10709_v51  ;;  %v10710_v58 = vunpack.i.l.bf16 %v10709_v51  ;;  %v10291_v28 = vpack.c.bf16 %v2770_v23, %v2763_v59  ;;  %v10754_v12 = vpop.permute.xlu0 %10753  ;;  %v10576_v3 = vunpack.i.h.bf16 %v13910_v11 }
 0x2c0   :  { %v10756_v30 = vunpack.i.h.bf16 %v10754_v12  ;;  %v10755_v29 = vunpack.i.l.bf16 %v10754_v12  ;;  %v10575_v2 = vunpack.i.l.bf16 %v13910_v11  ;;  %v10611_v11 = vunpack.i.h.bf16 %v13942_v38 }
 0x2c1   :  { %v2028_v22 = vsel %vm782_vm12, %v2027_v63, %v10710_v58  ;;  %v2035_v57 = vsel %vm782_vm12, %v2034_v37, %v10711_v56  ;;  %2779 = vst [vmem:[#allocation3 + $0x40] sm:$0x33] %v10291_v28  ;;  %v10610_v56 = vunpack.i.l.bf16 %v13942_v38  ;;  %v10581_v63 = vunpack.i.h.bf16 %v13914_v39 }
 0x2c2   :  { %v10288_v18 = vpack.c.bf16 %v2035_v57, %v2028_v22  ;;  %v10714_v21 = vpop.permute.xlu1 %10713  ;;  %v3242_v54 = vsel %vm770_vm6, %v13736_v16, %v10756_v30  ;;  %v3235_v45 = vsel %vm770_vm6, %v18298_v55, %v10755_v29  ;;  %v10580_v37 = vunpack.i.l.bf16 %v13914_v39 }
 0x2c3   :  { %v10716_v48 = vunpack.i.h.bf16 %v10714_v21  ;;  %v10715_v36 = vunpack.i.l.bf16 %v10714_v21  ;;  %v10759_v31 = vpop.permute.xlu0 %10758  ;;  %v3236_v51 = vsel %vm772_vm7, %v3235_v45, %v10605_v43  ;;  %v3243_v25 = vsel %vm772_vm7, %v3242_v54, %v10606_v7 }
 0x2c4   :  { %v2043_v52 = vrot.slane %v10288_v18, 6  ;;  %v10761_v13 = vunpack.i.h.bf16 %v10759_v31  ;;  %v10760_v49 = vunpack.i.l.bf16 %v10759_v31  ;;  %v10615_v39 = vunpack.i.l.bf16 %v13948_v42 }
 0x2c5   :  { %v2508_v40 = vsel %vm770_vm6, %v13623_v62, %v10716_v48  ;;  %v2501_v47 = vsel %vm770_vm6, %v13651_v15, %v10715_v36  ;;  %v10616_v48 = vunpack.i.h.bf16 %v13948_v42  ;;  %v10586_v55 = vunpack.i.h.bf16 %v13916_v61 }
 0x2c6   :  { %2045 = vst [vmem:[#allocation3 + $0x20] sm:$0xcc] %v2043_v52  ;;  %v10719_v16 = vpop.permute.xlu1 %10718  ;;  %v2502_v62 = vsel %vm772_vm7, %v2501_v47, %v10575_v2  ;;  %v2509_v6 = vsel %vm772_vm7, %v2508_v40, %v10576_v3  ;;  %v3237_v15 = vsel %vm774_vm8, %v3236_v51, %v10760_v49  ;;  %v3244_v10 = vsel %vm774_vm8, %v3243_v25, %v10761_v13 }
 0x2c7   :  { %v10721_v17 = vunpack.i.h.bf16 %v10719_v16  ;;  %v10720_v46 = vunpack.i.l.bf16 %v10719_v16  ;;  %v10764_v0 = vpop.permute.xlu0 %10763  ;;  %v3238_v12 = vsel %vm776_vm9, %v3237_v15, %v10610_v56  ;;  %v3245_v18 = vsel %vm776_vm9, %v3244_v10, %v10611_v11  ;;  %v18299_v10 = vld [vmem:[#allocation55_spill] sm:$0xff] }
 0x2c8   :  { %v10766_v23 = vunpack.i.h.bf16 %v10764_v0  ;;  %v10765_v22 = vunpack.i.l.bf16 %v10764_v0  ;;  %v10585_v45 = vunpack.i.l.bf16 %v13916_v61  ;;  %v3826_v61 = vcombine.low %v14014_v33, %v14070_v24 }
 0x2c9   :  { %v2503_v58 = vsel %vm774_vm8, %v2502_v62, %v10720_v46  ;;  %v2510_v9 = vsel %vm774_vm8, %v2509_v6, %v10721_v17  ;;  %v14132_v62 = vrot.slane %v3810_v8, %v11969_v26  ;;  %v3861_v8 = vrot.slane %v3847_v1, %v18294_v4 }
 0x2ca   :  { %v10724_v59 = vpop.permute.xlu1 %10723  ;;  %v2504_v38 = vsel %vm776_vm9, %v2503_v58, %v10580_v37  ;;  %v2511_v21 = vsel %vm776_vm9, %v2510_v9, %v10581_v63  ;;  %v3239_v30 = vsel %vm778_vm10, %v3238_v12, %v10765_v22  ;;  %v3246_v29 = vsel %vm778_vm10, %v3245_v18, %v10766_v23 }
 0x2cb   :  { %v10726_v57 = vunpack.i.h.bf16 %v10724_v59  ;;  %v10725_v28 = vunpack.i.l.bf16 %v10724_v59  ;;  %v10769_v54 = vpop.permute.xlu0 %10768  ;;  %v3240_v3 = vsel %vm780_vm11, %v3239_v30, %v10615_v39  ;;  %v3247_v2 = vsel %vm780_vm11, %v3246_v29, %v10616_v48 }
 0x2cc   :  { %v10771_v43 = vunpack.i.h.bf16 %v10769_v54  ;;  %v10770_v40 = vunpack.i.l.bf16 %v10769_v54  ;;  %v3854_v58 = vrot.slane %v3846_v27, %v18294_v4  ;;  %v3827_v22 = vcombine.high %v14014_v33, %v14070_v24 }
 0x2cd   :  { %v2505_v36 = vsel %vm778_vm10, %v2504_v38, %v10725_v28  ;;  %v2512_v52 = vsel %vm778_vm10, %v2511_v21, %v10726_v57  ;;  %v10621_v57 = vunpack.i.h.bf16 %v13920_v35  ;;  %v10620_v44 = vunpack.i.l.bf16 %v13920_v35 }
 0x2ce   :  { %v2506_v42 = vsel %vm780_vm11, %v2505_v36, %v10585_v45  ;;  %v2513_v16 = vsel %vm780_vm11, %v2512_v52, %v10586_v55  ;;  %v3241_v13 = vsel %vm782_vm12, %v3240_v3, %v10770_v40  ;;  %v3248_v49 = vsel %vm782_vm12, %v3247_v2, %v10771_v43  ;;  %v4992_v43 = vld [vmem:[#allocation3 + $0x40] sm:$0x33] }
 0x2cf   :  { %v10729_v7 = vpop.permute.xlu1 %10728  ;;  %v10293_v51 = vpack.c.bf16 %v3248_v49, %v3241_v13  ;;  %v3769_v25 = vpop.permute.xlu0 %3768  ;;  %v3825_v33 = vrot.slane %v3811_v41, %v11969_v26  ;;  %v10626_v29 = vunpack.i.h.bf16 %v13924_v53  ;;  %v10625_v48 = vunpack.i.l.bf16 %v13924_v53 }
 0x2d0   :  { %v10731_v47 = vunpack.i.h.bf16 %v10729_v7  ;;  %v10730_v31 = vunpack.i.l.bf16 %v10729_v7  ;;  %v3862_v11 = vcombine.low %v18299_v10, %v3769_v25  ;;  %v3863_v56 = vcombine.high %v18299_v10, %v3769_v25 }
 0x2d1   :  { %v3256_v9 = vrot.slane %v10293_v51, 6  ;;  %v3834_v7 = vrot.slane %v3826_v61, %v11969_v26  ;;  %v3841_v40 = vrot.slane %v3827_v22, %v11969_v26  ;;  %v10631_v2 = vunpack.i.h.bf16 %v13928_v5 }
 0x2d2   :  { %v2507_v17 = vsel %vm782_vm12, %v2506_v42, %v10730_v31  ;;  %v2514_v46 = vsel %vm782_vm12, %v2513_v16, %v10731_v47  ;;  %v3870_v59 = vrot.slane %v3862_v11, %v18294_v4  ;;  %v3877_v23 = vrot.slane %v3863_v56, %v18294_v4 }
 0x2d3   :  { %v10290_v6 = vpack.c.bf16 %v2514_v46, %v2507_v17  ;;  %v10774_v15 = vpop.permute.xlu1 %10773  ;;  %3258 = vst [vmem:[#allocation3 + $0x8] sm:$0xcc] %v3256_v9  ;;  %v3843_v61 = vcombine.high %v3825_v33, %v18156_v14  ;;  %v10630_v17 = vunpack.i.l.bf16 %v13928_v5  ;;  %v10242_v25 = vcombine.high %v4992_v43, %v4992_v43 }
 0x2d4   :  { %v10776_v0 = vunpack.i.h.bf16 %v10774_v15  ;;  %v10775_v63 = vunpack.i.l.bf16 %v10774_v15  ;;  %v3878_v34 = vcombine.low %v3854_v58, %v3870_v59  ;;  %v3879_v1 = vcombine.high %v3854_v58, %v3870_v59 }
 0x2d5   :  { %v2522_v37 = vrot.slane %v10290_v6, 6  ;;  %v3894_v12 = vcombine.low %v3861_v8, %v3877_v23  ;;  %v3895_v32 = vcombine.high %v3861_v8, %v3877_v23  ;;  %v10241_v11 = vcombine.low %v4992_v43, %v4992_v43 }
 0x2d6   :  { %v3498_v27 = vsel %vm770_vm6, %v13657_v50, %v10776_v0  ;;  %v3491_v28 = vsel %vm770_vm6, %v13585_v20, %v10775_v63  ;;  %v3842_v50 = vcombine.high %v14132_v62, %v18156_v14  ;;  %v14161_v24 = vrot.slane %v3878_v34, %v11969_v26  ;;  %v3995_v34 = vld [vmem:[#allocation2 + $0x79] sm:$0xff] }
 0x2d7   :  { %2524 = vst [vmem:[#allocation3 + $0x30] sm:$0xcc] %v2522_v37  ;;  %v10779_v18 = vpop.permute.xlu1 %10778  ;;  %v3492_v20 = vsel %vm772_vm7, %v3491_v28, %v10620_v44  ;;  %v3499_v35 = vsel %vm772_vm7, %v3498_v27, %v10621_v57  ;;  %v3893_v30 = vrot.slane %v3879_v1, %v11969_v26  ;;  %v3902_v54 = vrot.slane %v3894_v12, %v11969_v26  ;;  %v3993_v28 = vld [vmem:[#allocation2 + $0x61] sm:$0xff] }
 0x2d8   :  { %v10781_v38 = vunpack.i.h.bf16 %v10779_v18  ;;  %v10780_v21 = vunpack.i.l.bf16 %v10779_v18  ;;  %v3910_v52 = vcombine.high %v14161_v24, %v18156_v14  ;;  %v3909_v6 = vrot.slane %v3895_v32, %v11969_v26  ;;  %v3994_v18 = vld [vmem:[#allocation2 + $0x69] sm:$0xff] }
 0x2d9   :  { %v10797_v36 = vpack.i.bf16 %v3893_v30, %v3825_v33  ;;  %v3911_v3 = vcombine.high %v3893_v30, %v18156_v14  ;;  %v10807_v51 = vpack.i.bf16 %v3902_v54, %v3834_v7  ;;  %v3912_v56 = vcombine.high %v3902_v54, %v18156_v14  ;;  %v3999_v33 = vld [vmem:[#allocation2 + $0xa9] sm:$0xff] }
 0x2da   :  { %v3493_v39 = vsel %vm774_vm8, %v3492_v20, %v10780_v21  ;;  %v3500_v19 = vsel %vm774_vm8, %v3499_v35, %v10781_v38  ;;  %v10792_v31 = vpack.i.bf16 %v3910_v52, %v3842_v50  ;;  %v10817_v37 = vpack.i.bf16 %v3909_v6, %v3841_v40  ;;  %v3997_v38 = vld [vmem:[#allocation2 + $0x91] sm:$0xff]  ;;  %v3996_v21 = vld [vmem:[#allocation2 + $0x81] sm:$0xff]  ;;  %v3998_v50 = vld [vmem:[#allocation2 + $0x99] sm:$0xff] }
 0x2db   :  { %v10784_v41 = vpop.permute.xlu1 %10783  ;;  %v3494_v53 = vsel %vm776_vm9, %v3493_v39, %v10625_v48  ;;  %v3501_v47 = vsel %vm776_vm9, %v3500_v19, %v10626_v29  ;;  %10798 = vrot.lane.b32.xlu0 %v10797_v36, %s11759_s0  ;;  %v10802_v5 = vpack.i.bf16 %v3911_v3, %v3843_v61  ;;  %v3844_v59 = vcombine.high %v3834_v7, %v18156_v14 }
 0x2dc   :  { %v10786_v55 = vunpack.i.h.bf16 %v10784_v41  ;;  %v10785_v45 = vunpack.i.l.bf16 %v10784_v41  ;;  %10793 = vrot.lane.b32.xlu1 %v10792_v31, %s11761_s12  ;;  %v5056_v23 = vsel %vm5054_vm13, %v10241_v11, 0  ;;  %v3913_v57 = vcombine.high %v3909_v6, %v18156_v14 }
 0x2dd   :  { %v10812_v22 = vpack.i.bf16 %v3912_v56, %v3844_v59  ;;  %v3845_v27 = vcombine.high %v3841_v40, %v18156_v14  ;;  %v14227_v59 = vld [vmem:[#allocation2 + $0xaa] sm:$0xff] }
 0x2de   :  { %v3495_v42 = vsel %vm778_vm10, %v3494_v53, %v10785_v45  ;;  %v3502_v16 = vsel %vm778_vm10, %v3501_v47, %v10786_v55  ;;  %v11633_v13 = vld [vmem:[#allocation3 + $0x24] ss:$16 sps:$4 sm:$0xff]   ;;  %v11635_v49 = vld [vmem:[#allocation3 + $0x20] ss:$16 sps:$4 sm:$0xff]  }
 0x2df   :  { %v10789_v46 = vpop.permute.xlu1 %10788  ;;  %5069 = vmatprep.subr.bf16.mxu0 %v11633_v13  ;;  %v3496_v58 = vsel %vm780_vm11, %v3495_v42, %v10630_v17  ;;  %v3503_v9 = vsel %vm780_vm11, %v3502_v16, %v10631_v2  ;;  %10808 = vrot.lane.b32.xlu0 %v10807_v51, %s11757_s9  ;;  %v10822_v44 = vpack.i.bf16 %v3913_v57, %v3845_v27  ;;  %v14232_v27 = vld [vmem:[#allocation2 + $0x7a] sm:$0xff] }
 0x2e0   :  { %v10791_v15 = vunpack.i.h.bf16 %v10789_v46  ;;  %v10790_v10 = vunpack.i.l.bf16 %v10789_v46  ;;  %5070 = vmatpush1.bf16.msra.mxu0 %v11635_v49  ;;  %10803 = vrot.lane.b32.xlu1 %v10802_v5, %s11760_s11 }
 0x2e1   :  { %10245 = vmatprep.subr.msk.bf16.mxu0 %vm5054_vm13, %v10242_v25 }
 0x2e2   :  { %v3497_v0 = vsel %vm782_vm12, %v3496_v58, %v10790_v10  ;;  %v3504_v63 = vsel %vm782_vm12, %v3503_v9, %v10791_v15 }
 0x2e3   :  { %v10294_v8 = vpack.c.bf16 %v3504_v63, %v3497_v0  ;;  %10818 = vrot.lane.b32.xlu0 %v10817_v37, %s11758_s10 }
 0x2e4   :  { %5072 = vmatpush1.bf16.msra.mxu0 %v5056_v23  ;;  %10813 = vrot.lane.b32.xlu1 %v10812_v22, %s11755_s7  ;;  %v14229_v23 = vld [vmem:[#allocation2 + $0xb2] sm:$0xff] }
 0x2e5   :  { %3513 = vst [vmem:[#allocation3 + $0x18] sm:$0x33] %v10294_v8 }
 0x2e7   :  { %4009 = vrot.lane.b32.xlu0 %v3993_v28, %s11766_s14 }
 0x2e8   :  { %10823 = vrot.lane.b32.xlu1 %v10822_v44, %s11756_s8 }
 0x2eb   :  { %4013 = vrot.lane.b32.xlu0 %v3995_v34, %s11766_s14  ;;  %v14234_v34 = vld [vmem:[#allocation2 + $0x82] sm:$0xff] }
 0x2ec   :  { %v11638_v1 = vld [vmem:[#allocation3 + $0xc] ss:$16 sps:$4 sm:$0xff]   ;;  %v11640_v12 = vld [vmem:[#allocation3 + $0x8] ss:$16 sps:$4 sm:$0xff]   ;;  %4011 = vrot.lane.b32.xlu1 %v3994_v18, %s11766_s14 }
 0x2ed   :  { %5108 = vmatprep.subr.bf16.mxu1 %v11638_v1  ;;  %v14236_v1 = vld [vmem:[#allocation2 + $0x92] sm:$0xff] }
 0x2ee   :  { %5109 = vmatpush1.bf16.msra.mxu1 %v11640_v12  ;;  %v14238_v12 = vld [vmem:[#allocation2 + $0x9a] sm:$0xff] }
 0x2ef   :  { %4017 = vrot.lane.b32.xlu0 %v3997_v38, %s11766_s14 }
 0x2f0   :  { %4015 = vrot.lane.b32.xlu1 %v3996_v21, %s11766_s14  ;;  %v4273_v21 = vcombine.low %v14232_v27, %v14227_v59 }
 0x2f3   :  { %4021 = vrot.lane.b32.xlu0 %v3999_v33, %s11766_s14  ;;  %v4341_v33 = vcombine.low %v14234_v34, %v14229_v23 }
 0x2f4   :  { %4019 = vrot.lane.b32.xlu1 %v3998_v50, %s11766_s14 }
 0x2f8   :  { %4023 = vrot.lane.b32.xlu1 %v13868_v60, %s11766_s14 }
 0x34d   :  { %v10799_v20 = vpop.permute.xlu0 %10798 }
 0x34e   :  { %v10794_v35 = vpop.permute.xlu1 %10793  ;;  %v10801_v32 = vunpack.i.h.bf16 %v10799_v20  ;;  %v10800_v41 = vunpack.i.l.bf16 %v10799_v20 }
 0x34f   :  { %v10796_v30 = vunpack.i.h.bf16 %v10794_v35  ;;  %v10795_v29 = vunpack.i.l.bf16 %v10794_v35 }
 0x351   :  { %v10809_v48 = vpop.permute.xlu0 %10808  ;;  %v3977_v39 = vsel %vm770_vm6, %v14161_v24, %v10796_v30  ;;  %v3970_v19 = vsel %vm770_vm6, %v14132_v62, %v10795_v29  ;;  %v14244_v30 = vld [vmem:[#allocation2 + $0x62] sm:$0xff]  ;;  %v14246_v29 = vld [vmem:[#allocation2 + $0x6a] sm:$0xff] }
 0x352   :  { %v10804_v36 = vpop.permute.xlu1 %10803  ;;  %v3971_v55 = vsel %vm772_vm7, %v3970_v19, %v10800_v41  ;;  %v3978_v60 = vsel %vm772_vm7, %v3977_v39, %v10801_v32  ;;  %v10811_v40 = vunpack.i.h.bf16 %v10809_v48  ;;  %v10810_v53 = vunpack.i.l.bf16 %v10809_v48 }
 0x353   :  { %v10806_v52 = vunpack.i.h.bf16 %v10804_v36  ;;  %v10805_v54 = vunpack.i.l.bf16 %v10804_v36  ;;  %v4257_v19 = vcombine.low %v14244_v30, %v14236_v1  ;;  %v4325_v32 = vcombine.low %v14246_v29, %v14238_v12 }
 0x355   :  { %v10819_v45 = vpop.permute.xlu0 %10818  ;;  %v3972_v7 = vsel %vm774_vm8, %v3971_v55, %v10805_v54  ;;  %v3979_v43 = vsel %vm774_vm8, %v3978_v60, %v10806_v52  ;;  %v4281_v60 = vrot.slane %v4273_v21, %v18294_v4 }
 0x356   :  { %v10814_v24 = vpop.permute.xlu1 %10813  ;;  %v3973_v62 = vsel %vm776_vm9, %v3972_v7, %v10810_v53  ;;  %v3980_v3 = vsel %vm776_vm9, %v3979_v43, %v10811_v40  ;;  %v10821_v13 = vunpack.i.h.bf16 %v10819_v45  ;;  %v10820_v49 = vunpack.i.l.bf16 %v10819_v45 }
 0x357   :  { %v10816_v47 = vunpack.i.h.bf16 %v10814_v24  ;;  %v10815_v31 = vunpack.i.l.bf16 %v10814_v24  ;;  %v4349_v45 = vrot.slane %v4341_v33, %v18294_v4  ;;  %v4265_v24 = vrot.slane %v4257_v19, %v18294_v4 }
 0x359   :  { %v4010_v2 = vpop.permute.xlu0 %4009  ;;  %v3974_v42 = vsel %vm778_vm10, %v3973_v62, %v10815_v31  ;;  %v3981_v16 = vsel %vm778_vm10, %v3980_v3, %v10816_v47  ;;  %v4333_v47 = vrot.slane %v4325_v32, %v18294_v4  ;;  %v4274_v31 = vcombine.high %v14232_v27, %v14227_v59 }
 0x35a   :  { %v10824_v61 = vpop.permute.xlu1 %10823  ;;  %v3975_v51 = vsel %vm780_vm11, %v3974_v42, %v10820_v49  ;;  %v3982_v25 = vsel %vm780_vm11, %v3981_v16, %v10821_v13  ;;  %v4289_v13 = vcombine.low %v4265_v24, %v4281_v60 }
 0x35b   :  { %v10826_v17 = vunpack.i.h.bf16 %v10824_v61  ;;  %v10825_v46 = vunpack.i.l.bf16 %v10824_v61  ;;  %v4357_v49 = vcombine.low %v4333_v47, %v4349_v45  ;;  %v4342_v61 = vcombine.high %v14234_v34, %v14229_v23 }
 0x35d   :  { %v4014_v6 = vpop.permute.xlu0 %4013  ;;  %v3976_v15 = vsel %vm782_vm12, %v3975_v51, %v10825_v46  ;;  %v3983_v10 = vsel %vm782_vm12, %v3982_v25, %v10826_v17 }
 0x35e   :  { %v10296_v11 = vpack.c.bf16 %v3983_v10, %v3976_v15  ;;  %v4012_v56 = vpop.permute.xlu1 %4011  ;;  %v4288_v15 = vrot.slane %v4274_v31, %v18294_v4  ;;  %v4326_v10 = vcombine.high %v14246_v29, %v14238_v12 }
 0x360   :  { %3992 = vst [vmem:[#allocation3 + $0x28] sm:$0x33] %v10296_v11  ;;  %v4340_v33 = vrot.slane %v4326_v10, %v18294_v4 }
 0x361   :  { %v4018_v58 = vpop.permute.xlu0 %4017 }
 0x362   :  { %v4016_v9 = vpop.permute.xlu1 %4015  ;;  %v4033_v5 = vcombine.low %v4010_v2, %v4018_v58  ;;  %v4034_v50 = vcombine.high %v4010_v2, %v4018_v58 }
 0x364   :  { %v4041_v22 = vrot.slane %v4033_v5, %v18294_v4  ;;  %v4048_v7 = vrot.slane %v4034_v50, %v18294_v4  ;;  %v14288_v5 = vrot.slane %v4289_v13, %v11969_v26 }
 0x365   :  { %v4022_v0 = vpop.permute.xlu0 %4021 }
 0x366   :  { %v4049_v63 = vcombine.low %v4014_v6, %v4022_v0  ;;  %v4020_v8 = vpop.permute.xlu1 %4019  ;;  %v4050_v57 = vcombine.high %v4014_v6, %v4022_v0  ;;  %v4258_v6 = vcombine.high %v14244_v30, %v14236_v1  ;;  %v4290_v0 = vcombine.high %v4265_v24, %v4281_v60 }
 0x367   :  { %v4101_v28 = vcombine.low %v4012_v56, %v4020_v8  ;;  %v4102_v44 = vcombine.high %v4012_v56, %v4020_v8  ;;  %v4356_v8 = vrot.slane %v4342_v61, %v18294_v4  ;;  %v4321_v50 = vcombine.high %v14288_v5, %v18156_v14 }
 0x368   :  { %v4057_v37 = vrot.slane %v4049_v63, %v18294_v4  ;;  %v4064_v48 = vrot.slane %v4050_v57, %v18294_v4  ;;  %v4358_v63 = vcombine.high %v4333_v47, %v4349_v45 }
 0x369   :  { %v4109_v41 = vrot.slane %v4101_v28, %v18294_v4  ;;  %v4116_v36 = vrot.slane %v4102_v44, %v18294_v4  ;;  %v14295_v28 = vrot.slane %v4357_v49, %v11969_v26  ;;  %v4272_v44 = vrot.slane %v4258_v6, %v18294_v4  ;;  %v14363_v6 = vld [vmem:[%s17793_s1] sm:$0x3] }
 0x36a   :  { %v4065_v18 = vcombine.low %v4041_v22, %v4057_v37  ;;  %v4024_v38 = vpop.permute.xlu1 %4023  ;;  %v4066_v39 = vcombine.high %v4041_v22, %v4057_v37  ;;  %v4081_v62 = vcombine.low %v4048_v7, %v4064_v48  ;;  %v4082_v11 = vcombine.high %v4048_v7, %v4064_v48 }
 0x36b   :  { %v4117_v20 = vcombine.low %v4016_v9, %v4024_v38  ;;  %v4118_v35 = vcombine.high %v4016_v9, %v4024_v38  ;;  %v4305_v48 = vcombine.low %v4272_v44, %v4288_v15  ;;  %v4389_v32 = vcombine.high %v14295_v28, %v18156_v14 }
 0x36c   :  { %v14258_v55 = vrot.slane %v4065_v18, %v11969_v26  ;;  %v4080_v2 = vrot.slane %v4066_v39, %v11969_v26  ;;  %v4089_v58 = vrot.slane %v4081_v62, %v11969_v26  ;;  %v4096_v38 = vrot.slane %v4082_v11, %v11969_v26 }
 0x36d   :  { %v4125_v52 = vrot.slane %v4117_v20, %v18294_v4  ;;  %v4132_v54 = vrot.slane %v4118_v35, %v18294_v4  ;;  %v4304_v20 = vrot.slane %v4290_v0, %v11969_v26  ;;  %v4372_v35 = vrot.slane %v4358_v63, %v11969_v26 }
 0x36e   :  { %v4097_v16 = vcombine.high %v14258_v55, %v18156_v14  ;;  %v4098_v22 = vcombine.high %v4080_v2, %v18156_v14  ;;  %v4099_v19 = vcombine.high %v4089_v58, %v18156_v14  ;;  %v4313_v60 = vrot.slane %v4305_v48, %v11969_v26 }
 0x36f   :  { %v4133_v43 = vcombine.low %v4109_v41, %v4125_v52  ;;  %v4134_v40 = vcombine.high %v4109_v41, %v4125_v52  ;;  %v4149_v53 = vcombine.low %v4116_v36, %v4132_v54  ;;  %v4150_v17 = vcombine.high %v4116_v36, %v4132_v54 }
 0x370   :  { %v4373_v41 = vcombine.low %v4340_v33, %v4356_v8  ;;  %v4322_v54 = vcombine.high %v4304_v20, %v18156_v14  ;;  %v4306_v45 = vcombine.high %v4272_v44, %v4288_v15  ;;  %v4374_v7 = vcombine.high %v4340_v33, %v4356_v8 }
 0x371   :  { %v14268_v3 = vrot.slane %v4133_v43, %v11969_v26  ;;  %v4148_v42 = vrot.slane %v4134_v40, %v11969_v26  ;;  %v4157_v25 = vrot.slane %v4149_v53, %v11969_v26  ;;  %v4164_v57 = vrot.slane %v4150_v17, %v11969_v26 }
 0x372   :  { %v10862_v43 = vpack.i.bf16 %v4389_v32, %v4321_v50  ;;  %v4100_v40 = vcombine.high %v4096_v38, %v18156_v14  ;;  %v4390_v53 = vcombine.high %v4372_v35, %v18156_v14  ;;  %v4381_v24 = vrot.slane %v4373_v41, %v11969_v26 }
 0x373   :  { %v10832_v46 = vpack.i.bf16 %v4148_v42, %v4080_v2  ;;  %v4165_v51 = vcombine.high %v14268_v3, %v18156_v14  ;;  %v4166_v9 = vcombine.high %v4148_v42, %v18156_v14  ;;  %v10842_v37 = vpack.i.bf16 %v4157_v25, %v4089_v58 }
 0x374   :  { %v4167_v21 = vcombine.high %v4157_v25, %v18156_v14  ;;  %v10852_v39 = vpack.i.bf16 %v4164_v57, %v4096_v38  ;;  %v4168_v52 = vcombine.high %v4164_v57, %v18156_v14  ;;  %v4323_v31 = vcombine.high %v4313_v60, %v18156_v14 }
 0x375   :  { %10833 = vrot.lane.b32.xlu1 %v10832_v46, %s11759_s0  ;;  %v10827_v56 = vpack.i.bf16 %v4165_v51, %v4097_v16  ;;  %v10837_v18 = vpack.i.bf16 %v4166_v9, %v4098_v22  ;;  %v10872_v62 = vpack.i.bf16 %v4390_v53, %v4322_v54  ;;  %v4391_v2 = vcombine.high %v4381_v24, %v18156_v14 }
 0x376   :  { %v10847_v36 = vpack.i.bf16 %v4167_v21, %v4099_v19  ;;  %v10857_v47 = vpack.i.bf16 %v4168_v52, %v4100_v40  ;;  %v4320_v42 = vrot.slane %v4306_v45, %v11969_v26  ;;  %v4388_v16 = vrot.slane %v4374_v7, %v11969_v26 }
 0x377   :  { %10828 = vrot.lane.b32.xlu0 %v10827_v56, %s11761_s12  ;;  %v10867_v13 = vpack.i.bf16 %v4372_v35, %v4304_v20  ;;  %v10882_v49 = vpack.i.bf16 %v4391_v2, %v4323_v31  ;;  %v10877_v46 = vpack.i.bf16 %v4381_v24, %v4313_v60 }
 0x378   :  { %v4324_v61 = vcombine.high %v4320_v42, %v18156_v14  ;;  %v4392_v17 = vcombine.high %v4388_v16, %v18156_v14  ;;  %v10887_v25 = vpack.i.bf16 %v4388_v16, %v4320_v42 }
 0x379   :  { %10843 = vrot.lane.b32.xlu1 %v10842_v37, %s11757_s9 }
 0x37a   :  { %v10892_v51 = vpack.i.bf16 %v4392_v17, %v4324_v61 }
 0x37b   :  { %10838 = vrot.lane.b32.xlu0 %v10837_v18, %s11760_s11 }
 0x37d   :  { %10853 = vrot.lane.b32.xlu1 %v10852_v39, %s11758_s10 }
 0x37f   :  { %10848 = vrot.lane.b32.xlu0 %v10847_v36, %s11755_s7 }
 0x381   :  { %10863 = vrot.lane.b32.xlu1 %v10862_v43, %s11761_s12 }
 0x383   :  { %10858 = vrot.lane.b32.xlu0 %v10857_v47, %s11756_s8 }
 0x385   :  { %10873 = vrot.lane.b32.xlu1 %v10872_v62, %s11760_s11 }
 0x387   :  { %10868 = vrot.lane.b32.xlu0 %v10867_v13, %s11759_s0 }
 0x389   :  { %10883 = vrot.lane.b32.xlu1 %v10882_v49, %s11755_s7 }
 0x38b   :  { %10878 = vrot.lane.b32.xlu0 %v10877_v46, %s11757_s9 }
 0x38d   :  { %10893 = vrot.lane.b32.xlu1 %v10892_v51, %s11756_s8 }
 0x38f   :  { %10888 = vrot.lane.b32.xlu0 %v10887_v25, %s11758_s10 }
 0x391   :  { %4490 = vrot.lane.b32.xlu1 %v14246_v29, %s11767_s15 }
 0x393   :  { %4488 = vrot.lane.b32.xlu0 %v14244_v30, %s11767_s15 }
 0x395   :  { %4494 = vrot.lane.b32.xlu1 %v14234_v34, %s11767_s15 }
 0x397   :  { %4492 = vrot.lane.b32.xlu0 %v14232_v27, %s11767_s15 }
 0x399   :  { %4498 = vrot.lane.b32.xlu1 %v14238_v12, %s11767_s15 }
 0x39b   :  { %4496 = vrot.lane.b32.xlu0 %v14236_v1, %s11767_s15 }
 0x39d   :  { %4502 = vrot.lane.b32.xlu1 %v14229_v23, %s11767_s15 }
 0x39f   :  { %4500 = vrot.lane.b32.xlu0 %v14227_v59, %s11767_s15 }
 0x3a1   :  { %4746 = vrot.lane.b32.xlu1 %v14246_v29, %s11766_s14  ;;  %v11768_v29 = vmov 0  }
 0x3a2   :  { %5099 = vmatprep.mubr.bf16.mxu0 %v11768_v29  ;;  %10967 = vset.pattern.permute.xlu0 %v11768_v29 }
 0x3a3   :  { %4744 = vrot.lane.b32.xlu0 %v14244_v30, %s11766_s14  ;;  %10246 = vmatmul.mubr.msk.bf16.vlgmr.msra.gmra.mrb[0].mxu0 %vm5050_vm14, %v14363_v6 }
 0x3a4   :  { %5140 = vmatprep.mubr.bf16.mxu1 %v11768_v29  ;;  %10113 = vmatprep.mubr.bf16.mxu0 %v11768_v29 }
 0x3a5   :  { %4750 = vrot.lane.b32.xlu1 %v14234_v34, %s11766_s14 }
 0x3a7   :  { %4748 = vrot.lane.b32.xlu0 %v14232_v27, %s11766_s14 }
 0x3a9   :  { %4754 = vrot.lane.b32.xlu1 %v14238_v12, %s11766_s14 }
 0x3ab   :  { %4752 = vrot.lane.b32.xlu0 %v14236_v1, %s11766_s14 }
 0x3ad   :  { %4758 = vrot.lane.b32.xlu1 %v14229_v23, %s11766_s14 }
 0x3af   :  { %4756 = vrot.lane.b32.xlu0 %v14227_v59, %s11766_s14 }
 0x3e7   :  { %v10834_v27 = vpop.permute.xlu1 %10833 }
 0x3e8   :  { %v10836_v10 = vunpack.i.h.bf16 %v10834_v27  ;;  %v10835_v11 = vunpack.i.l.bf16 %v10834_v27 }
 0x3e9   :  { %v10829_v34 = vpop.permute.xlu0 %10828 }
 0x3ea   :  { %v10831_v1 = vunpack.i.h.bf16 %v10829_v34  ;;  %v10830_v12 = vunpack.i.l.bf16 %v10829_v34 }
 0x3eb   :  { %v10844_v30 = vpop.permute.xlu1 %10843 }
 0x3ec   :  { %v4232_v15 = vsel %vm770_vm6, %v14268_v3, %v10831_v1  ;;  %v4225_v23 = vsel %vm770_vm6, %v14258_v55, %v10830_v12  ;;  %v10846_v22 = vunpack.i.h.bf16 %v10844_v30  ;;  %v10845_v57 = vunpack.i.l.bf16 %v10844_v30 }
 0x3ed   :  { %v10839_v56 = vpop.permute.xlu0 %10838  ;;  %v4226_v0 = vsel %vm772_vm7, %v4225_v23, %v10835_v11  ;;  %v4233_v59 = vsel %vm772_vm7, %v4232_v15, %v10836_v10 }
 0x3ee   :  { %v10841_v58 = vunpack.i.h.bf16 %v10839_v56  ;;  %v10840_v9 = vunpack.i.l.bf16 %v10839_v56 }
 0x3ef   :  { %v10854_v63 = vpop.permute.xlu1 %10853 }
 0x3f0   :  { %v4227_v8 = vsel %vm774_vm8, %v4226_v0, %v10840_v9  ;;  %v4234_v37 = vsel %vm774_vm8, %v4233_v59, %v10841_v58  ;;  %v10856_v20 = vunpack.i.h.bf16 %v10854_v63  ;;  %v10855_v35 = vunpack.i.l.bf16 %v10854_v63 }
 0x3f1   :  { %v10849_v3 = vpop.permute.xlu0 %10848  ;;  %v4228_v55 = vsel %vm776_vm9, %v4227_v8, %v10845_v57  ;;  %v4235_v38 = vsel %vm776_vm9, %v4234_v37, %v10846_v22 }
 0x3f2   :  { %v10851_v44 = vunpack.i.h.bf16 %v10849_v3  ;;  %v10850_v18 = vunpack.i.l.bf16 %v10849_v3 }
 0x3f3   :  { %v10864_v21 = vpop.permute.xlu1 %10863 }
 0x3f4   :  { %v4229_v33 = vsel %vm778_vm10, %v4228_v55, %v10850_v18  ;;  %v4236_v50 = vsel %vm778_vm10, %v4235_v38, %v10851_v44  ;;  %v10866_v32 = vunpack.i.h.bf16 %v10864_v21  ;;  %v10865_v41 = vunpack.i.l.bf16 %v10864_v21 }
 0x3f5   :  { %v10859_v48 = vpop.permute.xlu0 %10858  ;;  %v4230_v36 = vsel %vm780_vm11, %v4229_v33, %v10855_v35  ;;  %v4237_v52 = vsel %vm780_vm11, %v4236_v50, %v10856_v20 }
 0x3f6   :  { %v10861_v39 = vunpack.i.h.bf16 %v10859_v48  ;;  %v10860_v19 = vunpack.i.l.bf16 %v10859_v48  ;;  %v4456_v24 = vsel %vm770_vm6, %v14295_v28, %v10866_v32  ;;  %v4449_v47 = vsel %vm770_vm6, %v14288_v5, %v10865_v41 }
 0x3f7   :  { %v10874_v54 = vpop.permute.xlu1 %10873 }
 0x3f8   :  { %v4231_v60 = vsel %vm782_vm12, %v4230_v36, %v10860_v19  ;;  %v4238_v45 = vsel %vm782_vm12, %v4237_v52, %v10861_v39  ;;  %v10876_v16 = vunpack.i.h.bf16 %v10874_v54  ;;  %v10875_v13 = vunpack.i.l.bf16 %v10874_v54 }
 0x3f9   :  { %v10297_v7 = vpack.c.bf16 %v4238_v45, %v4231_v60  ;;  %v10869_v43 = vpop.permute.xlu0 %10868 }
 0x3fa   :  { %v10871_v40 = vunpack.i.h.bf16 %v10869_v43  ;;  %v10870_v53 = vunpack.i.l.bf16 %v10869_v43 }
 0x3fb   :  { %v4246_v31 = vrot.slane %v10297_v7, 6  ;;  %v10884_v62 = vpop.permute.xlu1 %10883 }
 0x3fc   :  { %v4457_v2 = vsel %vm772_vm7, %v4456_v24, %v10871_v40  ;;  %v4450_v42 = vsel %vm772_vm7, %v4449_v47, %v10870_v53  ;;  %v10886_v27 = vunpack.i.h.bf16 %v10884_v62  ;;  %v10885_v34 = vunpack.i.l.bf16 %v10884_v62 }
 0x3fd   :  { %4248 = vst [vmem:[#allocation3 + $0x28] sm:$0xcc] %v4246_v31  ;;  %v10879_v49 = vpop.permute.xlu0 %10878  ;;  %v4451_v46 = vsel %vm774_vm8, %v4450_v42, %v10875_v13  ;;  %v4458_v51 = vsel %vm774_vm8, %v4457_v2, %v10876_v16 }
 0x3fe   :  { %v10881_v61 = vunpack.i.h.bf16 %v10879_v49  ;;  %v10880_v17 = vunpack.i.l.bf16 %v10879_v49 }
 0x3ff   :  { %v10894_v28 = vpop.permute.xlu1 %10893 }
 0x400   :  { %v4452_v25 = vsel %vm776_vm9, %v4451_v46, %v10880_v17  ;;  %v4459_v5 = vsel %vm776_vm9, %v4458_v51, %v10881_v61  ;;  %v10896_v15 = vunpack.i.h.bf16 %v10894_v28  ;;  %v10895_v23 = vunpack.i.l.bf16 %v10894_v28 }
 0x401   :  { %v10889_v1 = vpop.permute.xlu0 %10888  ;;  %v4453_v10 = vsel %vm778_vm10, %v4452_v25, %v10885_v34  ;;  %v4460_v11 = vsel %vm778_vm10, %v4459_v5, %v10886_v27 }
 0x402   :  { %v10891_v12 = vunpack.i.h.bf16 %v10889_v1  ;;  %v10890_v30 = vunpack.i.l.bf16 %v10889_v1 }
 0x403   :  { %v4491_v56 = vpop.permute.xlu1 %4490 }
 0x404   :  { %v4454_v58 = vsel %vm780_vm11, %v4453_v10, %v10890_v30  ;;  %v4461_v9 = vsel %vm780_vm11, %v4460_v11, %v10891_v12 }
 0x405   :  { %v4455_v0 = vsel %vm782_vm12, %v4454_v58, %v10895_v23  ;;  %v4462_v59 = vsel %vm782_vm12, %v4461_v9, %v10896_v15  ;;  %v4489_v63 = vpop.permute.xlu0 %4488 }
 0x406   :  { %v10298_v8 = vpack.c.bf16 %v4462_v59, %v4455_v0 }
 0x407   :  { %v4495_v37 = vpop.permute.xlu1 %4494 }
 0x408   :  { %4471 = vst [vmem:[#allocation3 + $0x38] sm:$0x33] %v10298_v8 }
 0x409   :  { %v4493_v22 = vpop.permute.xlu0 %4492 }
 0x40b   :  { %v4499_v57 = vpop.permute.xlu1 %4498 }
 0x40c   :  { %v4580_v44 = vcombine.low %v4491_v56, %v4499_v57  ;;  %v4581_v33 = vcombine.high %v4491_v56, %v4499_v57 }
 0x40d   :  { %v4497_v3 = vpop.permute.xlu0 %4496 }
 0x40e   :  { %v4512_v55 = vcombine.low %v4489_v63, %v4497_v3  ;;  %v4513_v38 = vcombine.high %v4489_v63, %v4497_v3  ;;  %v4588_v35 = vrot.slane %v4580_v44, %v18294_v4  ;;  %v4595_v40 = vrot.slane %v4581_v33, %v18294_v4 }
 0x40f   :  { %v4503_v18 = vpop.permute.xlu1 %4502 }
 0x410   :  { %v4596_v21 = vcombine.low %v4495_v37, %v4503_v18  ;;  %v4597_v50 = vcombine.high %v4495_v37, %v4503_v18  ;;  %v4520_v41 = vrot.slane %v4512_v55, %v18294_v4  ;;  %v4527_v36 = vrot.slane %v4513_v38, %v18294_v4 }
 0x411   :  { %v4501_v20 = vpop.permute.xlu0 %4500 }
 0x412   :  { %v4604_v48 = vrot.slane %v4596_v21, %v18294_v4  ;;  %v4528_v39 = vcombine.low %v4493_v22, %v4501_v20  ;;  %v4529_v19 = vcombine.high %v4493_v22, %v4501_v20  ;;  %v4611_v54 = vrot.slane %v4597_v50, %v18294_v4 }
 0x413   :  { %v14409_v32 = vpop.permute.xlu1 %4746 }
 0x414   :  { %v4612_v52 = vcombine.low %v4588_v35, %v4604_v48  ;;  %v4613_v60 = vcombine.high %v4588_v35, %v4604_v48  ;;  %v4536_v45 = vrot.slane %v4528_v39, %v18294_v4  ;;  %v4543_v7 = vrot.slane %v4529_v19, %v18294_v4 }
 0x415   :  { %v4745_v43 = vpop.permute.xlu0 %4744  ;;  %v4628_v2 = vcombine.low %v4595_v40, %v4611_v54  ;;  %v4629_v5 = vcombine.high %v4595_v40, %v4611_v54 }
 0x416   :  { %v14418_v53 = vrot.slane %v4612_v52, %v11969_v26  ;;  %v4544_v24 = vcombine.low %v4520_v41, %v4536_v45  ;;  %v4545_v47 = vcombine.high %v4520_v41, %v4536_v45  ;;  %v4560_v31 = vcombine.low %v4527_v36, %v4543_v7 }
 0x417   :  { %v4751_v62 = vpop.permute.xlu1 %4750  ;;  %v4627_v49 = vrot.slane %v4613_v60, %v11969_v26  ;;  %v4561_v61 = vcombine.high %v4527_v36, %v4543_v7  ;;  %v4636_v12 = vrot.slane %v4628_v2, %v11969_v26  ;;  %v4643_v58 = vrot.slane %v4629_v5, %v11969_v26 }
 0x418   :  { %v14421_v42 = vrot.slane %v4544_v24, %v11969_v26  ;;  %v4559_v13 = vrot.slane %v4545_v47, %v11969_v26  ;;  %v4644_v28 = vcombine.high %v14418_v53, %v18156_v14  ;;  %v4568_v25 = vrot.slane %v4560_v31, %v11969_v26 }
 0x419   :  { %v4749_v16 = vpop.permute.xlu0 %4748  ;;  %v4645_v10 = vcombine.high %v4627_v49, %v18156_v14  ;;  %v4575_v11 = vrot.slane %v4561_v61, %v11969_v26  ;;  %v4646_v55 = vcombine.high %v4636_v12, %v18156_v14  ;;  %v4647_v41 = vcombine.high %v4643_v58, %v18156_v14 }
 0x41a   :  { %v10902_v46 = vpack.i.bf16 %v4627_v49, %v4559_v13  ;;  %v4576_v51 = vcombine.high %v14421_v42, %v18156_v14  ;;  %v4577_v30 = vcombine.high %v4559_v13, %v18156_v14  ;;  %v10912_v23 = vpack.i.bf16 %v4636_v12, %v4568_v25 }
 0x41b   :  { %v4755_v17 = vpop.permute.xlu1 %4754  ;;  %v4578_v9 = vcombine.high %v4568_v25, %v18156_v14  ;;  %v10922_v18 = vpack.i.bf16 %v4643_v58, %v4575_v11  ;;  %v4579_v33 = vcombine.high %v4575_v11, %v18156_v14 }
 0x41c   :  { %v4836_v27 = vcombine.low %v14409_v32, %v4755_v17  ;;  %10903 = vrot.lane.b32.xlu1 %v10902_v46, %s11759_s0  ;;  %v10897_v1 = vpack.i.bf16 %v4644_v28, %v4576_v51  ;;  %v10907_v37 = vpack.i.bf16 %v4645_v10, %v4577_v30  ;;  %v4837_v38 = vcombine.high %v14409_v32, %v4755_v17  ;;  %v4994_v10 = vld [vmem:[%s17794_s2] sm:$0xf] }
 0x41d   :  { %v4753_v34 = vpop.permute.xlu0 %4752  ;;  %v10917_v48 = vpack.i.bf16 %v4646_v55, %v4578_v9 }
 0x41e   :  { %10898 = vrot.lane.b32.xlu0 %v10897_v1, %s11761_s12  ;;  %v4844_v0 = vrot.slane %v4836_v27, %v18294_v4  ;;  %v4768_v59 = vcombine.low %v4745_v43, %v4753_v34  ;;  %v4769_v63 = vcombine.high %v4745_v43, %v4753_v34  ;;  %v4851_v60 = vrot.slane %v4837_v38, %v18294_v4 }
 0x41f   :  { %v4759_v15 = vpop.permute.xlu1 %4758  ;;  %v10927_v43 = vpack.i.bf16 %v4647_v41, %v4579_v33 }
 0x420   :  { %v4852_v56 = vcombine.low %v4751_v62, %v4759_v15  ;;  %10913 = vrot.lane.b32.xlu1 %v10912_v23, %s11757_s9  ;;  %v4853_v22 = vcombine.high %v4751_v62, %v4759_v15  ;;  %v4776_v50 = vrot.slane %v4768_v59, %v18294_v4  ;;  %v4783_v39 = vrot.slane %v4769_v63, %v18294_v4 }
 0x421   :  { %v4757_v8 = vpop.permute.xlu0 %4756 }
 0x422   :  { %v4860_v57 = vrot.slane %v4852_v56, %v18294_v4  ;;  %v4784_v3 = vcombine.low %v4749_v16, %v4757_v8  ;;  %v4785_v44 = vcombine.high %v4749_v16, %v4757_v8  ;;  %10908 = vrot.lane.b32.xlu0 %v10907_v37, %s11760_s11  ;;  %v4867_v19 = vrot.slane %v4853_v22, %v18294_v4 }
 0x424   :  { %v4868_v21 = vcombine.low %v4844_v0, %v4860_v57  ;;  %v4792_v20 = vrot.slane %v4784_v3, %v18294_v4  ;;  %v4799_v35 = vrot.slane %v4785_v44, %v18294_v4  ;;  %10923 = vrot.lane.b32.xlu1 %v10922_v18, %s11758_s10  ;;  %v4869_v36 = vcombine.high %v4844_v0, %v4860_v57 }
 0x425   :  { %v4884_v24 = vcombine.low %v4851_v60, %v4867_v19  ;;  %v4885_v17 = vcombine.high %v4851_v60, %v4867_v19 }
 0x426   :  { %v14454_v32 = vrot.slane %v4868_v21, %v11969_v26  ;;  %v4800_v52 = vcombine.low %v4776_v50, %v4792_v20  ;;  %v4801_v54 = vcombine.high %v4776_v50, %v4792_v20  ;;  %10918 = vrot.lane.b32.xlu0 %v10917_v48, %s11755_s7  ;;  %v4816_v7 = vcombine.low %v4783_v39, %v4799_v35 }
 0x427   :  { %v4883_v47 = vrot.slane %v4869_v36, %v11969_v26  ;;  %v4817_v2 = vcombine.high %v4783_v39, %v4799_v35  ;;  %v4892_v46 = vrot.slane %v4884_v24, %v11969_v26  ;;  %v4899_v34 = vrot.slane %v4885_v17, %v11969_v26 }
 0x428   :  { %v14459_v45 = vrot.slane %v4800_v52, %v11969_v26  ;;  %v4815_v40 = vrot.slane %v4801_v54, %v11969_v26  ;;  %v4900_v62 = vcombine.high %v14454_v32, %v18156_v14  ;;  %v4824_v49 = vrot.slane %v4816_v7, %v11969_v26 }
 0x429   :  { %v4901_v51 = vcombine.high %v4883_v47, %v18156_v14  ;;  %v4831_v5 = vrot.slane %v4817_v2, %v11969_v26  ;;  %v4902_v1 = vcombine.high %v4892_v46, %v18156_v14  ;;  %v4903_v23 = vcombine.high %v4899_v34, %v18156_v14 }
 0x42a   :  { %10928 = vrot.lane.b32.xlu0 %v10927_v43, %s11756_s8  ;;  %v4832_v31 = vcombine.high %v14459_v45, %v18156_v14  ;;  %v10937_v16 = vpack.i.bf16 %v4883_v47, %v4815_v40  ;;  %v4833_v61 = vcombine.high %v4815_v40, %v18156_v14  ;;  %v10947_v28 = vpack.i.bf16 %v4892_v46, %v4824_v49 }
 0x42b   :  { %v4834_v27 = vcombine.high %v4824_v49, %v18156_v14  ;;  %v10957_v12 = vpack.i.bf16 %v4899_v34, %v4831_v5  ;;  %v4835_v15 = vcombine.high %v4831_v5, %v18156_v14 }
 0x42c   :  { %v10932_v13 = vpack.i.bf16 %v4900_v62, %v4832_v31  ;;  %v10942_v25 = vpack.i.bf16 %v4901_v51, %v4833_v61 }
 0x42d   :  { %v10952_v30 = vpack.i.bf16 %v4902_v1, %v4834_v27  ;;  %v10962_v11 = vpack.i.bf16 %v4903_v23, %v4835_v15 }
 0x42e   :  { %10938 = vrot.lane.b32.xlu0 %v10937_v16, %s11759_s0  ;;  %10933 = vrot.lane.b32.xlu1 %v10932_v13, %s11761_s12 }
 0x432   :  { %10948 = vrot.lane.b32.xlu0 %v10947_v28, %s11757_s9  ;;  %10943 = vrot.lane.b32.xlu1 %v10942_v25, %s11760_s11 }
 0x436   :  { %10958 = vrot.lane.b32.xlu0 %v10957_v12, %s11758_s10  ;;  %10953 = vrot.lane.b32.xlu1 %v10952_v30, %s11755_s7 }
 0x43a   :  { %10963 = vrot.lane.b32.xlu1 %v10962_v11, %s11756_s8  ;;  %4997 = vperm.xlu0 %10967, %v4994_v10  }
 0x476   :  { %v14488_v56 = vpop.f32.mrb[0].mxu0 }
 0x48e   :  { %v10904_v58 = vpop.permute.xlu1 %10903 }
 0x48f   :  { %v10906_v22 = vunpack.i.h.bf16 %v10904_v58  ;;  %v10905_v57 = vunpack.i.l.bf16 %v10904_v58 }
 0x490   :  { %v10899_v9 = vpop.permute.xlu0 %10898 }
 0x491   :  { %v10901_v0 = vunpack.i.h.bf16 %v10899_v9  ;;  %v10900_v59 = vunpack.i.l.bf16 %v10899_v9 }
 0x492   :  { %v10914_v37 = vpop.permute.xlu1 %10913 }
 0x493   :  { %v4711_v63 = vsel %vm770_vm6, %v14418_v53, %v10901_v0  ;;  %v4704_v8 = vsel %vm770_vm6, %v14421_v42, %v10900_v59  ;;  %v10916_v50 = vunpack.i.h.bf16 %v10914_v37  ;;  %v10915_v20 = vunpack.i.l.bf16 %v10914_v37 }
 0x494   :  { %v10909_v3 = vpop.permute.xlu0 %10908  ;;  %v4705_v55 = vsel %vm772_vm7, %v4704_v8, %v10905_v57  ;;  %v4712_v38 = vsel %vm772_vm7, %v4711_v63, %v10906_v22 }
 0x495   :  { %v10911_v44 = vunpack.i.h.bf16 %v10909_v3  ;;  %v10910_v18 = vunpack.i.l.bf16 %v10909_v3 }
 0x496   :  { %v10924_v35 = vpop.permute.xlu1 %10923 }
 0x497   :  { %v4706_v21 = vsel %vm774_vm8, %v4705_v55, %v10910_v18  ;;  %v4713_v33 = vsel %vm774_vm8, %v4712_v38, %v10911_v44  ;;  %v10926_v52 = vunpack.i.h.bf16 %v10924_v35  ;;  %v10925_v54 = vunpack.i.l.bf16 %v10924_v35 }
 0x498   :  { %v10919_v53 = vpop.permute.xlu0 %10918  ;;  %v4707_v39 = vsel %vm776_vm9, %v4706_v21, %v10915_v20  ;;  %v4714_v19 = vsel %vm776_vm9, %v4713_v33, %v10916_v50 }
 0x499   :  { %v10921_v48 = vunpack.i.h.bf16 %v10919_v53  ;;  %v10920_v42 = vunpack.i.l.bf16 %v10919_v53 }
 0x49b   :  { %v4708_v41 = vsel %vm778_vm10, %v4707_v39, %v10920_v42  ;;  %v4715_v36 = vsel %vm778_vm10, %v4714_v19, %v10921_v48  ;;  %v5103_v39 = vpop.f32.mrb[1].mxu0 }
 0x49c   :  { %v10929_v60 = vpop.permute.xlu0 %10928  ;;  %v4709_v40 = vsel %vm780_vm11, %v4708_v41, %v10925_v54  ;;  %v4716_v24 = vsel %vm780_vm11, %v4715_v36, %v10926_v52  ;;  %v5105_v36 = vpop.f32.mrb[2].mxu0 }
 0x49d   :  { %v10931_v7 = vunpack.i.h.bf16 %v10929_v60  ;;  %v10930_v43 = vunpack.i.l.bf16 %v10929_v60  ;;  %v5106_v52 = vpop.f32.mrb[3].mxu0 }
 0x49f   :  { %v4710_v47 = vsel %vm782_vm12, %v4709_v40, %v10930_v43  ;;  %v4717_v31 = vsel %vm782_vm12, %v4716_v24, %v10931_v7 }
 0x4a0   :  { %v10299_v62 = vpack.c.bf16 %v4717_v31, %v4710_v47  ;;  %v10934_v2 = vpop.permute.xlu1 %10933  ;;  %v10939_v16 = vpop.permute.xlu0 %10938 }
 0x4a1   :  { %v10936_v13 = vunpack.i.h.bf16 %v10934_v2  ;;  %v10935_v49 = vunpack.i.l.bf16 %v10934_v2  ;;  %v10941_v17 = vunpack.i.h.bf16 %v10939_v16  ;;  %v10940_v46 = vunpack.i.l.bf16 %v10939_v16 }
 0x4a2   :  { %v4725_v61 = vrot.slane %v10299_v62, 6 }
 0x4a3   :  { %v4967_v51 = vsel %vm770_vm6, %v14454_v32, %v10936_v13  ;;  %v4960_v28 = vsel %vm770_vm6, %v14459_v45, %v10935_v49 }
 0x4a4   :  { %4727 = vst [vmem:[#allocation3 + $0x38] sm:$0xcc] %v4725_v61  ;;  %v10944_v25 = vpop.permute.xlu1 %10943  ;;  %v10949_v5 = vpop.permute.xlu0 %10948  ;;  %v4968_v1 = vsel %vm772_vm7, %v4967_v51, %v10941_v17  ;;  %v4961_v12 = vsel %vm772_vm7, %v4960_v28, %v10940_v46 }
 0x4a5   :  { %v10946_v27 = vunpack.i.h.bf16 %v10944_v25  ;;  %v10945_v34 = vunpack.i.l.bf16 %v10944_v25  ;;  %v10951_v30 = vunpack.i.h.bf16 %v10949_v5  ;;  %v10950_v15 = vunpack.i.l.bf16 %v10949_v5 }
 0x4a7   :  { %v4962_v23 = vsel %vm774_vm8, %v4961_v12, %v10945_v34  ;;  %v4969_v10 = vsel %vm774_vm8, %v4968_v1, %v10946_v27 }
 0x4a8   :  { %v10954_v11 = vpop.permute.xlu1 %10953  ;;  %v10959_v32 = vpop.permute.xlu0 %10958  ;;  %v4963_v45 = vsel %vm776_vm9, %v4962_v23, %v10950_v15  ;;  %v4970_v0 = vsel %vm776_vm9, %v4969_v10, %v10951_v30 }
 0x4a9   :  { %v10956_v58 = vunpack.i.h.bf16 %v10954_v11  ;;  %v10955_v9 = vunpack.i.l.bf16 %v10954_v11  ;;  %v10961_v59 = vunpack.i.h.bf16 %v10959_v32  ;;  %v10960_v63 = vunpack.i.l.bf16 %v10959_v32 }
 0x4ab   :  { %v4964_v8 = vsel %vm778_vm10, %v4963_v45, %v10955_v9  ;;  %v4971_v37 = vsel %vm778_vm10, %v4970_v0, %v10956_v58  ;;  %v11649_v22 = vld [vmem:[#allocation3 + $0x2c] ss:$16 sps:$4 sm:$0xff]   ;;  %v11651_v57 = vld [vmem:[#allocation3 + $0x28] ss:$16 sps:$4 sm:$0xff]  }
 0x4ac   :  { %v10964_v3 = vpop.permute.xlu1 %10963  ;;  %5110 = vmatprep.subr.bf16.mxu1 %v11649_v22  ;;  %v4965_v55 = vsel %vm780_vm11, %v4964_v8, %v10960_v63  ;;  %v4972_v38 = vsel %vm780_vm11, %v4971_v37, %v10961_v59 }
 0x4ad   :  { %v10966_v44 = vunpack.i.h.bf16 %v10964_v3  ;;  %v10965_v18 = vunpack.i.l.bf16 %v10964_v3  ;;  %5111 = vmatpush1.bf16.msra.mxu1 %v11651_v57 }
 0x4af   :  { %v4966_v21 = vsel %vm782_vm12, %v4965_v55, %v10965_v18  ;;  %v4973_v33 = vsel %vm782_vm12, %v4972_v38, %v10966_v44 }
 0x4b0   :  { %v10300_v50 = vpack.c.bf16 %v4973_v33, %v4966_v21 }
 0x4b2   :  { %4982 = vst [vmem:[#allocation3 + $0x48] sm:$0x33] %v10300_v50 }
 0x4b9   :  { %v4993_v20 = vld [vmem:[#allocation3 + $0x48] sm:$0x33]  ;;  %v4998_v53 = vpop.permute.xlu0 %4997 }
 0x4ba   :  { %v10244_v35 = vcombine.high %v4993_v20, %v4993_v20  ;;  %v10243_v48 = vcombine.low %v4993_v20, %v4993_v20  ;;  %v5102_v42 = vadd.f32 %v14488_v56, %v4998_v53 }
 0x4bc   :  { %10247 = vmatprep.subr.msk.bf16.mxu1 %vm5054_vm13, %v10244_v35  ;;  %v5062_v19 = vsel %vm5054_vm13, %v10243_v48, 0  ;;  %v5149_v41 = vmax.f32 %v5102_v42, 0.0 }
 0x4bd   :  { %5113 = vmatpush1.bf16.msra.mxu1 %v5062_v19 }
 0x4be   :  { %5154 = vrot.lane.b32.xlu1 %v5149_v41, %s11756_s8  ;;  %5160 = vrot.lane.b32.xlu0 %v5149_v41, %s11755_s7 }
 0x4c0   :  { %10248 = vmatmul.mubr.msk.bf16.vlgmr.msra.gmra.mrb[0].mxu1 %vm5050_vm14, %v14363_v6 }
 0x4c1   :  { %10154 = vmatprep.mubr.bf16.mxu1 %v11768_v29  ;;  %v5104_v29 = vadd.f32 %v5103_v39, %v4998_v53 }
 0x4c2   :  { %5157 = vrot.lane.b32.xlu1 %v5149_v41, %s11758_s10  ;;  %5166 = vrot.lane.b32.xlu0 %v5149_v41, %s11760_s11 }
 0x4c3   :  { %v14549_v31 = vmax.f32 %v5104_v29, 0.0 }
 0x4c6   :  { %5163 = vrot.lane.b32.xlu1 %v5149_v41, %s11757_s9  ;;  %5172 = vrot.lane.b32.xlu0 %v5149_v41, %s11761_s12 }
 0x4ca   :  { %5169 = vrot.lane.b32.xlu1 %v5149_v41, %s11759_s0 }
 0x530   :  { %v5155_v6 = vpop.permute.xlu1 %5154  ;;  %v5161_v24 = vpop.permute.xlu0 %5160 }
 0x531   :  { %v5205_v49 = vcombine.low %v5155_v6, %v5161_v24 }
 0x533   :  { %v5212_v28 = vrot.slane %v5205_v49, %v18294_v4 }
 0x534   :  { %v5158_v47 = vpop.permute.xlu1 %5157  ;;  %v5167_v62 = vpop.permute.xlu0 %5166 }
 0x535   :  { %v5197_v61 = vcombine.low %v5149_v41, %v5158_v47 }
 0x537   :  { %v5204_v25 = vrot.slane %v5197_v61, %v18294_v4 }
 0x538   :  { %v5164_v2 = vpop.permute.xlu1 %5163  ;;  %v5173_v16 = vpop.permute.xlu0 %5172 }
 0x539   :  { %v5221_v17 = vcombine.low %v5167_v62, %v5173_v16  ;;  %v5229_v1 = vcombine.low %v5204_v25, %v5212_v28  ;;  %v5230_v23 = vcombine.high %v5204_v25, %v5212_v28 }
 0x53b   :  { %v5228_v5 = vrot.slane %v5221_v17, %v18294_v4  ;;  %v5237_v30 = vrot.slane %v5229_v1, %v11969_v26  ;;  %v5244_v32 = vrot.slane %v5230_v23, %v11969_v26 }
 0x53c   :  { %v5170_v13 = vpop.permute.xlu1 %5169 }
 0x53d   :  { %v5213_v46 = vcombine.low %v5164_v2, %v5170_v13 }
 0x53f   :  { %v5220_v27 = vrot.slane %v5213_v46, %v18294_v4 }
 0x541   :  { %v5245_v12 = vcombine.low %v5220_v27, %v5228_v5  ;;  %v5246_v10 = vcombine.high %v5220_v27, %v5228_v5 }
 0x543   :  { %v5253_v15 = vrot.slane %v5245_v12, %v11969_v26  ;;  %v5260_v58 = vrot.slane %v5246_v10, %v11969_v26 }
 0x545   :  { %v5261_v11 = vcombine.low %v5237_v30, %v5253_v15  ;;  %v5262_v9 = vcombine.high %v5237_v30, %v5253_v15  ;;  %v5263_v45 = vcombine.low %v5244_v32, %v5260_v58  ;;  %v5264_v0 = vcombine.high %v5244_v32, %v5260_v58 }
 0x593   :  { %v5142_v56 = vpop.f32.mrb[0].mxu1 }
 0x594   :  { %v5143_v54 = vadd.f32 %v5142_v56, %v4998_v53  ;;  %v5144_v60 = vpop.f32.mrb[1].mxu1 }
 0x595   :  { %v5146_v7 = vpop.f32.mrb[2].mxu1  ;;  %v5145_v51 = vadd.f32 %v5144_v60, %v4998_v53 }
 0x596   :  { %v14535_v43 = vmax.f32 %v5143_v54, 0.0  ;;  %v5147_v40 = vpop.f32.mrb[3].mxu1 }
 0x597   :  { %v14571_v34 = vmax.f32 %v5145_v51, 0.0 }
 0x598   :  { %5374 = vrot.lane.b32.xlu0 %v14535_v43, %s11756_s8  ;;  %5377 = vrot.lane.b32.xlu1 %v14535_v43, %s11758_s10 }
 0x59c   :  { %5380 = vrot.lane.b32.xlu0 %v14535_v43, %s11755_s7  ;;  %5383 = vrot.lane.b32.xlu1 %v14535_v43, %s11757_s9 }
 0x5a0   :  { %5386 = vrot.lane.b32.xlu0 %v14535_v43, %s11760_s11  ;;  %5389 = vrot.lane.b32.xlu1 %v14535_v43, %s11759_s0 }
 0x5a4   :  { %5392 = vrot.lane.b32.xlu0 %v14535_v43, %s11761_s12  ;;  %5176 = vrot.lane.b32.xlu1 %v14549_v31, %s11756_s8 }
 0x5a8   :  { %5179 = vrot.lane.b32.xlu0 %v14549_v31, %s11758_s10  ;;  %5182 = vrot.lane.b32.xlu1 %v14549_v31, %s11755_s7 }
 0x5ac   :  { %5185 = vrot.lane.b32.xlu0 %v14549_v31, %s11757_s9  ;;  %5188 = vrot.lane.b32.xlu1 %v14549_v31, %s11760_s11 }
 0x5b0   :  { %5191 = vrot.lane.b32.xlu0 %v14549_v31, %s11759_s0  ;;  %5194 = vrot.lane.b32.xlu1 %v14549_v31, %s11761_s12 }
 0x5b4   :  { %5399 = vrot.lane.b32.xlu0 %v14571_v34, %s11758_s10  ;;  %5396 = vrot.lane.b32.xlu1 %v14571_v34, %s11756_s8 }
 0x5b8   :  { %5405 = vrot.lane.b32.xlu0 %v14571_v34, %s11757_s9  ;;  %5402 = vrot.lane.b32.xlu1 %v14571_v34, %s11755_s7 }
 0x5bc   :  { %5411 = vrot.lane.b32.xlu0 %v14571_v34, %s11759_s0  ;;  %5408 = vrot.lane.b32.xlu1 %v14571_v34, %s11760_s11 }
 0x5c0   :  { %5414 = vrot.lane.b32.xlu1 %v14571_v34, %s11761_s12  ;;  %5341 = vrot.lane.b32.xlu0 %v5261_v11, %s11765_s13 }
 0x5c4   :  { %5345 = vrot.lane.b32.xlu0 %v5262_v9, %s11765_s13 }
 0x5c8   :  { %5349 = vrot.lane.b32.xlu0 %v5263_v45, %s11765_s13 }
 0x5cc   :  { %5353 = vrot.lane.b32.xlu0 %v5264_v0, %s11765_s13 }
 0x60a   :  { %v5375_v59 = vpop.permute.xlu0 %5374  ;;  %v5378_v63 = vpop.permute.xlu1 %5377 }
 0x60b   :  { %v5417_v44 = vcombine.low %v14535_v43, %v5378_v63 }
 0x60d   :  { %v5424_v33 = vrot.slane %v5417_v44, %v18294_v4 }
 0x60e   :  { %v5381_v8 = vpop.permute.xlu0 %5380  ;;  %v5384_v37 = vpop.permute.xlu1 %5383 }
 0x60f   :  { %v5425_v22 = vcombine.low %v5375_v59, %v5381_v8 }
 0x611   :  { %v5432_v18 = vrot.slane %v5425_v22, %v18294_v4 }
 0x612   :  { %v5387_v57 = vpop.permute.xlu0 %5386  ;;  %v5390_v3 = vpop.permute.xlu1 %5389 }
 0x613   :  { %v5433_v55 = vcombine.low %v5384_v37, %v5390_v3  ;;  %v5449_v20 = vcombine.low %v5424_v33, %v5432_v18  ;;  %v5450_v43 = vcombine.high %v5424_v33, %v5432_v18 }
 0x615   :  { %v5440_v53 = vrot.slane %v5433_v55, %v18294_v4  ;;  %v5457_v19 = vrot.slane %v5449_v20, %v11969_v26 }
 0x616   :  { %v5393_v38 = vpop.permute.xlu0 %5392  ;;  %v5177_v21 = vpop.permute.xlu1 %5176 }
 0x617   :  { %v5441_v50 = vcombine.low %v5387_v57, %v5393_v38 }
 0x619   :  { %v5448_v35 = vrot.slane %v5441_v50, %v18294_v4 }
 0x61a   :  { %v5180_v48 = vpop.permute.xlu0 %5179  ;;  %v5183_v42 = vpop.permute.xlu1 %5182 }
 0x61b   :  { %v5465_v39 = vcombine.low %v5440_v53, %v5448_v35  ;;  %v5265_v36 = vcombine.low %v14549_v31, %v5180_v48  ;;  %v5273_v52 = vcombine.low %v5177_v21, %v5183_v42  ;;  %v5466_v60 = vcombine.high %v5440_v53, %v5448_v35 }
 0x61c   :  { %v5464_v31 = vrot.slane %v5450_v43, %v11969_v26 }
 0x61d   :  { %v5473_v41 = vrot.slane %v5465_v39, %v11969_v26  ;;  %v5272_v40 = vrot.slane %v5265_v36, %v18294_v4  ;;  %v5280_v6 = vrot.slane %v5273_v52, %v18294_v4  ;;  %v5480_v47 = vrot.slane %v5466_v60, %v11969_v26 }
 0x61e   :  { %v5186_v56 = vpop.permute.xlu0 %5185  ;;  %v5189_v54 = vpop.permute.xlu1 %5188 }
 0x61f   :  { %v5481_v7 = vcombine.low %v5457_v19, %v5473_v41  ;;  %v5482_v16 = vcombine.high %v5457_v19, %v5473_v41  ;;  %v5297_v13 = vcombine.low %v5272_v40, %v5280_v6  ;;  %v5483_v28 = vcombine.low %v5464_v31, %v5480_v47 }
 0x620   :  { %v5484_v30 = vcombine.high %v5464_v31, %v5480_v47  ;;  %v5298_v23 = vcombine.high %v5272_v40, %v5280_v6 }
 0x621   :  { %5561 = vrot.lane.b32.xlu0 %v5481_v7, %s11765_s13  ;;  %v5305_v25 = vrot.slane %v5297_v13, %v11969_v26 }
 0x622   :  { %v5192_v29 = vpop.permute.xlu0 %5191  ;;  %v5195_v24 = vpop.permute.xlu1 %5194  ;;  %v5312_v0 = vrot.slane %v5298_v23, %v11969_v26 }
 0x623   :  { %v5281_v62 = vcombine.low %v5186_v56, %v5192_v29  ;;  %v5289_v2 = vcombine.low %v5189_v54, %v5195_v24 }
 0x625   :  { %v5288_v49 = vrot.slane %v5281_v62, %v18294_v4  ;;  %v5296_v61 = vrot.slane %v5289_v2, %v18294_v4  ;;  %5565 = vrot.lane.b32.xlu0 %v5482_v16, %s11765_s13 }
 0x626   :  { %v5400_v17 = vpop.permute.xlu0 %5399  ;;  %v5397_v46 = vpop.permute.xlu1 %5396 }
 0x627   :  { %v5313_v51 = vcombine.low %v5288_v49, %v5296_v61  ;;  %v5314_v12 = vcombine.high %v5288_v49, %v5296_v61  ;;  %v5485_v9 = vcombine.low %v14571_v34, %v5400_v17 }
 0x629   :  { %v5321_v5 = vrot.slane %v5313_v51, %v11969_v26  ;;  %5569 = vrot.lane.b32.xlu0 %v5483_v28, %s11765_s13  ;;  %v5328_v58 = vrot.slane %v5314_v12, %v11969_v26  ;;  %v5492_v22 = vrot.slane %v5485_v9, %v18294_v4 }
 0x62a   :  { %v5406_v27 = vpop.permute.xlu0 %5405  ;;  %v5403_v1 = vpop.permute.xlu1 %5402 }
 0x62b   :  { %v5329_v15 = vcombine.low %v5305_v25, %v5321_v5  ;;  %v5493_v10 = vcombine.low %v5397_v46, %v5403_v1  ;;  %v5330_v45 = vcombine.high %v5305_v25, %v5321_v5  ;;  %v5331_v3 = vcombine.low %v5312_v0, %v5328_v58 }
 0x62c   :  { %v5332_v21 = vcombine.high %v5312_v0, %v5328_v58 }
 0x62d   :  { %5573 = vrot.lane.b32.xlu0 %v5484_v30, %s11765_s13  ;;  %5343 = vrot.lane.b32.xlu1 %v5329_v15, %s11765_s13  ;;  %v5500_v59 = vrot.slane %v5493_v10, %v18294_v4 }
 0x62e   :  { %v5412_v11 = vpop.permute.xlu0 %5411  ;;  %v5409_v32 = vpop.permute.xlu1 %5408 }
 0x62f   :  { %v5501_v63 = vcombine.low %v5406_v27, %v5412_v11  ;;  %v5517_v44 = vcombine.low %v5492_v22, %v5500_v59  ;;  %v5518_v42 = vcombine.high %v5492_v22, %v5500_v59 }
 0x631   :  { %5347 = vrot.lane.b32.xlu1 %v5330_v45, %s11765_s13  ;;  %v5508_v18 = vrot.slane %v5501_v63, %v18294_v4  ;;  %v5525_v33 = vrot.slane %v5517_v44, %v11969_v26  ;;  %v5532_v52 = vrot.slane %v5518_v42, %v11969_v26 }
 0x632   :  { %v5342_v8 = vpop.permute.xlu0 %5341  ;;  %v5415_v37 = vpop.permute.xlu1 %5414 }
 0x633   :  { %5365 = vst.msk [vmem:[#allocation2 + $0x1] sm:$0xff] %vm328_vm5, %v5342_v8  ;;  %v5509_v57 = vcombine.low %v5409_v32, %v5415_v37 }
 0x635   :  { %v5516_v34 = vrot.slane %v5509_v57, %v18294_v4  ;;  %5351 = vrot.lane.b32.xlu1 %v5331_v3, %s11765_s13 }
 0x636   :  { %v5346_v55 = vpop.permute.xlu0 %5345 }
 0x637   :  { %v5533_v38 = vcombine.low %v5508_v18, %v5516_v34  ;;  %5367 = vst.msk [vmem:[#allocation2 + $0x19] sm:$0xff] %vm328_vm5, %v5346_v55  ;;  %v5534_v20 = vcombine.high %v5508_v18, %v5516_v34 }
 0x639   :  { %v5541_v50 = vrot.slane %v5533_v38, %v11969_v26  ;;  %5355 = vrot.lane.b32.xlu1 %v5332_v21, %s11765_s13  ;;  %v5548_v39 = vrot.slane %v5534_v20, %v11969_v26 }
 0x63a   :  { %v5350_v53 = vpop.permute.xlu0 %5349  ;;  %v6072_v35 = vld [vmem:[#allocation2] sm:$0xff] }
 0x63b   :  { %5369 = vst.msk [vmem:[#allocation2 + $0x31] sm:$0xff] %vm328_vm5, %v5350_v53  ;;  %6088 = vrot.lane.b32.xlu0 %v6072_v35, %s11766_s14  ;;  %v5549_v48 = vcombine.low %v5525_v33, %v5541_v50  ;;  %v5550_v36 = vcombine.high %v5525_v33, %v5541_v50  ;;  %v5551_v54 = vcombine.low %v5532_v52, %v5548_v39  ;;  %v6551_v60 = vld [vmem:[#allocation2 + $0x1] sm:$0xff] }
 0x63c   :  { %v5552_v47 = vcombine.high %v5532_v52, %v5548_v39 }
 0x63d   :  { %5563 = vrot.lane.b32.xlu1 %v5549_v48, %s11765_s13 }
 0x63e   :  { %v5354_v19 = vpop.permute.xlu0 %5353  ;;  %v6074_v41 = vld [vmem:[#allocation2 + $0x18] sm:$0xff] }
 0x63f   :  { %5371 = vst.msk [vmem:[#allocation2 + $0x49] sm:$0xff] %vm328_vm5, %v5354_v19  ;;  %6092 = vrot.lane.b32.xlu0 %v6074_v41, %s11766_s14  ;;  %v6553_v62 = vld [vmem:[#allocation2 + $0x19] sm:$0xff] }
 0x641   :  { %5567 = vrot.lane.b32.xlu1 %v5550_v36, %s11765_s13 }
 0x642   :  { %v6076_v56 = vld [vmem:[#allocation2 + $0x30] sm:$0xff] }
 0x643   :  { %v6555_v7 = vld [vmem:[#allocation2 + $0x31] sm:$0xff]  ;;  %6096 = vrot.lane.b32.xlu0 %v6076_v56, %s11766_s14  ;;  %v5601_v6 = vcombine.low %v6072_v35, %v6076_v56  ;;  %v5602_v29 = vcombine.high %v6072_v35, %v6076_v56 }
 0x644   :  { %v6335_v43 = vcombine.low %v6551_v60, %v6555_v7  ;;  %v6336_v40 = vcombine.high %v6551_v60, %v6555_v7 }
 0x645   :  { %5571 = vrot.lane.b32.xlu1 %v5551_v54, %s11765_s13  ;;  %v14648_v46 = vrot.slane %v5601_v6, %v18294_v4  ;;  %v14664_v27 = vrot.slane %v5602_v29, %v18294_v4 }
 0x646   :  { %v6078_v24 = vld [vmem:[#allocation2 + $0x48] sm:$0xff]  ;;  %v14642_v61 = vrot.slane %v6335_v43, %v18294_v4  ;;  %v14645_v17 = vrot.slane %v6336_v40, %v18294_v4 }
 0x647   :  { %v6557_v2 = vld [vmem:[#allocation2 + $0x49] sm:$0xff]  ;;  %6100 = vrot.lane.b32.xlu0 %v6078_v24, %s11766_s14  ;;  %v5617_v13 = vcombine.low %v6074_v41, %v6078_v24  ;;  %v5618_v49 = vcombine.high %v6074_v41, %v6078_v24 }
 0x648   :  { %v6351_v16 = vcombine.low %v6553_v62, %v6557_v2  ;;  %v6352_v31 = vcombine.high %v6553_v62, %v6557_v2  ;;  %18300 = vst [vmem:[#allocation32_spill] sm:$0xff] %v14642_v61 }
 0x649   :  { %5575 = vrot.lane.b32.xlu1 %v5552_v47, %s11765_s13  ;;  %v14658_v25 = vrot.slane %v5617_v13, %v18294_v4  ;;  %v14661_v5 = vrot.slane %v5618_v49, %v18294_v4 }
 0x64a   :  { %v14652_v51 = vrot.slane %v6351_v16, %v18294_v4  ;;  %v14655_v28 = vrot.slane %v6352_v31, %v18294_v4 }
 0x64b   :  { %18302 = vst [vmem:[#allocation37_spill] sm:$0xff] %v14658_v25  ;;  %6567 = vrot.lane.b32.xlu0 %v6551_v60, %s11767_s15  ;;  %v5634_v15 = vcombine.high %v14648_v46, %v14658_v25  ;;  %v5649_v23 = vcombine.low %v14664_v27, %v14661_v5  ;;  %v5650_v10 = vcombine.high %v14664_v27, %v14661_v5 }
 0x64c   :  { %18301 = vst [vmem:[#allocation27_spill] sm:$0xff] %v14652_v51  ;;  %v6368_v1 = vcombine.high %v14642_v61, %v14652_v51  ;;  %v6383_v12 = vcombine.low %v14645_v17, %v14655_v28  ;;  %v6384_v30 = vcombine.high %v14645_v17, %v14655_v28 }
 0x64d   :  { %5832 = vrot.lane.b32.xlu1 %v6072_v35, %s11767_s15 }
 0x64e   :  { %v14779_v49 = vrot.slane %v6368_v1, %v11969_v26 }
 0x64f   :  { %6571 = vrot.lane.b32.xlu0 %v6553_v62, %s11767_s15 }
 0x651   :  { %5836 = vrot.lane.b32.xlu1 %v6074_v41, %s11767_s15 }
 0x653   :  { %6575 = vrot.lane.b32.xlu0 %v6555_v7, %s11767_s15 }
 0x655   :  { %5840 = vrot.lane.b32.xlu1 %v6076_v56, %s11767_s15 }
 0x657   :  { %6579 = vrot.lane.b32.xlu0 %v6557_v2, %s11767_s15 }
 0x659   :  { %5844 = vrot.lane.b32.xlu1 %v6078_v24, %s11767_s15 }
 0x65d   :  { %6822 = vrot.lane.b32.xlu1 %v6551_v60, %s11766_s14 }
 0x661   :  { %6826 = vrot.lane.b32.xlu1 %v6553_v62, %s11766_s14 }
 0x665   :  { %6830 = vrot.lane.b32.xlu1 %v6555_v7, %s11766_s14 }
 0x669   :  { %6834 = vrot.lane.b32.xlu1 %v6557_v2, %s11766_s14 }
 0x693   :  { %v5562_v58 = vpop.permute.xlu0 %5561 }
 0x694   :  { %5585 = vst.msk [vmem:[#allocation2 + $0x61] sm:$0xff] %vm328_vm5, %v5562_v58  ;;  %v14785_v58 = vrot.slane %v6383_v12, %v11969_v26 }
 0x697   :  { %v5566_v9 = vpop.permute.xlu0 %5565 }
 0x698   :  { %5587 = vst.msk [vmem:[#allocation2 + $0x79] sm:$0xff] %vm328_vm5, %v5566_v9  ;;  %v14791_v9 = vrot.slane %v6384_v30, %v11969_v26 }
 0x69b   :  { %v5570_v45 = vpop.permute.xlu0 %5569  ;;  %v8019_v0 = vld [vmem:[#allocation2 + $0x60] sm:$0xff] }
 0x69c   :  { %5589 = vst.msk [vmem:[#allocation2 + $0x91] sm:$0xff] %vm328_vm5, %v5570_v45  ;;  %8035 = vrot.lane.b32.xlu0 %v8019_v0, %s11767_s15 }
 0x69f   :  { %v5574_v59 = vpop.permute.xlu0 %5573  ;;  %v5344_v63 = vpop.permute.xlu1 %5343  ;;  %v8021_v8 = vld [vmem:[#allocation2 + $0x78] sm:$0xff] }
 0x6a0   :  { %5591 = vst.msk [vmem:[#allocation2 + $0xa9] sm:$0xff] %vm328_vm5, %v5574_v59  ;;  %5366 = vst.msk [vmem:[#allocation2 + $0x9] sm:$0xff] %vm328_vm5, %v5344_v63  ;;  %8039 = vrot.lane.b32.xlu0 %v8021_v8, %s11767_s15 }
 0x6a3   :  { %v5348_v37 = vpop.permute.xlu1 %5347  ;;  %v8023_v22 = vld [vmem:[#allocation2 + $0x90] sm:$0xff] }
 0x6a4   :  { %5368 = vst.msk [vmem:[#allocation2 + $0x21] sm:$0xff] %vm328_vm5, %v5348_v37  ;;  %8043 = vrot.lane.b32.xlu0 %v8023_v22, %s11767_s15  ;;  %v7804_v57 = vcombine.low %v8019_v0, %v8023_v22  ;;  %v7805_v3 = vcombine.high %v8019_v0, %v8023_v22  ;;  %v9013_v27 = vld [vmem:[#allocation2 + $0x91] sm:$0xff] }
 0x6a6   :  { %v14710_v21 = vrot.slane %v7804_v57, %v18294_v4  ;;  %v14716_v50 = vrot.slane %v7805_v3, %v18294_v4  ;;  %v14823_v57 = vrot.slane %v5634_v15, %v11969_v26  ;;  %v14838_v15 = vrot.slane %v5649_v23, %v11969_v26 }
 0x6a7   :  { %v5352_v44 = vpop.permute.xlu1 %5351  ;;  %v8025_v18 = vld [vmem:[#allocation2 + $0xa8] sm:$0xff] }
 0x6a8   :  { %v14703_v34 = vld [vmem:[#allocation2 + $0x8] sm:$0xff]  ;;  %5370 = vst.msk [vmem:[#allocation2 + $0x39] sm:$0xff] %vm328_vm5, %v5352_v44  ;;  %8047 = vrot.lane.b32.xlu0 %v8025_v18, %s11767_s15  ;;  %v7820_v55 = vcombine.low %v8021_v8, %v8025_v18  ;;  %v7821_v38 = vcombine.high %v8021_v8, %v8025_v18  ;;  %18303 = vst [vmem:[#allocation38_spill] sm:$0xff] %v14710_v21 }
 0x6a9   :  { %6090 = vrot.lane.b32.xlu1 %v14703_v34, %s11766_s14  ;;  %v14749_v7 = vld [vmem:[#allocation2 + $0x9] sm:$0xff] }
 0x6aa   :  { %v14713_v33 = vrot.slane %v7820_v55, %v18294_v4  ;;  %v14719_v20 = vrot.slane %v7821_v38, %v18294_v4  ;;  %v14930_v51 = vld [vmem:[#allocation2 + $0x2] sm:$0xff] }
 0x6ab   :  { %v5356_v53 = vpop.permute.xlu1 %5355  ;;  %v14721_v35 = vld [vmem:[#allocation2 + $0x20] sm:$0xff] }
 0x6ac   :  { %18304 = vst [vmem:[#allocation14_spill] sm:$0xff] %v14713_v33  ;;  %5372 = vst.msk [vmem:[#allocation2 + $0x51] sm:$0xff] %vm328_vm5, %v5356_v53  ;;  %8291 = vrot.lane.b32.xlu0 %v8019_v0, %s11766_s14  ;;  %v14759_v47 = vld [vmem:[#allocation2 + $0x21] sm:$0xff] }
 0x6ad   :  { %6094 = vrot.lane.b32.xlu1 %v14721_v35, %s11766_s14  ;;  %v14733_v19 = vpop.permute.xlu0 %6088 }
 0x6af   :  { %v5564_v36 = vpop.permute.xlu1 %5563  ;;  %v14737_v52 = vld [vmem:[#allocation2 + $0x38] sm:$0xff] }
 0x6b0   :  { %v14739_v56 = vld [vmem:[#allocation2 + $0x39] sm:$0xff]  ;;  %5586 = vst.msk [vmem:[#allocation2 + $0x69] sm:$0xff] %vm328_vm5, %v5564_v36  ;;  %8295 = vrot.lane.b32.xlu0 %v8021_v8, %s11766_s14  ;;  %v5669_v54 = vcombine.low %v14703_v34, %v14737_v52  ;;  %v5670_v43 = vcombine.high %v14703_v34, %v14737_v52 }
 0x6b1   :  { %6098 = vrot.lane.b32.xlu1 %v14737_v52, %s11766_s14  ;;  %v14747_v60 = vpop.permute.xlu0 %6092  ;;  %v6403_v40 = vcombine.low %v14749_v7, %v14739_v56  ;;  %v6404_v6 = vcombine.high %v14749_v7, %v14739_v56 }
 0x6b2   :  { %v14804_v8 = vrot.slane %v5669_v54, %v18294_v4  ;;  %v5684_v28 = vrot.slane %v5670_v43, %v18294_v4 }
 0x6b3   :  { %v5568_v29 = vpop.permute.xlu1 %5567  ;;  %v14757_v24 = vld [vmem:[#allocation2 + $0x50] sm:$0xff]  ;;  %v14796_v0 = vrot.slane %v6403_v40, %v18294_v4  ;;  %v6418_v59 = vrot.slane %v6404_v6, %v18294_v4  ;;  %v9009_v40 = vld [vmem:[#allocation2 + $0x61] sm:$0xff] }
 0x6b4   :  { %v14761_v62 = vld [vmem:[#allocation2 + $0x51] sm:$0xff]  ;;  %5588 = vst.msk [vmem:[#allocation2 + $0x81] sm:$0xff] %vm328_vm5, %v5568_v29  ;;  %8299 = vrot.lane.b32.xlu0 %v8023_v22, %s11766_s14  ;;  %v5685_v31 = vcombine.low %v14721_v35, %v14757_v24  ;;  %v5686_v45 = vcombine.high %v14721_v35, %v14757_v24 }
 0x6b5   :  { %6102 = vrot.lane.b32.xlu1 %v14757_v24, %s11766_s14  ;;  %v6419_v2 = vcombine.low %v14759_v47, %v14761_v62  ;;  %v6420_v16 = vcombine.high %v14759_v47, %v14761_v62  ;;  %v14773_v13 = vpop.permute.xlu0 %6096  ;;  %18305 = vst [vmem:[#allocation48_spill] sm:$0xff] %v14796_v0 }
 0x6b6   :  { %v14807_v17 = vrot.slane %v5685_v31, %v18294_v4  ;;  %v5700_v30 = vrot.slane %v5686_v45, %v18294_v4  ;;  %v6112_v37 = vcombine.low %v14733_v19, %v14773_v13  ;;  %v9015_v45 = vld [vmem:[#allocation2 + $0xa9] sm:$0xff] }
 0x6b7   :  { %v14799_v1 = vrot.slane %v6419_v2, %v18294_v4  ;;  %v6434_v12 = vrot.slane %v6420_v16, %v18294_v4  ;;  %v5572_v63 = vpop.permute.xlu1 %5571 }
 0x6b8   :  { %18307 = vst [vmem:[#allocation11_spill] sm:$0xff] %v14807_v17  ;;  %5590 = vst.msk [vmem:[#allocation2 + $0x99] sm:$0xff] %vm328_vm5, %v5572_v63  ;;  %8303 = vrot.lane.b32.xlu0 %v8025_v18, %s11766_s14  ;;  %v5702_v38 = vcombine.high %v14804_v8, %v14807_v17  ;;  %v5717_v18 = vcombine.low %v5684_v28, %v5700_v30  ;;  %v5718_v54 = vcombine.high %v5684_v28, %v5700_v30  ;;  %v15065_v17 = vld [vmem:[#allocation2 + $0x3a] sm:$0xff] }
 0x6b9   :  { %18306 = vst [vmem:[#allocation25_spill] sm:$0xff] %v14799_v1  ;;  %6569 = vrot.lane.b32.xlu1 %v14749_v7, %s11767_s15  ;;  %v6436_v22 = vcombine.high %v14796_v0, %v14799_v1  ;;  %v14825_v3 = vpop.permute.xlu0 %6100  ;;  %v6451_v44 = vcombine.low %v6418_v59, %v6434_v12  ;;  %v6452_v55 = vcombine.high %v6418_v59, %v6434_v12 }
 0x6ba   :  { %v6128_v53 = vcombine.low %v14747_v60, %v14825_v3  ;;  %v14847_v2 = vrot.slane %v5702_v38, %v11969_v26  ;;  %v14850_v16 = vrot.slane %v5717_v18, %v11969_v26  ;;  %v14853_v31 = vrot.slane %v6112_v37, %v18294_v4  ;;  %v14896_v37 = vld [vmem:[#allocation2 + $0x68] sm:$0xff] }
 0x6bb   :  { %v14832_v36 = vrot.slane %v6436_v22, %v11969_v26  ;;  %v5576_v43 = vpop.permute.xlu1 %5575  ;;  %v14841_v6 = vrot.slane %v6451_v44, %v11969_v26  ;;  %v14844_v29 = vrot.slane %v6452_v55, %v11969_v26  ;;  %v9011_v44 = vld [vmem:[#allocation2 + $0x79] sm:$0xff]  ;;  %v14882_v55 = vrot.slane %v5650_v10, %v11969_v26 }
 0x6bc   :  { %18308 = vst [vmem:[#allocation13_spill] sm:$0xff] %v14853_v31  ;;  %v14856_v23 = vrot.slane %v6128_v53, %v18294_v4  ;;  %5592 = vst.msk [vmem:[#allocation2 + $0xb1] sm:$0xff] %vm328_vm5, %v5576_v43  ;;  %9025 = vrot.lane.b32.xlu0 %v9009_v40, %s11766_s14  ;;  %v14885_v38 = vrot.slane %v5718_v54, %v11969_v26  ;;  %v14900_v10 = vld [vmem:[#allocation2 + $0x80] sm:$0xff] }
 0x6bd   :  { %6573 = vrot.lane.b32.xlu1 %v14759_v47, %s11767_s15  ;;  %v14864_v59 = vpop.permute.xlu0 %6567 }
 0x6be   :  { %18309 = vst [vmem:[#allocation12_spill] sm:$0xff] %v14856_v23  ;;  %18310 = vst [vmem:[#allocation49_spill] sm:$0xff] %v14864_v59 }
 0x6bf   :  { %v14876_v22 = vpop.permute.xlu1 %5832  ;;  %v14890_v18 = vld [vmem:[#allocation2 + $0x98] sm:$0xff] }
 0x6c0   :  { %18311 = vst [vmem:[#allocation47_spill] sm:$0xff] %v14876_v22  ;;  %9029 = vrot.lane.b32.xlu0 %v9011_v44, %s11766_s14  ;;  %v7872_v41 = vcombine.low %v14896_v37, %v14890_v18  ;;  %v7873_v32 = vcombine.high %v14896_v37, %v14890_v18 }
 0x6c1   :  { %6577 = vrot.lane.b32.xlu1 %v14739_v56, %s11767_s15  ;;  %v14892_v53 = vpop.permute.xlu0 %6571 }
 0x6c2   :  { %18312 = vst [vmem:[#allocation51_spill] sm:$0xff] %v14892_v53  ;;  %v14924_v39 = vrot.slane %v7872_v41, %v18294_v4  ;;  %v7887_v42 = vrot.slane %v7873_v32, %v18294_v4 }
 0x6c3   :  { %v14898_v5 = vpop.permute.xlu1 %5836  ;;  %v14902_v54 = vld [vmem:[#allocation2 + $0xb0] sm:$0xff] }
 0x6c4   :  { %18313 = vst [vmem:[#allocation50_spill] sm:$0xff] %v14898_v5  ;;  %9033 = vrot.lane.b32.xlu0 %v9013_v27, %s11766_s14  ;;  %v7888_v43 = vcombine.low %v14900_v10, %v14902_v54  ;;  %v7889_v30 = vcombine.high %v14900_v10, %v14902_v54  ;;  %18317 = vst [vmem:[#allocation45_spill] sm:$0xff] %v14924_v39  ;;  %v18320_v5 = vcombine.low %v14716_v50, %v14719_v20 }
 0x6c5   :  { %6581 = vrot.lane.b32.xlu1 %v14761_v62, %s11767_s15  ;;  %v14915_v28 = vpop.permute.xlu0 %6575 }
 0x6c6   :  { %18314 = vst [vmem:[#allocation44_spill] sm:$0xff] %v14915_v28  ;;  %v14918_v63 = vrot.slane %v7888_v43, %v18294_v4  ;;  %v7903_v11 = vrot.slane %v7889_v30, %v18294_v4  ;;  %v6591_v48 = vcombine.low %v14864_v59, %v14915_v28  ;;  %v18319_v59 = vcombine.high %v14710_v21, %v14713_v33 }
 0x6c7   :  { %v14921_v12 = vpop.permute.xlu1 %5840  ;;  %v14950_v22 = vrot.slane %v18320_v5, %v11969_v26 }
 0x6c8   :  { %18315 = vst [vmem:[#allocation43_spill] sm:$0xff] %v14918_v63  ;;  %18316 = vst [vmem:[#allocation42_spill] sm:$0xff] %v14921_v12  ;;  %9037 = vrot.lane.b32.xlu0 %v9015_v45, %s11766_s14  ;;  %v7905_v30 = vcombine.high %v14924_v39, %v14918_v63  ;;  %v7920_v61 = vcombine.low %v7887_v42, %v7903_v11  ;;  %v7921_v41 = vcombine.high %v7887_v42, %v7903_v11 }
 0x6c9   :  { %7301 = vrot.lane.b32.xlu1 %v14930_v51, %s11767_s15  ;;  %v14934_v43 = vpop.permute.xlu0 %6579  ;;  %v14944_v28 = vrot.slane %v18319_v59, %v11969_v26  ;;  %v18321_v42 = vcombine.high %v14716_v50, %v14719_v20  ;;  %v14970_v5 = vrot.slane %v6591_v48, %v18294_v4  ;;  %v15000_v20 = vld [vmem:[#allocation2 + $0x4a] sm:$0xff] }
 0x6ca   :  { %18318 = vst [vmem:[#allocation24_spill] sm:$0xff] %v14934_v43  ;;  %v6607_v32 = vcombine.low %v14892_v53, %v14934_v43  ;;  %v14955_v25 = vrot.slane %v7905_v30, %v11969_v26  ;;  %v14958_v11 = vrot.slane %v7920_v61, %v11969_v26  ;;  %v14967_v33 = vrot.slane %v7921_v41, %v11969_v26  ;;  %v14976_v30 = vld [vmem:[#allocation2 + $0x1a] sm:$0xff]  ;;  %v15011_v50 = vld [vmem:[#allocation2 + $0xa] sm:$0xff]  ;;  %v15033_v53 = vld [vmem:[#allocation2 + $0x22] sm:$0xff] }
 0x6cb   :  { %v14952_v12 = vpop.permute.xlu1 %5844  ;;  %v14964_v59 = vrot.slane %v18321_v42, %v11969_v26  ;;  %18322 = vst [vmem:[#allocation21_spill] sm:$0xff] %v14970_v5  ;;  %v15015_v42 = vcombine.high %v14823_v57, %v18156_v14  ;;  %v15041_v61 = vcombine.high %v14882_v55, %v18156_v14  ;;  %v15089_v43 = vcombine.high %v14841_v6, %v18156_v14 }
 0x6cc   :  { %v14973_v21 = vrot.slane %v6607_v32, %v18294_v4  ;;  %8770 = vrot.lane.b32.xlu0 %v9009_v40, %s11767_s15  ;;  %v14991_v40 = vld [vmem:[#allocation2 + $0x32] sm:$0xff] }
 0x6cd   :  { %7305 = vrot.lane.b32.xlu1 %v14976_v30, %s11767_s15  ;;  %18328 = vst [vmem:[#allocation19_spill] sm:$0xff] %v15015_v42  ;;  %18332 = vst [vmem:[#allocation17_spill] sm:$0xff] %v15041_v61  ;;  %v15085_v42 = vcombine.high %v14785_v58, %v18156_v14 }
 0x6ce   :  { %18323 = vst [vmem:[#allocation18_spill] sm:$0xff] %v14973_v21  ;;  %18339 = vst [vmem:[#allocation30_spill] sm:$0xff] %v15089_v43 }
 0x6cf   :  { %v14988_v41 = vpop.permute.xlu1 %6822  ;;  %18338 = vst [vmem:[#allocation39_spill] sm:$0xff] %v15085_v42  ;;  %v6129_v42 = vcombine.high %v14747_v60, %v14825_v3  ;;  %v15248_v60 = vld [vmem:[#allocation2 + $0xb2] sm:$0xff] }
 0x6d0   :  { %18324 = vst [vmem:[#allocation33_spill] sm:$0xff] %v14988_v41  ;;  %8774 = vrot.lane.b32.xlu0 %v9011_v44, %s11767_s15  ;;  %v15008_v44 = vcombine.high %v14847_v2, %v18156_v14 }
 0x6d1   :  { %7309 = vrot.lane.b32.xlu1 %v14991_v40, %s11767_s15 }
 0x6d2   :  { %18327 = vst [vmem:[#allocation52_spill] sm:$0xff] %v15008_v44  ;;  %v15079_v44 = vld [vmem:[#allocation2 + $0x52] sm:$0xff] }
 0x6d3   :  { %v14995_v32 = vpop.permute.xlu1 %6826 }
 0x6d4   :  { %18325 = vst [vmem:[#allocation35_spill] sm:$0xff] %v14995_v32  ;;  %8778 = vrot.lane.b32.xlu0 %v9013_v27, %s11767_s15 }
 0x6d5   :  { %7313 = vrot.lane.b32.xlu1 %v15000_v20, %s11767_s15 }
 0x6d7   :  { %v15004_v48 = vpop.permute.xlu1 %6830 }
 0x6d8   :  { %18326 = vst [vmem:[#allocation29_spill] sm:$0xff] %v15004_v48  ;;  %8782 = vrot.lane.b32.xlu0 %v9015_v45, %s11767_s15  ;;  %v6846_v27 = vcombine.low %v14988_v41, %v15004_v48  ;;  %v15027_v45 = vcombine.high %v14838_v15, %v18156_v14  ;;  %v15037_v41 = vcombine.high %v14850_v16, %v18156_v14 }
 0x6d9   :  { %7559 = vrot.lane.b32.xlu1 %v15011_v50, %s11766_s14  ;;  %v15045_v48 = vcombine.high %v14885_v38, %v18156_v14 }
 0x6da   :  { %18330 = vst [vmem:[#allocation15_spill] sm:$0xff] %v15027_v45  ;;  %18331 = vst [vmem:[#allocation26_spill] sm:$0xff] %v15037_v41  ;;  %v15255_v45 = vld [vmem:[#allocation2 + $0xaa] sm:$0xff] }
 0x6db   :  { %v15023_v5 = vpop.permute.xlu1 %6834  ;;  %18333 = vst [vmem:[#allocation20_spill] sm:$0xff] %v15045_v48 }
 0x6dc   :  { %18329 = vst [vmem:[#allocation16_spill] sm:$0xff] %v15023_v5  ;;  %v6862_v21 = vcombine.low %v14995_v32, %v15023_v5  ;;  %5834 = vrot.lane.b32.xlu0 %v14703_v34, %s11767_s15  ;;  %v15052_v32 = vrot.slane %v6846_v27, %v18294_v4  ;;  %v15075_v27 = vcombine.high %v14832_v36, %v18156_v14 }
 0x6dd   :  { %7563 = vrot.lane.b32.xlu1 %v15033_v53, %s11766_s14  ;;  %v15095_v34 = vcombine.high %v14791_v9, %v18156_v14 }
 0x6de   :  { %18334 = vst [vmem:[#allocation53_spill] sm:$0xff] %v15052_v32  ;;  %v15055_v5 = vrot.slane %v6862_v21, %v18294_v4  ;;  %v15071_v21 = vcombine.high %v14779_v49, %v18156_v14  ;;  %18337 = vst [vmem:[#allocation56_spill] sm:$0xff] %v15075_v27  ;;  %v15117_v27 = vcombine.high %v14955_v25, %v18156_v14 }
 0x6df   :  { %18340 = vst [vmem:[#allocation58_spill] sm:$0xff] %v15095_v34  ;;  %v15125_v32 = vcombine.high %v14950_v22, %v18156_v14 }
 0x6e0   :  { %18335 = vst [vmem:[#allocation23_spill] sm:$0xff] %v15055_v5  ;;  %5838 = vrot.lane.b32.xlu0 %v14721_v35, %s11767_s15  ;;  %18336 = vst [vmem:[#allocation54_spill] sm:$0xff] %v15071_v21  ;;  %v15113_v21 = vcombine.high %v14944_v28, %v18156_v14  ;;  %v15129_v35 = vcombine.high %v14958_v11, %v18156_v14 }
 0x6e1   :  { %7567 = vrot.lane.b32.xlu1 %v15065_v17, %s11766_s14  ;;  %18343 = vst [vmem:[#allocation46_spill] sm:$0xff] %v15117_v27  ;;  %18344 = vst [vmem:[#allocation40_spill] sm:$0xff] %v15125_v32  ;;  %v15215_v27 = vld [vmem:[#allocation2 + $0x82] sm:$0xff] }
 0x6e2   :  { %18342 = vst [vmem:[#allocation57_spill] sm:$0xff] %v15113_v21  ;;  %18345 = vst [vmem:[#allocation22_spill] sm:$0xff] %v15129_v35  ;;  %v15201_v21 = vld [vmem:[#allocation2 + $0x6a] sm:$0xff]  ;;  %v15211_v35 = vld [vmem:[#allocation2 + $0x62] sm:$0xff] }
 0x6e4   :  { %5842 = vrot.lane.b32.xlu0 %v14737_v52, %s11767_s15  ;;  %v15099_v52 = vcombine.high %v14844_v29, %v18156_v14 }
 0x6e5   :  { %7571 = vrot.lane.b32.xlu1 %v15079_v44, %s11766_s14 }
 0x6e6   :  { %18341 = vst [vmem:[#allocation36_spill] sm:$0xff] %v15099_v52 }
 0x6e8   :  { %5846 = vrot.lane.b32.xlu0 %v14757_v24, %s11767_s15  ;;  %v15143_v24 = vcombine.high %v14967_v33, %v18156_v14 }
 0x6e9   :  { %8037 = vrot.lane.b32.xlu1 %v14896_v37, %s11767_s15 }
 0x6ea   :  { %18347 = vst [vmem:[#allocation10_spill] sm:$0xff] %v15143_v24 }
 0x6ec   :  { %6824 = vrot.lane.b32.xlu0 %v14749_v7, %s11766_s14  ;;  %v15139_v7 = vcombine.high %v14964_v59, %v18156_v14 }
 0x6ed   :  { %8041 = vrot.lane.b32.xlu1 %v14900_v10, %s11767_s15 }
 0x6ee   :  { %18346 = vst [vmem:[#allocation41_spill] sm:$0xff] %v15139_v7 }
 0x6f0   :  { %6828 = vrot.lane.b32.xlu0 %v14759_v47, %s11766_s14  ;;  %v15177_v47 = vld [vmem:[#allocation2 + $0x81] sm:$0xff] }
 0x6f1   :  { %8045 = vrot.lane.b32.xlu1 %v14890_v18, %s11767_s15 }
 0x6f4   :  { %6832 = vrot.lane.b32.xlu0 %v14739_v56, %s11766_s14  ;;  %v15171_v56 = vld [vmem:[#allocation2 + $0x69] sm:$0xff] }
 0x6f5   :  { %8049 = vrot.lane.b32.xlu1 %v14902_v54, %s11767_s15 }
 0x6f8   :  { %6836 = vrot.lane.b32.xlu0 %v14761_v62, %s11766_s14 }
 0x6f9   :  { %8293 = vrot.lane.b32.xlu1 %v14896_v37, %s11766_s14  ;;  %v15185_v37 = vld [vmem:[#allocation2 + $0x99] sm:$0xff] }
 0x6fc   :  { %7303 = vrot.lane.b32.xlu0 %v15011_v50, %s11767_s15 }
 0x6fd   :  { %8297 = vrot.lane.b32.xlu1 %v14900_v10, %s11766_s14  ;;  %v15193_v10 = vld [vmem:[#allocation2 + $0xb1] sm:$0xff] }
 0x700   :  { %7307 = vrot.lane.b32.xlu0 %v15033_v53, %s11767_s15 }
 0x701   :  { %8301 = vrot.lane.b32.xlu1 %v14890_v18, %s11766_s14 }
 0x704   :  { %7311 = vrot.lane.b32.xlu0 %v15065_v17, %s11767_s15 }
 0x705   :  { %8305 = vrot.lane.b32.xlu1 %v14902_v54, %s11766_s14 }
 0x708   :  { %7315 = vrot.lane.b32.xlu0 %v15079_v44, %s11767_s15 }
 0x709   :  { %9027 = vrot.lane.b32.xlu1 %v15171_v56, %s11766_s14 }
 0x70c   :  { %7557 = vrot.lane.b32.xlu0 %v14930_v51, %s11766_s14 }
 0x70d   :  { %9031 = vrot.lane.b32.xlu1 %v15177_v47, %s11766_s14 }
 0x70e   :  { %v15181_v62 = vpop.permute.xlu0 %8035 }
 0x70f   :  { %18348 = vst [vmem:[#allocation28_spill] sm:$0xff] %v15181_v62 }
 0x710   :  { %7561 = vrot.lane.b32.xlu0 %v14976_v30, %s11766_s14 }
 0x711   :  { %9035 = vrot.lane.b32.xlu1 %v15185_v37, %s11766_s14 }
 0x712   :  { %v15189_v18 = vpop.permute.xlu0 %8039 }
 0x713   :  { %18349 = vst [vmem:[#allocation34_spill] sm:$0xff] %v15189_v18 }
 0x714   :  { %7565 = vrot.lane.b32.xlu0 %v14991_v40, %s11766_s14 }
 0x715   :  { %9039 = vrot.lane.b32.xlu1 %v15193_v10, %s11766_s14 }
 0x716   :  { %v15197_v54 = vpop.permute.xlu0 %8043 }
 0x717   :  { %18350 = vst [vmem:[#allocation31_spill] sm:$0xff] %v15197_v54  ;;  %v8059_v5 = vcombine.low %v15181_v62, %v15197_v54 }
 0x718   :  { %7569 = vrot.lane.b32.xlu0 %v15000_v20, %s11766_s14 }
 0x719   :  { %9506 = vrot.lane.b32.xlu1 %v15201_v21, %s11767_s15  ;;  %v15218_v34 = vrot.slane %v8059_v5, %v18294_v4  ;;  %v15235_v5 = vld [vmem:[#allocation2 + $0x9a] sm:$0xff] }
 0x71a   :  { %v15207_v7 = vpop.permute.xlu0 %8047 }
 0x71b   :  { %18351 = vst [vmem:[#allocation59_spill] sm:$0xff] %v15207_v7  ;;  %v6091_v24 = vpop.permute.xlu1 %6090  ;;  %v8075_v32 = vcombine.low %v15189_v18, %v15207_v7  ;;  %18352 = vst [vmem:[#allocation55_spill] sm:$0xff] %v15218_v34  ;;  %v15229_v7 = vld [vmem:[#allocation2 + $0x7a] sm:$0xff]  ;;  %v15243_v18 = vld [vmem:[#allocation2 + $0x92] sm:$0xff]  ;;  %v6143_v34 = vrot.slane %v6129_v42, %v18294_v4  ;;  %v6145_v42 = vcombine.high %v14853_v31, %v14856_v23 }
 0x71c   :  { %9504 = vrot.lane.b32.xlu0 %v15211_v35, %s11767_s15 }
 0x71d   :  { %v15221_v62 = vrot.slane %v8075_v32, %v18294_v4  ;;  %9510 = vrot.lane.b32.xlu1 %v15215_v27, %s11767_s15  ;;  %v6113_v32 = vcombine.high %v14733_v19, %v14773_v13 }
 0x71e   :  { %v15225_v54 = vpop.permute.xlu0 %8291 }
 0x71f   :  { %18353 = vst [vmem:[#allocation60_spill] sm:$0xff] %v15221_v62  ;;  %18354 = vst [vmem:[#allocation61_spill] sm:$0xff] %v15225_v54  ;;  %v6095_v52 = vpop.permute.xlu1 %6094  ;;  %v6127_v39 = vrot.slane %v6113_v32, %v18294_v4 }
 0x720   :  { %9508 = vrot.lane.b32.xlu0 %v15229_v7, %s11767_s15 }
 0x721   :  { %9514 = vrot.lane.b32.xlu1 %v15235_v5, %s11767_s15  ;;  %v6160_v41 = vcombine.low %v6127_v39, %v6143_v34 }
 0x722   :  { %v15241_v43 = vpop.permute.xlu0 %8295 }
 0x723   :  { %18355 = vst [vmem:[#allocation62_spill] sm:$0xff] %v15241_v43  ;;  %v6099_v63 = vpop.permute.xlu1 %6098 }
 0x724   :  { %9512 = vrot.lane.b32.xlu0 %v15243_v18, %s11767_s15  ;;  %v6180_v3 = vcombine.low %v6091_v24, %v6099_v63  ;;  %v6181_v62 = vcombine.high %v6091_v24, %v6099_v63 }
 0x725   :  { %9518 = vrot.lane.b32.xlu1 %v15248_v60, %s11767_s15 }
 0x726   :  { %v15253_v19 = vpop.permute.xlu0 %8299  ;;  %v15262_v63 = vrot.slane %v6180_v3, %v18294_v4  ;;  %v6195_v24 = vrot.slane %v6181_v62, %v18294_v4  ;;  %v15294_v3 = vrot.slane %v6160_v41, %v11969_v26 }
 0x727   :  { %18356 = vst [vmem:[#allocation63_spill] sm:$0xff] %v15253_v19  ;;  %v6103_v13 = vpop.permute.xlu1 %6102 }
 0x728   :  { %v6196_v61 = vcombine.low %v6095_v52, %v6103_v13  ;;  %v6197_v48 = vcombine.high %v6095_v52, %v6103_v13  ;;  %9516 = vrot.lane.b32.xlu0 %v15255_v45, %s11767_s15  ;;  %18357 = vst [vmem:[#allocation64_spill] sm:$0xff] %v15262_v63  ;;  %v6161_v52 = vcombine.high %v6127_v39, %v6143_v34  ;;  %18363 = vst [vmem:[#allocation70_spill] sm:$0xff] %v15294_v3 }
 0x729   :  { %8772 = vrot.lane.b32.xlu1 %v15171_v56, %s11767_s15  ;;  %v8315_v13 = vcombine.low %v15225_v54, %v15253_v19  ;;  %v15286_v39 = vrot.slane %v6145_v42, %v11969_v26 }
 0x72a   :  { %v15266_v32 = vrot.slane %v6196_v61, %v18294_v4  ;;  %v6211_v1 = vrot.slane %v6197_v48, %v18294_v4  ;;  %v15273_v23 = vpop.permute.xlu0 %8303 }
 0x72b   :  { %18359 = vst [vmem:[#allocation66_spill] sm:$0xff] %v15273_v23  ;;  %v15275_v31 = vpop.permute.xlu1 %6569  ;;  %v8331_v48 = vcombine.low %v15241_v43, %v15273_v23  ;;  %18361 = vst [vmem:[#allocation68_spill] sm:$0xff] %v15286_v39 }
 0x72c   :  { %18358 = vst [vmem:[#allocation65_spill] sm:$0xff] %v15266_v32  ;;  %18360 = vst [vmem:[#allocation67_spill] sm:$0xff] %v15275_v31  ;;  %v6213_v61 = vcombine.high %v15262_v63, %v15266_v32  ;;  %v6228_v62 = vcombine.low %v6195_v24, %v6211_v1  ;;  %v6229_v0 = vcombine.high %v6195_v24, %v6211_v1  ;;  %9760 = vrot.lane.b32.xlu0 %v15211_v35, %s11766_s14 }
 0x72d   :  { %8776 = vrot.lane.b32.xlu1 %v15177_v47, %s11767_s15  ;;  %v15303_v32 = vrot.slane %v8315_v13, %v18294_v4  ;;  %v15306_v42 = vrot.slane %v8331_v48, %v18294_v4 }
 0x72e   :  { %v15291_v34 = vrot.slane %v6213_v61, %v11969_v26  ;;  %v15297_v1 = vrot.slane %v6228_v62, %v11969_v26  ;;  %v15300_v24 = vrot.slane %v6229_v0, %v11969_v26  ;;  %v15308_v63 = vpop.permute.xlu0 %9025  ;;  %v15313_v61 = vrot.slane %v6161_v52, %v11969_v26 }
 0x72f   :  { %18366 = vst [vmem:[#allocation73_spill] sm:$0xff] %v15303_v32  ;;  %18367 = vst [vmem:[#allocation74_spill] sm:$0xff] %v15306_v42  ;;  %v15310_v43 = vpop.permute.xlu1 %6573  ;;  %v15321_v0 = vcombine.high %v15286_v39, %v18156_v14  ;;  %v15331_v52 = vcombine.high %v15294_v3, %v18156_v14  ;;  %v9357_v39 = vcombine.low %v15215_v27, %v15248_v60 }
 0x730   :  { %18362 = vst [vmem:[#allocation69_spill] sm:$0xff] %v15291_v34  ;;  %18364 = vst [vmem:[#allocation71_spill] sm:$0xff] %v15297_v1  ;;  %9764 = vrot.lane.b32.xlu0 %v15229_v7, %s11766_s14  ;;  %v15327_v13 = vcombine.high %v15291_v34, %v18156_v14  ;;  %v15335_v62 = vcombine.high %v15297_v1, %v18156_v14  ;;  %v15339_v48 = vcombine.high %v15300_v24, %v18156_v14  ;;  %v11683_v34 = vld [vmem:[#allocation2 + $0x7d] ss:$48 sps:$4 sm:$0xff]  }
 0x731   :  { %18365 = vst [vmem:[#allocation72_spill] sm:$0xff] %v15300_v24  ;;  %18368 = vst [vmem:[#allocation75_spill] sm:$0xff] %v15308_v63  ;;  %8780 = vrot.lane.b32.xlu1 %v15185_v37, %s11767_s15  ;;  %v15347_v42 = vcombine.high %v15313_v61, %v18156_v14 }
 0x732   :  { %18369 = vst [vmem:[#allocation76_spill] sm:$0xff] %v15310_v43  ;;  %18370 = vst [vmem:[#allocation77_spill] sm:$0xff] %v15313_v61  ;;  %v15341_v41 = vpop.permute.xlu0 %9029 }
 0x733   :  { %18371 = vst [vmem:[#allocation78_spill] sm:$0xff] %v15321_v0  ;;  %18372 = vst [vmem:[#allocation79_spill] sm:$0xff] %v15327_v13  ;;  %v15343_v32 = vpop.permute.xlu1 %6577  ;;  %v11678_v0 = vld [vmem:[#allocation2 + $0x79] ss:$48 sps:$4 sm:$0xff]   ;;  %v7086_v13 = vcombine.low %v14976_v30, %v15000_v20 }
 0x734   :  { %18373 = vst [vmem:[#allocation80_spill] sm:$0xff] %v15331_v52  ;;  %18374 = vst [vmem:[#allocation81_spill] sm:$0xff] %v15335_v62  ;;  %9768 = vrot.lane.b32.xlu0 %v15243_v18, %s11766_s14  ;;  %v6659_v24 = vcombine.low %v15275_v31, %v15343_v32  ;;  %v15418_v3 = vrot.slane %v11678_v0, %v18294_v4  ;;  %v18390_v0 = vld [vmem:[#allocation37_spill] sm:$0xff] }
 0x735   :  { %18375 = vst [vmem:[#allocation82_spill] sm:$0xff] %v15339_v48  ;;  %18376 = vst [vmem:[#allocation83_spill] sm:$0xff] %v15341_v41  ;;  %8784 = vrot.lane.b32.xlu1 %v15193_v10, %s11767_s15 }
 0x736   :  { %18377 = vst [vmem:[#allocation84_spill] sm:$0xff] %v15343_v32  ;;  %18378 = vst [vmem:[#allocation85_spill] sm:$0xff] %v15347_v42  ;;  %v15361_v61 = vpop.permute.xlu0 %9033  ;;  %v15370_v54 = vrot.slane %v6659_v24, %v18294_v4 }
 0x737   :  { %18379 = vst [vmem:[#allocation86_spill] sm:$0xff] %v15361_v61  ;;  %v15363_v1 = vpop.permute.xlu1 %6581  ;;  %v9049_v42 = vcombine.low %v15308_v63, %v15361_v61 }
 0x738   :  { %18380 = vst [vmem:[#allocation87_spill] sm:$0xff] %v15363_v1  ;;  %v6675_v23 = vcombine.low %v15310_v43, %v15363_v1  ;;  %9772 = vrot.lane.b32.xlu0 %v15255_v45, %s11766_s14  ;;  %18381 = vst [vmem:[#allocation88_spill] sm:$0xff] %v15370_v54  ;;  %v7087_v43 = vcombine.high %v14976_v30, %v15000_v20  ;;  %v15471_v30 = vrot.slane %v9357_v39, %v18294_v4 }
 0x739   :  { %9762 = vrot.lane.b32.xlu1 %v15201_v21, %s11766_s14  ;;  %v15396_v63 = vrot.slane %v9049_v42, %v18294_v4  ;;  %v18388_v42 = vpack.i.bf16 %v14841_v6, %v14785_v58  ;;  %v7138_v58 = vcombine.low %v15011_v50, %v15065_v17  ;;  %v9290_v39 = vcombine.high %v15229_v7, %v15255_v45 }
 0x73a   :  { %v15373_v19 = vrot.slane %v6675_v23, %v18294_v4  ;;  %v15379_v48 = vpop.permute.xlu0 %9037  ;;  %v18384_v23 = vpack.i.bf16 %v14832_v36, %v14779_v49  ;;  %v7070_v49 = vcombine.low %v14930_v51, %v14991_v40  ;;  %v7154_v36 = vcombine.low %v15033_v53, %v15079_v44 }
 0x73b   :  { %18383 = vst [vmem:[#allocation90_spill] sm:$0xff] %v15379_v48  ;;  %v15383_v62 = vpop.permute.xlu1 %7301  ;;  %v9065_v24 = vcombine.low %v15341_v41, %v15379_v48  ;;  %18385 = vst [vmem:[#allocation91_spill] sm:$0xff] %v15396_v63  ;;  %v11676_v41 = vld [vmem:[#allocation2 + $0x61] ss:$48 sps:$4 sm:$0xff]   ;;  %v18391_v63 = vcombine.low %v14648_v46, %v18390_v0  ;;  %v18393_v46 = vpack.i.bf16 %v14844_v29, %v14791_v9 }
 0x73c   :  { %18382 = vst [vmem:[#allocation89_spill] sm:$0xff] %v15373_v19  ;;  %10984 = vrot.lane.b32.xlu0 %v18384_v23, %s11759_s0  ;;  %v15425_v23 = vrot.slane %v7086_v13, %v18294_v4  ;;  %v15440_v54 = vrot.slane %v11676_v41, %v18294_v4  ;;  %v9341_v13 = vcombine.low %v15201_v21, %v15235_v5 }
 0x73d   :  { %9766 = vrot.lane.b32.xlu1 %v15215_v27, %s11766_s14  ;;  %v15399_v52 = vrot.slane %v9065_v24, %v18294_v4  ;;  %v9289_v24 = vcombine.low %v15229_v7, %v15255_v45  ;;  %v15447_v31 = vrot.slane %v7070_v49, %v18294_v4  ;;  %v15450_v32 = vrot.slane %v7154_v36, %v18294_v4 }
 0x73e   :  { %v15401_v61 = vpop.permute.xlu0 %8770  ;;  %v7071_v41 = vcombine.high %v14930_v51, %v14991_v40  ;;  %v8571_v49 = vcombine.high %v15440_v54, %v15418_v3  ;;  %v15466_v36 = vrot.slane %v11683_v34, %v18294_v4  ;;  %v15476_v29 = vrot.slane %v7138_v58, %v18294_v4 }
 0x73f   :  { %18386 = vst [vmem:[#allocation92_spill] sm:$0xff] %v15399_v52  ;;  %18387 = vst [vmem:[#allocation93_spill] sm:$0xff] %v15401_v61  ;;  %v15403_v48 = vpop.permute.xlu1 %7305  ;;  %v15437_v52 = vrot.slane %v18391_v63, %v11969_v26  ;;  %v15459_v63 = vrot.slane %v9289_v24, %v18294_v4  ;;  %v7103_v9 = vcombine.high %v15447_v31, %v15425_v23 }
 0x740   :  { %10989 = vrot.lane.b32.xlu0 %v18388_v42, %s11757_s9  ;;  %v9273_v42 = vcombine.low %v15211_v35, %v15243_v18  ;;  %v7139_v51 = vcombine.high %v15011_v50, %v15065_v17  ;;  %v9358_v24 = vcombine.high %v15215_v27, %v15248_v60  ;;  %v15494_v58 = vrot.slane %v9341_v13, %v18294_v4 }
 0x741   :  { %9770 = vrot.lane.b32.xlu1 %v15235_v5, %s11766_s14  ;;  %18392 = vst [vmem:[#allocation37_spill] sm:$0xff] %v15437_v52  ;;  %v7171_v17 = vcombine.high %v15476_v29, %v15450_v32  ;;  %v15499_v50 = vrot.slane %v7087_v43, %v18294_v4  ;;  %v18395_v27 = vpack.i.bf16 %v14955_v25, %v14944_v28 }
 0x742   :  { %v15429_v6 = vpop.permute.xlu0 %8774  ;;  %v15485_v34 = vrot.slane %v9273_v42, %v18294_v4  ;;  %v7155_v42 = vcombine.high %v15033_v53, %v15079_v44  ;;  %v9342_v43 = vcombine.high %v15201_v21, %v15235_v5  ;;  %v18396_v44 = vpack.i.bf16 %v14847_v2, %v14823_v57  ;;  %v11682_v5 = vld [vmem:[#allocation2 + $0x65] ss:$48 sps:$4 sm:$0xff]  }
 0x743   :  { %18389 = vst [vmem:[#allocation94_spill] sm:$0xff] %v15429_v6  ;;  %v15442_v19 = vpop.permute.xlu1 %7309  ;;  %v9374_v25 = vcombine.high %v15494_v58, %v15471_v30  ;;  %v15524_v28 = vrot.slane %v7103_v9, %v11969_v26  ;;  %v15527_v13 = vrot.slane %v7071_v41, %v18294_v4  ;;  %v9304_v57 = vrot.slane %v9290_v39, %v18294_v4 }
 0x744   :  { %10994 = vrot.lane.b32.xlu0 %v18393_v46, %s11758_s10  ;;  %v7325_v20 = vcombine.low %v15383_v62, %v15442_v19  ;;  %v9306_v7 = vcombine.high %v15485_v34, %v15459_v63  ;;  %v9372_v2 = vrot.slane %v9358_v24, %v18294_v4  ;;  %v15544_v41 = vrot.slane %v7171_v17, %v11969_v26 }
 0x745   :  { %9774 = vrot.lane.b32.xlu1 %v15248_v60, %s11766_s14  ;;  %v9274_v60 = vcombine.high %v15211_v35, %v15243_v18  ;;  %v18401_v39 = vpack.i.bf16 %v14958_v11, %v14950_v22  ;;  %v9356_v17 = vrot.slane %v9342_v43, %v18294_v4  ;;  %v15571_v22 = vrot.slane %v9374_v25, %v11969_v26 }
 0x746   :  { %v15482_v40 = vpop.permute.xlu0 %8778  ;;  %v15530_v35 = vrot.slane %v7325_v20, %v18294_v4  ;;  %v7118_v20 = vcombine.low %v15527_v13, %v15499_v50  ;;  %v15556_v24 = vrot.slane %v9306_v7, %v11969_v26  ;;  %v7153_v11 = vrot.slane %v7139_v51, %v18294_v4 }
 0x747   :  { %18394 = vst [vmem:[#allocation95_spill] sm:$0xff] %v15482_v40  ;;  %v15491_v0 = vpop.permute.xlu1 %7313  ;;  %v8794_v53 = vcombine.low %v15401_v61, %v15482_v40  ;;  %v9389_v43 = vcombine.low %v9356_v17, %v9372_v2  ;;  %v15587_v25 = vcombine.high %v15437_v52, %v18156_v14  ;;  %v18405_v51 = vpack.i.bf16 %v14967_v33, %v14964_v59  ;;  %v18407_v52 = vld [vmem:[#allocation47_spill] sm:$0xff] }
 0x748   :  { %v7341_v45 = vcombine.low %v15403_v48, %v15491_v0  ;;  %11019 = vrot.lane.b32.xlu0 %v18395_v27, %s11759_s0  ;;  %18397 = vst [vmem:[#allocation96_spill] sm:$0xff] %v15530_v35  ;;  %v18404_v27 = vpack.i.bf16 %v14850_v16, %v14838_v15  ;;  %v18408_v33 = vpack.i.bf16 %v14885_v38, %v14882_v55 }
 0x749   :  { %10969 = vrot.lane.b32.xlu1 %v18396_v44, %s11759_s0  ;;  %v9288_v44 = vrot.slane %v9274_v60, %v18294_v4  ;;  %v11043_v59 = vpack.i.bf16 %v15571_v22, %v15556_v24  ;;  %v9390_v1 = vcombine.high %v9356_v17, %v9372_v2  ;;  %v18410_v2 = vld [vmem:[#allocation50_spill] sm:$0xff] }
 0x74a   :  { %v15533_v21 = vrot.slane %v7341_v45, %v18294_v4  ;;  %v15535_v18 = vpop.permute.xlu0 %8782  ;;  %v7169_v45 = vrot.slane %v7155_v42, %v18294_v4  ;;  %v5872_v17 = vcombine.low %v18410_v2, %v14952_v12 }
 0x74b   :  { %18399 = vst [vmem:[#allocation98_spill] sm:$0xff] %v15535_v18  ;;  %v8810_v46 = vcombine.low %v15429_v6, %v15535_v18  ;;  %v15541_v9 = vpop.permute.xlu1 %7559  ;;  %v15561_v6 = vrot.slane %v8794_v53, %v18294_v4  ;;  %v9321_v60 = vcombine.low %v9288_v44, %v9304_v57  ;;  %v8622_v53 = vcombine.low %v15177_v47, %v15193_v10 }
 0x74c   :  { %18398 = vst [vmem:[#allocation97_spill] sm:$0xff] %v15533_v21  ;;  %18400 = vst [vmem:[#allocation99_spill] sm:$0xff] %v15541_v9  ;;  %11029 = vrot.lane.b32.xlu0 %v18401_v39, %s11757_s9  ;;  %v7186_v16 = vcombine.low %v7153_v11, %v7169_v45  ;;  %v8606_v39 = vcombine.low %v15171_v56, %v15185_v37 }
 0x74d   :  { %18402 = vst [vmem:[#allocation100_spill] sm:$0xff] %v15561_v6  ;;  %v15564_v42 = vrot.slane %v8810_v46, %v18294_v4  ;;  %10974 = vrot.lane.b32.xlu1 %v18404_v27, %s11757_s9  ;;  %v15579_v46 = vrot.slane %v11682_v5, %v18294_v4  ;;  %v10998_v27 = vpack.i.bf16 %v15544_v41, %v15524_v28 }
 0x74e   :  { %v15574_v7 = vpop.permute.xlu0 %5834  ;;  %v15596_v5 = vrot.slane %v8571_v49, %v11969_v26  ;;  %v15611_v49 = vrot.slane %v7118_v20, %v11969_v26  ;;  %v15614_v40 = vrot.slane %v9321_v60, %v11969_v26  ;;  %v15617_v6 = vrot.slane %v9389_v43, %v11969_v26 }
 0x74f   :  { %18403 = vst [vmem:[#allocation101_spill] sm:$0xff] %v15564_v42  ;;  %v15583_v15 = vpop.permute.xlu1 %7563  ;;  %v18406_v42 = vld [vmem:[#allocation42_spill] sm:$0xff]  ;;  %v15620_v35 = vrot.slane %v8622_v53, %v18294_v4  ;;  %v15625_v38 = vrot.slane %v7186_v16, %v11969_v26  ;;  %v7119_v20 = vcombine.high %v15527_v13, %v15499_v50  ;;  %v5873_v43 = vcombine.high %v18410_v2, %v14952_v12 }
 0x750   :  { %11039 = vrot.lane.b32.xlu0 %v18405_v51, %s11758_s10  ;;  %v5856_v18 = vcombine.low %v18407_v52, %v18406_v42  ;;  %v9322_v51 = vcombine.high %v9288_v44, %v9304_v57  ;;  %v7187_v57 = vcombine.high %v7153_v11, %v7169_v45  ;;  %v8623_v44 = vcombine.high %v15177_v47, %v15193_v10  ;;  %v18412_v10 = vld [vmem:[#allocation11_spill] sm:$0xff] }
 0x751   :  { %10979 = vrot.lane.b32.xlu1 %v18408_v33, %s11758_s10  ;;  %v5857_v60 = vcombine.high %v18407_v52, %v18406_v42  ;;  %v15639_v53 = vrot.slane %v8606_v39, %v18294_v4  ;;  %v18413_v52 = vcombine.low %v14804_v8, %v18412_v10  ;;  %v8607_v12 = vcombine.high %v15171_v56, %v15185_v37 }
 0x752   :  { %v5839_v61 = vpop.permute.xlu0 %5838  ;;  %v15642_v50 = vrot.slane %v5856_v18, %v18294_v4  ;;  %v15646_v47 = vrot.slane %v9322_v51, %v11969_v26  ;;  %v11048_v18 = vpack.i.bf16 %v15617_v6, %v15614_v40  ;;  %v15661_v11 = vrot.slane %v9390_v1, %v11969_v26 }
 0x753   :  { %v15622_v55 = vpop.permute.xlu1 %7567  ;;  %v15652_v13 = vrot.slane %v18413_v52, %v11969_v26  ;;  %v8639_v39 = vcombine.high %v15639_v53, %v15620_v35  ;;  %v11003_v8 = vpack.i.bf16 %v15625_v38, %v15611_v49  ;;  %v15670_v56 = vrot.slane %v7119_v20, %v11969_v26 }
 0x754   :  { %18409 = vst [vmem:[#allocation42_spill] sm:$0xff] %v15622_v55  ;;  %11044 = vrot.lane.b32.xlu0 %v11043_v59, %s11759_s0  ;;  %18411 = vst [vmem:[#allocation47_spill] sm:$0xff] %v15642_v50  ;;  %v7649_v45 = vcombine.low %v15541_v9, %v15622_v55  ;;  %v15673_v37 = vrot.slane %v7187_v57, %v11969_v26  ;;  %v5871_v33 = vrot.slane %v5857_v60, %v18294_v4 }
 0x755   :  { %10999 = vrot.lane.b32.xlu1 %v10998_v27, %s11759_s0  ;;  %18414 = vst [vmem:[#allocation50_spill] sm:$0xff] %v15652_v13  ;;  %v8637_v27 = vrot.slane %v8623_v44, %v18294_v4  ;;  %v15678_v1 = vrot.slane %v5872_v17, %v18294_v4  ;;  %v5887_v59 = vrot.slane %v5873_v43, %v18294_v4 }
 0x756   :  { %v5843_v42 = vpop.permute.xlu0 %5842  ;;  %v5733_v57 = vcombine.high %v15652_v13, %v18156_v14  ;;  %v8621_v44 = vrot.slane %v8607_v12, %v18294_v4  ;;  %v15691_v60 = vrot.slane %v7649_v45, %v18294_v4  ;;  %v11053_v10 = vpack.i.bf16 %v15661_v11, %v15646_v47 }
 0x757   :  { %v15665_v16 = vpop.permute.xlu1 %7571  ;;  %18415 = vst [vmem:[#allocation11_spill] sm:$0xff] %v15678_v1  ;;  %v5924_v20 = vcombine.low %v15574_v7, %v5843_v42  ;;  %v5925_v2 = vcombine.high %v15574_v7, %v5843_v42  ;;  %v15699_v52 = vrot.slane %v8639_v39, %v11969_v26  ;;  %v11008_v12 = vpack.i.bf16 %v15673_v37, %v15670_v56 }
 0x758   :  { %v7665_v51 = vcombine.low %v15583_v15, %v15665_v16  ;;  %11049 = vrot.lane.b32.xlu0 %v11048_v18, %s11757_s9  ;;  %18416 = vst [vmem:[#allocation102_spill] sm:$0xff] %v15691_v60  ;;  %v5889_v45 = vcombine.high %v15642_v50, %v15678_v1  ;;  %v5905_v13 = vcombine.high %v5871_v33, %v5887_v59 }
 0x759   :  { %11004 = vrot.lane.b32.xlu1 %v11003_v8, %s11757_s9  ;;  %v8654_v8 = vcombine.low %v8621_v44, %v8637_v27  ;;  %v15711_v39 = vrot.slane %v5924_v20, %v18294_v4  ;;  %v8587_v20 = vcombine.high %v15579_v46, %v15466_v36 }
 0x75a   :  { %v15694_v17 = vrot.slane %v7665_v51, %v18294_v4  ;;  %v5847_v43 = vpop.permute.xlu0 %5846  ;;  %v5904_v51 = vcombine.low %v5871_v33, %v5887_v59  ;;  %v11058_v33 = vpack.i.bf16 %v5733_v57, %v15587_v25  ;;  %v11013_v59 = vpack.i.bf16 %v15699_v52, %v15596_v5 }
 0x75b   :  { %v5940_v7 = vcombine.low %v5839_v61, %v5847_v43  ;;  %v5941_v42 = vcombine.high %v5839_v61, %v5847_v43  ;;  %v15701_v18 = vpop.permute.xlu1 %8037  ;;  %18419 = vst [vmem:[#allocation105_spill] sm:$0xff] %v15711_v39  ;;  %v5939_v61 = vrot.slane %v5925_v2, %v18294_v4  ;;  %v18422_v25 = vcombine.low %v15579_v46, %v15466_v36 }
 0x75c   :  { %18417 = vst [vmem:[#allocation103_spill] sm:$0xff] %v15694_v17  ;;  %18418 = vst [vmem:[#allocation104_spill] sm:$0xff] %v15701_v18  ;;  %11054 = vrot.lane.b32.xlu0 %v11053_v10, %s11758_s10  ;;  %v8655_v10 = vcombine.high %v8621_v44, %v8637_v27  ;;  %v7102_v27 = vcombine.low %v15447_v31, %v15425_v23  ;;  %v15743_v44 = vrot.slane %v5889_v45, %v11969_v26 }
 0x75d   :  { %v15715_v43 = vrot.slane %v5940_v7, %v18294_v4  ;;  %v5955_v55 = vrot.slane %v5941_v42, %v18294_v4  ;;  %11009 = vrot.lane.b32.xlu1 %v11008_v12, %s11758_s10  ;;  %v15731_v42 = vrot.slane %v8654_v8, %v11969_v26  ;;  %v15738_v57 = vrot.slane %v18422_v25, %v11969_v26 }
 0x75e   :  { %v15719_v50 = vpop.permute.xlu0 %6824  ;;  %18423 = vst [vmem:[#allocation108_spill] sm:$0xff] %v15743_v44  ;;  %v15756_v36 = vrot.slane %v5905_v13, %v11969_v26  ;;  %v7170_v23 = vcombine.low %v15476_v29, %v15450_v32  ;;  %v18432_v13 = vld [vmem:[#allocation27_spill] sm:$0xff]  ;;  %v18439_v32 = vld [vmem:[#allocation52_spill] sm:$0xff] }
 0x75f   :  { %18420 = vst [vmem:[#allocation106_spill] sm:$0xff] %v15715_v43  ;;  %18421 = vst [vmem:[#allocation107_spill] sm:$0xff] %v15719_v50  ;;  %v5957_v2 = vcombine.high %v15711_v39, %v15715_v43  ;;  %v5972_v7 = vcombine.low %v5939_v61, %v5955_v55  ;;  %v5973_v9 = vcombine.high %v5939_v61, %v5955_v55  ;;  %v15728_v1 = vpop.permute.xlu1 %8041  ;;  %v18440_v29 = vld [vmem:[#allocation19_spill] sm:$0xff] }
 0x760   :  { %11059 = vrot.lane.b32.xlu0 %v11058_v33, %s11761_s12  ;;  %v15746_v55 = vrot.slane %v5904_v51, %v11969_v26  ;;  %18427 = vst [vmem:[#allocation112_spill] sm:$0xff] %v15756_v36  ;;  %v11023_v51 = vpack.i.bf16 %v15731_v42, %v15738_v57  ;;  %v15770_v61 = vrot.slane %v8655_v10, %v11969_v26  ;;  %v18431_v33 = vld [vmem:[#allocation32_spill] sm:$0xff] }
 0x761   :  { %11014 = vrot.lane.b32.xlu1 %v11013_v59, %s11759_s0  ;;  %v15750_v12 = vrot.slane %v5957_v2, %v11969_v26  ;;  %v15753_v8 = vrot.slane %v5972_v7, %v11969_v26  ;;  %v15759_v46 = vrot.slane %v5973_v9, %v11969_v26  ;;  %v18433_v59 = vcombine.low %v18431_v33, %v18432_v13  ;;  %v18435_v9 = vld [vmem:[#allocation48_spill] sm:$0xff]  ;;  %v18436_v7 = vld [vmem:[#allocation25_spill] sm:$0xff] }
 0x762   :  { %18424 = vst [vmem:[#allocation109_spill] sm:$0xff] %v15746_v55  ;;  %v15761_v31 = vpop.permute.xlu0 %6828  ;;  %v18437_v25 = vcombine.low %v18435_v9, %v18436_v7  ;;  %v18441_v43 = vpack.i.bf16 %v18439_v32, %v18440_v29  ;;  %v15790_v10 = vcombine.high %v15743_v44, %v18156_v14  ;;  %v15798_v13 = vcombine.high %v15746_v55, %v18156_v14 }
 0x763   :  { %18425 = vst [vmem:[#allocation110_spill] sm:$0xff] %v15750_v12  ;;  %18426 = vst [vmem:[#allocation111_spill] sm:$0xff] %v15753_v8  ;;  %v15765_v45 = vpop.permute.xlu1 %8045  ;;  %v15776_v2 = vrot.slane %v18433_v59, %v11969_v26  ;;  %v15794_v33 = vcombine.high %v15750_v12, %v18156_v14  ;;  %v15802_v59 = vcombine.high %v15753_v8, %v18156_v14  ;;  %v18463_v12 = vld [vmem:[#allocation17_spill] sm:$0xff] }
 0x764   :  { %18428 = vst [vmem:[#allocation113_spill] sm:$0xff] %v15759_v46  ;;  %18429 = vst [vmem:[#allocation114_spill] sm:$0xff] %v15761_v31  ;;  %v15782_v39 = vrot.slane %v18437_v25, %v11969_v26  ;;  %11064 = vrot.lane.b32.xlu0 %v18441_v43, %s11760_s11  ;;  %v15806_v43 = vrot.slane %v8587_v20, %v11969_v26  ;;  %v15809_v9 = vrot.slane %v7102_v27, %v11969_v26  ;;  %v18452_v20 = vld [vmem:[#allocation15_spill] sm:$0xff]  ;;  %v18454_v27 = vld [vmem:[#allocation24_spill] sm:$0xff] }
 0x765   :  { %18430 = vst [vmem:[#allocation115_spill] sm:$0xff] %v15765_v45  ;;  %18434 = vst [vmem:[#allocation32_spill] sm:$0xff] %v15776_v2  ;;  %11024 = vrot.lane.b32.xlu1 %v11023_v51, %s11757_s9  ;;  %v15813_v7 = vcombine.high %v15756_v36, %v18156_v14  ;;  %v15817_v25 = vcombine.high %v15759_v46, %v18156_v14  ;;  %v8127_v32 = vcombine.low %v15701_v18, %v15765_v45  ;;  %v18451_v18 = vld [vmem:[#allocation26_spill] sm:$0xff] }
 0x766   :  { %18438 = vst [vmem:[#allocation27_spill] sm:$0xff] %v15782_v39  ;;  %18442 = vst [vmem:[#allocation48_spill] sm:$0xff] %v15790_v10  ;;  %v15821_v29 = vpop.permute.xlu0 %6832  ;;  %v15824_v51 = vrot.slane %v7170_v23, %v11969_v26  ;;  %v11033_v46 = vpack.i.bf16 %v15770_v61, %v15806_v43  ;;  %v6467_v8 = vcombine.high %v15782_v39, %v18156_v14 }
 0x767   :  { %18443 = vst [vmem:[#allocation25_spill] sm:$0xff] %v15794_v33  ;;  %18444 = vst [vmem:[#allocation52_spill] sm:$0xff] %v15798_v13  ;;  %v15830_v36 = vpop.permute.xlu1 %8049  ;;  %v18453_v10 = vpack.i.bf16 %v18451_v18, %v18452_v20  ;;  %v18455_v13 = vld [vmem:[#allocation51_spill] sm:$0xff]  ;;  %v6914_v33 = vcombine.low %v15719_v50, %v15821_v29  ;;  %v6399_v39 = vcombine.high %v15776_v2, %v18156_v14  ;;  %v18460_v50 = vld [vmem:[#allocation44_spill] sm:$0xff] }
 0x768   :  { %18445 = vst [vmem:[#allocation19_spill] sm:$0xff] %v15802_v59  ;;  %18446 = vst [vmem:[#allocation116_spill] sm:$0xff] %v15809_v9  ;;  %v8143_v23 = vcombine.low %v15728_v1, %v15830_v36  ;;  %v6608_v59 = vcombine.high %v18455_v13, %v18454_v27  ;;  %v15852_v55 = vrot.slane %v8127_v32, %v18294_v4  ;;  %v18458_v13 = vld [vmem:[#allocation16_spill] sm:$0xff]  ;;  %v18459_v20 = vld [vmem:[#allocation35_spill] sm:$0xff] }
 0x769   :  { %18447 = vst [vmem:[#allocation117_spill] sm:$0xff] %v15813_v7  ;;  %18448 = vst [vmem:[#allocation118_spill] sm:$0xff] %v15817_v25  ;;  %11069 = vrot.lane.b32.xlu0 %v18453_v10, %s11755_s7  ;;  %11034 = vrot.lane.b32.xlu1 %v11033_v46, %s11758_s10  ;;  %v7134_v18 = vcombine.high %v15809_v9, %v18156_v14  ;;  %v7202_v10 = vcombine.high %v15824_v51, %v18156_v14 }
 0x76a   :  { %18449 = vst [vmem:[#allocation119_spill] sm:$0xff] %v15821_v29  ;;  %18450 = vst [vmem:[#allocation120_spill] sm:$0xff] %v15824_v51  ;;  %v15855_v7 = vrot.slane %v8143_v23, %v18294_v4  ;;  %v15857_v25 = vpop.permute.xlu0 %6836  ;;  %v6863_v46 = vcombine.high %v18459_v20, %v18458_v13  ;;  %v11078_v32 = vpack.i.bf16 %v6467_v8, %v6399_v39  ;;  %v18461_v29 = vld [vmem:[#allocation49_spill] sm:$0xff]  ;;  %v18462_v51 = vld [vmem:[#allocation20_spill] sm:$0xff] }
 0x76b   :  { %18456 = vst [vmem:[#allocation26_spill] sm:$0xff] %v15852_v55  ;;  %v6930_v27 = vcombine.low %v15761_v31, %v15857_v25  ;;  %v15867_v2 = vpop.permute.xlu1 %8293  ;;  %v8570_v23 = vcombine.low %v15440_v54, %v15418_v3  ;;  %v6592_v45 = vcombine.high %v18461_v29, %v18460_v50  ;;  %v18464_v44 = vpack.i.bf16 %v18462_v51, %v18463_v12  ;;  %v18465_v20 = vld [vmem:[#allocation29_spill] sm:$0xff] }
 0x76c   :  { %18457 = vst [vmem:[#allocation15_spill] sm:$0xff] %v15855_v7  ;;  %v8638_v13 = vcombine.low %v15639_v53, %v15620_v35  ;;  %v18466_v31 = vld [vmem:[#allocation33_spill] sm:$0xff]  ;;  %v15884_v8 = vrot.slane %v6914_v33, %v18294_v4  ;;  %v15891_v3 = vrot.slane %v6608_v59, %v18294_v4  ;;  %v7135_v35 = vcombine.high %v15524_v28, %v18156_v14 }
 0x76d   :  { %11074 = vrot.lane.b32.xlu0 %v18464_v44, %s11756_s8  ;;  %v6847_v39 = vcombine.high %v18466_v31, %v18465_v20  ;;  %v15887_v54 = vrot.slane %v6930_v27, %v18294_v4  ;;  %11079 = vrot.lane.b32.xlu1 %v11078_v32, %s11761_s12  ;;  %v11098_v44 = vpack.i.bf16 %v7202_v10, %v7134_v18  ;;  %v18471_v10 = vld [vmem:[#allocation56_spill] sm:$0xff]  ;;  %v18474_v32 = vld [vmem:[#allocation45_spill] sm:$0xff]  ;;  %v18478_v20 = vld [vmem:[#allocation18_spill] sm:$0xff] }
 0x76e   :  { %18467 = vst [vmem:[#allocation24_spill] sm:$0xff] %v15884_v8  ;;  %v15893_v50 = vpop.permute.xlu0 %7303  ;;  %v7203_v53 = vcombine.high %v15544_v41, %v18156_v14  ;;  %v15900_v12 = vrot.slane %v6863_v46, %v18294_v4  ;;  %v15907_v59 = vrot.slane %v8570_v23, %v11969_v26  ;;  %v15910_v29 = vrot.slane %v6592_v45, %v18294_v4  ;;  %v18472_v46 = vld [vmem:[#allocation54_spill] sm:$0xff] }
 0x76f   :  { %18468 = vst [vmem:[#allocation51_spill] sm:$0xff] %v15887_v54  ;;  %v15904_v33 = vpop.permute.xlu1 %8297  ;;  %v7136_v28 = vcombine.high %v15611_v49, %v18156_v14  ;;  %v7204_v41 = vcombine.high %v15625_v38, %v18156_v14  ;;  %v15918_v51 = vrot.slane %v8638_v13, %v11969_v26  ;;  %v15921_v18 = vrot.slane %v6847_v39, %v18294_v4  ;;  %v18475_v38 = vld [vmem:[#allocation43_spill] sm:$0xff]  ;;  %v18479_v39 = vld [vmem:[#allocation21_spill] sm:$0xff] }
 0x770   :  { %18469 = vst [vmem:[#allocation16_spill] sm:$0xff] %v15907_v59  ;;  %v18473_v27 = vpack.i.bf16 %v18471_v10, %v18472_v46  ;;  %v7137_v45 = vcombine.high %v15670_v56, %v18156_v14  ;;  %v7205_v49 = vcombine.high %v15673_v37, %v18156_v14  ;;  %v18476_v23 = vcombine.low %v18474_v32, %v18475_v38  ;;  %v18481_v56 = vld [vmem:[#allocation14_spill] sm:$0xff]  ;;  %v18484_v32 = vld [vmem:[#allocation23_spill] sm:$0xff]  ;;  %v18485_v38 = vld [vmem:[#allocation53_spill] sm:$0xff] }
 0x771   :  { %11099 = vrot.lane.b32.xlu0 %v11098_v44, %s11761_s12  ;;  %18470 = vst [vmem:[#allocation35_spill] sm:$0xff] %v15918_v51  ;;  %v11103_v46 = vpack.i.bf16 %v7203_v53, %v7135_v35  ;;  %v15957_v35 = vcombine.high %v15699_v52, %v18156_v14  ;;  %v18486_v44 = vld [vmem:[#allocation30_spill] sm:$0xff]  ;;  %v8602_v52 = vcombine.high %v15907_v59, %v18156_v14 }
 0x772   :  { %11084 = vrot.lane.b32.xlu1 %v18473_v27, %s11760_s11  ;;  %v15935_v13 = vrot.slane %v18476_v23, %v11969_v26  ;;  %v7308_v10 = vpop.permute.xlu0 %7307  ;;  %v18480_v27 = vld [vmem:[#allocation38_spill] sm:$0xff]  ;;  %v18487_v23 = vld [vmem:[#allocation39_spill] sm:$0xff]  ;;  %v11113_v9 = vpack.i.bf16 %v7205_v49, %v7137_v45  ;;  %v15984_v45 = vcombine.high %v15738_v57, %v18156_v14 }
 0x773   :  { %v18482_v31 = vcombine.low %v18480_v27, %v18481_v56  ;;  %v15953_v7 = vpop.permute.xlu1 %8301  ;;  %v11108_v27 = vpack.i.bf16 %v7204_v41, %v7136_v28  ;;  %v8670_v56 = vcombine.high %v15918_v51, %v18156_v14  ;;  %v18488_v37 = vpack.i.bf16 %v18486_v44, %v18487_v23 }
 0x774   :  { %18477 = vst [vmem:[#allocation44_spill] sm:$0xff] %v15935_v13  ;;  %v7936_v53 = vcombine.high %v15935_v13, %v18156_v14  ;;  %v8383_v28 = vcombine.low %v15867_v2, %v15953_v7 }
 0x775   :  { %v15945_v55 = vrot.slane %v18482_v31, %v11969_v26  ;;  %v7342_v31 = vcombine.high %v15403_v48, %v15491_v0  ;;  %11104 = vrot.lane.b32.xlu0 %v11103_v46, %s11760_s11  ;;  %v8603_v48 = vcombine.high %v15596_v5, %v18156_v14  ;;  %v7326_v0 = vcombine.high %v15383_v62, %v15442_v19 }
 0x776   :  { %11089 = vrot.lane.b32.xlu1 %v18488_v37, %s11755_s7  ;;  %v7312_v41 = vpop.permute.xlu0 %7311  ;;  %v15991_v5 = vcombine.high %v15731_v42, %v18156_v14  ;;  %v15995_v19 = vcombine.high %v15806_v43, %v18156_v14  ;;  %v9305_v62 = vcombine.low %v15485_v34, %v15459_v63  ;;  %v11118_v23 = vpack.i.bf16 %v8670_v56, %v8602_v52  ;;  %v18492_v56 = vld [vmem:[#allocation96_spill] sm:$0xff] }
 0x777   :  { %18483 = vst [vmem:[#allocation49_spill] sm:$0xff] %v15945_v55  ;;  %v7868_v44 = vcombine.high %v15945_v55, %v18156_v14  ;;  %v15986_v49 = vpop.permute.xlu1 %8305  ;;  %v11128_v46 = vpack.i.bf16 %v15957_v35, %v8603_v48  ;;  %v7356_v37 = vrot.slane %v7342_v31, %v18294_v4  ;;  %v16005_v35 = vcombine.high %v15770_v61, %v18156_v14  ;;  %v18489_v48 = vld [vmem:[#allocation36_spill] sm:$0xff]  ;;  %v18490_v55 = vld [vmem:[#allocation58_spill] sm:$0xff] }
 0x778   :  { %v8399_v57 = vcombine.low %v15904_v33, %v15986_v49  ;;  %v7393_v42 = vcombine.low %v15893_v50, %v7312_v41  ;;  %v7394_v43 = vcombine.high %v15893_v50, %v7312_v41  ;;  %v18491_v63 = vpack.i.bf16 %v18489_v48, %v18490_v55 }
 0x779   :  { %11109 = vrot.lane.b32.xlu0 %v11108_v27, %s11755_s7  ;;  %v11123_v34 = vpack.i.bf16 %v7936_v53, %v7868_v44  ;;  %v9373_v31 = vcombine.low %v15494_v58, %v15471_v30  ;;  %v7340_v27 = vrot.slane %v7326_v0, %v18294_v4  ;;  %v7358_v52 = vcombine.high %v18492_v56, %v15533_v21 }
 0x77a   :  { %11094 = vrot.lane.b32.xlu1 %v18491_v63, %s11756_s8  ;;  %v16019_v61 = vrot.slane %v8383_v28, %v18294_v4  ;;  %v16022_v13 = vrot.slane %v8399_v57, %v18294_v4  ;;  %v7316_v50 = vpop.permute.xlu0 %7315  ;;  %v16027_v53 = vrot.slane %v9305_v62, %v11969_v26  ;;  %v16031_v30 = vcombine.high %v15614_v40, %v18156_v14 }
 0x77b   :  { %v7409_v41 = vcombine.low %v7308_v10, %v7316_v50  ;;  %v7410_v59 = vcombine.high %v7308_v10, %v7316_v50  ;;  %v16024_v55 = vpop.permute.xlu1 %9027  ;;  %v7373_v58 = vcombine.low %v7340_v27, %v7356_v37  ;;  %v7374_v0 = vcombine.high %v7340_v27, %v7356_v37 }
 0x77c   :  { %18493 = vst [vmem:[#allocation20_spill] sm:$0xff] %v16027_v53  ;;  %v16038_v44 = vcombine.high %v15617_v6, %v18156_v14  ;;  %v16041_v10 = vrot.slane %v7393_v42, %v18294_v4  ;;  %v7408_v62 = vrot.slane %v7394_v43, %v18294_v4  ;;  %v16056_v6 = vcombine.high %v15556_v24, %v18156_v14 }
 0x77d   :  { %11114 = vrot.lane.b32.xlu0 %v11113_v9, %s11756_s8  ;;  %v16045_v57 = vrot.slane %v7409_v41, %v18294_v4  ;;  %v7424_v40 = vrot.slane %v7410_v59, %v18294_v4  ;;  %v16052_v9 = vrot.slane %v9373_v31, %v11969_v26  ;;  %v16060_v42 = vcombine.high %v15571_v22, %v18156_v14  ;;  %v18510_v59 = vld [vmem:[#allocation34_spill] sm:$0xff] }
 0x77e   :  { %18494 = vst [vmem:[#allocation17_spill] sm:$0xff] %v16041_v10  ;;  %11119 = vrot.lane.b32.xlu1 %v11118_v23, %s11761_s12  ;;  %v16049_v37 = vpop.permute.xlu0 %7557  ;;  %v16063_v43 = vrot.slane %v7358_v52, %v11969_v26  ;;  %v11138_v24 = vpack.i.bf16 %v15991_v5, %v15984_v45  ;;  %v11148_v22 = vpack.i.bf16 %v16005_v35, %v15995_v19 }
 0x77f   :  { %18495 = vst [vmem:[#allocation29_spill] sm:$0xff] %v16045_v57  ;;  %18496 = vst [vmem:[#allocation33_spill] sm:$0xff] %v16052_v9  ;;  %v7426_v23 = vcombine.high %v16041_v10, %v16045_v57  ;;  %v7441_v48 = vcombine.low %v7408_v62, %v7424_v40  ;;  %v7442_v63 = vcombine.high %v7408_v62, %v7424_v40  ;;  %v16069_v31 = vpop.permute.xlu1 %9031  ;;  %v18499_v62 = vld [vmem:[#allocation28_spill] sm:$0xff]  ;;  %v18516_v57 = vld [vmem:[#allocation99_spill] sm:$0xff] }
 0x780   :  { %v9337_v27 = vcombine.high %v16027_v53, %v18156_v14  ;;  %v16079_v52 = vrot.slane %v7373_v58, %v11969_v26  ;;  %v9405_v19 = vcombine.high %v16052_v9, %v18156_v14  ;;  %v11168_v35 = vpack.i.bf16 %v16038_v44, %v16031_v30  ;;  %v18504_v44 = vld [vmem:[#allocation57_spill] sm:$0xff]  ;;  %v18512_v9 = vld [vmem:[#allocation67_spill] sm:$0xff] }
 0x781   :  { %11124 = vrot.lane.b32.xlu0 %v11123_v34, %s11761_s12  ;;  %v16083_v50 = vrot.slane %v7426_v23, %v11969_v26  ;;  %v16086_v41 = vrot.slane %v7441_v48, %v11969_v26  ;;  %v16089_v34 = vrot.slane %v7374_v0, %v11969_v26  ;;  %v16092_v45 = vrot.slane %v7442_v63, %v11969_v26  ;;  %v18498_v0 = vld [vmem:[#allocation31_spill] sm:$0xff]  ;;  %v18501_v48 = vld [vmem:[#allocation76_spill] sm:$0xff] }
 0x782   :  { %11129 = vrot.lane.b32.xlu1 %v11128_v46, %s11760_s11  ;;  %v7562_v5 = vpop.permute.xlu0 %7561  ;;  %v16100_v46 = vcombine.high %v15646_v47, %v18156_v14  ;;  %v16104_v58 = vcombine.high %v15661_v11, %v18156_v14  ;;  %v8060_v40 = vcombine.high %v18499_v62, %v18498_v0  ;;  %v18500_v23 = vld [vmem:[#allocation87_spill] sm:$0xff]  ;;  %v16116_v30 = vcombine.high %v16063_v43, %v18156_v14  ;;  %v18503_v11 = vld [vmem:[#allocation46_spill] sm:$0xff] }
 0x783   :  { %18497 = vst [vmem:[#allocation56_spill] sm:$0xff] %v16092_v45  ;;  %v6676_v63 = vcombine.high %v18501_v48, %v18500_v23  ;;  %v16110_v28 = vpop.permute.xlu1 %9035  ;;  %v7666_v47 = vcombine.high %v15583_v15, %v15665_v16  ;;  %v18505_v53 = vpack.i.bf16 %v18503_v11, %v18504_v44  ;;  %v16126_v0 = vcombine.high %v16083_v50, %v18156_v14  ;;  %v18509_v48 = vld [vmem:[#allocation59_spill] sm:$0xff]  ;;  %v18511_v16 = vld [vmem:[#allocation84_spill] sm:$0xff]  ;;  %v18515_v44 = vld [vmem:[#allocation42_spill] sm:$0xff] }
 0x784   :  { %18502 = vst [vmem:[#allocation54_spill] sm:$0xff] %v16116_v30  ;;  %v16130_v62 = vcombine.high %v16079_v52, %v18156_v14  ;;  %v16134_v23 = vcombine.high %v16086_v41, %v18156_v14  ;;  %v8076_v15 = vcombine.high %v18510_v59, %v18509_v48  ;;  %v6660_v51 = vcombine.high %v18512_v9, %v18511_v16  ;;  %v18525_v30 = vld [vmem:[#allocation88_spill] sm:$0xff] }
 0x785   :  { %11134 = vrot.lane.b32.xlu0 %v18505_v53, %s11760_s11  ;;  %18506 = vst [vmem:[#allocation45_spill] sm:$0xff] %v16126_v0  ;;  %v16143_v53 = vcombine.high %v16089_v34, %v18156_v14  ;;  %v16147_v11 = vcombine.high %v16092_v45, %v18156_v14  ;;  %v7650_v10 = vcombine.high %v18516_v57, %v18515_v44 }
 0x786   :  { %18507 = vst [vmem:[#allocation43_spill] sm:$0xff] %v16130_v62  ;;  %18508 = vst [vmem:[#allocation38_spill] sm:$0xff] %v16134_v23  ;;  %11139 = vrot.lane.b32.xlu1 %v11138_v24, %s11755_s7  ;;  %v9117_v21 = vcombine.low %v16024_v55, %v16110_v28  ;;  %v7566_v59 = vpop.permute.xlu0 %7565  ;;  %v16158_v48 = vrot.slane %v6676_v63, %v18294_v4  ;;  %v11153_v56 = vpack.i.bf16 %v9405_v19, %v9337_v27  ;;  %v18519_v63 = vld [vmem:[#allocation22_spill] sm:$0xff]  ;;  %v18520_v62 = vld [vmem:[#allocation40_spill] sm:$0xff] }
 0x787   :  { %18513 = vst [vmem:[#allocation14_spill] sm:$0xff] %v16143_v53  ;;  %18514 = vst [vmem:[#allocation23_spill] sm:$0xff] %v16147_v11  ;;  %v16160_v16 = vpop.permute.xlu1 %9039  ;;  %v18517_v57 = vcombine.high %v18479_v39, %v18478_v20  ;;  %v7680_v9 = vrot.slane %v7666_v47, %v18294_v4  ;;  %v18521_v23 = vpack.i.bf16 %v18519_v63, %v18520_v62 }
 0x788   :  { %v9133_v24 = vcombine.low %v16069_v31, %v16160_v16  ;;  %v18522_v19 = vcombine.low %v15910_v29, %v15891_v3  ;;  %v8074_v45 = vrot.slane %v8060_v40, %v18294_v4  ;;  %v6674_v47 = vrot.slane %v6660_v51, %v18294_v4  ;;  %v18524_v40 = vld [vmem:[#allocation89_spill] sm:$0xff] }
 0x789   :  { %v16166_v44 = vrot.slane %v18517_v57, %v11969_v26  ;;  %11144 = vrot.lane.b32.xlu0 %v18521_v23, %s11755_s7  ;;  %v7581_v53 = vcombine.low %v16049_v37, %v7566_v59  ;;  %v7582_v11 = vcombine.high %v16049_v37, %v7566_v59  ;;  %v8090_v62 = vrot.slane %v8076_v15, %v18294_v4 }
 0x78a   :  { %v16183_v57 = vrot.slane %v18522_v19, %v11969_v26  ;;  %11149 = vrot.lane.b32.xlu1 %v11148_v22, %s11756_s8  ;;  %v7664_v23 = vrot.slane %v7650_v10, %v18294_v4  ;;  %v16193_v63 = vrot.slane %v9117_v21, %v18294_v4  ;;  %v16196_v19 = vrot.slane %v9133_v24, %v18294_v4  ;;  %v7570_v27 = vpop.permute.xlu0 %7569  ;;  %v18528_v21 = vld [vmem:[#allocation68_spill] sm:$0xff] }
 0x78b   :  { %18518 = vst [vmem:[#allocation53_spill] sm:$0xff] %v16166_v44  ;;  %v6692_v51 = vcombine.high %v18525_v30, %v18524_v40  ;;  %v6707_v0 = vcombine.low %v6674_v47, %v16158_v48  ;;  %v7597_v20 = vcombine.low %v7562_v5, %v7570_v27  ;;  %v7598_v37 = vcombine.high %v7562_v5, %v7570_v27  ;;  %v16201_v59 = vpop.permute.xlu1 %9506 }
 0x78c   :  { %18523 = vst [vmem:[#allocation30_spill] sm:$0xff] %v16193_v63  ;;  %v7682_v22 = vcombine.high %v15691_v60, %v15694_v17  ;;  %v7697_v10 = vcombine.low %v7664_v23, %v7680_v9  ;;  %v7698_v15 = vcombine.high %v7664_v23, %v7680_v9  ;;  %v16209_v24 = vrot.slane %v7581_v53, %v18294_v4  ;;  %v18531_v63 = vld [vmem:[#allocation41_spill] sm:$0xff]  ;;  %v18549_v53 = vld [vmem:[#allocation72_spill] sm:$0xff] }
 0x78d   :  { %11154 = vrot.lane.b32.xlu0 %v11153_v56, %s11761_s12  ;;  %v7596_v40 = vrot.slane %v7582_v11, %v18294_v4  ;;  %v16213_v30 = vrot.slane %v7597_v20, %v18294_v4  ;;  %v7612_v5 = vrot.slane %v7598_v37, %v18294_v4  ;;  %v8107_v27 = vcombine.low %v8074_v45, %v8090_v62  ;;  %v18529_v56 = vld [vmem:[#allocation69_spill] sm:$0xff] }
 0x78e   :  { %18526 = vst [vmem:[#allocation39_spill] sm:$0xff] %v16209_v24  ;;  %11169 = vrot.lane.b32.xlu1 %v11168_v35, %s11755_s7  ;;  %v8108_v17 = vcombine.high %v8074_v45, %v8090_v62  ;;  %v6708_v9 = vcombine.high %v6674_v47, %v16158_v48  ;;  %v16218_v23 = vpop.permute.xlu0 %9504  ;;  %v11193_v60 = vpack.i.bf16 %v18529_v56, %v18528_v21  ;;  %v18530_v35 = vld [vmem:[#allocation10_spill] sm:$0xff] }
 0x78f   :  { %18527 = vst [vmem:[#allocation36_spill] sm:$0xff] %v16213_v30  ;;  %v7614_v20 = vcombine.high %v16209_v24, %v16213_v30  ;;  %v7629_v11 = vcombine.low %v7596_v40, %v7612_v5  ;;  %v7630_v39 = vcombine.high %v7596_v40, %v7612_v5  ;;  %v9511_v37 = vpop.permute.xlu1 %9510  ;;  %v18532_v45 = vpack.i.bf16 %v18530_v35, %v18531_v63  ;;  %v18547_v35 = vld [vmem:[#allocation71_spill] sm:$0xff] }
 0x790   :  { %v16231_v48 = vrot.slane %v6692_v51, %v11969_v26  ;;  %v16234_v47 = vrot.slane %v6707_v0, %v11969_v26  ;;  %v16237_v62 = vrot.slane %v7682_v22, %v11969_v26  ;;  %v16240_v21 = vrot.slane %v7697_v10, %v11969_v26 }
 0x791   :  { %11159 = vrot.lane.b32.xlu0 %v18532_v45, %s11756_s8  ;;  %v18537_v40 = vcombine.high %v15910_v29, %v15891_v3  ;;  %v16250_v51 = vrot.slane %v7614_v20, %v11969_v26  ;;  %v16253_v0 = vrot.slane %v7629_v11, %v11969_v26  ;;  %v16256_v22 = vrot.slane %v7698_v15, %v11969_v26  ;;  %v18546_v11 = vld [vmem:[#allocation70_spill] sm:$0xff] }
 0x792   :  { %18533 = vst [vmem:[#allocation58_spill] sm:$0xff] %v16231_v48  ;;  %18534 = vst [vmem:[#allocation31_spill] sm:$0xff] %v16234_v47  ;;  %11194 = vrot.lane.b32.xlu1 %v11193_v60, %s11759_s0  ;;  %v9509_v5 = vpop.permute.xlu0 %9508  ;;  %v18542_v60 = vcombine.high %v18485_v38, %v18484_v32  ;;  %v16265_v3 = vrot.slane %v8107_v27, %v11969_v26  ;;  %v18544_v29 = vcombine.low %v15921_v18, %v15900_v12 }
 0x793   :  { %18535 = vst [vmem:[#allocation28_spill] sm:$0xff] %v16237_v62  ;;  %18536 = vst [vmem:[#allocation87_spill] sm:$0xff] %v16240_v21  ;;  %v16247_v63 = vrot.slane %v18537_v40, %v11969_v26  ;;  %v16274_v20 = vrot.slane %v7630_v39, %v11969_v26  ;;  %v9515_v15 = vpop.permute.xlu1 %9514  ;;  %v11198_v45 = vpack.i.bf16 %v18547_v35, %v18546_v11  ;;  %v18548_v40 = vld [vmem:[#allocation77_spill] sm:$0xff] }
 0x794   :  { %18539 = vst [vmem:[#allocation46_spill] sm:$0xff] %v16250_v51  ;;  %18540 = vst [vmem:[#allocation57_spill] sm:$0xff] %v16253_v0  ;;  %v16262_v10 = vrot.slane %v18542_v60, %v11969_v26  ;;  %v16271_v56 = vrot.slane %v18544_v29, %v11969_v26  ;;  %v11203_v60 = vpack.i.bf16 %v18549_v53, %v18548_v40 }
 0x795   :  { %18538 = vst [vmem:[#allocation76_spill] sm:$0xff] %v16247_v63  ;;  %18541 = vst [vmem:[#allocation59_spill] sm:$0xff] %v16256_v22  ;;  %v16281_v30 = vrot.slane %v6708_v9, %v11969_v26  ;;  %v16284_v27 = vrot.slane %v8108_v17, %v11969_v26  ;;  %v18552_v29 = vpack.i.bf16 %v16060_v42, %v16056_v6 }
 0x796   :  { %18543 = vst [vmem:[#allocation34_spill] sm:$0xff] %v16265_v3  ;;  %18545 = vst [vmem:[#allocation84_spill] sm:$0xff] %v16274_v20  ;;  %v11208_v39 = vpack.i.bf16 %v16231_v48, %v16166_v44  ;;  %v16296_v53 = vcombine.high %v16237_v62, %v18156_v14  ;;  %v16300_v9 = vcombine.high %v16240_v21, %v18156_v14  ;;  %11199 = vrot.lane.b32.xlu1 %v11198_v45, %s11757_s9  ;;  %v9513_v11 = vpop.permute.xlu0 %9512  ;;  %v18561_v48 = vld [vmem:[#allocation115_spill] sm:$0xff]  ;;  %v18562_v21 = vld [vmem:[#allocation104_spill] sm:$0xff] }
 0x797   :  { %18550 = vst [vmem:[#allocation67_spill] sm:$0xff] %v16281_v30  ;;  %18551 = vst [vmem:[#allocation42_spill] sm:$0xff] %v16284_v27  ;;  %11164 = vrot.lane.b32.xlu0 %v18552_v29, %s11760_s11  ;;  %v8144_v17 = vcombine.high %v15728_v1, %v15830_v36  ;;  %v16307_v6 = vcombine.high %v16250_v51, %v18156_v14  ;;  %v16311_v42 = vcombine.high %v16253_v0, %v18156_v14  ;;  %v18558_v1 = vld [vmem:[#allocation108_spill] sm:$0xff]  ;;  %v18559_v36 = vld [vmem:[#allocation110_spill] sm:$0xff] }
 0x798   :  { %18553 = vst [vmem:[#allocation99_spill] sm:$0xff] %v16296_v53  ;;  %18554 = vst [vmem:[#allocation22_spill] sm:$0xff] %v16300_v9  ;;  %v16315_v35 = vcombine.high %v16256_v22, %v18156_v14  ;;  %v9596_v40 = vcombine.low %v16201_v59, %v9515_v15  ;;  %v9597_v29 = vcombine.high %v16201_v59, %v9515_v15  ;;  %v18563_v62 = vld [vmem:[#allocation114_spill] sm:$0xff]  ;;  %v9519_v22 = vpop.permute.xlu1 %9518  ;;  %v18567_v59 = vld [vmem:[#allocation109_spill] sm:$0xff] }
 0x799   :  { %18555 = vst [vmem:[#allocation40_spill] sm:$0xff] %v16307_v6  ;;  %18556 = vst [vmem:[#allocation68_spill] sm:$0xff] %v16311_v42  ;;  %v11178_v45 = vpack.i.bf16 %v18559_v36, %v18558_v1  ;;  %v16323_v24 = vcombine.high %v16274_v20, %v18156_v14  ;;  %v8128_v0 = vcombine.high %v18562_v21, %v18561_v48  ;;  %v18568_v42 = vld [vmem:[#allocation111_spill] sm:$0xff]  ;;  %v18578_v9 = vld [vmem:[#allocation112_spill] sm:$0xff] }
 0x79a   :  { %18557 = vst [vmem:[#allocation69_spill] sm:$0xff] %v16315_v35  ;;  %v6931_v51 = vcombine.high %v18563_v62, %v15857_v25  ;;  %v9528_v15 = vcombine.low %v16218_v23, %v9513_v11  ;;  %v9612_v1 = vcombine.low %v9511_v37, %v9519_v22  ;;  %v9613_v36 = vcombine.high %v9511_v37, %v9519_v22  ;;  %v18565_v25 = vld [vmem:[#allocation119_spill] sm:$0xff]  ;;  %v18579_v53 = vld [vmem:[#allocation113_spill] sm:$0xff] }
 0x79b   :  { %18560 = vst [vmem:[#allocation10_spill] sm:$0xff] %v16323_v24  ;;  %v18564_v20 = vpack.i.bf16 %v16104_v58, %v16100_v46  ;;  %v18566_v62 = vld [vmem:[#allocation107_spill] sm:$0xff]  ;;  %v8158_v44 = vrot.slane %v8144_v17, %v18294_v4  ;;  %v9529_v6 = vcombine.high %v16218_v23, %v9513_v11  ;;  %11204 = vrot.lane.b32.xlu1 %v11203_v60, %s11758_s10 }
 0x79c   :  { %v6915_v21 = vcombine.high %v18566_v62, %v18565_v25  ;;  %v11183_v37 = vpack.i.bf16 %v18568_v42, %v18567_v59  ;;  %v16348_v22 = vrot.slane %v9596_v40, %v18294_v4  ;;  %v9611_v46 = vrot.slane %v9597_v29, %v18294_v4  ;;  %v9517_v25 = vpop.permute.xlu0 %9516  ;;  %v16359_v62 = vpop.permute.xlu1 %8772 }
 0x79d   :  { %11174 = vrot.lane.b32.xlu0 %v18564_v20, %s11756_s8  ;;  %v16352_v58 = vrot.slane %v9612_v1, %v18294_v4  ;;  %v9627_v20 = vrot.slane %v9613_v36, %v18294_v4  ;;  %v8142_v17 = vrot.slane %v8128_v0, %v18294_v4  ;;  %v16357_v23 = vrot.slane %v6931_v51, %v18294_v4 }
 0x79e   :  { %18569 = vst [vmem:[#allocation41_spill] sm:$0xff] %v16348_v22  ;;  %v9544_v60 = vcombine.low %v9509_v5, %v9517_v25  ;;  %v9545_v11 = vcombine.high %v9509_v5, %v9517_v25  ;;  %v16362_v42 = vrot.slane %v9528_v15, %v18294_v4  ;;  %v9543_v0 = vrot.slane %v9529_v6, %v18294_v4 }
 0x79f   :  { %18570 = vst [vmem:[#allocation70_spill] sm:$0xff] %v16352_v58  ;;  %v9629_v29 = vcombine.high %v16348_v22, %v16352_v58  ;;  %v9645_v59 = vcombine.high %v9611_v46, %v9627_v20  ;;  %v9644_v51 = vcombine.low %v9611_v46, %v9627_v20  ;;  %11209 = vrot.lane.b32.xlu1 %v11208_v39, %s11759_s0  ;;  %v18573_v39 = vld [vmem:[#allocation63_spill] sm:$0xff] }
 0x7a0   :  { %18571 = vst [vmem:[#allocation71_spill] sm:$0xff] %v16362_v42  ;;  %v16371_v1 = vrot.slane %v9544_v60, %v18294_v4  ;;  %v9559_v5 = vrot.slane %v9545_v11, %v18294_v4  ;;  %v16376_v15 = vrot.slane %v6915_v21, %v18294_v4  ;;  %v8175_v36 = vcombine.low %v8142_v17, %v8158_v44  ;;  %v16380_v40 = vpop.permute.xlu0 %9760  ;;  %v16386_v60 = vpop.permute.xlu1 %8776  ;;  %v18574_v21 = vld [vmem:[#allocation61_spill] sm:$0xff] }
 0x7a1   :  { %11179 = vrot.lane.b32.xlu0 %v11178_v45, %s11759_s0  ;;  %v8176_v25 = vcombine.high %v8142_v17, %v8158_v44  ;;  %v6947_v48 = vcombine.high %v15884_v8, %v15887_v54  ;;  %v8316_v11 = vcombine.high %v18574_v21, %v18573_v39  ;;  %v16394_v17 = vrot.slane %v9629_v29, %v11969_v26  ;;  %v18576_v29 = vld [vmem:[#allocation66_spill] sm:$0xff]  ;;  %v18608_v54 = vld [vmem:[#allocation93_spill] sm:$0xff] }
 0x7a2   :  { %18572 = vst [vmem:[#allocation77_spill] sm:$0xff] %v16371_v1  ;;  %v9561_v45 = vcombine.high %v16362_v42, %v16371_v1  ;;  %v9576_v46 = vcombine.low %v9543_v0, %v9559_v5  ;;  %v9577_v20 = vcombine.high %v9543_v0, %v9559_v5  ;;  %v6962_v44 = vcombine.low %v16376_v15, %v16357_v23  ;;  %v18609_v8 = vld [vmem:[#allocation98_spill] sm:$0xff] }
 0x7a3   :  { %v16397_v6 = vrot.slane %v9645_v59, %v11969_v26  ;;  %v18575_v0 = vpack.i.bf16 %v16234_v47, %v16183_v57  ;;  %v16410_v21 = vrot.slane %v9644_v51, %v11969_v26  ;;  %v18577_v59 = vld [vmem:[#allocation62_spill] sm:$0xff]  ;;  %v6963_v51 = vcombine.high %v16376_v15, %v16357_v23  ;;  %v18607_v47 = vld [vmem:[#allocation95_spill] sm:$0xff] }
 0x7a4   :  { %v16404_v5 = vrot.slane %v9561_v45, %v11969_v26  ;;  %v16407_v39 = vrot.slane %v9576_v46, %v11969_v26  ;;  %v8332_v24 = vcombine.high %v18577_v59, %v18576_v29  ;;  %v16417_v35 = vpop.permute.xlu0 %9764  ;;  %v11218_v45 = vpack.i.bf16 %v16281_v30, %v16247_v63  ;;  %v16430_v58 = vpop.permute.xlu1 %8780 }
 0x7a5   :  { %11184 = vrot.lane.b32.xlu0 %v11183_v37, %s11757_s9  ;;  %11214 = vrot.lane.b32.xlu1 %v18575_v0, %s11757_s9  ;;  %v16413_v37 = vrot.slane %v9577_v20, %v11969_v26  ;;  %v11188_v0 = vpack.i.bf16 %v18579_v53, %v18578_v9  ;;  %v16424_v46 = vrot.slane %v6947_v48, %v11969_v26 }
 0x7a6   :  { %v8400_v20 = vcombine.high %v15904_v33, %v15986_v49  ;;  %v16433_v29 = vrot.slane %v8175_v36, %v11969_v26  ;;  %v16436_v59 = vrot.slane %v8176_v25, %v11969_v26  ;;  %v16441_v53 = vcombine.high %v16404_v5, %v18156_v14 }
 0x7a7   :  { %18580 = vst [vmem:[#allocation72_spill] sm:$0xff] %v16424_v46  ;;  %v16445_v9 = vcombine.high %v16394_v17, %v18156_v14  ;;  %v16449_v33 = vcombine.high %v16413_v37, %v18156_v14  ;;  %v16453_v49 = vcombine.high %v16397_v6, %v18156_v14  ;;  %v8384_v48 = vcombine.high %v15867_v2, %v15953_v7 }
 0x7a8   :  { %18581 = vst [vmem:[#allocation108_spill] sm:$0xff] %v16433_v29  ;;  %18582 = vst [vmem:[#allocation110_spill] sm:$0xff] %v16436_v59  ;;  %v16459_v23 = vrot.slane %v6962_v44, %v11969_v26  ;;  %v16463_v15 = vcombine.high %v16407_v39, %v18156_v14  ;;  %v16467_v36 = vcombine.high %v16410_v21, %v18156_v14  ;;  %v16484_v1 = vpop.permute.xlu1 %8784  ;;  %v18590_v44 = vld [vmem:[#allocation90_spill] sm:$0xff] }
 0x7a9   :  { %11189 = vrot.lane.b32.xlu0 %v11188_v0, %s11758_s10  ;;  %18583 = vst [vmem:[#allocation115_spill] sm:$0xff] %v16441_v53  ;;  %18584 = vst [vmem:[#allocation104_spill] sm:$0xff] %v16445_v9  ;;  %11219 = vrot.lane.b32.xlu1 %v11218_v45, %s11758_s10  ;;  %v8862_v25 = vcombine.low %v16359_v62, %v16430_v58  ;;  %v16471_v0 = vpop.permute.xlu0 %9768  ;;  %v11223_v2 = vpack.i.bf16 %v16424_v46, %v16262_v10 }
 0x7aa   :  { %18585 = vst [vmem:[#allocation114_spill] sm:$0xff] %v16449_v33  ;;  %18586 = vst [vmem:[#allocation119_spill] sm:$0xff] %v16453_v49  ;;  %v16480_v45 = vrot.slane %v8400_v20, %v18294_v4  ;;  %v9134_v22 = vcombine.high %v16069_v31, %v16160_v16  ;;  %v11258_v42 = vpack.i.bf16 %v16433_v29, %v16265_v3  ;;  %v18591_v20 = vld [vmem:[#allocation83_spill] sm:$0xff]  ;;  %v18592_v16 = vld [vmem:[#allocation86_spill] sm:$0xff] }
 0x7ab   :  { %18587 = vst [vmem:[#allocation107_spill] sm:$0xff] %v16459_v23  ;;  %18588 = vst [vmem:[#allocation109_spill] sm:$0xff] %v16463_v15  ;;  %v16491_v30 = vrot.slane %v8316_v11, %v18294_v4  ;;  %v16494_v7 = vrot.slane %v8332_v24, %v18294_v4  ;;  %v9066_v33 = vcombine.high %v18591_v20, %v18590_v44  ;;  %v18593_v49 = vld [vmem:[#allocation75_spill] sm:$0xff]  ;;  %v18610_v3 = vld [vmem:[#allocation94_spill] sm:$0xff] }
 0x7ac   :  { %18589 = vst [vmem:[#allocation111_spill] sm:$0xff] %v16467_v36  ;;  %v8878_v31 = vcombine.low %v16386_v60, %v16484_v1  ;;  %v9050_v53 = vcombine.high %v18593_v49, %v18592_v16  ;;  %v16504_v9 = vrot.slane %v8384_v48, %v18294_v4  ;;  %v9118_v11 = vcombine.high %v16024_v55, %v16110_v28 }
 0x7ad   :  { %11224 = vrot.lane.b32.xlu0 %v11223_v2, %s11759_s0  ;;  %v9784_v24 = vcombine.low %v16380_v40, %v16471_v0  ;;  %11259 = vrot.lane.b32.xlu1 %v11258_v42, %s11757_s9  ;;  %v16512_v44 = vrot.slane %v8862_v25, %v18294_v4  ;;  %v9773_v2 = vpop.permute.xlu0 %9772  ;;  %v11228_v49 = vpack.i.bf16 %v16459_v23, %v16271_v56  ;;  %v16528_v25 = vpop.permute.xlu1 %9762 }
 0x7ae   :  { %v16515_v20 = vrot.slane %v8878_v31, %v18294_v4  ;;  %v16520_v48 = vrot.slane %v6963_v51, %v11969_v26  ;;  %v8432_v55 = vcombine.high %v16504_v9, %v16480_v45  ;;  %v16525_v28 = vrot.slane %v9134_v22, %v18294_v4  ;;  %v18601_v51 = vld [vmem:[#allocation26_spill] sm:$0xff] }
 0x7af   :  { %18594 = vst [vmem:[#allocation63_spill] sm:$0xff] %v16512_v44  ;;  %v9800_v42 = vcombine.low %v16417_v35, %v9773_v2  ;;  %v11268_v31 = vpack.i.bf16 %v16436_v59, %v16284_v27  ;;  %v8364_v16 = vcombine.high %v16491_v30, %v16494_v7  ;;  %v9080_v46 = vrot.slane %v9066_v33, %v18294_v4 }
 0x7b0   :  { %18595 = vst [vmem:[#allocation61_spill] sm:$0xff] %v16515_v20  ;;  %18596 = vst [vmem:[#allocation66_spill] sm:$0xff] %v16520_v48  ;;  %v18597_v22 = vcombine.high %v15921_v18, %v15900_v12  ;;  %v16545_v36 = vrot.slane %v9118_v11, %v18294_v4  ;;  %v16548_v27 = vrot.slane %v9784_v24, %v18294_v4 }
 0x7b1   :  { %11229 = vrot.lane.b32.xlu0 %v11228_v49, %s11757_s9  ;;  %v16551_v59 = vrot.slane %v9800_v42, %v18294_v4  ;;  %11269 = vrot.lane.b32.xlu1 %v11268_v31, %s11758_s10  ;;  %v9064_v33 = vrot.slane %v9050_v53, %v18294_v4  ;;  %v18600_v49 = vld [vmem:[#allocation15_spill] sm:$0xff]  ;;  %v16557_v23 = vpop.permute.xlu0 %10984  ;;  %v9767_v24 = vpop.permute.xlu1 %9766  ;;  %v11283_v42 = vpack.i.bf16 %v16394_v17, %v16404_v5  ;;  %v18604_v31 = vld [vmem:[#allocation60_spill] sm:$0xff] }
 0x7b2   :  { %v16542_v15 = vrot.slane %v18597_v22, %v11969_v26  ;;  %18598 = vst [vmem:[#allocation62_spill] sm:$0xff] %v16548_v27  ;;  %v8160_v29 = vcombine.high %v18601_v51, %v18600_v49  ;;  %18602 = vst [vmem:[#allocation113_spill] sm:$0xff] %v16557_v23  ;;  %v9165_v18 = vcombine.low %v16545_v36, %v16525_v28  ;;  %v18605_v22 = vld [vmem:[#allocation55_spill] sm:$0xff] }
 0x7b3   :  { %18599 = vst [vmem:[#allocation112_spill] sm:$0xff] %v16551_v59  ;;  %v16568_v53 = vrot.slane %v8432_v55, %v11969_v26  ;;  %v8092_v49 = vcombine.high %v18605_v22, %v18604_v31  ;;  %v9097_v51 = vcombine.low %v9064_v33, %v9080_v46  ;;  %v16574_v23 = vrot.slane %v8364_v16, %v11969_v26 }
 0x7b4   :  { %v11233_v12 = vpack.i.bf16 %v16520_v48, %v16542_v15  ;;  %v9098_v48 = vcombine.high %v9064_v33, %v9080_v46  ;;  %v8795_v11 = vcombine.high %v18608_v54, %v18607_v47  ;;  %v8811_v63 = vcombine.high %v18610_v3, %v18609_v8  ;;  %v18612_v47 = vld [vmem:[#allocation74_spill] sm:$0xff]  ;;  %v18613_v3 = vld [vmem:[#allocation73_spill] sm:$0xff] }
 0x7b5   :  { %18603 = vst [vmem:[#allocation90_spill] sm:$0xff] %v16568_v53  ;;  %18606 = vst [vmem:[#allocation83_spill] sm:$0xff] %v16574_v23  ;;  %v9801_v17 = vcombine.high %v16417_v35, %v9773_v2  ;;  %11284 = vrot.lane.b32.xlu1 %v11283_v42, %s11759_s0  ;;  %v16582_v5 = vpop.permute.xlu0 %10989  ;;  %v11238_v55 = vpack.i.bf16 %v16083_v50, %v16063_v43  ;;  %v9785_v46 = vcombine.high %v16380_v40, %v16471_v0  ;;  %v9771_v16 = vpop.permute.xlu1 %9770 }
 0x7b6   :  { %11234 = vrot.lane.b32.xlu0 %v11233_v12, %s11758_s10  ;;  %v16587_v12 = vrot.slane %v8160_v29, %v11969_v26  ;;  %v11288_v54 = vpack.i.bf16 %v16568_v53, %v16574_v23  ;;  %v16594_v8 = vrot.slane %v9165_v18, %v11969_v26  ;;  %v8348_v35 = vcombine.high %v18613_v3, %v18612_v47  ;;  %v18642_v53 = vld [vmem:[#allocation13_spill] sm:$0xff] }
 0x7b7   :  { %v16600_v43 = vrot.slane %v9097_v51, %v11969_v26  ;;  %v16603_v50 = vrot.slane %v8092_v49, %v11969_v26  ;;  %v16606_v40 = vrot.slane %v8795_v11, %v18294_v4  ;;  %v16609_v29 = vrot.slane %v8811_v63, %v18294_v4 }
 0x7b8   :  { %18611 = vst [vmem:[#allocation86_spill] sm:$0xff] %v16594_v8  ;;  %v9815_v0 = vrot.slane %v9801_v17, %v18294_v4  ;;  %v16614_v2 = vrot.slane %v9098_v48, %v11969_v26  ;;  %v9852_v33 = vcombine.low %v16528_v25, %v9771_v16  ;;  %v9853_v51 = vcombine.high %v16528_v25, %v9771_v16 }
 0x7b9   :  { %18614 = vst [vmem:[#allocation75_spill] sm:$0xff] %v16600_v43  ;;  %11289 = vrot.lane.b32.xlu1 %v11288_v54, %s11758_s10  ;;  %v16618_v18 = vpop.permute.xlu0 %10994  ;;  %v11243_v49 = vpack.i.bf16 %v16086_v41, %v16079_v52  ;;  %v11253_v63 = vpack.i.bf16 %v16587_v12, %v16603_v50  ;;  %v9166_v11 = vcombine.high %v16545_v36, %v16525_v28  ;;  %v9775_v17 = vpop.permute.xlu1 %9774  ;;  %v18616_v41 = vld [vmem:[#allocation56_spill] sm:$0xff] }
 0x7ba   :  { %11239 = vrot.lane.b32.xlu0 %v11238_v55, %s11759_s0  ;;  %18615 = vst [vmem:[#allocation60_spill] sm:$0xff] %v16614_v2  ;;  %v9799_v42 = vrot.slane %v9785_v46, %v18294_v4  ;;  %v8879_v48 = vcombine.high %v16386_v60, %v16484_v1  ;;  %v11298_v25 = vpack.i.bf16 %v16594_v8, %v16600_v43  ;;  %v18630_v43 = vld [vmem:[#allocation91_spill] sm:$0xff] }
 0x7bb   :  { %v8416_v55 = vcombine.high %v16019_v61, %v16022_v13  ;;  %v9868_v16 = vcombine.low %v9767_v24, %v9775_v17  ;;  %v9869_v52 = vcombine.high %v9767_v24, %v9775_v17  ;;  %v11248_v54 = vpack.i.bf16 %v18616_v41, %v16089_v34 }
 0x7bc   :  { %v8863_v36 = vcombine.high %v16359_v62, %v16430_v58  ;;  %v9817_v1 = vcombine.high %v16548_v27, %v16551_v59  ;;  %v9832_v60 = vcombine.low %v9799_v42, %v9815_v0  ;;  %v9833_v28 = vcombine.high %v9799_v42, %v9815_v0 }
 0x7bd   :  { %11299 = vrot.lane.b32.xlu1 %v11298_v25, %s11757_s9  ;;  %v16642_v46 = vrot.slane %v9852_v33, %v18294_v4  ;;  %v9867_v24 = vrot.slane %v9853_v51, %v18294_v4  ;;  %v9883_v34 = vrot.slane %v9869_v52, %v18294_v4  ;;  %v16649_v17 = vpop.permute.xlu0 %11019  ;;  %v8431_v58 = vcombine.low %v16504_v9, %v16480_v45  ;;  %v16656_v0 = vpop.permute.xlu1 %10969 }
 0x7be   :  { %11244 = vrot.lane.b32.xlu0 %v11243_v49, %s11757_s9  ;;  %v16646_v49 = vrot.slane %v9868_v16, %v18294_v4  ;;  %v16654_v62 = vrot.slane %v8879_v48, %v18294_v4  ;;  %v11303_v33 = vpack.i.bf16 %v16410_v21, %v16407_v39  ;;  %v16661_v51 = vrot.slane %v9166_v11, %v11969_v26 }
 0x7bf   :  { %18617 = vst [vmem:[#allocation55_spill] sm:$0xff] %v16642_v46  ;;  %v9900_v16 = vcombine.low %v9867_v24, %v9883_v34  ;;  %v9901_v52 = vcombine.high %v9867_v24, %v9883_v34  ;;  %v16669_v9 = vrot.slane %v8863_v36, %v18294_v4  ;;  %v16673_v39 = vrot.slane %v8416_v55, %v11969_v26 }
 0x7c0   :  { %18618 = vst [vmem:[#allocation95_spill] sm:$0xff] %v16646_v49  ;;  %18619 = vst [vmem:[#allocation93_spill] sm:$0xff] %v16661_v51  ;;  %v9885_v25 = vcombine.high %v16642_v46, %v16646_v49  ;;  %v9831_v21 = vrot.slane %v9817_v1, %v11969_v26  ;;  %v16677_v45 = vrot.slane %v9832_v60, %v11969_v26  ;;  %v18629_v46 = vld [vmem:[#allocation92_spill] sm:$0xff] }
 0x7c1   :  { %11304 = vrot.lane.b32.xlu1 %v11303_v33, %s11757_s9  ;;  %v16679_v11 = vpop.permute.xlu0 %11029  ;;  %v16683_v41 = vrot.slane %v9900_v16, %v11969_v26  ;;  %v16686_v4 = vrot.slane %v9833_v28, %v11969_v26  ;;  %v8911_v55 = vcombine.high %v16669_v9, %v16654_v62  ;;  %v16693_v36 = vpop.permute.xlu1 %10974  ;;  %v11313_v1 = vpack.i.bf16 %v16661_v51, %v16614_v2 }
 0x7c2   :  { %11249 = vrot.lane.b32.xlu0 %v11248_v54, %s11758_s10  ;;  %v9899_v48 = vrot.slane %v9885_v25, %v11969_v26  ;;  %v16689_v54 = vrot.slane %v9901_v52, %v11969_v26  ;;  %v16698_v60 = vrot.slane %v8348_v35, %v11969_v26  ;;  %v8363_v24 = vcombine.low %v16491_v30, %v16494_v7  ;;  %v18624_v7 = vld [vmem:[#allocation30_spill] sm:$0xff] }
 0x7c3   :  { %v8843_v28 = vcombine.high %v16606_v40, %v16609_v29  ;;  %v16706_v34 = vrot.slane %v8431_v58, %v11969_v26  ;;  %v16712_v25 = vcombine.high %v9831_v21, %v18156_v14  ;;  %v16719_v30 = vcombine.high %v16683_v41, %v18156_v14 }
 0x7c4   :  { %v11263_v33 = vpack.i.bf16 %v16673_v39, %v16698_v60  ;;  %v16715_v35 = vcombine.high %v9899_v48, %v18156_v14  ;;  %v16727_v16 = vcombine.high %v16677_v45, %v18156_v14  ;;  %v16731_v52 = vcombine.high %v16686_v4, %v18156_v14 }
 0x7c5   :  { %18620 = vst [vmem:[#allocation98_spill] sm:$0xff] %v16706_v34  ;;  %11314 = vrot.lane.b32.xlu1 %v11313_v1, %s11758_s10  ;;  %18621 = vst [vmem:[#allocation94_spill] sm:$0xff] %v16712_v25  ;;  %v16723_v58 = vpop.permute.xlu0 %11039  ;;  %v16735_v1 = vcombine.high %v16689_v54, %v18156_v14  ;;  %v16737_v42 = vpop.permute.xlu1 %10979  ;;  %v11318_v59 = vpack.i.bf16 %v16397_v6, %v16413_v37  ;;  %v16742_v27 = vrot.slane %v8911_v55, %v11969_v26 }
 0x7c6   :  { %11254 = vrot.lane.b32.xlu0 %v11253_v63, %s11759_s0  ;;  %18622 = vst [vmem:[#allocation74_spill] sm:$0xff] %v16715_v35  ;;  %18623 = vst [vmem:[#allocation73_spill] sm:$0xff] %v16719_v30  ;;  %v9150_v63 = vcombine.high %v18624_v7, %v16196_v19  ;;  %v9082_v2 = vcombine.high %v18630_v43, %v18629_v46  ;;  %v16750_v8 = vrot.slane %v8363_v24, %v11969_v26 }
 0x7c7   :  { %18625 = vst [vmem:[#allocation56_spill] sm:$0xff] %v16727_v16  ;;  %18626 = vst [vmem:[#allocation30_spill] sm:$0xff] %v16731_v52  ;;  %v16758_v37 = vrot.slane %v8843_v28, %v11969_v26  ;;  %v8895_v55 = vcombine.high %v16512_v44, %v16515_v20  ;;  %v18635_v52 = vld [vmem:[#allocation47_spill] sm:$0xff]  ;;  %v18637_v16 = vld [vmem:[#allocation100_spill] sm:$0xff] }
 0x7c8   :  { %18627 = vst [vmem:[#allocation121_spill] sm:$0xff] %v16735_v1  ;;  %18628 = vst [vmem:[#allocation122_spill] sm:$0xff] %v16742_v27  ;;  %v11273_v24 = vpack.i.bf16 %v16706_v34, %v16750_v8  ;;  %v18636_v1 = vld [vmem:[#allocation101_spill] sm:$0xff]  ;;  %v16779_v25 = vrot.slane %v9082_v2, %v11969_v26  ;;  %v11333_v2 = vpack.i.bf16 %v9899_v48, %v9831_v21  ;;  %v18699_v20 = vld [vmem:[#allocation107_spill] sm:$0xff] }
 0x7c9   :  { %18631 = vst [vmem:[#allocation92_spill] sm:$0xff] %v16750_v8  ;;  %11319 = vrot.lane.b32.xlu1 %v11318_v59, %s11758_s10  ;;  %18632 = vst [vmem:[#allocation91_spill] sm:$0xff] %v16758_v37  ;;  %v16762_v49 = vpop.permute.xlu0 %11044  ;;  %v16769_v51 = vpop.permute.xlu1 %10999  ;;  %v11328_v6 = vpack.i.bf16 %v16742_v27, %v16758_v37  ;;  %v18634_v59 = vld [vmem:[#allocation11_spill] sm:$0xff]  ;;  %v8827_v30 = vcombine.high %v18637_v16, %v18636_v1  ;;  %v18641_v27 = vld [vmem:[#allocation105_spill] sm:$0xff] }
 0x7ca   :  { %11264 = vrot.lane.b32.xlu0 %v11263_v33, %s11759_s0  ;;  %v16767_v33 = vrot.slane %v9150_v63, %v11969_v26  ;;  %v5888_v28 = vcombine.low %v18635_v52, %v18634_v59  ;;  %18638 = vst [vmem:[#allocation11_spill] sm:$0xff] %v16779_v25  ;;  %v8910_v63 = vcombine.low %v16669_v9, %v16654_v62  ;;  %v18640_v59 = vld [vmem:[#allocation106_spill] sm:$0xff]  ;;  %v18708_v44 = vld [vmem:[#allocation116_spill] sm:$0xff] }
 0x7cb   :  { %v16789_v52 = vrot.slane %v8895_v55, %v11969_v26  ;;  %v5956_v23 = vcombine.low %v18641_v27, %v18640_v59  ;;  %v8842_v9 = vcombine.low %v16606_v40, %v16609_v29  ;;  %v16808_v55 = vrot.slane %v8827_v30, %v11969_v26  ;;  %v18656_v59 = vld [vmem:[#allocation64_spill] sm:$0xff] }
 0x7cc   :  { %18633 = vst [vmem:[#allocation123_spill] sm:$0xff] %v16767_v33  ;;  %v11278_v37 = vpack.i.bf16 %v16767_v33, %v16779_v25  ;;  %v16802_v62 = vrot.slane %v5888_v28, %v11969_v26  ;;  %v18648_v27 = vcombine.low %v18485_v38, %v18484_v32  ;;  %v16828_v30 = vrot.slane %v8910_v63, %v11969_v26  ;;  %v18695_v33 = vld [vmem:[#allocation72_spill] sm:$0xff] }
 0x7cd   :  { %11329 = vrot.lane.b32.xlu1 %v11328_v6, %s11758_s10  ;;  %v16784_v35 = vpop.permute.xlu0 %11049  ;;  %18639 = vst [vmem:[#allocation47_spill] sm:$0xff] %v16789_v52  ;;  %v18643_v6 = vld [vmem:[#allocation12_spill] sm:$0xff]  ;;  %18647 = vst [vmem:[#allocation13_spill] sm:$0xff] %v16808_v55  ;;  %v11293_v29 = vpack.i.bf16 %v16789_v52, %v16808_v55  ;;  %v16831_v32 = vrot.slane %v5956_v23, %v11969_v26  ;;  %v17017_v16 = vcombine.high %v18695_v33, %v18156_v14 }
 0x7ce   :  { %11274 = vrot.lane.b32.xlu0 %v11273_v24, %s11757_s9  ;;  %v16793_v24 = vpop.permute.xlu1 %11004  ;;  %v18644_v8 = vcombine.low %v18642_v53, %v18643_v6  ;;  %18646 = vst [vmem:[#allocation105_spill] sm:$0xff] %v16802_v62  ;;  %v16814_v21 = vrot.slane %v18648_v27, %v11969_v26  ;;  %v18650_v53 = vld [vmem:[#allocation21_spill] sm:$0xff]  ;;  %v5920_v23 = vcombine.high %v16802_v62, %v18156_v14 }
 0x7cf   :  { %18655 = vst [vmem:[#allocation124_spill] sm:$0xff] %v16831_v32 }
 0x7d0   :  { %v16799_v1 = vrot.slane %v18644_v8, %v11969_v26  ;;  %18649 = vst [vmem:[#allocation12_spill] sm:$0xff] %v16814_v21  ;;  %v18651_v8 = vld [vmem:[#allocation18_spill] sm:$0xff] }
 0x7d1   :  { %11334 = vrot.lane.b32.xlu1 %v11333_v2, %s11759_s0  ;;  %v18652_v48 = vcombine.low %v18650_v53, %v18651_v8  ;;  %v16823_v40 = vpop.permute.xlu0 %11054  ;;  %18654 = vst [vmem:[#allocation18_spill] sm:$0xff] %v16828_v30  ;;  %v18657_v2 = vld [vmem:[#allocation65_spill] sm:$0xff]  ;;  %v16845_v53 = vrot.slane %v8842_v9, %v11969_v26  ;;  %v16862_v8 = vcombine.high %v16814_v21, %v18156_v14 }
 0x7d2   :  { %18645 = vst [vmem:[#allocation106_spill] sm:$0xff] %v16799_v1  ;;  %11279 = vrot.lane.b32.xlu0 %v11278_v37, %s11759_s0  ;;  %v16833_v38 = vpop.permute.xlu1 %11009  ;;  %v11343_v37 = vpack.i.bf16 %v16683_v41, %v16677_v45  ;;  %v18658_v6 = vcombine.low %v18656_v59, %v18657_v2  ;;  %v16851_v63 = vcombine.high %v16799_v1, %v18156_v14  ;;  %v18664_v59 = vld [vmem:[#allocation89_spill] sm:$0xff]  ;;  %v18668_v1 = vld [vmem:[#allocation76_spill] sm:$0xff] }
 0x7d3   :  { %v16821_v28 = vrot.slane %v18652_v48, %v11969_v26  ;;  %18660 = vst [vmem:[#allocation65_spill] sm:$0xff] %v16845_v53  ;;  %v18661_v45 = vcombine.low %v18605_v22, %v18604_v31  ;;  %v16866_v9 = vcombine.high %v16262_v10, %v18156_v14  ;;  %v16870_v48 = vcombine.high %v16271_v56, %v18156_v14 }
 0x7d4   :  { %v16841_v27 = vrot.slane %v18658_v6, %v11969_v26  ;;  %v16886_v10 = vcombine.high %v16542_v15, %v18156_v14 }
 0x7d5   :  { %18653 = vst [vmem:[#allocation21_spill] sm:$0xff] %v16821_v28  ;;  %v16857_v41 = vrot.slane %v18661_v45, %v11969_v26  ;;  %11344 = vrot.lane.b32.xlu1 %v11343_v37, %s11757_s9  ;;  %v11060_v2 = vpop.permute.xlu0 %11059  ;;  %v11308_v37 = vpack.i.bf16 %v16828_v30, %v16845_v53  ;;  %v16882_v6 = vcombine.high %v16821_v28, %v18156_v14  ;;  %v18667_v28 = vld [vmem:[#allocation53_spill] sm:$0xff]  ;;  %v10971_v53 = vunpack.i.l.bf16 %v16656_v0 }
 0x7d6   :  { %18659 = vst [vmem:[#allocation64_spill] sm:$0xff] %v16841_v27  ;;  %11294 = vrot.lane.b32.xlu0 %v11293_v29, %s11759_s0  ;;  %v18663_v29 = vld [vmem:[#allocation88_spill] sm:$0xff]  ;;  %v11062_v56 = vunpack.i.h.bf16 %v11060_v2  ;;  %v11061_v45 = vunpack.i.l.bf16 %v11060_v2  ;;  %v16888_v21 = vpop.permute.xlu1 %11014  ;;  %v16901_v15 = vcombine.high %v18667_v28, %v18156_v14  ;;  %v16905_v2 = vcombine.high %v16183_v57, %v18156_v14 }
 0x7d7   :  { %18662 = vst [vmem:[#allocation125_spill] sm:$0xff] %v16857_v41  ;;  %v18665_v31 = vcombine.low %v18663_v29, %v18664_v59  ;;  %v11353_v29 = vpack.i.bf16 %v16689_v54, %v16686_v4  ;;  %v5988_v59 = vcombine.high %v16831_v32, %v18156_v14  ;;  %v16909_v4 = vcombine.high %v18668_v1, %v18156_v14  ;;  %v18672_v32 = vld [vmem:[#allocation37_spill] sm:$0xff] }
 0x7d8   :  { %v18669_v54 = vcombine.low %v18613_v3, %v18612_v47  ;;  %v5793_v28 = vsel %vm770_vm6, %v18672_v32, %v11061_v45  ;;  %v16924_v57 = vcombine.high %v16857_v41, %v18156_v14  ;;  %v10972_v1 = vunpack.i.h.bf16 %v16656_v0  ;;  %v18673_v47 = vld [vmem:[#allocation46_spill] sm:$0xff]  ;;  %v18674_v3 = vld [vmem:[#allocation28_spill] sm:$0xff] }
 0x7d9   :  { %v16876_v22 = vrot.slane %v18665_v31, %v11969_v26  ;;  %v16897_v31 = vcombine.high %v16841_v27, %v18156_v14  ;;  %v18671_v27 = vld [vmem:[#allocation50_spill] sm:$0xff]  ;;  %11354 = vrot.lane.b32.xlu1 %v11353_v29, %s11758_s10  ;;  %v11065_v30 = vpop.permute.xlu0 %11064  ;;  %v11358_v29 = vpack.i.bf16 %v5988_v59, %v5920_v23  ;;  %v5794_v55 = vsel %vm772_vm7, %v5793_v28, %v10971_v53  ;;  %v18677_v23 = vld [vmem:[#allocation51_spill] sm:$0xff] }
 0x7da   :  { %11309 = vrot.lane.b32.xlu0 %v11308_v37, %s11757_s9  ;;  %v16915_v37 = vrot.slane %v18669_v54, %v11969_v26  ;;  %v5800_v62 = vsel %vm770_vm6, %v18671_v27, %v11062_v56  ;;  %v11323_v54 = vpack.i.bf16 %v18674_v3, %v18673_v47  ;;  %v16932_v27 = vcombine.high %v16603_v50, %v18156_v14  ;;  %v16934_v45 = vpop.permute.xlu1 %11024  ;;  %v18675_v50 = vld [vmem:[#allocation34_spill] sm:$0xff] }
 0x7db   :  { %18666 = vst [vmem:[#allocation88_spill] sm:$0xff] %v16876_v22  ;;  %v11067_v56 = vunpack.i.h.bf16 %v11065_v30  ;;  %v11066_v32 = vunpack.i.l.bf16 %v11065_v30  ;;  %v16938_v41 = vcombine.high %v16876_v22, %v18156_v14  ;;  %v5801_v0 = vsel %vm772_vm7, %v5800_v62, %v10972_v1  ;;  %v18676_v30 = vld [vmem:[#allocation24_spill] sm:$0xff]  ;;  %v18680_v1 = vld [vmem:[#allocation57_spill] sm:$0xff] }
 0x7dc   :  { %18670 = vst [vmem:[#allocation89_spill] sm:$0xff] %v16915_v37  ;;  %v11378_v47 = vpack.i.bf16 %v16897_v31, %v16851_v63  ;;  %v16947_v3 = vcombine.high %v18675_v50, %v18156_v14  ;;  %v18678_v59 = vcombine.low %v18676_v30, %v18677_v23  ;;  %v16960_v62 = vcombine.high %v16915_v37, %v18156_v14  ;;  %v18682_v30 = vld [vmem:[#allocation58_spill] sm:$0xff] }
 0x7dd   :  { %v5795_v22 = vsel %vm774_vm8, %v5794_v55, %v11066_v32  ;;  %v5802_v53 = vsel %vm774_vm8, %v5801_v0, %v11067_v56  ;;  %11359 = vrot.lane.b32.xlu1 %v11358_v29, %s11761_s12  ;;  %v10977_v63 = vunpack.i.h.bf16 %v16693_v36  ;;  %v10976_v31 = vunpack.i.l.bf16 %v16693_v36  ;;  %v11070_v28 = vpop.permute.xlu0 %11069 }
 0x7de   :  { %11324 = vrot.lane.b32.xlu0 %v11323_v54, %s11759_s0  ;;  %v16953_v52 = vrot.slane %v18678_v59, %v11969_v26  ;;  %v18681_v54 = vld [vmem:[#allocation87_spill] sm:$0xff]  ;;  %v16968_v23 = vcombine.high %v18682_v30, %v18156_v14  ;;  %v11072_v55 = vunpack.i.h.bf16 %v11070_v28  ;;  %v11071_v56 = vunpack.i.l.bf16 %v11070_v28  ;;  %v16970_v32 = vpop.permute.xlu1 %11034 }
 0x7df   :  { %v11338_v50 = vpack.i.bf16 %v18681_v54, %v18680_v1  ;;  %v16976_v0 = vcombine.high %v16698_v60, %v18156_v14  ;;  %v5796_v36 = vsel %vm776_vm9, %v5795_v22, %v10976_v31  ;;  %v5803_v59 = vsel %vm776_vm9, %v5802_v53, %v10977_v63  ;;  %v18683_v1 = vld [vmem:[#allocation31_spill] sm:$0xff]  ;;  %v18687_v63 = vld [vmem:[#allocation25_spill] sm:$0xff]  ;;  %v18688_v31 = vld [vmem:[#allocation48_spill] sm:$0xff] }
 0x7e0   :  { %18679 = vst [vmem:[#allocation53_spill] sm:$0xff] %v16953_v52  ;;  %v16983_v54 = vcombine.high %v18683_v1, %v18156_v14  ;;  %v18684_v28 = vld [vmem:[#allocation67_spill] sm:$0xff]  ;;  %v18685_v29 = vcombine.low %v18630_v43, %v18629_v46  ;;  %v5797_v22 = vsel %vm778_vm10, %v5796_v36, %v11071_v56  ;;  %v5804_v53 = vsel %vm778_vm10, %v5803_v59, %v11072_v55  ;;  %v18690_v43 = vld [vmem:[#allocation84_spill] sm:$0xff]  ;;  %v18693_v36 = vld [vmem:[#allocation97_spill] sm:$0xff] }
 0x7e1   :  { %v16987_v30 = vcombine.high %v18684_v28, %v18156_v14  ;;  %v6978_v1 = vcombine.high %v16953_v52, %v18156_v14  ;;  %v10982_v28 = vunpack.i.h.bf16 %v16737_v42  ;;  %v10981_v37 = vunpack.i.l.bf16 %v16737_v42  ;;  %v11075_v25 = vpop.permute.xlu0 %11074  ;;  %v18691_v46 = vld [vmem:[#allocation59_spill] sm:$0xff]  ;;  %v18692_v55 = vld [vmem:[#allocation96_spill] sm:$0xff] }
 0x7e2   :  { %11339 = vrot.lane.b32.xlu0 %v11338_v50, %s11757_s9  ;;  %v16993_v60 = vrot.slane %v18685_v29, %v11969_v26  ;;  %v18689_v50 = vpack.i.bf16 %v18687_v63, %v18688_v31  ;;  %v11348_v29 = vpack.i.bf16 %v18691_v46, %v18690_v43  ;;  %v18694_v59 = vcombine.low %v18692_v55, %v18693_v36  ;;  %v11080_v52 = vpop.permute.xlu1 %11079  ;;  %v18696_v36 = vld [vmem:[#allocation19_spill] sm:$0xff] }
 0x7e3   :  { %v11077_v31 = vunpack.i.h.bf16 %v11075_v25  ;;  %v5798_v42 = vsel %vm780_vm11, %v5797_v22, %v10981_v37  ;;  %v5805_v43 = vsel %vm780_vm11, %v5804_v53, %v10982_v28  ;;  %v11082_v46 = vunpack.i.h.bf16 %v11080_v52  ;;  %v18700_v53 = vld [vmem:[#allocation27_spill] sm:$0xff]  ;;  %v18701_v28 = vld [vmem:[#allocation32_spill] sm:$0xff] }
 0x7e4   :  { %18686 = vst [vmem:[#allocation76_spill] sm:$0xff] %v16993_v60  ;;  %11364 = vrot.lane.b32.xlu1 %v18689_v50, %s11760_s11  ;;  %v17013_v63 = vrot.slane %v18694_v59, %v11969_v26  ;;  %v11076_v50 = vunpack.i.l.bf16 %v11075_v25  ;;  %v11081_v34 = vunpack.i.l.bf16 %v11080_v52  ;;  %v18697_v25 = vld [vmem:[#allocation52_spill] sm:$0xff]  ;;  %v11418_v33 = vpack.i.bf16 %v6978_v1, %v16862_v8 }
 0x7e5   :  { %v5806_v55 = vsel %vm782_vm12, %v5805_v43, %v11077_v31  ;;  %v18698_v59 = vpack.i.bf16 %v18696_v36, %v18697_v25  ;;  %v17031_v37 = vcombine.high %v18699_v20, %v18156_v14  ;;  %v6534_v52 = vsel %vm770_vm6, %v18700_v53, %v11082_v46  ;;  %v18702_v31 = vld [vmem:[#allocation66_spill] sm:$0xff]  ;;  %v18703_v43 = vld [vmem:[#allocation113_spill] sm:$0xff] }
 0x7e6   :  { %11349 = vrot.lane.b32.xlu0 %v11348_v29, %s11758_s10  ;;  %v5799_v56 = vsel %vm782_vm12, %v5798_v42, %v11076_v50  ;;  %v6527_v29 = vsel %vm770_vm6, %v18701_v28, %v11081_v34  ;;  %v11100_v50 = vpop.permute.xlu0 %11099  ;;  %v17039_v42 = vcombine.high %v18702_v31, %v18156_v14  ;;  %v10987_v36 = vunpack.i.h.bf16 %v18703_v43  ;;  %v11085_v20 = vpop.permute.xlu1 %11084  ;;  %v18707_v31 = vld [vmem:[#allocation120_spill] sm:$0xff] }
 0x7e7   :  { %v10301_v22 = vpack.c.bf16 %v5806_v55, %v5799_v56  ;;  %v10986_v8 = vunpack.i.l.bf16 %v18703_v43  ;;  %v11102_v1 = vunpack.i.h.bf16 %v11100_v50  ;;  %v11101_v25 = vunpack.i.l.bf16 %v11100_v50  ;;  %v18704_v56 = vld [vmem:[#allocation17_spill] sm:$0xff] }
 0x7e8   :  { %11369 = vrot.lane.b32.xlu1 %v18698_v59, %s11755_s7  ;;  %v18705_v55 = vld [vmem:[#allocation29_spill] sm:$0xff]  ;;  %v11087_v34 = vunpack.i.h.bf16 %v11085_v20  ;;  %v11086_v53 = vunpack.i.l.bf16 %v11085_v20  ;;  %v11423_v28 = vpack.i.bf16 %v17017_v16, %v16866_v9  ;;  %v11001_v20 = vunpack.i.l.bf16 %v16769_v51 }
 0x7e9   :  { %v18706_v59 = vcombine.low %v18704_v56, %v18705_v55  ;;  %5815 = vst [vmem:[#allocation3] sm:$0x33] %v10301_v22  ;;  %v7269_v43 = vsel %vm770_vm6, %v18707_v31, %v11102_v1  ;;  %v7262_v50 = vsel %vm770_vm6, %v18708_v44, %v11101_v25  ;;  %v6528_v60 = vsel %vm772_vm7, %v6527_v29, %v10986_v8  ;;  %v18709_v55 = vld [vmem:[#allocation118_spill] sm:$0xff]  ;;  %v18710_v22 = vld [vmem:[#allocation117_spill] sm:$0xff] }
 0x7ea   :  { %11379 = vrot.lane.b32.xlu0 %v11378_v47, %s11761_s12  ;;  %v6535_v56 = vsel %vm772_vm7, %v6534_v52, %v10987_v36  ;;  %v11002_v47 = vunpack.i.h.bf16 %v16769_v51  ;;  %v6529_v16 = vsel %vm774_vm8, %v6528_v60, %v11086_v53  ;;  %v11105_v1 = vpop.permute.xlu0 %11104  ;;  %v10992_v44 = vunpack.i.h.bf16 %v16582_v5  ;;  %v11090_v36 = vpop.permute.xlu1 %11089  ;;  %v18712_v51 = vld [vmem:[#allocation79_spill] sm:$0xff] }
 0x7eb   :  { %v17047_v46 = vrot.slane %v18706_v59, %v11969_v26  ;;  %v18711_v59 = vpack.i.bf16 %v18709_v55, %v18710_v22  ;;  %v6536_v9 = vsel %vm774_vm8, %v6535_v56, %v11087_v34  ;;  %v10991_v29 = vunpack.i.l.bf16 %v16582_v5 }
 0x7ec   :  { %v11107_v8 = vunpack.i.h.bf16 %v11105_v1  ;;  %v11106_v52 = vunpack.i.l.bf16 %v11105_v1  ;;  %v7263_v25 = vsel %vm772_vm7, %v7262_v50, %v11001_v20  ;;  %v7270_v31 = vsel %vm772_vm7, %v7269_v43, %v11002_v47 }
 0x7ed   :  { %11374 = vrot.lane.b32.xlu1 %v18711_v59, %s11756_s8  ;;  %v11092_v55 = vunpack.i.h.bf16 %v11090_v36  ;;  %v11091_v22 = vunpack.i.l.bf16 %v11090_v36  ;;  %v18713_v59 = vld [vmem:[#allocation78_spill] sm:$0xff]  ;;  %v6530_v5 = vsel %vm776_vm9, %v6529_v16, %v10991_v29  ;;  %v6537_v56 = vsel %vm776_vm9, %v6536_v9, %v10992_v44 }
 0x7ee   :  { %v18714_v60 = vpack.i.bf16 %v18712_v51, %v18713_v59  ;;  %v7264_v34 = vsel %vm774_vm8, %v7263_v25, %v11106_v52  ;;  %v7271_v53 = vsel %vm774_vm8, %v7270_v31, %v11107_v8  ;;  %v11007_v50 = vunpack.i.h.bf16 %v16793_v24  ;;  %v11110_v1 = vpop.permute.xlu0 %11109  ;;  %v11095_v16 = vpop.permute.xlu1 %11094  ;;  %v18716_v31 = vld [vmem:[#allocation80_spill] sm:$0xff] }
 0x7ef   :  { %v11006_v43 = vunpack.i.l.bf16 %v16793_v24  ;;  %v6531_v47 = vsel %vm778_vm10, %v6530_v5, %v11091_v22  ;;  %v6538_v20 = vsel %vm778_vm10, %v6537_v56, %v11092_v55  ;;  %v10997_v36 = vunpack.i.h.bf16 %v16618_v18  ;;  %v18715_v24 = vld [vmem:[#allocation81_spill] sm:$0xff] }
 0x7f0   :  { %11384 = vrot.lane.b32.xlu0 %v18714_v60, %s11760_s11  ;;  %v10996_v52 = vunpack.i.l.bf16 %v16618_v18  ;;  %v11112_v8 = vunpack.i.h.bf16 %v11110_v1  ;;  %v11111_v25 = vunpack.i.l.bf16 %v11110_v1  ;;  %v11097_v44 = vunpack.i.h.bf16 %v11095_v16 }
 0x7f1   :  { %11419 = vrot.lane.b32.xlu1 %v11418_v33, %s11761_s12  ;;  %v7265_v9 = vsel %vm776_vm9, %v7264_v34, %v11006_v43  ;;  %v7272_v33 = vsel %vm776_vm9, %v7271_v53, %v11007_v50  ;;  %v11096_v29 = vunpack.i.l.bf16 %v11095_v16  ;;  %v18717_v22 = vpack.i.bf16 %v18715_v24, %v18716_v31 }
 0x7f2   :  { %v7266_v55 = vsel %vm778_vm10, %v7265_v9, %v11111_v25  ;;  %v7273_v51 = vsel %vm778_vm10, %v7272_v33, %v11112_v8  ;;  %v6532_v18 = vsel %vm780_vm11, %v6531_v47, %v10996_v52  ;;  %v6539_v59 = vsel %vm780_vm11, %v6538_v20, %v10997_v36  ;;  %v11115_v56 = vpop.permute.xlu0 %11114  ;;  %v11120_v25 = vpop.permute.xlu1 %11119  ;;  %v18719_v8 = vld [vmem:[#allocation85_spill] sm:$0xff]  ;;  %v18721_v9 = vld [vmem:[#allocation26_spill] sm:$0xff]  ;;  %v18722_v33 = vld [vmem:[#allocation15_spill] sm:$0xff] }
 0x7f3   :  { %v11012_v60 = vunpack.i.h.bf16 %v16833_v38  ;;  %v11011_v34 = vunpack.i.l.bf16 %v16833_v38  ;;  %v6533_v53 = vsel %vm782_vm12, %v6532_v18, %v11096_v29  ;;  %v6540_v5 = vsel %vm782_vm12, %v6539_v59, %v11097_v44  ;;  %v18718_v38 = vld [vmem:[#allocation82_spill] sm:$0xff] }
 0x7f4   :  { %11389 = vrot.lane.b32.xlu0 %v18717_v22, %s11755_s7  ;;  %v10304_v50 = vpack.c.bf16 %v6540_v5, %v6533_v53  ;;  %v11117_v43 = vunpack.i.h.bf16 %v11115_v56  ;;  %v11116_v1 = vunpack.i.l.bf16 %v11115_v56  ;;  %v11428_v47 = vpack.i.bf16 %v17031_v37, %v16870_v48  ;;  %v18724_v22 = vld [vmem:[#allocation35_spill] sm:$0xff] }
 0x7f5   :  { %11424 = vrot.lane.b32.xlu1 %v11423_v28, %s11760_s11  ;;  %v7267_v20 = vsel %vm780_vm11, %v7266_v55, %v11011_v34  ;;  %v7274_v28 = vsel %vm780_vm11, %v7273_v51, %v11012_v60  ;;  %v11122_v36 = vunpack.i.h.bf16 %v11120_v25  ;;  %v11121_v52 = vunpack.i.l.bf16 %v11120_v25  ;;  %v18725_v51 = vld [vmem:[#allocation16_spill] sm:$0xff] }
 0x7f6   :  { %v18720_v16 = vpack.i.bf16 %v18718_v38, %v18719_v8  ;;  %v18723_v44 = vcombine.low %v18721_v9, %v18722_v33  ;;  %v6548_v24 = vrot.slane %v10304_v50, 6  ;;  %v7268_v48 = vsel %vm782_vm12, %v7267_v20, %v11116_v1  ;;  %v11125_v59 = vpop.permute.xlu0 %11124  ;;  %v11130_v56 = vpop.permute.xlu1 %11129 }
 0x7f7   :  { %v7275_v37 = vsel %vm782_vm12, %v7274_v28, %v11117_v43  ;;  %v8737_v55 = vsel %vm770_vm6, %v18724_v22, %v11122_v36  ;;  %v8730_v18 = vsel %vm770_vm6, %v18725_v51, %v11121_v52  ;;  %v7457_v60 = vcombine.high %v17047_v46, %v18156_v14 }
 0x7f8   :  { %11394 = vrot.lane.b32.xlu0 %v18720_v16, %s11756_s8  ;;  %v17112_v29 = vrot.slane %v18723_v44, %v11969_v26  ;;  %v10307_v31 = vpack.c.bf16 %v7275_v37, %v7268_v48  ;;  %v11017_v34 = vunpack.i.h.bf16 %v16888_v21  ;;  %v11016_v53 = vunpack.i.l.bf16 %v16888_v21  ;;  %6550 = vst [vmem:[#allocation3 + $0x10] sm:$0xcc] %v6548_v24 }
 0x7f9   :  { %11429 = vrot.lane.b32.xlu1 %v11428_v47, %s11755_s7  ;;  %v11127_v5 = vunpack.i.h.bf16 %v11125_v59  ;;  %v11433_v50 = vpack.i.bf16 %v17039_v42, %v16886_v10  ;;  %v11126_v43 = vunpack.i.l.bf16 %v11125_v59  ;;  %v11132_v1 = vunpack.i.h.bf16 %v11130_v56 }
 0x7fa   :  { %7284 = vst [vmem:[#allocation3 + $0x30] sm:$0x33] %v10307_v31  ;;  %v11131_v25 = vunpack.i.l.bf16 %v11130_v56  ;;  %v18726_v47 = vpack.i.bf16 %v16938_v41, %v16882_v6  ;;  %v7389_v20 = vcombine.high %v17013_v63, %v18156_v14  ;;  %v8731_v21 = vsel %vm772_vm7, %v8730_v18, %v11016_v53  ;;  %v11135_v6 = vpop.permute.xlu0 %11134 }
 0x7fb   :  { %v8738_v28 = vsel %vm772_vm7, %v8737_v55, %v11017_v34  ;;  %v11408_v10 = vpack.i.bf16 %v16983_v54, %v16905_v2  ;;  %v11413_v42 = vpack.i.bf16 %v16987_v30, %v16909_v4  ;;  %v17144_v38 = vcombine.high %v17112_v29, %v18156_v14  ;;  %v18727_v2 = vld [vmem:[#allocation44_spill] sm:$0xff]  ;;  %v11140_v4 = vpop.permute.xlu1 %11139  ;;  %v18728_v30 = vld [vmem:[#allocation49_spill] sm:$0xff] }
 0x7fc   :  { %11399 = vrot.lane.b32.xlu0 %v18726_v47, %s11761_s12  ;;  %v8732_v36 = vsel %vm774_vm8, %v8731_v21, %v11131_v25  ;;  %v8739_v41 = vsel %vm774_vm8, %v8738_v28, %v11132_v1  ;;  %v11438_v52 = vpack.i.bf16 %v7457_v60, %v7389_v20  ;;  %v11022_v8 = vunpack.i.h.bf16 %v16649_v17  ;;  %v18732_v21 = vld [vmem:[#allocation54_spill] sm:$0xff] }
 0x7fd   :  { %11434 = vrot.lane.b32.xlu1 %v11433_v50, %s11756_s8  ;;  %v11027_v16 = vunpack.i.h.bf16 %v16934_v45  ;;  %v11026_v9 = vunpack.i.l.bf16 %v16934_v45  ;;  %v8003_v54 = vsel %vm770_vm6, %v18727_v2, %v11127_v5  ;;  %v7996_v33 = vsel %vm770_vm6, %v18728_v30, %v11126_v43 }
 0x7fe   :  { %v11136_v44 = vunpack.i.l.bf16 %v11135_v6  ;;  %v11142_v24 = vunpack.i.h.bf16 %v11140_v4  ;;  %v11141_v48 = vunpack.i.l.bf16 %v11140_v4  ;;  %v18729_v37 = vpack.i.bf16 %v16968_v23, %v16901_v15 }
 0x7ff   :  { %v11021_v31 = vunpack.i.l.bf16 %v16649_v17  ;;  %v11137_v22 = vunpack.i.h.bf16 %v11135_v6  ;;  %v8733_v45 = vsel %vm776_vm9, %v8732_v36, %v11026_v9  ;;  %v8740_v55 = vsel %vm776_vm9, %v8739_v41, %v11027_v16  ;;  %v11145_v17 = vpop.permute.xlu0 %11144  ;;  %v11150_v56 = vpop.permute.xlu1 %11149 }
 0x800   :  { %11404 = vrot.lane.b32.xlu0 %v18729_v37, %s11760_s11  ;;  %v18730_v51 = vcombine.low %v16019_v61, %v16022_v13  ;;  %v11031_v59 = vunpack.i.l.bf16 %v16679_v11  ;;  %v8734_v15 = vsel %vm778_vm10, %v8733_v45, %v11141_v48  ;;  %v8741_v23 = vsel %vm778_vm10, %v8740_v55, %v11142_v24  ;;  %v18735_v48 = vld [vmem:[#allocation38_spill] sm:$0xff]  ;;  %v18736_v37 = vld [vmem:[#allocation43_spill] sm:$0xff] }
 0x801   :  { %11439 = vrot.lane.b32.xlu1 %v11438_v52, %s11761_s12  ;;  %v11037_v60 = vunpack.i.h.bf16 %v16970_v32  ;;  %v11036_v34 = vunpack.i.l.bf16 %v16970_v32  ;;  %v7997_v53 = vsel %vm772_vm7, %v7996_v33, %v11021_v31  ;;  %v8004_v5 = vsel %vm772_vm7, %v8003_v54, %v11022_v8  ;;  %v18731_v32 = vld [vmem:[#allocation45_spill] sm:$0xff]  ;;  %v18734_v54 = vld [vmem:[#allocation108_spill] sm:$0xff] }
 0x802   :  { %v17165_v18 = vrot.slane %v18730_v51, %v11969_v26  ;;  %v7998_v13 = vsel %vm774_vm8, %v7997_v53, %v11136_v44  ;;  %v11146_v61 = vunpack.i.l.bf16 %v11145_v17  ;;  %v11152_v50 = vunpack.i.h.bf16 %v11150_v56 }
 0x803   :  { %v11151_v43 = vunpack.i.l.bf16 %v11150_v56  ;;  %v8005_v1 = vsel %vm774_vm8, %v8004_v5, %v11137_v22  ;;  %v11147_v25 = vunpack.i.h.bf16 %v11145_v17  ;;  %v8735_v47 = vsel %vm780_vm11, %v8734_v15, %v11036_v34  ;;  %v11155_v52 = vpop.permute.xlu0 %11154  ;;  %v17189_v9 = vpop.permute.xlu1 %11169  ;;  %v18740_v15 = vld [vmem:[#allocation77_spill] sm:$0xff] }
 0x804   :  { %11409 = vrot.lane.b32.xlu0 %v11408_v10, %s11755_s7  ;;  %v8742_v20 = vsel %vm780_vm11, %v8741_v23, %v11037_v60  ;;  %v18733_v28 = vpack.i.bf16 %v18731_v32, %v18732_v21  ;;  %v11032_v36 = vunpack.i.h.bf16 %v16679_v11  ;;  %v8192_v10 = vcombine.high %v16587_v12, %v18156_v14  ;;  %v18742_v56 = vld [vmem:[#allocation33_spill] sm:$0xff] }
 0x805   :  { %v8736_v41 = vsel %vm782_vm12, %v8735_v47, %v11151_v43  ;;  %v8743_v6 = vsel %vm782_vm12, %v8742_v20, %v11152_v50  ;;  %v7999_v8 = vsel %vm776_vm9, %v7998_v13, %v11031_v59  ;;  %v11458_v2 = vpack.i.bf16 %v17144_v38, %v16924_v57  ;;  %v18739_v59 = vld [vmem:[#allocation71_spill] sm:$0xff] }
 0x806   :  { %11444 = vrot.lane.b32.xlu1 %v18733_v28, %s11760_s11  ;;  %v10313_v16 = vpack.c.bf16 %v8743_v6, %v8736_v41  ;;  %v17195_v4 = vcombine.high %v18734_v54, %v18156_v14  ;;  %v8000_v11 = vsel %vm778_vm10, %v7999_v8, %v11146_v61  ;;  %v8006_v30 = vsel %vm776_vm9, %v8005_v1, %v11032_v36  ;;  %v18743_v61 = vld [vmem:[#allocation20_spill] sm:$0xff]  ;;  %v18744_v1 = vld [vmem:[#allocation23_spill] sm:$0xff]  ;;  %v18747_v28 = vld [vmem:[#allocation41_spill] sm:$0xff] }
 0x807   :  { %v8447_v12 = vcombine.high %v17165_v18, %v18156_v14  ;;  %v8448_v33 = vcombine.high %v16673_v39, %v18156_v14  ;;  %v8007_v44 = vsel %vm778_vm10, %v8006_v30, %v11147_v25  ;;  %v11157_v57 = vunpack.i.h.bf16 %v11155_v52  ;;  %v11160_v55 = vpop.permute.xlu0 %11159  ;;  %v17224_v53 = vpop.permute.xlu1 %11194  ;;  %v18745_v25 = vld [vmem:[#allocation14_spill] sm:$0xff] }
 0x808   :  { %11414 = vrot.lane.b32.xlu0 %v11413_v42, %s11756_s8  ;;  %v8751_v24 = vrot.slane %v10313_v16, 6  ;;  %v11156_v38 = vunpack.i.l.bf16 %v11155_v52  ;;  %v18737_v31 = vpack.i.bf16 %v18735_v48, %v18736_v37  ;;  %v18738_v42 = vcombine.low %v18624_v7, %v16196_v19  ;;  %v18748_v36 = vld [vmem:[#allocation70_spill] sm:$0xff] }
 0x809   :  { %v11042_v45 = vunpack.i.h.bf16 %v16723_v58  ;;  %v11041_v39 = vunpack.i.l.bf16 %v16723_v58  ;;  %v11463_v51 = vpack.i.bf16 %v8192_v10, %v16932_v27  ;;  %v18741_v23 = vcombine.low %v18739_v59, %v18740_v15 }
 0x80a   :  { %11449 = vrot.lane.b32.xlu1 %v18737_v31, %s11755_s7  ;;  %v17213_v22 = vrot.slane %v18738_v42, %v11969_v26  ;;  %8753 = vst [vmem:[#allocation3 + $0x18] sm:$0xcc] %v8751_v24  ;;  %v11162_v60 = vunpack.i.h.bf16 %v11160_v55  ;;  %v11161_v34 = vunpack.i.l.bf16 %v11160_v55  ;;  %v11473_v19 = vpack.i.bf16 %v17195_v4, %v16947_v3 }
 0x80b   :  { %v17222_v17 = vrot.slane %v18741_v23, %v11969_v26  ;;  %v8001_v7 = vsel %vm780_vm11, %v8000_v11, %v11041_v39  ;;  %v8008_v58 = vsel %vm780_vm11, %v8007_v44, %v11042_v45  ;;  %v11468_v27 = vpack.i.bf16 %v8447_v12, %v16960_v62  ;;  %v11165_v32 = vpop.permute.xlu0 %11164  ;;  %v17253_v8 = vpop.permute.xlu1 %11199  ;;  %v18751_v23 = vld [vmem:[#allocation63_spill] sm:$0xff] }
 0x80c   :  { %11459 = vrot.lane.b32.xlu0 %v11458_v2, %s11761_s12  ;;  %v11478_v5 = vpack.i.bf16 %v8448_v33, %v16976_v0  ;;  %v9472_v13 = vsel %vm770_vm6, %v18742_v56, %v11157_v57  ;;  %v9465_v50 = vsel %vm770_vm6, %v18743_v61, %v11156_v38  ;;  %v8002_v43 = vsel %vm782_vm12, %v8001_v7, %v11161_v34  ;;  %v18754_v56 = vld [vmem:[#allocation98_spill] sm:$0xff] }
 0x80d   :  { %v8009_v3 = vsel %vm782_vm12, %v8008_v58, %v11162_v60  ;;  %v18746_v47 = vpack.i.bf16 %v18744_v1, %v18745_v25  ;;  %v11047_v20 = vunpack.i.h.bf16 %v16762_v49  ;;  %v11046_v62 = vunpack.i.l.bf16 %v16762_v49  ;;  %v18752_v60 = vld [vmem:[#allocation61_spill] sm:$0xff] }
 0x80e   :  { %v10310_v0 = vpack.c.bf16 %v8009_v3, %v8002_v43  ;;  %v9181_v21 = vcombine.high %v17213_v22, %v18156_v14  ;;  %v18749_v41 = vcombine.low %v18747_v28, %v18748_v36  ;;  %v11167_v52 = vunpack.i.h.bf16 %v11165_v32  ;;  %v18756_v3 = vld [vmem:[#allocation100_spill] sm:$0xff]  ;;  %v18757_v1 = vld [vmem:[#allocation101_spill] sm:$0xff] }
 0x80f   :  { %11454 = vrot.lane.b32.xlu1 %v18746_v47, %s11756_s8  ;;  %v11166_v10 = vunpack.i.l.bf16 %v11165_v32  ;;  %v9592_v16 = vcombine.high %v17222_v17, %v18156_v14  ;;  %v11052_v49 = vunpack.i.h.bf16 %v16784_v35  ;;  %v11051_v2 = vunpack.i.l.bf16 %v16784_v35  ;;  %v11175_v38 = vpop.permute.xlu0 %11174  ;;  %v17273_v42 = vpop.permute.xlu1 %11204 }
 0x810   :  { %v17251_v6 = vrot.slane %v18749_v41, %v11969_v26  ;;  %8018 = vst [vmem:[#allocation3 + $0x8] sm:$0x33] %v10310_v0  ;;  %v9466_v54 = vsel %vm772_vm7, %v9465_v50, %v11046_v62  ;;  %v9473_v4 = vsel %vm772_vm7, %v9472_v13, %v11047_v20  ;;  %11469 = vrot.lane.b32.xlu0 %v11468_v27, %s11761_s12  ;;  %v11172_v11 = vunpack.i.h.bf16 %v17189_v9  ;;  %v18759_v20 = vld [vmem:[#allocation92_spill] sm:$0xff]  ;;  %v18760_v0 = vld [vmem:[#allocation42_spill] sm:$0xff] }
 0x811   :  { %v11171_v30 = vunpack.i.l.bf16 %v17189_v9  ;;  %v9467_v12 = vsel %vm774_vm8, %v9466_v54, %v11166_v10  ;;  %v9474_v33 = vsel %vm774_vm8, %v9473_v4, %v11167_v52  ;;  %v11057_v44 = vunpack.i.h.bf16 %v16823_v40  ;;  %v18761_v10 = vld [vmem:[#allocation123_spill] sm:$0xff] }
 0x812   :  { %v11056_v35 = vunpack.i.l.bf16 %v16823_v40  ;;  %v9468_v24 = vsel %vm776_vm9, %v9467_v12, %v11051_v2  ;;  %v9475_v57 = vsel %vm776_vm9, %v9474_v33, %v11052_v49  ;;  %v11177_v48 = vunpack.i.h.bf16 %v11175_v38  ;;  %v18750_v40 = vld [vmem:[#allocation76_spill] sm:$0xff]  ;;  %v18762_v2 = vld [vmem:[#allocation11_spill] sm:$0xff] }
 0x813   :  { %11464 = vrot.lane.b32.xlu1 %v11463_v51, %s11760_s11  ;;  %v11176_v37 = vunpack.i.l.bf16 %v11175_v38  ;;  %v9469_v31 = vsel %vm778_vm10, %v9468_v24, %v11171_v30  ;;  %v9476_v9 = vsel %vm778_vm10, %v9475_v57, %v11172_v11  ;;  %v9113_v55 = vcombine.high %v18750_v40, %v18156_v14  ;;  %v17291_v27 = vpop.permute.xlu0 %11179  ;;  %v17295_v61 = vpop.permute.xlu1 %11209  ;;  %v18763_v4 = vld [vmem:[#allocation39_spill] sm:$0xff]  ;;  %v18764_v11 = vld [vmem:[#allocation36_spill] sm:$0xff] }
 0x814   :  { %v9470_v45 = vsel %vm780_vm11, %v9469_v31, %v11056_v35  ;;  %v9477_v39 = vsel %vm780_vm11, %v9476_v9, %v11057_v44  ;;  %11479 = vrot.lane.b32.xlu0 %v11478_v5, %s11760_s11  ;;  %v9660_v15 = vcombine.high %v17251_v6, %v18156_v14  ;;  %v18753_v34 = vcombine.low %v18751_v23, %v18752_v60  ;;  %v18766_v35 = vld [vmem:[#allocation47_spill] sm:$0xff]  ;;  %v18771_v23 = vld [vmem:[#allocation90_spill] sm:$0xff] }
 0x815   :  { %v9471_v51 = vsel %vm782_vm12, %v9470_v45, %v11176_v37  ;;  %v9478_v59 = vsel %vm782_vm12, %v9477_v39, %v11177_v48  ;;  %v11483_v5 = vpack.i.bf16 %v9181_v21, %v9113_v55  ;;  %v8449_v13 = vcombine.high %v18754_v56, %v18156_v14  ;;  %v18767_v48 = vld [vmem:[#allocation102_spill] sm:$0xff]  ;;  %v18768_v37 = vld [vmem:[#allocation103_spill] sm:$0xff]  ;;  %v18770_v45 = vld [vmem:[#allocation13_spill] sm:$0xff] }
 0x816   :  { %v17289_v7 = vrot.slane %v18753_v34, %v11969_v26  ;;  %v10316_v58 = vpack.c.bf16 %v9478_v59, %v9471_v51  ;;  %v11488_v50 = vpack.i.bf16 %v9660_v15, %v9592_v16  ;;  %v18758_v25 = vcombine.low %v18756_v3, %v18757_v1  ;;  %v18776_v3 = vld [vmem:[#allocation93_spill] sm:$0xff] }
 0x817   :  { %11474 = vrot.lane.b32.xlu1 %v11473_v19, %s11755_s7  ;;  %v18755_v19 = vld [vmem:[#allocation110_spill] sm:$0xff]  ;;  %v8381_v62 = vcombine.high %v18759_v20, %v18156_v14  ;;  %v8126_v32 = vcombine.high %v18760_v0, %v18156_v14  ;;  %v17311_v21 = vpop.permute.xlu0 %11184  ;;  %v17315_v41 = vpop.permute.xlu1 %11214  ;;  %v9182_v16 = vcombine.high %v18761_v10, %v18156_v14  ;;  %v9114_v54 = vcombine.high %v18762_v2, %v18156_v14 }
 0x818   :  { %v8194_v43 = vcombine.high %v18755_v19, %v18156_v14  ;;  %v17303_v47 = vrot.slane %v18758_v25, %v11969_v26  ;;  %9487 = vst [vmem:[#allocation3 + $0x38] sm:$0x33] %v10316_v58  ;;  %11484 = vrot.lane.b32.xlu0 %v11483_v5, %s11761_s12  ;;  %v8926_v36 = vcombine.high %v17289_v7, %v18156_v14  ;;  %v18772_v58 = vld [vmem:[#allocation104_spill] sm:$0xff]  ;;  %v18773_v5 = vld [vmem:[#allocation115_spill] sm:$0xff] }
 0x819   :  { %v11498_v28 = vpack.i.bf16 %v8449_v13, %v8381_v62  ;;  %v18765_v30 = vcombine.low %v18763_v4, %v18764_v11  ;;  %v8927_v24 = vcombine.high %v18766_v35, %v18156_v14  ;;  %v11508_v38 = vpack.i.bf16 %v9182_v16, %v9114_v54  ;;  %v18775_v13 = vld [vmem:[#allocation83_spill] sm:$0xff]  ;;  %v18777_v62 = vld [vmem:[#allocation86_spill] sm:$0xff] }
 0x81a   :  { %v11493_v52 = vpack.i.bf16 %v8194_v43, %v8126_v32  ;;  %v8858_v49 = vcombine.high %v17303_v47, %v18156_v14  ;;  %v18769_v31 = vcombine.low %v18767_v48, %v18768_v37  ;;  %v8859_v39 = vcombine.high %v18770_v45, %v18156_v14  ;;  %v18778_v32 = vld [vmem:[#allocation60_spill] sm:$0xff]  ;;  %v18780_v4 = vld [vmem:[#allocation55_spill] sm:$0xff]  ;;  %v18786_v37 = vld [vmem:[#allocation114_spill] sm:$0xff] }
 0x81b   :  { %11489 = vrot.lane.b32.xlu1 %v11488_v50, %s11761_s12  ;;  %v17329_v12 = vrot.slane %v18765_v30, %v11969_v26  ;;  %v17331_v33 = vpop.permute.xlu0 %11189  ;;  %v17335_v57 = vpop.permute.xlu1 %11219  ;;  %v8450_v60 = vcombine.high %v18771_v23, %v18156_v14  ;;  %v18774_v56 = vpack.i.bf16 %v18772_v58, %v18773_v5  ;;  %v8382_v50 = vcombine.high %v18775_v13, %v18156_v14  ;;  %v18781_v11 = vld [vmem:[#allocation95_spill] sm:$0xff]  ;;  %v18788_v45 = vld [vmem:[#allocation62_spill] sm:$0xff]  ;;  %v18795_v58 = vld [vmem:[#allocation65_spill] sm:$0xff] }
 0x81c   :  { %11499 = vrot.lane.b32.xlu0 %v11498_v28, %s11755_s7  ;;  %v11503_v44 = vpack.i.bf16 %v8926_v36, %v8858_v49  ;;  %v17341_v9 = vrot.slane %v18769_v31, %v11969_v26  ;;  %v11523_v51 = vpack.i.bf16 %v8927_v24, %v8859_v39  ;;  %v9184_v1 = vcombine.high %v18776_v3, %v18156_v14  ;;  %v18779_v36 = vld [vmem:[#allocation75_spill] sm:$0xff]  ;;  %v18784_v24 = vld [vmem:[#allocation18_spill] sm:$0xff]  ;;  %v18789_v39 = vld [vmem:[#allocation112_spill] sm:$0xff] }
 0x81d   :  { %v7645_v59 = vcombine.high %v17329_v12, %v18156_v14  ;;  %v11518_v20 = vpack.i.bf16 %v8450_v60, %v8382_v50  ;;  %v9183_v0 = vcombine.high %v18777_v62, %v18156_v14  ;;  %v9116_v28 = vcombine.high %v18778_v32, %v18156_v14  ;;  %v18785_v48 = vld [vmem:[#allocation119_spill] sm:$0xff]  ;;  %v18793_v60 = vld [vmem:[#allocation109_spill] sm:$0xff] }
 0x81e   :  { %v7713_v34 = vcombine.high %v17341_v9, %v18156_v14  ;;  %v18782_v30 = vcombine.low %v18780_v4, %v18781_v11  ;;  %v18787_v31 = vpack.i.bf16 %v18785_v48, %v18786_v37  ;;  %v18792_v23 = vld [vmem:[#allocation111_spill] sm:$0xff]  ;;  %v8860_v5 = vcombine.high %v18795_v58, %v18156_v14  ;;  %v18804_v48 = vld [vmem:[#allocation69_spill] sm:$0xff]  ;;  %v18805_v37 = vld [vmem:[#allocation10_spill] sm:$0xff] }
 0x81f   :  { %11494 = vrot.lane.b32.xlu1 %v11493_v52, %s11756_s8  ;;  %v17347_v55 = vpop.permute.xlu0 %11224  ;;  %v17351_v15 = vpop.permute.xlu1 %11259  ;;  %v9115_v52 = vcombine.high %v18779_v36, %v18156_v14  ;;  %v11548_v16 = vpack.i.bf16 %v9184_v1, %v9116_v28  ;;  %v18796_v3 = vld [vmem:[#allocation99_spill] sm:$0xff]  ;;  %v18799_v28 = vld [vmem:[#allocation122_spill] sm:$0xff] }
 0x820   :  { %11504 = vrot.lane.b32.xlu0 %v11503_v44, %s11761_s12  ;;  %v11538_v43 = vpack.i.bf16 %v7713_v34, %v7645_v59  ;;  %v17390_v44 = vrot.slane %v18782_v30, %v11969_v26  ;;  %v18794_v34 = vpack.i.bf16 %v18792_v23, %v18793_v60  ;;  %v8929_v36 = vcombine.high %v18799_v28, %v18156_v14  ;;  %v18803_v4 = vld [vmem:[#allocation91_spill] sm:$0xff]  ;;  %v18808_v23 = vld [vmem:[#allocation94_spill] sm:$0xff] }
 0x821   :  { %v11528_v2 = vpack.i.bf16 %v9183_v0, %v9115_v52  ;;  %v18800_v52 = vld [vmem:[#allocation22_spill] sm:$0xff]  ;;  %v8861_v11 = vcombine.high %v18803_v4, %v18156_v14 }
 0x822   :  { %18783 = vst [vmem:[#allocation50_spill] sm:$0xff] %v17390_v44 }
 0x823   :  { %11509 = vrot.lane.b32.xlu1 %v11508_v38, %s11760_s11  ;;  %v17364_v19 = vpop.permute.xlu0 %11229  ;;  %v17368_v25 = vpop.permute.xlu1 %11269  ;;  %v8928_v38 = vcombine.high %v18784_v24, %v18156_v14 }
 0x824   :  { %11524 = vrot.lane.b32.xlu0 %v11523_v51, %s11760_s11  ;;  %v18790_v51 = vcombine.low %v18788_v45, %v18789_v39  ;;  %v10010_v45 = vld [vmem:[%s17796_s4] sm:$0xf] }
 0x825   :  { %v11543_v50 = vpack.i.bf16 %v8928_v38, %v8860_v5  ;;  %v11568_v38 = vpack.i.bf16 %v8929_v36, %v8861_v11  ;;  %v18810_v5 = vld [vmem:[#allocation73_spill] sm:$0xff] }
 0x826   :  { %v17404_v59 = vrot.slane %v18790_v51, %v11969_v26  ;;  %v18797_v26 = vld [vmem:[#allocation40_spill] sm:$0xff] }
 0x827   :  { %11514 = vrot.lane.b32.xlu1 %v18774_v56, %s11760_s11  ;;  %v17380_v49 = vpop.permute.xlu1 %11284  ;;  %v18798_v1 = vpack.i.bf16 %v18796_v3, %v18797_v26 }
 0x828   :  { %11539 = vrot.lane.b32.xlu0 %v11538_v43, %s11761_s12  ;;  %v17378_v10 = vpop.permute.xlu0 %11234  ;;  %18791 = vst [vmem:[#allocation37_spill] sm:$0xff] %v17404_v59  ;;  %v9916_v43 = vcombine.high %v17390_v44, %v18156_v14  ;;  %v11206_v44 = vunpack.i.l.bf16 %v17273_v42 }
 0x82b   :  { %11519 = vrot.lane.b32.xlu1 %v11518_v20, %s11756_s8  ;;  %v17392_v35 = vpop.permute.xlu1 %11289  ;;  %v9848_v20 = vcombine.high %v17404_v59, %v18156_v14  ;;  %v18807_v14 = vld [vmem:[#allocation74_spill] sm:$0xff] }
 0x82c   :  { %11549 = vrot.lane.b32.xlu0 %v11548_v16, %s11756_s8  ;;  %v17384_v54 = vpop.permute.xlu0 %11239  ;;  %v18801_v16 = vld [vmem:[#allocation68_spill] sm:$0xff]  ;;  %v18809_v60 = vpack.i.bf16 %v18807_v14, %v18808_v23  ;;  %v11182_v23 = vunpack.i.h.bf16 %v17291_v27 }
 0x82d   :  { %v11558_v32 = vpack.i.bf16 %v9916_v43, %v9848_v20  ;;  %v18815_v20 = vld [vmem:[#allocation30_spill] sm:$0xff] }
 0x82f   :  { %11529 = vrot.lane.b32.xlu1 %v11528_v2, %s11755_s7  ;;  %v17414_v13 = vpop.permute.xlu1 %11299  ;;  %v18802_v2 = vpack.i.bf16 %v18800_v52, %v18801_v16 }
 0x830   :  { %11554 = vrot.lane.b32.xlu0 %v18787_v31, %s11756_s8  ;;  %v17412_v56 = vpop.permute.xlu0 %11244  ;;  %v18806_v31 = vpack.i.bf16 %v18804_v48, %v18805_v37  ;;  %v18819_v48 = vld [vmem:[#allocation124_spill] sm:$0xff] }
 0x833   :  { %11534 = vrot.lane.b32.xlu1 %v18794_v34, %s11755_s7  ;;  %v17427_v0 = vpop.permute.xlu1 %11304 }
 0x834   :  { %11564 = vrot.lane.b32.xlu0 %v18798_v1, %s11760_s11  ;;  %v17425_v62 = vpop.permute.xlu0 %11249  ;;  %v18814_v1 = vld [vmem:[#allocation121_spill] sm:$0xff] }
 0x837   :  { %11544 = vrot.lane.b32.xlu1 %v11543_v50, %s11755_s7  ;;  %v17440_v24 = vpop.permute.xlu1 %11314  ;;  %v18811_v50 = vld [vmem:[#allocation56_spill] sm:$0xff] }
 0x838   :  { %11579 = vrot.lane.b32.xlu0 %v18802_v2, %s11755_s7  ;;  %v17438_v30 = vpop.permute.xlu0 %11254  ;;  %v18812_v43 = vpack.i.bf16 %v18810_v5, %v18811_v50 }
 0x83b   :  { %11559 = vrot.lane.b32.xlu1 %v11558_v32, %s11761_s12  ;;  %v17452_v51 = vpop.permute.xlu1 %11319  ;;  %v18816_v32 = vpack.i.bf16 %v18814_v1, %v18815_v20  ;;  %v11187_v1 = vunpack.i.h.bf16 %v17311_v21  ;;  %v11186_v20 = vunpack.i.l.bf16 %v17311_v21  ;;  %v11191_v21 = vunpack.i.l.bf16 %v17331_v33 }
 0x83c   :  { %11589 = vrot.lane.b32.xlu0 %v18806_v31, %s11756_s8  ;;  %v17450_v39 = vpop.permute.xlu0 %11264  ;;  %v18820_v31 = vld [vmem:[#allocation105_spill] sm:$0xff] }
 0x83f   :  { %11569 = vrot.lane.b32.xlu1 %v11568_v38, %s11756_s8  ;;  %v17460_v58 = vpop.permute.xlu1 %11329 }
 0x840   :  { %10013 = vperm.xlu0 %10967, %v10010_v45   ;;  %v17458_v34 = vpop.permute.xlu0 %11274 }
 0x843   :  { %11574 = vrot.lane.b32.xlu1 %v18809_v60, %s11760_s11  ;;  %v17468_v26 = vpop.permute.xlu1 %11334  ;;  %v11181_v60 = vunpack.i.l.bf16 %v17291_v27 }
 0x844   :  { %v17466_v3 = vpop.permute.xlu0 %11279  ;;  %18813 = vst [vmem:[#allocation46_spill] sm:$0xff] %v17468_v26  ;;  %v11192_v26 = vunpack.i.h.bf16 %v17331_v33 }
 0x847   :  { %11584 = vrot.lane.b32.xlu1 %v18812_v43, %s11755_s7  ;;  %v17476_v36 = vpop.permute.xlu1 %11344 }
 0x848   :  { %v17474_v28 = vpop.permute.xlu0 %11294  ;;  %18817 = vst [vmem:[#allocation28_spill] sm:$0xff] %v17476_v36 }
 0x84b   :  { %11594 = vrot.lane.b32.xlu1 %v18816_v32, %s11756_s8  ;;  %v17480_v16 = vpop.permute.xlu1 %11354 }
 0x84c   :  { %v17478_v52 = vpop.permute.xlu0 %11309  ;;  %18818 = vst [vmem:[#allocation34_spill] sm:$0xff] %v17480_v16 }
 0x84f   :  { %v11360_v4 = vpop.permute.xlu1 %11359 }
 0x850   :  { %v17482_v2 = vpop.permute.xlu0 %11324  ;;  %v11362_v11 = vunpack.i.h.bf16 %v11360_v4  ;;  %v11361_v38 = vunpack.i.l.bf16 %v11360_v4 }
 0x852   :  { %v6055_v37 = vsel %vm770_vm6, %v18819_v48, %v11362_v11  ;;  %v6048_v45 = vsel %vm770_vm6, %v18820_v31, %v11361_v38 }
 0x853   :  { %v6049_v32 = vsel %vm772_vm7, %v6048_v45, %v11181_v60  ;;  %v6056_v4 = vsel %vm772_vm7, %v6055_v37, %v11182_v23 }
 0x854   :  { %v17488_v14 = vpop.permute.xlu0 %11339 }
 0x856   :  { %v11365_v5 = vpop.permute.xlu1 %11364 }
 0x857   :  { %v11367_v50 = vunpack.i.h.bf16 %v11365_v5  ;;  %v11366_v43 = vunpack.i.l.bf16 %v11365_v5 }
 0x858   :  { %v17498_v48 = vpop.permute.xlu0 %11349 }
 0x859   :  { %v6050_v11 = vsel %vm774_vm8, %v6049_v32, %v11366_v43  ;;  %v6057_v38 = vsel %vm774_vm8, %v6056_v4, %v11367_v50 }
 0x85a   :  { %v11370_v31 = vpop.permute.xlu1 %11369  ;;  %v6051_v27 = vsel %vm776_vm9, %v6050_v11, %v11186_v20  ;;  %v6058_v16 = vsel %vm776_vm9, %v6057_v38, %v11187_v1  ;;  %v11197_v11 = vunpack.i.h.bf16 %v17224_v53  ;;  %v11196_v38 = vunpack.i.l.bf16 %v17224_v53 }
 0x85b   :  { %v11372_v5 = vunpack.i.h.bf16 %v11370_v31  ;;  %v11371_v36 = vunpack.i.l.bf16 %v11370_v31  ;;  %v18821_v31 = vld [vmem:[#allocation64_spill] sm:$0xff] }
 0x85c   :  { %v11380_v23 = vpop.permute.xlu0 %11379 }
 0x85d   :  { %v6052_v45 = vsel %vm778_vm10, %v6051_v27, %v11371_v36  ;;  %v6059_v37 = vsel %vm778_vm10, %v6058_v16, %v11372_v5  ;;  %v11382_v60 = vunpack.i.h.bf16 %v11380_v23  ;;  %v11381_v50 = vunpack.i.l.bf16 %v11380_v23  ;;  %v18822_v36 = vld [vmem:[#allocation106_spill] sm:$0xff] }
 0x85e   :  { %v6053_v32 = vsel %vm780_vm11, %v6052_v45, %v11191_v21  ;;  %v6060_v20 = vsel %vm780_vm11, %v6059_v37, %v11192_v26  ;;  %v11202_v27 = vunpack.i.h.bf16 %v17253_v8  ;;  %v11201_v5 = vunpack.i.l.bf16 %v17253_v8 }
 0x85f   :  { %v11375_v43 = vpop.permute.xlu1 %11374  ;;  %v6311_v33 = vsel %vm770_vm6, %v18821_v31, %v11382_v60  ;;  %v6304_v16 = vsel %vm770_vm6, %v18822_v36, %v11381_v50  ;;  %v11207_v37 = vunpack.i.h.bf16 %v17273_v42  ;;  %v11226_v42 = vunpack.i.l.bf16 %v17347_v55 }
 0x860   :  { %v11377_v4 = vunpack.i.h.bf16 %v11375_v43  ;;  %v11376_v1 = vunpack.i.l.bf16 %v11375_v43  ;;  %v6305_v60 = vsel %vm772_vm7, %v6304_v16, %v11196_v38  ;;  %v6312_v31 = vsel %vm772_vm7, %v6311_v33, %v11197_v11 }
 0x862   :  { %v6054_v21 = vsel %vm782_vm12, %v6053_v32, %v11376_v1  ;;  %v6061_v26 = vsel %vm782_vm12, %v6060_v20, %v11377_v4  ;;  %v11385_v45 = vpop.permute.xlu0 %11384  ;;  %v18823_v4 = vld [vmem:[#allocation53_spill] sm:$0xff] }
 0x863   :  { %v10302_v23 = vpack.c.bf16 %v6061_v26, %v6054_v21  ;;  %v11387_v43 = vunpack.i.h.bf16 %v11385_v45  ;;  %v11386_v53 = vunpack.i.l.bf16 %v11385_v45  ;;  %v11420_v59 = vpop.permute.xlu1 %11419  ;;  %v18824_v21 = vld [vmem:[#allocation12_spill] sm:$0xff] }
 0x864   :  { %v11422_v50 = vunpack.i.h.bf16 %v11420_v59  ;;  %v11421_v36 = vunpack.i.l.bf16 %v11420_v59  ;;  %v11227_v59 = vunpack.i.h.bf16 %v17347_v55 }
 0x865   :  { %v6069_v8 = vrot.slane %v10302_v23, 6  ;;  %v6306_v32 = vsel %vm774_vm8, %v6305_v60, %v11386_v53  ;;  %v6313_v20 = vsel %vm774_vm8, %v6312_v31, %v11387_v43  ;;  %v11232_v43 = vunpack.i.h.bf16 %v17364_v19 }
 0x866   :  { %v7045_v1 = vsel %vm770_vm6, %v18823_v4, %v11422_v50  ;;  %v7038_v26 = vsel %vm770_vm6, %v18824_v21, %v11421_v36  ;;  %v11390_v45 = vpop.permute.xlu0 %11389  ;;  %v6307_v38 = vsel %vm776_vm9, %v6306_v32, %v11201_v5  ;;  %v6314_v11 = vsel %vm776_vm9, %v6313_v20, %v11202_v27 }
 0x867   :  { %6071 = vst [vmem:[#allocation3] sm:$0xcc] %v6069_v8  ;;  %v11392_v33 = vunpack.i.h.bf16 %v11390_v45  ;;  %v11391_v16 = vunpack.i.l.bf16 %v11390_v45  ;;  %v11425_v23 = vpop.permute.xlu1 %11424  ;;  %v11231_v53 = vunpack.i.l.bf16 %v17364_v19  ;;  %v7039_v27 = vsel %vm772_vm7, %v7038_v26, %v11226_v42 }
 0x868   :  { %v11427_v60 = vunpack.i.h.bf16 %v11425_v23  ;;  %v11426_v31 = vunpack.i.l.bf16 %v11425_v23  ;;  %v7046_v36 = vsel %vm772_vm7, %v7045_v1, %v11227_v59  ;;  %v11237_v1 = vunpack.i.h.bf16 %v17378_v10 }
 0x869   :  { %v6308_v50 = vsel %vm778_vm10, %v6307_v38, %v11391_v16  ;;  %v6315_v5 = vsel %vm778_vm10, %v6314_v11, %v11392_v33  ;;  %v11236_v59 = vunpack.i.l.bf16 %v17378_v10 }
 0x86a   :  { %v7040_v55 = vsel %vm774_vm8, %v7039_v27, %v11426_v31  ;;  %v7047_v8 = vsel %vm774_vm8, %v7046_v36, %v11427_v60  ;;  %v11395_v32 = vpop.permute.xlu0 %11394  ;;  %v6309_v20 = vsel %vm780_vm11, %v6308_v50, %v11206_v44  ;;  %v6316_v4 = vsel %vm780_vm11, %v6315_v5, %v11207_v37 }
 0x86b   :  { %v11397_v19 = vunpack.i.h.bf16 %v11395_v32  ;;  %v11396_v21 = vunpack.i.l.bf16 %v11395_v32  ;;  %v11430_v45 = vpop.permute.xlu1 %11429  ;;  %v7041_v38 = vsel %vm776_vm9, %v7040_v55, %v11231_v53  ;;  %v7048_v11 = vsel %vm776_vm9, %v7047_v8, %v11232_v43  ;;  %v18825_v8 = vld [vmem:[#allocation88_spill] sm:$0xff] }
 0x86c   :  { %v11432_v33 = vunpack.i.h.bf16 %v11430_v45  ;;  %v11431_v26 = vunpack.i.l.bf16 %v11430_v45  ;;  %v11212_v36 = vunpack.i.h.bf16 %v17295_v61  ;;  %v11211_v55 = vunpack.i.l.bf16 %v17295_v61 }
 0x86d   :  { %v6310_v42 = vsel %vm782_vm12, %v6309_v20, %v11396_v21  ;;  %v6317_v16 = vsel %vm782_vm12, %v6316_v4, %v11397_v19  ;;  %v18826_v20 = vld [vmem:[#allocation21_spill] sm:$0xff]  ;;  %v11217_v19 = vunpack.i.h.bf16 %v17315_v41  ;;  %v11216_v21 = vunpack.i.l.bf16 %v17315_v41 }
 0x86e   :  { %v10303_v44 = vpack.c.bf16 %v6317_v16, %v6310_v42  ;;  %v7042_v37 = vsel %vm778_vm10, %v7041_v38, %v11431_v26  ;;  %v7049_v23 = vsel %vm778_vm10, %v7048_v11, %v11432_v33  ;;  %v11400_v60 = vpop.permute.xlu0 %11399  ;;  %v11222_v33 = vunpack.i.h.bf16 %v17335_v57 }
 0x86f   :  { %v11402_v31 = vunpack.i.h.bf16 %v11400_v60  ;;  %v11401_v53 = vunpack.i.l.bf16 %v11400_v60  ;;  %v11435_v50 = vpop.permute.xlu1 %11434  ;;  %v7043_v43 = vsel %vm780_vm11, %v7042_v37, %v11236_v59  ;;  %v7050_v5 = vsel %vm780_vm11, %v7049_v23, %v11237_v1 }
 0x870   :  { %6326 = vst [vmem:[#allocation3 + $0x10] sm:$0x33] %v10303_v44  ;;  %v11437_v27 = vunpack.i.h.bf16 %v11435_v50  ;;  %v11436_v10 = vunpack.i.l.bf16 %v11435_v50  ;;  %v11221_v23 = vunpack.i.l.bf16 %v17335_v57  ;;  %v11241_v57 = vunpack.i.l.bf16 %v17384_v54 }
 0x871   :  { %v6790_v32 = vsel %vm770_vm6, %v18825_v8, %v11402_v31  ;;  %v6783_v4 = vsel %vm770_vm6, %v18826_v20, %v11401_v53 }
 0x872   :  { %v7044_v45 = vsel %vm782_vm12, %v7043_v43, %v11436_v10  ;;  %v7051_v38 = vsel %vm782_vm12, %v7050_v5, %v11437_v27  ;;  %v11405_v11 = vpop.permute.xlu0 %11404  ;;  %v6784_v42 = vsel %vm772_vm7, %v6783_v4, %v11211_v55  ;;  %v6791_v16 = vsel %vm772_vm7, %v6790_v32, %v11212_v36 }
 0x873   :  { %v10306_v26 = vpack.c.bf16 %v7051_v38, %v7044_v45  ;;  %v11407_v1 = vunpack.i.h.bf16 %v11405_v11  ;;  %v11406_v61 = vunpack.i.l.bf16 %v11405_v11  ;;  %v11440_v59 = vpop.permute.xlu1 %11439  ;;  %v11242_v10 = vunpack.i.h.bf16 %v17384_v54 }
 0x874   :  { %v11442_v44 = vunpack.i.h.bf16 %v11440_v59  ;;  %v11441_v37 = vunpack.i.l.bf16 %v11440_v59  ;;  %v11246_v4 = vunpack.i.l.bf16 %v17412_v56 }
 0x875   :  { %v7059_v41 = vrot.slane %v10306_v26, 6  ;;  %v6785_v60 = vsel %vm774_vm8, %v6784_v42, %v11406_v61  ;;  %v6792_v31 = vsel %vm774_vm8, %v6791_v16, %v11407_v1 }
 0x876   :  { %v7524_v53 = vsel %vm770_vm6, %v17047_v46, %v11442_v44  ;;  %v7517_v50 = vsel %vm770_vm6, %v17013_v63, %v11441_v37  ;;  %v11410_v43 = vpop.permute.xlu0 %11409  ;;  %v6786_v5 = vsel %vm776_vm9, %v6785_v60, %v11216_v21  ;;  %v6793_v27 = vsel %vm776_vm9, %v6792_v31, %v11217_v19 }
 0x877   :  { %7061 = vst [vmem:[#allocation3 + $0x20] sm:$0xcc] %v7059_v41  ;;  %v11412_v36 = vunpack.i.h.bf16 %v11410_v43  ;;  %v11411_v55 = vunpack.i.l.bf16 %v11410_v43  ;;  %v11686_v32 = vld [vmem:[#allocation3] ss:$16 sps:$4 sm:$0xff]   ;;  %v11688_v20 = vld [vmem:[#allocation3 + $0x4] ss:$16 sps:$4 sm:$0xff]   ;;  %v11247_v46 = vunpack.i.h.bf16 %v17412_v56  ;;  %v7518_v38 = vsel %vm772_vm7, %v7517_v50, %v11241_v57 }
 0x878   :  { %v11445_v8 = vpop.permute.xlu1 %11444  ;;  %v7525_v54 = vsel %vm772_vm7, %v7524_v53, %v11242_v10  ;;  %10081 = vmatprep.subr.bf16.mxu0 %v11688_v20  ;;  %v11252_v31 = vunpack.i.h.bf16 %v17425_v62  ;;  %v11251_v53 = vunpack.i.l.bf16 %v17425_v62  ;;  %v11262_v20 = vunpack.i.h.bf16 %v17351_v15 }
 0x879   :  { %v11447_v63 = vunpack.i.h.bf16 %v11445_v8  ;;  %v11446_v45 = vunpack.i.l.bf16 %v11445_v8  ;;  %v6787_v21 = vsel %vm778_vm10, %v6786_v5, %v11411_v55  ;;  %v6794_v19 = vsel %vm778_vm10, %v6793_v27, %v11412_v36  ;;  %10082 = vmatpush1.bf16.msra.mxu0 %v11686_v32 }
 0x87a   :  { %v11415_v1 = vpop.permute.xlu0 %11414  ;;  %v6788_v61 = vsel %vm780_vm11, %v6787_v21, %v11221_v23  ;;  %v6795_v56 = vsel %vm780_vm11, %v6794_v19, %v11222_v33  ;;  %v11256_v21 = vunpack.i.l.bf16 %v17438_v30 }
 0x87b   :  { %v7519_v11 = vsel %vm774_vm8, %v7518_v38, %v11446_v45  ;;  %v7526_v26 = vsel %vm774_vm8, %v7525_v54, %v11447_v63  ;;  %v11417_v59 = vunpack.i.h.bf16 %v11415_v1  ;;  %v11416_v42 = vunpack.i.l.bf16 %v11415_v1  ;;  %v18827_v63 = vld [vmem:[#allocation125_spill] sm:$0xff] }
 0x87c   :  { %v11450_v16 = vpop.permute.xlu1 %11449  ;;  %v7520_v44 = vsel %vm776_vm9, %v7519_v11, %v11246_v4  ;;  %v7527_v37 = vsel %vm776_vm9, %v7526_v26, %v11247_v46  ;;  %v11261_v46 = vunpack.i.l.bf16 %v17351_v15  ;;  %v11257_v4 = vunpack.i.h.bf16 %v17438_v30 }
 0x87d   :  { %v11452_v41 = vunpack.i.h.bf16 %v11450_v16  ;;  %v11451_v60 = vunpack.i.l.bf16 %v11450_v16  ;;  %v6789_v50 = vsel %vm782_vm12, %v6788_v61, %v11416_v42  ;;  %v6796_v23 = vsel %vm782_vm12, %v6795_v56, %v11417_v59 }
 0x87e   :  { %v10305_v43 = vpack.c.bf16 %v6796_v23, %v6789_v50  ;;  %v11460_v27 = vpop.permute.xlu0 %11459  ;;  %v11267_v26 = vunpack.i.h.bf16 %v17450_v39  ;;  %v11266_v59 = vunpack.i.l.bf16 %v17450_v39 }
 0x87f   :  { %v7521_v33 = vsel %vm778_vm10, %v7520_v44, %v11451_v60  ;;  %v7528_v5 = vsel %vm778_vm10, %v7527_v37, %v11452_v41  ;;  %v11462_v10 = vunpack.i.h.bf16 %v11460_v27  ;;  %v11461_v57 = vunpack.i.l.bf16 %v11460_v27  ;;  %v18828_v37 = vld [vmem:[#allocation89_spill] sm:$0xff] }
 0x880   :  { %v7522_v55 = vsel %vm780_vm11, %v7521_v33, %v11251_v53  ;;  %v7529_v8 = vsel %vm780_vm11, %v7528_v5, %v11252_v31  ;;  %6805 = vst [vmem:[#allocation3 + $0x20] sm:$0x33] %v10305_v43  ;;  %v11277_v31 = vunpack.i.h.bf16 %v17458_v34  ;;  %v11276_v53 = vunpack.i.l.bf16 %v17458_v34 }
 0x881   :  { %v11455_v36 = vpop.permute.xlu1 %11454  ;;  %v8251_v45 = vsel %vm770_vm6, %v18827_v63, %v11461_v57  ;;  %v8258_v19 = vsel %vm770_vm6, %v17112_v29, %v11462_v10  ;;  %v11272_v34 = vunpack.i.h.bf16 %v17368_v25 }
 0x882   :  { %v11457_v32 = vunpack.i.h.bf16 %v11455_v36  ;;  %v11456_v62 = vunpack.i.l.bf16 %v11455_v36  ;;  %v11470_v11 = vpop.permute.xlu0 %11469  ;;  %v8252_v42 = vsel %vm772_vm7, %v8251_v45, %v11256_v21  ;;  %v8259_v60 = vsel %vm772_vm7, %v8258_v19, %v11257_v4 }
 0x883   :  { %v11472_v61 = vunpack.i.h.bf16 %v11470_v11  ;;  %v11471_v15 = vunpack.i.l.bf16 %v11470_v11  ;;  %v11292_v11 = vunpack.i.h.bf16 %v17392_v35 }
 0x884   :  { %v7523_v38 = vsel %vm782_vm12, %v7522_v55, %v11456_v62  ;;  %v7530_v54 = vsel %vm782_vm12, %v7529_v8, %v11457_v32  ;;  %v11271_v8 = vunpack.i.l.bf16 %v17368_v25  ;;  %v11287_v25 = vunpack.i.h.bf16 %v17380_v49 }
 0x885   :  { %v10308_v1 = vpack.c.bf16 %v7530_v54, %v7523_v38  ;;  %v11465_v56 = vpop.permute.xlu1 %11464  ;;  %v8514_v29 = vsel %vm770_vm6, %v17165_v18, %v11472_v61  ;;  %v8507_v41 = vsel %vm770_vm6, %v18828_v37, %v11471_v15  ;;  %v11286_v54 = vunpack.i.l.bf16 %v17380_v49 }
 0x886   :  { %v11467_v16 = vunpack.i.h.bf16 %v11465_v56  ;;  %v11466_v30 = vunpack.i.l.bf16 %v11465_v56  ;;  %v11480_v23 = vpop.permute.xlu0 %11479  ;;  %v8508_v10 = vsel %vm772_vm7, %v8507_v41, %v11266_v59  ;;  %v8515_v57 = vsel %vm772_vm7, %v8514_v29, %v11267_v26 }
 0x887   :  { %v7538_v44 = vrot.slane %v10308_v1, 6  ;;  %v11482_v43 = vunpack.i.h.bf16 %v11480_v23  ;;  %v11481_v33 = vunpack.i.l.bf16 %v11480_v23  ;;  %v11291_v26 = vunpack.i.l.bf16 %v17392_v35 }
 0x888   :  { %v8260_v50 = vsel %vm774_vm8, %v8259_v60, %v11467_v16  ;;  %v8253_v39 = vsel %vm774_vm8, %v8252_v42, %v11466_v30  ;;  %v11302_v1 = vunpack.i.h.bf16 %v17414_v13  ;;  %v11301_v61 = vunpack.i.l.bf16 %v17414_v13 }
 0x889   :  { %7540 = vst [vmem:[#allocation3 + $0x30] sm:$0xcc] %v7538_v44  ;;  %v11475_v5 = vpop.permute.xlu1 %11474  ;;  %v8254_v18 = vsel %vm776_vm9, %v8253_v39, %v11261_v46  ;;  %v8261_v27 = vsel %vm776_vm9, %v8260_v50, %v11262_v20  ;;  %v8509_v32 = vsel %vm774_vm8, %v8508_v10, %v11481_v33  ;;  %v8516_v62 = vsel %vm774_vm8, %v8515_v57, %v11482_v43 }
 0x88a   :  { %v11477_v36 = vunpack.i.h.bf16 %v11475_v5  ;;  %v11476_v55 = vunpack.i.l.bf16 %v11475_v5  ;;  %v11485_v63 = vpop.permute.xlu0 %11484  ;;  %v8510_v20 = vsel %vm776_vm9, %v8509_v32, %v11276_v53  ;;  %v8517_v45 = vsel %vm776_vm9, %v8516_v62, %v11277_v31 }
 0x88b   :  { %v11487_v15 = vunpack.i.h.bf16 %v11485_v63  ;;  %v11486_v56 = vunpack.i.l.bf16 %v11485_v63  ;;  %v11307_v59 = vunpack.i.h.bf16 %v17427_v0  ;;  %v11306_v42 = vunpack.i.l.bf16 %v17427_v0 }
 0x88c   :  { %v8255_v4 = vsel %vm778_vm10, %v8254_v18, %v11476_v55  ;;  %v8262_v46 = vsel %vm778_vm10, %v8261_v27, %v11477_v36  ;;  %v11282_v16 = vunpack.i.h.bf16 %v17466_v3  ;;  %v11281_v30 = vunpack.i.l.bf16 %v17466_v3 }
 0x88d   :  { %v11490_v21 = vpop.permute.xlu1 %11489  ;;  %v8256_v19 = vsel %vm780_vm11, %v8255_v4, %v11271_v8  ;;  %v8263_v38 = vsel %vm780_vm11, %v8262_v46, %v11272_v34  ;;  %v11297_v41 = vunpack.i.h.bf16 %v17474_v28  ;;  %v11296_v35 = vunpack.i.l.bf16 %v17474_v28 }
 0x88e   :  { %v11500_v44 = vpop.permute.xlu0 %11499  ;;  %v11492_v53 = vunpack.i.h.bf16 %v11490_v21  ;;  %v11491_v50 = vunpack.i.l.bf16 %v11490_v21  ;;  %v9248_v43 = vsel %vm770_vm6, %v17213_v22, %v11487_v15  ;;  %v9241_v3 = vsel %vm770_vm6, %v18750_v40, %v11486_v56 }
 0x88f   :  { %v11502_v60 = vunpack.i.h.bf16 %v11500_v44  ;;  %v11501_v31 = vunpack.i.l.bf16 %v11500_v44  ;;  %v11312_v36 = vunpack.i.h.bf16 %v17478_v52  ;;  %v11311_v8 = vunpack.i.l.bf16 %v17478_v52 }
 0x890   :  { %v11689_v29 = vld [vmem:[#allocation3 + $0x20] ss:$16 sps:$4 sm:$0xff]   ;;  %v11691_v37 = vld [vmem:[#allocation3 + $0x24] ss:$16 sps:$4 sm:$0xff]   ;;  %v9242_v32 = vsel %vm772_vm7, %v9241_v3, %v11281_v30  ;;  %v9727_v21 = vsel %vm770_vm6, %v17251_v6, %v11492_v53  ;;  %v11317_v3 = vunpack.i.h.bf16 %v17440_v24  ;;  %v11321_v0 = vunpack.i.l.bf16 %v17452_v51 }
 0x891   :  { %v11495_v13 = vpop.permute.xlu1 %11494  ;;  %10083 = vmatprep.subr.bf16.mxu0 %v11691_v37  ;;  %v8511_v33 = vsel %vm778_vm10, %v8510_v20, %v11501_v31  ;;  %v8518_v5 = vsel %vm778_vm10, %v8517_v45, %v11502_v60  ;;  %v9249_v45 = vsel %vm772_vm7, %v9248_v43, %v11282_v16 }
 0x892   :  { %v11497_v39 = vunpack.i.h.bf16 %v11495_v13  ;;  %v11496_v23 = vunpack.i.l.bf16 %v11495_v13  ;;  %10084 = vmatpush1.bf16.msra.mxu0 %v11689_v29  ;;  %v11505_v27 = vpop.permute.xlu0 %11504  ;;  %v8512_v10 = vsel %vm780_vm11, %v8511_v33, %v11291_v26  ;;  %v8519_v57 = vsel %vm780_vm11, %v8518_v5, %v11292_v11 }
 0x893   :  { %v11507_v55 = vunpack.i.h.bf16 %v11505_v27  ;;  %v11506_v34 = vunpack.i.l.bf16 %v11505_v27  ;;  %v11316_v33 = vunpack.i.l.bf16 %v17440_v24  ;;  %v11332_v27 = vunpack.i.h.bf16 %v17460_v58 }
 0x894   :  { %v8257_v28 = vsel %vm782_vm12, %v8256_v19, %v11496_v23  ;;  %v8264_v18 = vsel %vm782_vm12, %v8263_v38, %v11497_v39  ;;  %v9720_v19 = vsel %vm770_vm6, %v17222_v17, %v11491_v50 }
 0x895   :  { %v10311_v22 = vpack.c.bf16 %v8264_v18, %v8257_v28  ;;  %v11510_v40 = vpop.permute.xlu1 %11509  ;;  %v8993_v63 = vsel %vm770_vm6, %v17289_v7, %v11507_v55  ;;  %v8986_v20 = vsel %vm770_vm6, %v17303_v47, %v11506_v34  ;;  %v9721_v37 = vsel %vm772_vm7, %v9720_v19, %v11286_v54 }
 0x896   :  { %v11512_v62 = vunpack.i.h.bf16 %v11510_v40  ;;  %v11511_v4 = vunpack.i.l.bf16 %v11510_v40  ;;  %v11525_v11 = vpop.permute.xlu0 %11524  ;;  %v8987_v16 = vsel %vm772_vm7, %v8986_v20, %v11296_v35  ;;  %v8994_v6 = vsel %vm772_vm7, %v8993_v63, %v11297_v41 }
 0x897   :  { %v8272_v46 = vrot.slane %v10311_v22, 6  ;;  %v11527_v26 = vunpack.i.h.bf16 %v11525_v11  ;;  %v11526_v15 = vunpack.i.l.bf16 %v11525_v11 }
 0x898   :  { %v9250_v52 = vsel %vm774_vm8, %v9249_v45, %v11512_v62  ;;  %v9243_v38 = vsel %vm774_vm8, %v9242_v32, %v11511_v4  ;;  %v11342_v45 = vunpack.i.h.bf16 %v17488_v14 }
 0x899   :  { %8274 = vst [vmem:[#allocation3 + $0x8] sm:$0xcc] %v8272_v46  ;;  %v11515_v7 = vpop.permute.xlu1 %11514  ;;  %v9244_v56 = vsel %vm776_vm9, %v9243_v38, %v11301_v61  ;;  %v9251_v47 = vsel %vm776_vm9, %v9250_v52, %v11302_v1  ;;  %v8988_v17 = vsel %vm774_vm8, %v8987_v16, %v11526_v15  ;;  %v8995_v29 = vsel %vm774_vm8, %v8994_v6, %v11527_v26 }
 0x89a   :  { %v11517_v30 = vunpack.i.h.bf16 %v11515_v7  ;;  %v11516_v44 = vunpack.i.l.bf16 %v11515_v7  ;;  %v9728_v61 = vsel %vm772_vm7, %v9727_v21, %v11287_v25  ;;  %v11540_v60 = vpop.permute.xlu0 %11539  ;;  %v17683_v41 = vsel %vm776_vm9, %v8988_v17, %v11311_v8 }
 0x89b   :  { %v17686_v31 = vsel %vm776_vm9, %v8995_v29, %v11312_v36  ;;  %v11542_v50 = vunpack.i.h.bf16 %v11540_v60  ;;  %v11331_v36 = vunpack.i.l.bf16 %v17460_v58  ;;  %v11326_v8 = vunpack.i.l.bf16 %v17482_v2 }
 0x89c   :  { %v9722_v1 = vsel %vm774_vm8, %v9721_v37, %v11516_v44  ;;  %v9729_v35 = vsel %vm774_vm8, %v9728_v61, %v11517_v30 }
 0x89d   :  { %v11520_v13 = vpop.permute.xlu1 %11519  ;;  %v9723_v54 = vsel %vm776_vm9, %v9722_v1, %v11306_v42  ;;  %v9730_v49 = vsel %vm776_vm9, %v9729_v35, %v11307_v59  ;;  %v11322_v42 = vunpack.i.h.bf16 %v17452_v51  ;;  %v11327_v51 = vunpack.i.h.bf16 %v17482_v2 }
 0x89e   :  { %v11522_v25 = vunpack.i.h.bf16 %v11520_v13  ;;  %v11521_v53 = vunpack.i.l.bf16 %v11520_v13  ;;  %v11550_v43 = vpop.permute.xlu0 %11549  ;;  %v11341_v13 = vunpack.i.l.bf16 %v17488_v14  ;;  %v11351_v14 = vunpack.i.l.bf16 %v17498_v48 }
 0x89f   :  { %v11552_v22 = vunpack.i.h.bf16 %v11550_v43  ;;  %v11551_v55 = vunpack.i.l.bf16 %v11550_v43 }
 0x8a0   :  { %v8513_v39 = vsel %vm782_vm12, %v8512_v10, %v11521_v53  ;;  %v8520_v23 = vsel %vm782_vm12, %v8519_v57, %v11522_v25  ;;  %v7780_v10 = vsel %vm770_vm6, %v17341_v9, %v11542_v50  ;;  %v11541_v57 = vunpack.i.l.bf16 %v11540_v60 }
 0x8a1   :  { %v10312_v5 = vpack.c.bf16 %v8520_v23, %v8513_v39  ;;  %v11530_v28 = vpop.permute.xlu1 %11529  ;;  %v7781_v52 = vsel %vm772_vm7, %v7780_v10, %v11327_v51 }
 0x8a2   :  { %v11532_v18 = vunpack.i.h.bf16 %v11530_v28  ;;  %v11531_v59 = vunpack.i.l.bf16 %v11530_v28  ;;  %v11555_v40 = vpop.permute.xlu0 %11554  ;;  %v7773_v21 = vsel %vm770_vm6, %v17329_v12, %v11541_v57 }
 0x8a3   :  { %8529 = vst [vmem:[#allocation3 + $0x18] sm:$0x33] %v10312_v5  ;;  %v11557_v2 = vunpack.i.h.bf16 %v11555_v40  ;;  %v11556_v38 = vunpack.i.l.bf16 %v11555_v40  ;;  %v7774_v1 = vsel %vm772_vm7, %v7773_v21, %v11326_v8  ;;  %v18830_v8 = vld [vmem:[#allocation37_spill] sm:$0xff] }
 0x8a4   :  { %v9245_v24 = vsel %vm778_vm10, %v9244_v56, %v11531_v59  ;;  %v9252_v34 = vsel %vm778_vm10, %v9251_v47, %v11532_v18 }
 0x8a5   :  { %v9246_v32 = vsel %vm780_vm11, %v9245_v24, %v11316_v33  ;;  %v9253_v62 = vsel %vm780_vm11, %v9252_v34, %v11317_v3  ;;  %v11535_v4 = vpop.permute.xlu1 %11534  ;;  %v11352_v33 = vunpack.i.h.bf16 %v17498_v48  ;;  %v18829_v34 = vld [vmem:[#allocation50_spill] sm:$0xff] }
 0x8a6   :  { %v9247_v9 = vsel %vm782_vm12, %v9246_v32, %v11551_v55  ;;  %v9254_v46 = vsel %vm782_vm12, %v9253_v62, %v11552_v22  ;;  %v11537_v63 = vunpack.i.h.bf16 %v11535_v4  ;;  %v11536_v20 = vunpack.i.l.bf16 %v11535_v4  ;;  %v11565_v15 = vpop.permute.xlu0 %11564 }
 0x8a7   :  { %v10315_v19 = vpack.c.bf16 %v9254_v46, %v9247_v9  ;;  %v11567_v16 = vunpack.i.h.bf16 %v11565_v15  ;;  %v11566_v44 = vunpack.i.l.bf16 %v11565_v15  ;;  %v18831_v9 = vld [vmem:[#allocation46_spill] sm:$0xff] }
 0x8a8   :  { %v9724_v11 = vsel %vm778_vm10, %v9723_v54, %v11536_v20  ;;  %v9731_v26 = vsel %vm778_vm10, %v9730_v49, %v11537_v63  ;;  %v11337_v46 = vunpack.i.h.bf16 %v18831_v9  ;;  %v11336_v63 = vunpack.i.l.bf16 %v18831_v9 }
 0x8a9   :  { %v9262_v7 = vrot.slane %v10315_v19, 6  ;;  %v9725_v56 = vsel %vm780_vm11, %v9724_v11, %v11321_v0  ;;  %v9732_v47 = vsel %vm780_vm11, %v9731_v26, %v11322_v42  ;;  %v11545_v6 = vpop.permute.xlu1 %11544  ;;  %v7782_v35 = vsel %vm774_vm8, %v7781_v52, %v11567_v16  ;;  %v18832_v52 = vld [vmem:[#allocation28_spill] sm:$0xff] }
 0x8aa   :  { %v9726_v30 = vsel %vm782_vm12, %v9725_v56, %v11556_v38  ;;  %v9733_v12 = vsel %vm782_vm12, %v9732_v47, %v11557_v2  ;;  %v11547_v17 = vunpack.i.h.bf16 %v11545_v6  ;;  %v11692_v29 = vld [vmem:[#allocation3 + $0x8] ss:$16 sps:$4 sm:$0xff]   ;;  %v11694_v37 = vld [vmem:[#allocation3 + $0xc] ss:$16 sps:$4 sm:$0xff]   ;;  %v11546_v60 = vunpack.i.l.bf16 %v11545_v6  ;;  %v11580_v25 = vpop.permute.xlu0 %11579 }
 0x8ab   :  { %9264 = vst [vmem:[#allocation3 + $0x28] sm:$0xcc] %v9262_v7  ;;  %v10317_v61 = vpack.c.bf16 %v9733_v12, %v9726_v30  ;;  %v7775_v54 = vsel %vm774_vm8, %v7774_v1, %v11566_v44  ;;  %v7783_v53 = vsel %vm776_vm9, %v7782_v35, %v11342_v45  ;;  %10122 = vmatprep.subr.bf16.mxu1 %v11694_v37  ;;  %v11582_v23 = vunpack.i.h.bf16 %v11580_v25  ;;  %v18833_v12 = vld [vmem:[#allocation34_spill] sm:$0xff] }
 0x8ac   :  { %v8997_v49 = vsel %vm778_vm10, %v17686_v31, %v11547_v17  ;;  %v8990_v39 = vsel %vm778_vm10, %v17683_v41, %v11546_v60  ;;  %v11581_v43 = vunpack.i.l.bf16 %v11580_v25  ;;  %10123 = vmatpush1.bf16.msra.mxu1 %v11692_v29  ;;  %v7776_v5 = vsel %vm776_vm9, %v7775_v54, %v11341_v13 }
 0x8ad   :  { %v9741_v50 = vrot.slane %v10317_v61, 6  ;;  %v11560_v3 = vpop.permute.xlu1 %11559  ;;  %v8991_v31 = vsel %vm780_vm11, %v8990_v39, %v11331_v36  ;;  %v7784_v42 = vsel %vm778_vm10, %v7783_v53, %v11582_v23  ;;  %v8998_v41 = vsel %vm780_vm11, %v8997_v49, %v11332_v27 }
 0x8ae   :  { %v7777_v28 = vsel %vm778_vm10, %v7776_v5, %v11581_v43  ;;  %v11562_v0 = vunpack.i.h.bf16 %v11560_v3  ;;  %v11561_v18 = vunpack.i.l.bf16 %v11560_v3  ;;  %v11590_v59 = vpop.permute.xlu0 %11589  ;;  %v7785_v48 = vsel %vm780_vm11, %v7784_v42, %v11352_v33  ;;  %v9999_v33 = vld [vmem:[%s17795_s3] sm:$0x3]  ;;  %v10167_v42 = vld [vmem:[#allocation4] sm:$0xff]  ;;  %s11769_s3 = smov [#allocation7]  }
 0x8af   :  { %9743 = vst [vmem:[#allocation3 + $0x38] sm:$0xcc] %v9741_v50  ;;  %v7778_v10 = vsel %vm780_vm11, %v7777_v28, %v11351_v14  ;;  %v11592_v57 = vunpack.i.h.bf16 %v11590_v59  ;;  %v11591_v22 = vunpack.i.l.bf16 %v11590_v59  ;;  %v11347_v2 = vunpack.i.h.bf16 %v18832_v52  ;;  %s10195_s21 = sshll.u32 %s11769_s3, 4  ;;  %s10196_s21 = int_to_ptr.vmem [resolvable:$true] %s10195_s21 }
 0x8b0   :  { %v9983_v40 = vsel %vm770_vm6, %v18829_v34, %v11562_v0  ;;  %v9976_v27 = vsel %vm770_vm6, %v18830_v8, %v11561_v18  ;;  %v11346_v38 = vunpack.i.l.bf16 %v18832_v52  ;;  %v11357_v44 = vunpack.i.h.bf16 %v18833_v12  ;;  %s11726_s22 = scalar_lea.vmem %s10196_s21, 256  ;;  %p11731_p9 = scmp.lt.s32.totalorder %s10196_s21, %s10196_s21 }
 0x8b1   :  { %v11570_v55 = vpop.permute.xlu1 %11569  ;;  %v7779_v51 = vsel %vm782_vm12, %v7778_v10, %v11591_v22  ;;  %v7786_v58 = vsel %vm782_vm12, %v7785_v48, %v11592_v57  ;;  %v9977_v11 = vsel %vm772_vm7, %v9976_v27, %v11336_v63  ;;  %v9984_v26 = vsel %vm772_vm7, %v9983_v40, %v11337_v46  ;;  %p11727_p8 = scmp.ne.s32.totalorder %s10196_s21, %s11726_s22  ;;  %p11732_p10 = scmp.lt.s32.totalorder %s11726_s22, %s11726_s22 }
 0x8b2   :  { %v11572_v36 = vunpack.i.h.bf16 %v11570_v55  ;;  %v11571_v24 = vunpack.i.l.bf16 %v11570_v55  ;;  %v10309_v32 = vpack.c.bf16 %v7786_v58, %v7779_v51  ;;  %v11356_v17 = vunpack.i.l.bf16 %v18833_v12  ;;  %v10178_v51 = vld [vmem:[#allocation4 + $0x8] sm:$0xff] }
 0x8b3   :  { %v10169_v48 = vcombine.high %v10167_v42, %v10167_v42  ;;  %p11733_p11 = por %p11732_p10, %p11731_p9 }
 0x8b4   :  { %v8992_v62 = vsel %vm782_vm12, %v8991_v31, %v11571_v24  ;;  %v8999_v4 = vsel %vm782_vm12, %v8998_v41, %v11572_v36  ;;  %7795 = vst [vmem:[#allocation3 + $0x40] sm:$0x33] %v10309_v32 }
 0x8b5   :  { %v10314_v20 = vpack.c.bf16 %v8999_v4, %v8992_v62  ;;  %v11575_v45 = vpop.permute.xlu1 %11574  ;;  %v10180_v62 = vcombine.high %v10178_v51, %v10178_v51  ;;  %p11734_p12 = pnand %p11733_p11, %p11727_p8 }
 0x8b6   :  { %v11577_v21 = vunpack.i.h.bf16 %v11575_v45  ;;  %v11576_v19 = vunpack.i.l.bf16 %v11575_v45 }
 0x8b7   :  { %9008 = vst [vmem:[#allocation3 + $0x28] sm:$0x33] %v10314_v20 }
 0x8b8   :  { %v9978_v15 = vsel %vm774_vm8, %v9977_v11, %v11576_v19  ;;  %v9985_v7 = vsel %vm774_vm8, %v9984_v26, %v11577_v21 }
 0x8b9   :  { %v11585_v56 = vpop.permute.xlu1 %11584  ;;  %v9979_v47 = vsel %vm776_vm9, %v9978_v15, %v11346_v38  ;;  %v9986_v16 = vsel %vm776_vm9, %v9985_v7, %v11347_v2 }
 0x8ba   :  { %v11587_v6 = vunpack.i.h.bf16 %v11585_v56  ;;  %v11586_v30 = vunpack.i.l.bf16 %v11585_v56 }
 0x8bb   :  { %v10008_v60 = vld [vmem:[#allocation3 + $0x40] sm:$0x33] }
 0x8bc   :  { %v9980_v29 = vsel %vm778_vm10, %v9979_v47, %v11586_v30  ;;  %v9987_v37 = vsel %vm778_vm10, %v9986_v16, %v11587_v6  ;;  %v10276_v49 = vcombine.high %v10008_v60, %v10008_v60  ;;  %v10275_v50 = vcombine.low %v10008_v60, %v10008_v60 }
 0x8bd   :  { %v11595_v61 = vpop.permute.xlu1 %11594  ;;  %v9981_v1 = vsel %vm780_vm11, %v9980_v29, %v11356_v17  ;;  %v9988_v35 = vsel %vm780_vm11, %v9987_v37, %v11357_v44 }
 0x8be   :  { %v11597_v13 = vunpack.i.h.bf16 %v11595_v61  ;;  %v11596_v54 = vunpack.i.l.bf16 %v11595_v61  ;;  %v11696_v25 = vld [vmem:[#allocation3 + $0x28] ss:$16 sps:$4 sm:$0xff]   ;;  %v11698_v53 = vld [vmem:[#allocation3 + $0x2c] ss:$16 sps:$4 sm:$0xff]   ;;  %10279 = vmatprep.subr.msk.bf16.mxu0 %vm5054_vm13, %v10276_v49  ;;  %v10070_v43 = vsel %vm5054_vm13, %v10275_v50, 0 }
 0x8bf   :  { %10124 = vmatprep.subr.bf16.mxu1 %v11698_v53  ;;  %10086 = vmatpush1.bf16.msra.mxu0 %v10070_v43  ;;  %v10014_v0 = vpop.permute.xlu0 %10013 }
 0x8c0   :  { %v9982_v39 = vsel %vm782_vm12, %v9981_v1, %v11596_v54  ;;  %v9989_v23 = vsel %vm782_vm12, %v9988_v35, %v11597_v13  ;;  %10125 = vmatpush1.bf16.msra.mxu1 %v11696_v25 }
 0x8c1   :  { %v10318_v3 = vpack.c.bf16 %v9989_v23, %v9982_v39 }
 0x8c2   :  { %10280 = vmatmul.mubr.msk.bf16.vlgmr.msra.gmra.mrb[4].mxu0 %vm5050_vm14, %v9999_v33 }
 0x8c3   :  { %9998 = vst [vmem:[#allocation3 + $0x48] sm:$0x33] %v10318_v3 }
 0x8ca   :  { %v10009_v14 = vld [vmem:[#allocation3 + $0x48] sm:$0x33] }
 0x8cb   :  { %v10278_v5 = vcombine.high %v10009_v14, %v10009_v14  ;;  %v10277_v31 = vcombine.low %v10009_v14, %v10009_v14 }
 0x8cd   :  { %10281 = vmatprep.subr.msk.bf16.mxu1 %vm5054_vm13, %v10278_v5  ;;  %v10076_v28 = vsel %vm5054_vm13, %v10277_v31, 0 }
 0x8ce   :  { %10127 = vmatpush1.bf16.msra.mxu1 %v10076_v28 }
 0x8d1   :  { %10282 = vmatmul.mubr.msk.bf16.vlgmr.msra.gmra.mrb[4].mxu1 %vm5050_vm14, %v9999_v33 }
 0x995   :  { %v10115_v41 = vpop.f32.mrb[4].mxu0 }
 0x996   :  { %v10116_v18 = vadd.f32 %v10115_v41, %v10014_v0  ;;  %v10117_v59 = vpop.f32.mrb[5].mxu0 }
 0x997   :  { %v10118_v10 = vadd.f32 %v10117_v59, %v10014_v0  ;;  %v10119_v57 = vpop.f32.mrb[6].mxu0 }
 0x998   :  { %v10163_v22 = vmax.f32 %v10116_v18, 0.0  ;;  %v10120_v55 = vpop.f32.mrb[7].mxu0 }
 0x999   :  { %v10164_v36 = vmax.f32 %v10118_v10, 0.0 }
 0x99a   :  { %v10171_v24 = vadd.f32 %v10167_v42, %v10163_v22 }
 0x99b   :  { %v10172_v34 = vadd.f32 %v10169_v48, %v10164_v36 }
 0x99d   :  { %v10175_v40 = vcombine.low %v10171_v24, %v10172_v34 }
 0x99f   :  { %10177 = vst [vmem:[#allocation7] sm:$0xff] %v10175_v40 }
 0x9a4   :  { %v10156_v58 = vpop.f32.mrb[4].mxu1 }
 0x9a5   :  { %v10157_v8 = vadd.f32 %v10156_v58, %v10014_v0  ;;  %v10158_v27 = vpop.f32.mrb[5].mxu1 }
 0x9a6   :  { %v10159_v32 = vadd.f32 %v10158_v27, %v10014_v0  ;;  %v10160_v4 = vpop.f32.mrb[6].mxu1 }
 0x9a7   :  { %v10165_v9 = vmax.f32 %v10157_v8, 0.0  ;;  %v10161_v46 = vpop.f32.mrb[7].mxu1 }
 0x9a8   :  { %v10166_v63 = vmax.f32 %v10159_v32, 0.0 }
 0x9a9   :  { %v10182_v20 = vadd.f32 %v10178_v51, %v10165_v9 }
 0x9aa   :  { %v10183_v45 = vadd.f32 %v10180_v62, %v10166_v63 }
 0x9ac   :  { %v10186_v21 = vcombine.low %v10182_v20, %v10183_v45 }
 0x9ae   :  { %10189 = vst [vmem:[#allocation7 + $0x8] sm:$0xff] %v10186_v21 }
 0x9af   :  { %11737 = shalt.err (!%p11734_p12)
}
 0x9b0   :  { %s11738_s25 = scalar_lea.hbm %s17797_s5, 256 }
 0x9b1   :  { %p11739_p13 = scmp.ne.s32.totalorder %s17797_s5, %s11738_s25  ;;  %p11742_p0 = scmp.lt.u32.totalorder %s11738_s25, %s17797_s5 }
 0x9b3   :  { %p11744_p1 = pnand %p11742_p0, %p11739_p13 }
 0x9b5   :  { %11747 = shalt.err (!%p11744_p1)
}
 0x9b6   :  { %10201 = dma.vmem_to_hbm [thread:$0]  %s10196_s21, 256, %s17797_s5, [#allocation6], %s11753_s28, %s11753_s28, %s11754_s29  }
 0x9b7   :  { %11750 = dma.done.wait [#allocation6], 256  }
 0x9b8   :  { %11751 = vsyncadd [#allocation6], 4294967040 }
 0x9b9   :  { %10205 = vsyncpa [#allocation5], 1 }
 0x9ba   :  { %10206 = vsyncpa [#allocation6], 1 }

</bundles_post_ra>
